<compile_context>
chip_gen: v5e
topology: v5e:2x2
jax: 0.10.0
libtpu: 0.0.40
codegen_flags: <defaults>
</compile_context>

<pallas_src>
import functools
import math

import jax
import jax.numpy as jnp
from jax.experimental import pallas as pl
from jax.experimental.pallas import tpu as pltpu

_COMPUTE_DTYPE = jnp.bfloat16     # MXU-native operand dtype (f32 accumulation)

# Rows of the packed per-layer vector block (encoder).
_ROW_LN1_G, _ROW_LN1_B, _ROW_LN2_G, _ROW_LN2_B = 0, 1, 2, 3
_ROW_BO = 4
_ROW_MLP_B0 = 5                  # MLP bias rows 5, 6, 7
_ROW_WAVES = 8                   # WaveAct (w1, w2) pairs, 2 * n_mlp scalars
_N_VEC_ROWS = 9
_N_ENC_MLP = 3                   # EncoderLayer MLP uses PyTorch default num_layers=3


# ----------------------------------------------------------------------------
# Small helpers
# ----------------------------------------------------------------------------
def _round_up(x, m):
    return ((x + m - 1) // m) * m


def _full_spec(arr):
    """BlockSpec covering the whole array, replicated across the grid."""
    zeros = (0,) * arr.ndim
    return pl.BlockSpec(arr.shape, lambda *args, z=zeros: z)


def _layer_spec(arr):
    """BlockSpec selecting one layer slice of a (L, ...) stacked weight."""
    zeros = (0,) * (arr.ndim - 1)
    return pl.BlockSpec((None,) + arr.shape[1:], lambda b, l, z=zeros: (l,) + z)


def _layer_norm(v, g, b, eps=1e-5):
    mu = jnp.mean(v, axis=-1, keepdims=True)
    c = v - mu
    var = jnp.mean(c * c, axis=-1, keepdims=True)
    return c * jax.lax.rsqrt(var + eps) * g + b


def _pick_batch_block(B, S, target_rows=512, min_rows_per_step=64):
    """Largest divisor of B with Bb*S <= target_rows (fills the MXU M dim);
    split once more only if each grid step still gets a big row block so the
    two v7x TensorCores both get work."""
    best = 1
    for d in range(1, B + 1):
        if B % d == 0 and d * S <= target_rows:
            best = d
    if best == B and B > 1:
        for d in range(B - 1, 0, -1):
            if B % d == 0 and d * S >= min_rows_per_step:
                return d
    return best


# ----------------------------------------------------------------------------
# Fused encoder block kernel: num_atten x [LN -> MHA -> +res -> LN -> MLP -> +res]
# ----------------------------------------------------------------------------
def _encoder_block_kernel(x_ref, vec_ref, bqkv_ref, wqkv_ref, wo_ref,
                          w1_ref, w2_ref, w3_ref, o_ref, *, num_heads, d_ff):
    layer = pl.program_id(1)

    # Seed the VMEM-resident activation on the first layer of the stack; the
    # output block is revisited (same block index) across the whole layer axis.
    @pl.when(layer == 0)
    def _():
        o_ref[...] = x_ref[...]

    xb = o_ref[...]                                   # (Bb, S, D) f32
    Bb, S, D = xb.shape
    M = Bb * S
    H = num_heads
    hd = D // H
    scale = 1.0 / math.sqrt(hd)
    cdt = _COMPUTE_DTYPE

    def row(r, width):                                # (1, width) offset-0 lane slice
        return vec_ref[r:r + 1, :width]

    def wave_scalar(c):                               # (1, 1)
        return vec_ref[_ROW_WAVES:_ROW_WAVES + 1, c:c + 1]

    x = xb.reshape(M, D)                              # batch rows fused for matmuls

    # ---- sub-layer 1: x + MultiHeadAttention(LN1(x)) ----
    x2 = _layer_norm(x, row(_ROW_LN1_G, D), row(_ROW_LN1_B, D)).astype(cdt)
    wqkv = wqkv_ref[...]                              # (3H, D, hd) bf16
    bqkv = bqkv_ref[...]                              # (3H, 1, hd) f32
    wo = wo_ref[...]                                  # (H, hd, D)  bf16
    attn = None
    for h in range(H):                                # head / q-k-v picked on leading axes
        q = jnp.dot(x2, wqkv[h], preferred_element_type=jnp.float32) + bqkv[h]
        k = jnp.dot(x2, wqkv[H + h], preferred_element_type=jnp.float32) + bqkv[H + h]
        v = jnp.dot(x2, wqkv[2 * H + h], preferred_element_type=jnp.float32) + bqkv[2 * H + h]
        q3 = q.reshape(Bb, S, hd).astype(cdt)
        k3 = k.reshape(Bb, S, hd).astype(cdt)
        v3 = v.reshape(Bb, S, hd).astype(cdt)
        s = jnp.einsum('bqd,bkd->bqk', q3, k3,
                       preferred_element_type=jnp.float32) * scale
        s = s - jnp.max(s, axis=-1, keepdims=True)
        p = jnp.exp(s)
        p = p / jnp.sum(p, axis=-1, keepdims=True)    # exact softmax
        o3 = jnp.einsum('bqk,bkd->bqd', p.astype(cdt), v3,
                        preferred_element_type=jnp.float32)
        part = jnp.dot(o3.reshape(M, hd).astype(cdt), wo[h],
                       preferred_element_type=jnp.float32)
        attn = part if attn is None else attn + part  # concat+Wo folded per head
    x = x + attn + row(_ROW_BO, D)

    # ---- sub-layer 2: x + MLP(LN2(x)), MLP = 3 x (Linear + WaveAct) ----
    h2 = _layer_norm(x, row(_ROW_LN2_G, D), row(_ROW_LN2_B, D))
    widths = (d_ff, d_ff, D)
    for i, w_ref in enumerate((w1_ref, w2_ref, w3_ref)):
        z = jnp.dot(h2.astype(cdt), w_ref[...],
                    preferred_element_type=jnp.float32) + row(_ROW_MLP_B0 + i, widths[i])
        h2 = wave_scalar(2 * i) * jnp.sin(z) + wave_scalar(2 * i + 1) * jnp.cos(z)

    o_ref[...] = (x + h2).reshape(Bb, S, D)


def encoder_block(x, blk, num_heads):
    """x: (B, S, D) -> (B, S, D).  One fused pallas_call over all num_atten
    layers of the block; activation stays VMEM-resident across layers."""
    B, S, D = x.shape
    L = blk["wqkv"].shape[0]
    d_ff = blk["w1"].shape[-1]
    Bb = _pick_batch_block(B, S)
    grid = (B // Bb, L)

    x_spec = pl.BlockSpec((Bb, S, D), lambda b, l: (b, 0, 0))
    in_specs = [x_spec] + [_layer_spec(blk[k]) for k in
                           ("vecs", "bqkv", "wqkv", "wo", "w1", "w2", "w3")]

    # Advisory cost estimate for XLA scheduling around the custom call.
    R = B * S
    flops = L * (2 * R * D * 3 * D + 4 * R * S * D + 2 * R * D * D
                 + 2 * R * (D * d_ff + d_ff * d_ff + d_ff * D))
    trans = L * (R * S * num_heads + 2 * R * (2 * d_ff + D))
    bytes_acc = 8 * R * D + L * (2 * (4 * D * D + 2 * D * d_ff + d_ff * d_ff)
                                 + 4 * blk["vecs"].shape[1] * blk["vecs"].shape[2])

    kernel = functools.partial(_encoder_block_kernel,
                               num_heads=num_heads, d_ff=d_ff)
    return pl.pallas_call(
        kernel,
        out_shape=jax.ShapeDtypeStruct((B, S, D), jnp.float32),
        grid=grid,
        in_specs=in_specs,
        out_specs=x_spec,
        compiler_params=pltpu.CompilerParams(
            dimension_semantics=("parallel", "arbitrary")),
        cost_estimate=pl.CostEstimate(flops=int(flops),
                                      transcendentals=int(trans),
                                      bytes_accessed=int(bytes_acc)),
    )(x, blk["vecs"], blk["bqkv"], blk["wqkv"], blk["wo"],
      blk["w1"], blk["w2"], blk["w3"])


# ----------------------------------------------------------------------------
# Fused MLP-stack kernel: L x (Linear + WaveAct) -> optional LN -> optional Linear
# ----------------------------------------------------------------------------
def _mlp_stack_kernel(*refs, num_wave, has_ln, has_final):
    x_ref, waves_ref = refs[0], refs[1]
    idx = 2
    cdt = _COMPUTE_DTYPE
    h = x_ref[...]
    for l in range(num_wave):
        w_ref, b_ref = refs[idx], refs[idx + 1]
        idx += 2
        z = jnp.dot(h.astype(cdt), w_ref[...],
                    preferred_element_type=jnp.float32) + b_ref[...]
        h = waves_ref[l, 0] * jnp.sin(z) + waves_ref[l, 1] * jnp.cos(z)
    if has_ln:
        g_ref, b_ref = refs[idx], refs[idx + 1]
        idx += 2
        h = _layer_norm(h, g_ref[...], b_ref[...])
    if has_final:
        wf_ref, bf_ref = refs[idx], refs[idx + 1]
        idx += 2
        h = jnp.dot(h.astype(cdt), wf_ref[...],
                    preferred_element_type=jnp.float32) + bf_ref[...]
    refs[idx][...] = h.astype(refs[idx].dtype)


def mlp_stack(x2d, wave_Ws, wave_bs, waves, ln=None, final=None):
    """Fused [Linear+WaveAct]*L -> optional LayerNorm -> optional final Linear.

    x2d: (M, K) f32.  wave_Ws[i]: (Ki, Ni) bf16, wave_bs[i]: (Ni,) f32,
    waves: (L, 2) f32 (SMEM).  ln: (gamma, beta) or None.  final: (Wf, bf) or None.
    """
    M, K = x2d.shape
    tm = min(_round_up(max(M, 8), 8), 512)      # never degrade to 8-row tiles
    Mp = _round_up(M, tm)
    if Mp != M:
        x2d = jnp.pad(x2d, ((0, Mp - M), (0, 0)))

    if final is not None:
        out_dim = final[0].shape[1]
    elif ln is not None:
        out_dim = ln[0].shape[0]
    else:
        out_dim = wave_Ws[-1].shape[1]

    args = [x2d, waves]
    in_specs = [pl.BlockSpec((tm, K), lambda i: (i, 0)),
                pl.BlockSpec(memory_space=pltpu.MemorySpace.SMEM)]

    def add(a):
        args.append(a)
        in_specs.append(_full_spec(a))

    dims = []
    for W, b in zip(wave_Ws, wave_bs):
        add(W)
        add(b.reshape(1, -1))
        dims.append(W.shape)
    if ln is not None:
        add(ln[0].reshape(1, -1))
        add(ln[1].reshape(1, -1))
    if final is not None:
        add(final[0])
        add(final[1].reshape(1, -1))
        dims.append(final[0].shape)

    flops = sum(2 * Mp * k * n for k, n in dims)
    trans = sum(2 * Mp * W.shape[1] for W in wave_Ws)
    bytes_acc = 4 * Mp * (K + out_dim) + sum(2 * k * n for k, n in dims)

    kernel = functools.partial(_mlp_stack_kernel, num_wave=len(wave_Ws),
                               has_ln=ln is not None,
                               has_final=final is not None)
    out = pl.pallas_call(
        kernel,
        out_shape=jax.ShapeDtypeStruct((Mp, out_dim), jnp.float32),
        grid=(Mp // tm,),
        in_specs=in_specs,
        out_specs=pl.BlockSpec((tm, out_dim), lambda i: (i, 0)),
        compiler_params=pltpu.CompilerParams(
            dimension_semantics=("parallel",)),
        cost_estimate=pl.CostEstimate(flops=int(flops),
                                      transcendentals=int(trans),
                                      bytes_accessed=int(bytes_acc)),
    )(*args)
    return out[:M] if Mp != M else out


# ----------------------------------------------------------------------------
# Plain-JAX glue matching the PyTorch module structure
# ----------------------------------------------------------------------------
def serialization(a, b, bc, depth=16):
    # TODO(synk): original `serialization` not provided; synthetic lexicographic
    # space-filling key over the (a, b) coordinates (a-major, b-minor).
    a = a[..., 0]
    b = b[..., 0]

    def norm(v):
        vmin = jnp.min(v, axis=1, keepdims=True)
        vmax = jnp.max(v, axis=1, keepdims=True)
        return (v - vmin) / (vmax - vmin + 1e-9)

    qa = jnp.floor(norm(a) * (2 ** depth - 1)).astype(jnp.uint32)
    qb = jnp.floor(norm(b) * (2 ** depth - 1)).astype(jnp.uint32)
    key = qa * jnp.uint32(2 ** depth) + qb
    return jnp.argsort(key, axis=1).astype(jnp.int32)


def sort_tensor(x, indices):
    idx = jnp.broadcast_to(indices[:, :, None], x.shape)
    return jnp.take_along_axis(x, idx, axis=1)


def desort_tensor(x, indices):
    inv = jnp.argsort(indices, axis=1)
    idx = jnp.broadcast_to(inv[:, :, None], x.shape)
    return jnp.take_along_axis(x, idx, axis=1)


def encoder_forward(blocks, x, indices_all, cfg):
    # TODO(synk): original PatchEmbedding not provided; patching approximated by
    # grouping patch_size consecutive serialized tokens into one token of dim
    # d_emb * patch_size (reshape); depatching is the inverse reshape.
    B, N, d_emb = x.shape
    p = cfg["patch_size"]
    for i, blk in enumerate(blocks):
        indices = indices_all[i % len(indices_all)]
        x = sort_tensor(x, indices)
        x = x.reshape(B, N // p, p * d_emb)            # patching
        x = encoder_block(x, blk, cfg["num_heads"])    # fused num_atten layers
        x = x.reshape(B, N, d_emb)                     # depatching
        x = desort_tensor(x, indices)
    return x


def gbe_forward(params, x, y, bc, num_expand=4):
    # TODO(synk): original GBE not provided; synthetic geometric/boundary
    # embedding = Fourier expansion of (x, y) ++ bc -> Linear+WaveAct -> Linear.
    feats = [x, y, bc]
    for k in range(num_expand):
        f = (2.0 ** k) * jnp.pi
        feats += [jnp.sin(f * x), jnp.cos(f * x), jnp.sin(f * y), jnp.cos(f * y)]
    h = jnp.concatenate(feats, axis=-1)
    B, N, d_in = h.shape
    out = mlp_stack(h.reshape(B * N, d_in),
                    [params["W1"]], [params["b1"]], params["waves"],
                    ln=None, final=(params["W2"], params["b2"]))
    return out.reshape(B, N, -1)


def pinnsformer_forward(params, x, y, bc, cfg):
    indices_z = serialization(x, y, bc, depth=16)
    indices_zt = serialization(y, x, bc, depth=16)
    indices_all = [indices_z, indices_zt]
    emb = gbe_forward(params["gbe"], x, y, bc, num_expand=4)
    out = encoder_forward(params["encoder_blocks"], emb, indices_all, cfg)
    B, N, d_emb = out.shape
    head = params["head"]
    h = mlp_stack(out.reshape(B * N, d_emb),
                  head["Ws"], head["bs"], head["waves"],
                  ln=(head["ln_g"], head["ln_b"]),
                  final=(head["W_out"], head["b_out"]))
    return h.reshape(B, N, -1)


# ----------------------------------------------------------------------------
# Deterministic parameter construction (PyTorch-equivalent shapes)
# ----------------------------------------------------------------------------
class KeyGen:
    def __init__(self, key):
        self.key = key

    def __call__(self):
        self.key, k = jax.random.split(self.key)
        return k


def init_linear(key, d_in, d_out):
    kw, kb = jax.random.split(key)
    bound = 1.0 / math.sqrt(d_in)
    W = jax.random.uniform(kw, (d_in, d_out), jnp.float32, -bound, bound)
    b = jax.random.uniform(kb, (d_out,), jnp.float32, -bound, bound)
    return W, b


def make_mlp_params(kg, d_in, d_out, d_ff, num_layers):
    # Mirrors the PyTorch MLP: Linear(d_in,d_ff)+WaveAct, (num_layers-2) x
    # Linear(d_ff,d_ff)+WaveAct, and iff num_layers>2 Linear(d_ff,d_out)+WaveAct.
    dims = [(d_in, d_ff)]
    for _ in range(num_layers - 2):
        dims.append((d_ff, d_ff))
    if num_layers > 2:
        dims.append((d_ff, d_out))
    Ws, bs = [], []
    for di, do in dims:
        W, b = init_linear(kg(), di, do)
        Ws.append(W)
        bs.append(b)
    return {"W": Ws, "b": bs,
            "waves": jnp.ones((len(dims), 2), jnp.float32)}   # WaveAct w1,w2 = 1


def make_encoder_block_params(kg, d_model, num_atten, num_heads, d_ff=256):
    """num_atten encoder layers stacked on a leading layer axis, per-head QKV /
    Wo layouts (no lane slicing in-kernel), all small vectors packed into one
    (L, 9, vec_width) f32 block, matmul weights stored in bf16."""
    hd = d_model // num_heads
    assert d_model % num_heads == 0
    vec_width = _round_up(max(d_model, d_ff, 2 * _N_ENC_MLP), 128)

    def per_head(W):                         # (D, D) -> (H, D, hd)
        return W.reshape(d_model, num_heads, hd).transpose(1, 0, 2)

    def pad_row(v):
        return jnp.pad(v, (0, vec_width - v.shape[0]))

    wqkv_l, bqkv_l, wo_l, w1_l, w2_l, w3_l, vec_l = ([] for _ in range(7))
    for _ in range(num_atten):
        Wq, bq = init_linear(kg(), d_model, d_model)
        Wk, bk = init_linear(kg(), d_model, d_model)
        Wv, bv = init_linear(kg(), d_model, d_model)
        Wo, bo = init_linear(kg(), d_model, d_model)
        mlp = make_mlp_params(kg, d_model, d_model, d_ff, _N_ENC_MLP)
        (W1, W2, W3), (b1, b2, b3) = mlp["W"], mlp["b"]

        wqkv_l.append(jnp.concatenate(
            [per_head(Wq), per_head(Wk), per_head(Wv)], axis=0))       # (3H, D, hd)
        bqkv_l.append(jnp.concatenate(
            [bq.reshape(num_heads, 1, hd), bk.reshape(num_heads, 1, hd),
             bv.reshape(num_heads, 1, hd)], axis=0))                   # (3H, 1, hd)
        wo_l.append(Wo.reshape(num_heads, hd, d_model))                # (H, hd, D)
        w1_l.append(W1)
        w2_l.append(W2)
        w3_l.append(W3)

        ln1_g = jnp.ones((d_model,), jnp.float32)
        ln1_b = jnp.zeros((d_model,), jnp.float32)
        ln2_g = jnp.ones((d_model,), jnp.float32)
        ln2_b = jnp.zeros((d_model,), jnp.float32)
        waves = jnp.ones((2 * _N_ENC_MLP,), jnp.float32)
        vec_l.append(jnp.stack([pad_row(ln1_g), pad_row(ln1_b),
                                pad_row(ln2_g), pad_row(ln2_b),
                                pad_row(bo), pad_row(b1), pad_row(b2),
                                pad_row(b3), pad_row(waves)], axis=0))  # (9, vec_width)

    bf16 = jnp.bfloat16
    return {
        "wqkv": jnp.stack(wqkv_l).astype(bf16),     # (L, 3H, D, hd)
        "bqkv": jnp.stack(bqkv_l),                  # (L, 3H, 1, hd) f32
        "wo":   jnp.stack(wo_l).astype(bf16),       # (L, H, hd, D)
        "w1":   jnp.stack(w1_l).astype(bf16),       # (L, D, d_ff)
        "w2":   jnp.stack(w2_l).astype(bf16),       # (L, d_ff, d_ff)
        "w3":   jnp.stack(w3_l).astype(bf16),       # (L, d_ff, D)
        "vecs": jnp.stack(vec_l),                   # (L, 9, vec_width) f32
    }


def init_params(key, cfg, num_expand=4):
    kg = KeyGen(key)
    d_emb = cfg["d_emb"]
    d_model = d_emb * cfg["patch_size"]
    d_gbe_in = 2 + cfg["bc_dims"] + 4 * num_expand
    bf16 = jnp.bfloat16

    W1, b1 = init_linear(kg(), d_gbe_in, d_emb)
    W2, b2 = init_linear(kg(), d_emb, d_emb)
    gbe = {"W1": W1.astype(bf16), "b1": b1,
           "waves": jnp.ones((1, 2), jnp.float32),
           "W2": W2.astype(bf16), "b2": b2}

    blocks = [make_encoder_block_params(kg, d_model, cfg["num_atten"],
                                        cfg["num_heads"])
              for _ in range(cfg["num_layers"])]

    head_mlp = make_mlp_params(kg, d_emb, d_emb, d_emb * cfg["patch_size"],
                               cfg["num_mlp_layers"])
    head_W, head_b = init_linear(kg(), d_emb, cfg["d_output"])
    head = {"Ws": [w.astype(bf16) for w in head_mlp["W"]],
            "bs": head_mlp["b"],
            "waves": head_mlp["waves"],
            "ln_g": jnp.ones((d_emb,), jnp.float32),
            "ln_b": jnp.zeros((d_emb,), jnp.float32),
            "W_out": head_W.astype(bf16), "b_out": head_b}

    return {"gbe": gbe, "encoder_blocks": blocks, "head": head}


# ----------------------------------------------------------------------------
if __name__ == "__main__":
    cfg = dict(d_output=1, patch_size=2, bc_dims=2, d_emb=16,
               num_layers=2, num_atten=1, num_heads=2, num_mlp_layers=4)
    B, N = 2, 16

    key = jax.random.PRNGKey(0)
    kx, ky, kbc, kp = jax.random.split(key, 4)
    x = jax.random.uniform(kx, (B, N, 1), jnp.float32)
    y = jax.random.uniform(ky, (B, N, 1), jnp.float32)
    bc = jax.random.uniform(kbc, (B, N, cfg["bc_dims"]), jnp.float32)

    params = init_params(kp, cfg)
    fwd = jax.jit(functools.partial(pinnsformer_forward, cfg=cfg))
    out = jax.block_until_ready(fwd(params, x, y, bc))

    assert out.shape == (B, N, cfg["d_output"]), out.shape
    assert bool(jnp.all(jnp.isfinite(out)))
    print("KERNEL_OK")
</pallas_src>

<mosaic_0001>
module attributes {stable_mosaic.version = 11 : i64} {
  func.func @_mlp_stack_kernel(%arg0: i32, %arg1: memref<32x20xf32, #tpu.memory_space<vmem>>, %arg2: memref<1x2xf32, #tpu.memory_space<smem>>, %arg3: memref<20x16xbf16, #tpu.memory_space<vmem>>, %arg4: memref<1x16xf32, #tpu.memory_space<vmem>>, %arg5: memref<16x16xbf16, #tpu.memory_space<vmem>>, %arg6: memref<1x16xf32, #tpu.memory_space<vmem>>, %arg7: memref<32x16xf32, #tpu.memory_space<vmem>>) attributes {dimension_semantics = [#tpu.dimension_semantics<parallel>], iteration_bounds = array<i64: 1>, scalar_prefetch = 0 : i64, scratch_operands = 0 : i64, tpu.core_type = #tpu.core_type<tc>, window_params = [{transform_indices = @transform_0, window_bounds = array<i64: 32, 20>}, {transform_indices = @transform_1, window_bounds = array<i64: 1, 2>}, {pipeline_mode = #tpu.pipeline_mode<synchronous>, transform_indices = @transform_2, window_bounds = array<i64: 20, 16>}, {pipeline_mode = #tpu.pipeline_mode<synchronous>, transform_indices = @transform_3, window_bounds = array<i64: 1, 16>}, {pipeline_mode = #tpu.pipeline_mode<synchronous>, transform_indices = @transform_4, window_bounds = array<i64: 16, 16>}, {pipeline_mode = #tpu.pipeline_mode<synchronous>, transform_indices = @transform_5, window_bounds = array<i64: 1, 16>}, {transform_indices = @transform_6, window_bounds = array<i64: 32, 16>}]} {
    %c0 = arith.constant 0 : index
    %c0_0 = arith.constant 0 : index
    %0 = vector.load %arg1[%c0, %c0_0] : memref<32x20xf32, #tpu.memory_space<vmem>>, vector<32x20xf32>
    %1 = arith.truncf %0 : vector<32x20xf32> to vector<32x20xbf16>
    %c0_1 = arith.constant 0 : index
    %c0_2 = arith.constant 0 : index
    %2 = vector.load %arg3[%c0_1, %c0_2] : memref<20x16xbf16, #tpu.memory_space<vmem>>, vector<20x16xbf16>
    %cst = arith.constant dense<0.000000e+00> : vector<32x16xf32>
    %3 = tpu.matmul %1, %2, %cst {dimension_numbers = #tpu.dot_dimension_numbers<[1], [0], [0], [1], [0, 0, 1, 1], [], []>} : vector<32x20xbf16>, vector<20x16xbf16>, vector<32x16xf32> -> vector<32x16xf32>
    %c0_3 = arith.constant 0 : index
    %c0_4 = arith.constant 0 : index
    %4 = vector.load %arg4[%c0_3, %c0_4] : memref<1x16xf32, #tpu.memory_space<vmem>>, vector<1x16xf32>
    %5 = vector.broadcast %4 : vector<1x16xf32> to vector<32x16xf32>
    %6 = arith.addf %3, %5 : vector<32x16xf32>
    %c0_5 = arith.constant 0 : index
    %c0_6 = arith.constant 0 : index
    %7 = memref.load %arg2[%c0_5, %c0_6] : memref<1x2xf32, #tpu.memory_space<smem>>
    %8 = math.sin %6 : vector<32x16xf32>
    %9 = vector.broadcast %7 : f32 to vector<32x16xf32>
    %10 = arith.mulf %9, %8 : vector<32x16xf32>
    %c0_7 = arith.constant 0 : index
    %c1 = arith.constant 1 : index
    %11 = memref.load %arg2[%c0_7, %c1] : memref<1x2xf32, #tpu.memory_space<smem>>
    %12 = math.cos %6 : vector<32x16xf32>
    %13 = vector.broadcast %11 : f32 to vector<32x16xf32>
    %14 = arith.mulf %13, %12 : vector<32x16xf32>
    %15 = arith.addf %10, %14 : vector<32x16xf32>
    %16 = arith.truncf %15 : vector<32x16xf32> to vector<32x16xbf16>
    %c0_8 = arith.constant 0 : index
    %c0_9 = arith.constant 0 : index
    %17 = vector.load %arg5[%c0_8, %c0_9] : memref<16x16xbf16, #tpu.memory_space<vmem>>, vector<16x16xbf16>
    %cst_10 = arith.constant dense<0.000000e+00> : vector<32x16xf32>
    %18 = tpu.matmul %16, %17, %cst_10 {dimension_numbers = #tpu.dot_dimension_numbers<[1], [0], [0], [1], [0, 0, 1, 1], [], []>} : vector<32x16xbf16>, vector<16x16xbf16>, vector<32x16xf32> -> vector<32x16xf32>
    %c0_11 = arith.constant 0 : index
    %c0_12 = arith.constant 0 : index
    %19 = vector.load %arg6[%c0_11, %c0_12] : memref<1x16xf32, #tpu.memory_space<vmem>>, vector<1x16xf32>
    %20 = vector.broadcast %19 : vector<1x16xf32> to vector<32x16xf32>
    %21 = arith.addf %18, %20 : vector<32x16xf32>
    %c0_13 = arith.constant 0 : index
    %c0_14 = arith.constant 0 : index
    %22 = vector.load %arg7[%c0_13, %c0_14] : memref<32x16xf32, #tpu.memory_space<vmem>>, vector<32x16xf32>
    tpu.vector_store %arg7[%c0_13, %c0_14], %21 {strides = array<i32>} : memref<32x16xf32, #tpu.memory_space<vmem>>, vector<32x16xf32>,
    return
  }
  func.func @transform_0(%arg0: i32) -> (i32, i32) {
    %c0_i32 = arith.constant 0 : i32
    %c0_i32_0 = arith.constant 0 : i32
    return %arg0, %c0_i32 : i32, i32
  }
  func.func @transform_1(%arg0: i32) -> (i32, i32) {
    %c0_i32 = arith.constant 0 : i32
    %c0_i32_0 = arith.constant 0 : i32
    %c0_i32_1 = arith.constant 0 : i32
    return %c0_i32, %c0_i32_0 : i32, i32
  }
  func.func @transform_2(%arg0: i32) -> (i32, i32) {
    %c0_i32 = arith.constant 0 : i32
    %c0_i32_0 = arith.constant 0 : i32
    %c0_i32_1 = arith.constant 0 : i32
    return %c0_i32, %c0_i32_0 : i32, i32
  }
  func.func @transform_3(%arg0: i32) -> (i32, i32) {
    %c0_i32 = arith.constant 0 : i32
    %c0_i32_0 = arith.constant 0 : i32
    %c0_i32_1 = arith.constant 0 : i32
    return %c0_i32, %c0_i32_0 : i32, i32
  }
  func.func @transform_4(%arg0: i32) -> (i32, i32) {
    %c0_i32 = arith.constant 0 : i32
    %c0_i32_0 = arith.constant 0 : i32
    %c0_i32_1 = arith.constant 0 : i32
    return %c0_i32, %c0_i32_0 : i32, i32
  }
  func.func @transform_5(%arg0: i32) -> (i32, i32) {
    %c0_i32 = arith.constant 0 : i32
    %c0_i32_0 = arith.constant 0 : i32
    %c0_i32_1 = arith.constant 0 : i32
    return %c0_i32, %c0_i32_0 : i32, i32
  }
  func.func @transform_6(%arg0: i32) -> (i32, i32) {
    %c0_i32 = arith.constant 0 : i32
    %c0_i32_0 = arith.constant 0 : i32
    return %arg0, %c0_i32 : i32, i32
  }
}

module attributes {stable_mosaic.version = 11 : i64} {
  func.func @_encoder_block_kernel(%arg0: i32, %arg1: i32, %arg2: memref<2x8x32xf32, #tpu.memory_space<vmem>>, %arg3: memref<1x9x256xf32, #tpu.memory_space<vmem>>, %arg4: memref<1x6x1x16xf32, #tpu.memory_space<vmem>>, %arg5: memref<1x6x32x16xbf16, #tpu.memory_space<vmem>>, %arg6: memref<1x2x16x32xbf16, #tpu.memory_space<vmem>>, %arg7: memref<1x32x256xbf16, #tpu.memory_space<vmem>>, %arg8: memref<1x256x256xbf16, #tpu.memory_space<vmem>>, %arg9: memref<1x256x32xbf16, #tpu.memory_space<vmem>>, %arg10: memref<2x8x32xf32, #tpu.memory_space<vmem>>) attributes {dimension_semantics = [#tpu.dimension_semantics<parallel>, #tpu.dimension_semantics<arbitrary>], iteration_bounds = array<i64: 1, 1>, scalar_prefetch = 0 : i64, scratch_operands = 0 : i64, tpu.core_type = #tpu.core_type<tc>, window_params = [{transform_indices = @transform_0, window_bounds = array<i64: 2, 8, 32>}, {transform_indices = @transform_1, window_bounds = array<i64: 1, 9, 256>}, {transform_indices = @transform_2, window_bounds = array<i64: 1, 6, 1, 16>}, {transform_indices = @transform_3, window_bounds = array<i64: 1, 6, 32, 16>}, {transform_indices = @transform_4, window_bounds = array<i64: 1, 2, 16, 32>}, {transform_indices = @transform_5, window_bounds = array<i64: 1, 32, 256>}, {transform_indices = @transform_6, window_bounds = array<i64: 1, 256, 256>}, {transform_indices = @transform_7, window_bounds = array<i64: 1, 256, 32>}, {transform_indices = @transform_8, window_bounds = array<i64: 2, 8, 32>}]} {
    %c0_i32 = arith.constant 0 : i32
    %0 = arith.cmpi eq, %arg1, %c0_i32 : i32
    %1 = arith.extui %0 : i1 to i32
    %c0_i32_0 = arith.constant 0 : i32
    %2 = arith.cmpi ne, %1, %c0_i32_0 : i32
    scf.if %2 {
      %c0_91 = arith.constant 0 : index
      %c0_92 = arith.constant 0 : index
      %c0_93 = arith.constant 0 : index
      %218 = vector.load %arg2[%c0_91, %c0_92, %c0_93] : memref<2x8x32xf32, #tpu.memory_space<vmem>>, vector<2x8x32xf32>
      %c0_94 = arith.constant 0 : index
      %c0_95 = arith.constant 0 : index
      %c0_96 = arith.constant 0 : index
      %219 = vector.load %arg10[%c0_94, %c0_95, %c0_96] : memref<2x8x32xf32, #tpu.memory_space<vmem>>, vector<2x8x32xf32>
      tpu.vector_store %arg10[%c0_94, %c0_95, %c0_96], %218 {strides = array<i32>} : memref<2x8x32xf32, #tpu.memory_space<vmem>>, vector<2x8x32xf32>,
    } else {
    }
    %c0 = arith.constant 0 : index
    %c0_1 = arith.constant 0 : index
    %c0_2 = arith.constant 0 : index
    %3 = vector.load %arg10[%c0, %c0_1, %c0_2] : memref<2x8x32xf32, #tpu.memory_space<vmem>>, vector<2x8x32xf32>
    %4 = vector.shape_cast %3 : vector<2x8x32xf32> to vector<16x32xf32>
    %c0_3 = arith.constant 0 : index
    %c0_4 = arith.constant 0 : index
    %c0_5 = arith.constant 0 : index
    %5 = vector.load %arg3[%c0_3, %c0_4, %c0_5] : memref<1x9x256xf32, #tpu.memory_space<vmem>>, vector<1x1x32xf32>
    %6 = vector.shape_cast %5 : vector<1x1x32xf32> to vector<1x32xf32>
    %c0_6 = arith.constant 0 : index
    %c1 = arith.constant 1 : index
    %c0_7 = arith.constant 0 : index
    %7 = vector.load %arg3[%c0_6, %c1, %c0_7] : memref<1x9x256xf32, #tpu.memory_space<vmem>>, vector<1x1x32xf32>
    %8 = vector.shape_cast %7 : vector<1x1x32xf32> to vector<1x32xf32>
    %cst = arith.constant dense<0.000000e+00> : vector<16xf32>
    %9 = vector.multi_reduction <add>, %4, %cst [1] : vector<16x32xf32> to vector<16xf32>
    %10 = vector.shape_cast %9 : vector<16xf32> to vector<16x1xf32>
    %cst_8 = arith.constant 3.200000e+01 : f32
    %11 = vector.broadcast %cst_8 : f32 to vector<16x1xf32>
    %12 = arith.divf %10, %11 : vector<16x1xf32>
    %13 = vector.broadcast %12 : vector<16x1xf32> to vector<16x32xf32>
    %14 = arith.subf %4, %13 : vector<16x32xf32>
    %15 = arith.mulf %14, %14 : vector<16x32xf32>
    %cst_9 = arith.constant dense<0.000000e+00> : vector<16xf32>
    %16 = vector.multi_reduction <add>, %15, %cst_9 [1] : vector<16x32xf32> to vector<16xf32>
    %17 = vector.shape_cast %16 : vector<16xf32> to vector<16x1xf32>
    %cst_10 = arith.constant 3.200000e+01 : f32
    %18 = vector.broadcast %cst_10 : f32 to vector<16x1xf32>
    %19 = arith.divf %17, %18 : vector<16x1xf32>
    %cst_11 = arith.constant 9.99999974E-6 : f32
    %20 = vector.broadcast %cst_11 : f32 to vector<16x1xf32>
    %21 = arith.addf %19, %20 : vector<16x1xf32>
    %22 = math.rsqrt %21 : vector<16x1xf32>
    %23 = vector.broadcast %22 : vector<16x1xf32> to vector<16x32xf32>
    %24 = arith.mulf %14, %23 : vector<16x32xf32>
    %25 = vector.broadcast %6 : vector<1x32xf32> to vector<16x32xf32>
    %26 = arith.mulf %24, %25 : vector<16x32xf32>
    %27 = vector.broadcast %8 : vector<1x32xf32> to vector<16x32xf32>
    %28 = arith.addf %26, %27 : vector<16x32xf32>
    %29 = arith.truncf %28 : vector<16x32xf32> to vector<16x32xbf16>
    %c0_12 = arith.constant 0 : index
    %c0_13 = arith.constant 0 : index
    %c0_14 = arith.constant 0 : index
    %c0_15 = arith.constant 0 : index
    %30 = vector.load %arg5[%c0_12, %c0_13, %c0_14, %c0_15] : memref<1x6x32x16xbf16, #tpu.memory_space<vmem>>, vector<1x6x32x16xbf16>
    %31 = vector.shape_cast %30 : vector<1x6x32x16xbf16> to vector<6x32x16xbf16>
    %c0_16 = arith.constant 0 : index
    %c0_17 = arith.constant 0 : index
    %c0_18 = arith.constant 0 : index
    %c0_19 = arith.constant 0 : index
    %32 = vector.load %arg4[%c0_16, %c0_17, %c0_18, %c0_19] : memref<1x6x1x16xf32, #tpu.memory_space<vmem>>, vector<1x6x1x16xf32>
    %33 = vector.shape_cast %32 : vector<1x6x1x16xf32> to vector<6x1x16xf32>
    %c0_20 = arith.constant 0 : index
    %c0_21 = arith.constant 0 : index
    %c0_22 = arith.constant 0 : index
    %c0_23 = arith.constant 0 : index
    %34 = vector.load %arg6[%c0_20, %c0_21, %c0_22, %c0_23] : memref<1x2x16x32xbf16, #tpu.memory_space<vmem>>, vector<1x2x16x32xbf16>
    %35 = vector.shape_cast %34 : vector<1x2x16x32xbf16> to vector<2x16x32xbf16>
    %36 = vector.extract_strided_slice %31 {offsets = [0, 0, 0], sizes = [1, 32, 16], strides = [1, 1, 1]} : vector<6x32x16xbf16> to vector<1x32x16xbf16>
    %37 = vector.shape_cast %36 : vector<1x32x16xbf16> to vector<32x16xbf16>
    %cst_24 = arith.constant dense<0.000000e+00> : vector<16x16xf32>
    %38 = tpu.matmul %29, %37, %cst_24 {dimension_numbers = #tpu.dot_dimension_numbers<[1], [0], [0], [1], [0, 0, 1, 1], [], []>} : vector<16x32xbf16>, vector<32x16xbf16>, vector<16x16xf32> -> vector<16x16xf32>
    %39 = vector.extract_strided_slice %33 {offsets = [0, 0, 0], sizes = [1, 1, 16], strides = [1, 1, 1]} : vector<6x1x16xf32> to vector<1x1x16xf32>
    %40 = vector.shape_cast %39 : vector<1x1x16xf32> to vector<1x16xf32>
    %41 = vector.broadcast %40 : vector<1x16xf32> to vector<16x16xf32>
    %42 = arith.addf %38, %41 : vector<16x16xf32>
    %43 = vector.extract_strided_slice %31 {offsets = [2, 0, 0], sizes = [1, 32, 16], strides = [1, 1, 1]} : vector<6x32x16xbf16> to vector<1x32x16xbf16>
    %44 = vector.shape_cast %43 : vector<1x32x16xbf16> to vector<32x16xbf16>
    %cst_25 = arith.constant dense<0.000000e+00> : vector<16x16xf32>
    %45 = tpu.matmul %29, %44, %cst_25 {dimension_numbers = #tpu.dot_dimension_numbers<[1], [0], [0], [1], [0, 0, 1, 1], [], []>} : vector<16x32xbf16>, vector<32x16xbf16>, vector<16x16xf32> -> vector<16x16xf32>
    %46 = vector.extract_strided_slice %33 {offsets = [2, 0, 0], sizes = [1, 1, 16], strides = [1, 1, 1]} : vector<6x1x16xf32> to vector<1x1x16xf32>
    %47 = vector.shape_cast %46 : vector<1x1x16xf32> to vector<1x16xf32>
    %48 = vector.broadcast %47 : vector<1x16xf32> to vector<16x16xf32>
    %49 = arith.addf %45, %48 : vector<16x16xf32>
    %50 = vector.extract_strided_slice %31 {offsets = [4, 0, 0], sizes = [1, 32, 16], strides = [1, 1, 1]} : vector<6x32x16xbf16> to vector<1x32x16xbf16>
    %51 = vector.shape_cast %50 : vector<1x32x16xbf16> to vector<32x16xbf16>
    %cst_26 = arith.constant dense<0.000000e+00> : vector<16x16xf32>
    %52 = tpu.matmul %29, %51, %cst_26 {dimension_numbers = #tpu.dot_dimension_numbers<[1], [0], [0], [1], [0, 0, 1, 1], [], []>} : vector<16x32xbf16>, vector<32x16xbf16>, vector<16x16xf32> -> vector<16x16xf32>
    %53 = vector.extract_strided_slice %33 {offsets = [4, 0, 0], sizes = [1, 1, 16], strides = [1, 1, 1]} : vector<6x1x16xf32> to vector<1x1x16xf32>
    %54 = vector.shape_cast %53 : vector<1x1x16xf32> to vector<1x16xf32>
    %55 = vector.broadcast %54 : vector<1x16xf32> to vector<16x16xf32>
    %56 = arith.addf %52, %55 : vector<16x16xf32>
    %57 = vector.shape_cast %42 : vector<16x16xf32> to vector<2x8x16xf32>
    %58 = arith.truncf %57 : vector<2x8x16xf32> to vector<2x8x16xbf16>
    %59 = vector.shape_cast %49 : vector<16x16xf32> to vector<2x8x16xf32>
    %60 = arith.truncf %59 : vector<2x8x16xf32> to vector<2x8x16xbf16>
    %61 = vector.shape_cast %56 : vector<16x16xf32> to vector<2x8x16xf32>
    %62 = arith.truncf %61 : vector<2x8x16xf32> to vector<2x8x16xbf16>
    "tpu.trace_start"() <{level = 10 : i32, message = "bqd,bkd->bqk"}> : () -> ()
    %cst_27 = arith.constant dense<0.000000e+00> : vector<2x8x8xf32>
    %63 = tpu.matmul %58, %60, %cst_27 {dimension_numbers = #tpu.dot_dimension_numbers<[2], [2], [1], [1], [0, 0, 0, 1, 1, 1], [0], [0]>} : vector<2x8x16xbf16>, vector<2x8x16xbf16>, vector<2x8x8xf32> -> vector<2x8x8xf32>
    "tpu.trace_stop"() : () -> ()
    %cst_28 = arith.constant 2.500000e-01 : f32
    %64 = vector.broadcast %cst_28 : f32 to vector<2x8x8xf32>
    %65 = arith.mulf %63, %64 : vector<2x8x8xf32>
    %cst_29 = arith.constant dense<0xFF800000> : vector<2x8xf32>
    %66 = vector.multi_reduction <maximumf>, %65, %cst_29 [2] : vector<2x8x8xf32> to vector<2x8xf32>
    %67 = vector.shape_cast %66 : vector<2x8xf32> to vector<2x8x1xf32>
    %68 = vector.broadcast %67 : vector<2x8x1xf32> to vector<2x8x8xf32>
    %69 = arith.subf %65, %68 : vector<2x8x8xf32>
    %70 = math.exp %69 : vector<2x8x8xf32>
    %cst_30 = arith.constant dense<0.000000e+00> : vector<2x8xf32>
    %71 = vector.multi_reduction <add>, %70, %cst_30 [2] : vector<2x8x8xf32> to vector<2x8xf32>
    %72 = vector.shape_cast %71 : vector<2x8xf32> to vector<2x8x1xf32>
    %73 = vector.broadcast %72 : vector<2x8x1xf32> to vector<2x8x8xf32>
    %74 = arith.divf %70, %73 : vector<2x8x8xf32>
    %75 = arith.truncf %74 : vector<2x8x8xf32> to vector<2x8x8xbf16>
    "tpu.trace_start"() <{level = 10 : i32, message = "bqk,bkd->bqd"}> : () -> ()
    %cst_31 = arith.constant dense<0.000000e+00> : vector<2x8x16xf32>
    %76 = tpu.matmul %75, %62, %cst_31 {dimension_numbers = #tpu.dot_dimension_numbers<[2], [1], [1], [2], [0, 0, 0, 1, 1, 2], [0], [0]>} : vector<2x8x8xbf16>, vector<2x8x16xbf16>, vector<2x8x16xf32> -> vector<2x8x16xf32>
    "tpu.trace_stop"() : () -> ()
    %77 = vector.shape_cast %76 : vector<2x8x16xf32> to vector<16x16xf32>
    %78 = arith.truncf %77 : vector<16x16xf32> to vector<16x16xbf16>
    %79 = vector.extract_strided_slice %35 {offsets = [0, 0, 0], sizes = [1, 16, 32], strides = [1, 1, 1]} : vector<2x16x32xbf16> to vector<1x16x32xbf16>
    %80 = vector.shape_cast %79 : vector<1x16x32xbf16> to vector<16x32xbf16>
    %cst_32 = arith.constant dense<0.000000e+00> : vector<16x32xf32>
    %81 = tpu.matmul %78, %80, %cst_32 {dimension_numbers = #tpu.dot_dimension_numbers<[1], [0], [0], [1], [0, 0, 1, 1], [], []>} : vector<16x16xbf16>, vector<16x32xbf16>, vector<16x32xf32> -> vector<16x32xf32>
    %82 = vector.extract_strided_slice %31 {offsets = [1, 0, 0], sizes = [1, 32, 16], strides = [1, 1, 1]} : vector<6x32x16xbf16> to vector<1x32x16xbf16>
    %83 = vector.shape_cast %82 : vector<1x32x16xbf16> to vector<32x16xbf16>
    %cst_33 = arith.constant dense<0.000000e+00> : vector<16x16xf32>
    %84 = tpu.matmul %29, %83, %cst_33 {dimension_numbers = #tpu.dot_dimension_numbers<[1], [0], [0], [1], [0, 0, 1, 1], [], []>} : vector<16x32xbf16>, vector<32x16xbf16>, vector<16x16xf32> -> vector<16x16xf32>
    %85 = vector.extract_strided_slice %33 {offsets = [1, 0, 0], sizes = [1, 1, 16], strides = [1, 1, 1]} : vector<6x1x16xf32> to vector<1x1x16xf32>
    %86 = vector.shape_cast %85 : vector<1x1x16xf32> to vector<1x16xf32>
    %87 = vector.broadcast %86 : vector<1x16xf32> to vector<16x16xf32>
    %88 = arith.addf %84, %87 : vector<16x16xf32>
    %89 = vector.extract_strided_slice %31 {offsets = [3, 0, 0], sizes = [1, 32, 16], strides = [1, 1, 1]} : vector<6x32x16xbf16> to vector<1x32x16xbf16>
    %90 = vector.shape_cast %89 : vector<1x32x16xbf16> to vector<32x16xbf16>
    %cst_34 = arith.constant dense<0.000000e+00> : vector<16x16xf32>
    %91 = tpu.matmul %29, %90, %cst_34 {dimension_numbers = #tpu.dot_dimension_numbers<[1], [0], [0], [1], [0, 0, 1, 1], [], []>} : vector<16x32xbf16>, vector<32x16xbf16>, vector<16x16xf32> -> vector<16x16xf32>
    %92 = vector.extract_strided_slice %33 {offsets = [3, 0, 0], sizes = [1, 1, 16], strides = [1, 1, 1]} : vector<6x1x16xf32> to vector<1x1x16xf32>
    %93 = vector.shape_cast %92 : vector<1x1x16xf32> to vector<1x16xf32>
    %94 = vector.broadcast %93 : vector<1x16xf32> to vector<16x16xf32>
    %95 = arith.addf %91, %94 : vector<16x16xf32>
    %96 = vector.extract_strided_slice %31 {offsets = [5, 0, 0], sizes = [1, 32, 16], strides = [1, 1, 1]} : vector<6x32x16xbf16> to vector<1x32x16xbf16>
    %97 = vector.shape_cast %96 : vector<1x32x16xbf16> to vector<32x16xbf16>
    %cst_35 = arith.constant dense<0.000000e+00> : vector<16x16xf32>
    %98 = tpu.matmul %29, %97, %cst_35 {dimension_numbers = #tpu.dot_dimension_numbers<[1], [0], [0], [1], [0, 0, 1, 1], [], []>} : vector<16x32xbf16>, vector<32x16xbf16>, vector<16x16xf32> -> vector<16x16xf32>
    %99 = vector.extract_strided_slice %33 {offsets = [5, 0, 0], sizes = [1, 1, 16], strides = [1, 1, 1]} : vector<6x1x16xf32> to vector<1x1x16xf32>
    %100 = vector.shape_cast %99 : vector<1x1x16xf32> to vector<1x16xf32>
    %101 = vector.broadcast %100 : vector<1x16xf32> to vector<16x16xf32>
    %102 = arith.addf %98, %101 : vector<16x16xf32>
    %103 = vector.shape_cast %88 : vector<16x16xf32> to vector<2x8x16xf32>
    %104 = arith.truncf %103 : vector<2x8x16xf32> to vector<2x8x16xbf16>
    %105 = vector.shape_cast %95 : vector<16x16xf32> to vector<2x8x16xf32>
    %106 = arith.truncf %105 : vector<2x8x16xf32> to vector<2x8x16xbf16>
    %107 = vector.shape_cast %102 : vector<16x16xf32> to vector<2x8x16xf32>
    %108 = arith.truncf %107 : vector<2x8x16xf32> to vector<2x8x16xbf16>
    "tpu.trace_start"() <{level = 10 : i32, message = "bqd,bkd->bqk"}> : () -> ()
    %cst_36 = arith.constant dense<0.000000e+00> : vector<2x8x8xf32>
    %109 = tpu.matmul %104, %106, %cst_36 {dimension_numbers = #tpu.dot_dimension_numbers<[2], [2], [1], [1], [0, 0, 0, 1, 1, 1], [0], [0]>} : vector<2x8x16xbf16>, vector<2x8x16xbf16>, vector<2x8x8xf32> -> vector<2x8x8xf32>
    "tpu.trace_stop"() : () -> ()
    %cst_37 = arith.constant 2.500000e-01 : f32
    %110 = vector.broadcast %cst_37 : f32 to vector<2x8x8xf32>
    %111 = arith.mulf %109, %110 : vector<2x8x8xf32>
    %cst_38 = arith.constant dense<0xFF800000> : vector<2x8xf32>
    %112 = vector.multi_reduction <maximumf>, %111, %cst_38 [2] : vector<2x8x8xf32> to vector<2x8xf32>
    %113 = vector.shape_cast %112 : vector<2x8xf32> to vector<2x8x1xf32>
    %114 = vector.broadcast %113 : vector<2x8x1xf32> to vector<2x8x8xf32>
    %115 = arith.subf %111, %114 : vector<2x8x8xf32>
    %116 = math.exp %115 : vector<2x8x8xf32>
    %cst_39 = arith.constant dense<0.000000e+00> : vector<2x8xf32>
    %117 = vector.multi_reduction <add>, %116, %cst_39 [2] : vector<2x8x8xf32> to vector<2x8xf32>
    %118 = vector.shape_cast %117 : vector<2x8xf32> to vector<2x8x1xf32>
    %119 = vector.broadcast %118 : vector<2x8x1xf32> to vector<2x8x8xf32>
    %120 = arith.divf %116, %119 : vector<2x8x8xf32>
    %121 = arith.truncf %120 : vector<2x8x8xf32> to vector<2x8x8xbf16>
    "tpu.trace_start"() <{level = 10 : i32, message = "bqk,bkd->bqd"}> : () -> ()
    %cst_40 = arith.constant dense<0.000000e+00> : vector<2x8x16xf32>
    %122 = tpu.matmul %121, %108, %cst_40 {dimension_numbers = #tpu.dot_dimension_numbers<[2], [1], [1], [2], [0, 0, 0, 1, 1, 2], [0], [0]>} : vector<2x8x8xbf16>, vector<2x8x16xbf16>, vector<2x8x16xf32> -> vector<2x8x16xf32>
    "tpu.trace_stop"() : () -> ()
    %123 = vector.shape_cast %122 : vector<2x8x16xf32> to vector<16x16xf32>
    %124 = arith.truncf %123 : vector<16x16xf32> to vector<16x16xbf16>
    %125 = vector.extract_strided_slice %35 {offsets = [1, 0, 0], sizes = [1, 16, 32], strides = [1, 1, 1]} : vector<2x16x32xbf16> to vector<1x16x32xbf16>
    %126 = vector.shape_cast %125 : vector<1x16x32xbf16> to vector<16x32xbf16>
    %cst_41 = arith.constant dense<0.000000e+00> : vector<16x32xf32>
    %127 = tpu.matmul %124, %126, %cst_41 {dimension_numbers = #tpu.dot_dimension_numbers<[1], [0], [0], [1], [0, 0, 1, 1], [], []>} : vector<16x16xbf16>, vector<16x32xbf16>, vector<16x32xf32> -> vector<16x32xf32>
    %128 = arith.addf %81, %127 : vector<16x32xf32>
    %129 = arith.addf %4, %128 : vector<16x32xf32>
    %c0_42 = arith.constant 0 : index
    %c4 = arith.constant 4 : index
    %c0_43 = arith.constant 0 : index
    %130 = vector.load %arg3[%c0_42, %c4, %c0_43] : memref<1x9x256xf32, #tpu.memory_space<vmem>>, vector<1x1x32xf32>
    %131 = vector.shape_cast %130 : vector<1x1x32xf32> to vector<1x32xf32>
    %132 = vector.broadcast %131 : vector<1x32xf32> to vector<16x32xf32>
    %133 = arith.addf %129, %132 : vector<16x32xf32>
    %c0_44 = arith.constant 0 : index
    %c2 = arith.constant 2 : index
    %c0_45 = arith.constant 0 : index
    %134 = vector.load %arg3[%c0_44, %c2, %c0_45] : memref<1x9x256xf32, #tpu.memory_space<vmem>>, vector<1x1x32xf32>
    %135 = vector.shape_cast %134 : vector<1x1x32xf32> to vector<1x32xf32>
    %c0_46 = arith.constant 0 : index
    %c3 = arith.constant 3 : index
    %c0_47 = arith.constant 0 : index
    %136 = vector.load %arg3[%c0_46, %c3, %c0_47] : memref<1x9x256xf32, #tpu.memory_space<vmem>>, vector<1x1x32xf32>
    %137 = vector.shape_cast %136 : vector<1x1x32xf32> to vector<1x32xf32>
    %cst_48 = arith.constant dense<0.000000e+00> : vector<16xf32>
    %138 = vector.multi_reduction <add>, %133, %cst_48 [1] : vector<16x32xf32> to vector<16xf32>
    %139 = vector.shape_cast %138 : vector<16xf32> to vector<16x1xf32>
    %cst_49 = arith.constant 3.200000e+01 : f32
    %140 = vector.broadcast %cst_49 : f32 to vector<16x1xf32>
    %141 = arith.divf %139, %140 : vector<16x1xf32>
    %142 = vector.broadcast %141 : vector<16x1xf32> to vector<16x32xf32>
    %143 = arith.subf %133, %142 : vector<16x32xf32>
    %144 = arith.mulf %143, %143 : vector<16x32xf32>
    %cst_50 = arith.constant dense<0.000000e+00> : vector<16xf32>
    %145 = vector.multi_reduction <add>, %144, %cst_50 [1] : vector<16x32xf32> to vector<16xf32>
    %146 = vector.shape_cast %145 : vector<16xf32> to vector<16x1xf32>
    %cst_51 = arith.constant 3.200000e+01 : f32
    %147 = vector.broadcast %cst_51 : f32 to vector<16x1xf32>
    %148 = arith.divf %146, %147 : vector<16x1xf32>
    %cst_52 = arith.constant 9.99999974E-6 : f32
    %149 = vector.broadcast %cst_52 : f32 to vector<16x1xf32>
    %150 = arith.addf %148, %149 : vector<16x1xf32>
    %151 = math.rsqrt %150 : vector<16x1xf32>
    %152 = vector.broadcast %151 : vector<16x1xf32> to vector<16x32xf32>
    %153 = arith.mulf %143, %152 : vector<16x32xf32>
    %154 = vector.broadcast %135 : vector<1x32xf32> to vector<16x32xf32>
    %155 = arith.mulf %153, %154 : vector<16x32xf32>
    %156 = vector.broadcast %137 : vector<1x32xf32> to vector<16x32xf32>
    %157 = arith.addf %155, %156 : vector<16x32xf32>
    %158 = arith.truncf %157 : vector<16x32xf32> to vector<16x32xbf16>
    %c0_53 = arith.constant 0 : index
    %c0_54 = arith.constant 0 : index
    %c0_55 = arith.constant 0 : index
    %159 = vector.load %arg7[%c0_53, %c0_54, %c0_55] : memref<1x32x256xbf16, #tpu.memory_space<vmem>>, vector<1x32x256xbf16>
    %160 = vector.shape_cast %159 : vector<1x32x256xbf16> to vector<32x256xbf16>
    %cst_56 = arith.constant dense<0.000000e+00> : vector<16x256xf32>
    %161 = tpu.matmul %158, %160, %cst_56 {dimension_numbers = #tpu.dot_dimension_numbers<[1], [0], [0], [1], [0, 0, 1, 1], [], []>} : vector<16x32xbf16>, vector<32x256xbf16>, vector<16x256xf32> -> vector<16x256xf32>
    %c0_57 = arith.constant 0 : index
    %c5 = arith.constant 5 : index
    %c0_58 = arith.constant 0 : index
    %162 = vector.load %arg3[%c0_57, %c5, %c0_58] : memref<1x9x256xf32, #tpu.memory_space<vmem>>, vector<1x1x256xf32>
    %163 = vector.shape_cast %162 : vector<1x1x256xf32> to vector<1x256xf32>
    %164 = vector.broadcast %163 : vector<1x256xf32> to vector<16x256xf32>
    %165 = arith.addf %161, %164 : vector<16x256xf32>
    %c0_59 = arith.constant 0 : index
    %c8 = arith.constant 8 : index
    %c0_60 = arith.constant 0 : index
    %166 = vector.load %arg3[%c0_59, %c8, %c0_60] : memref<1x9x256xf32, #tpu.memory_space<vmem>>, vector<1x1x1xf32>
    %167 = vector.shape_cast %166 : vector<1x1x1xf32> to vector<1x1xf32>
    %168 = math.sin %165 : vector<16x256xf32>
    %169 = vector.broadcast %167 : vector<1x1xf32> to vector<16x256xf32>
    %170 = arith.mulf %169, %168 : vector<16x256xf32>
    %c0_61 = arith.constant 0 : index
    %c8_62 = arith.constant 8 : index
    %c1_63 = arith.constant 1 : index
    %171 = vector.load %arg3[%c0_61, %c8_62, %c1_63] : memref<1x9x256xf32, #tpu.memory_space<vmem>>, vector<1x1x1xf32>
    %172 = vector.shape_cast %171 : vector<1x1x1xf32> to vector<1x1xf32>
    %173 = math.cos %165 : vector<16x256xf32>
    %174 = vector.broadcast %172 : vector<1x1xf32> to vector<16x256xf32>
    %175 = arith.mulf %174, %173 : vector<16x256xf32>
    %176 = arith.addf %170, %175 : vector<16x256xf32>
    %177 = arith.truncf %176 : vector<16x256xf32> to vector<16x256xbf16>
    %c0_64 = arith.constant 0 : index
    %c0_65 = arith.constant 0 : index
    %c0_66 = arith.constant 0 : index
    %178 = vector.load %arg8[%c0_64, %c0_65, %c0_66] : memref<1x256x256xbf16, #tpu.memory_space<vmem>>, vector<1x256x256xbf16>
    %179 = vector.shape_cast %178 : vector<1x256x256xbf16> to vector<256x256xbf16>
    %cst_67 = arith.constant dense<0.000000e+00> : vector<16x256xf32>
    %180 = tpu.matmul %177, %179, %cst_67 {dimension_numbers = #tpu.dot_dimension_numbers<[1], [0], [0], [1], [0, 0, 1, 1], [], []>} : vector<16x256xbf16>, vector<256x256xbf16>, vector<16x256xf32> -> vector<16x256xf32>
    %c0_68 = arith.constant 0 : index
    %c6 = arith.constant 6 : index
    %c0_69 = arith.constant 0 : index
    %181 = vector.load %arg3[%c0_68, %c6, %c0_69] : memref<1x9x256xf32, #tpu.memory_space<vmem>>, vector<1x1x256xf32>
    %182 = vector.shape_cast %181 : vector<1x1x256xf32> to vector<1x256xf32>
    %183 = vector.broadcast %182 : vector<1x256xf32> to vector<16x256xf32>
    %184 = arith.addf %180, %183 : vector<16x256xf32>
    %c0_70 = arith.constant 0 : index
    %c8_71 = arith.constant 8 : index
    %c2_72 = arith.constant 2 : index
    %185 = vector.load %arg3[%c0_70, %c8_71, %c2_72] : memref<1x9x256xf32, #tpu.memory_space<vmem>>, vector<1x1x1xf32>
    %186 = vector.shape_cast %185 : vector<1x1x1xf32> to vector<1x1xf32>
    %187 = math.sin %184 : vector<16x256xf32>
    %188 = vector.broadcast %186 : vector<1x1xf32> to vector<16x256xf32>
    %189 = arith.mulf %188, %187 : vector<16x256xf32>
    %c0_73 = arith.constant 0 : index
    %c8_74 = arith.constant 8 : index
    %c3_75 = arith.constant 3 : index
    %190 = vector.load %arg3[%c0_73, %c8_74, %c3_75] : memref<1x9x256xf32, #tpu.memory_space<vmem>>, vector<1x1x1xf32>
    %191 = vector.shape_cast %190 : vector<1x1x1xf32> to vector<1x1xf32>
    %192 = math.cos %184 : vector<16x256xf32>
    %193 = vector.broadcast %191 : vector<1x1xf32> to vector<16x256xf32>
    %194 = arith.mulf %193, %192 : vector<16x256xf32>
    %195 = arith.addf %189, %194 : vector<16x256xf32>
    %196 = arith.truncf %195 : vector<16x256xf32> to vector<16x256xbf16>
    %c0_76 = arith.constant 0 : index
    %c0_77 = arith.constant 0 : index
    %c0_78 = arith.constant 0 : index
    %197 = vector.load %arg9[%c0_76, %c0_77, %c0_78] : memref<1x256x32xbf16, #tpu.memory_space<vmem>>, vector<1x256x32xbf16>
    %198 = vector.shape_cast %197 : vector<1x256x32xbf16> to vector<256x32xbf16>
    %cst_79 = arith.constant dense<0.000000e+00> : vector<16x32xf32>
    %199 = tpu.matmul %196, %198, %cst_79 {dimension_numbers = #tpu.dot_dimension_numbers<[1], [0], [0], [1], [0, 0, 1, 1], [], []>} : vector<16x256xbf16>, vector<256x32xbf16>, vector<16x32xf32> -> vector<16x32xf32>
    %c0_80 = arith.constant 0 : index
    %c7 = arith.constant 7 : index
    %c0_81 = arith.constant 0 : index
    %200 = vector.load %arg3[%c0_80, %c7, %c0_81] : memref<1x9x256xf32, #tpu.memory_space<vmem>>, vector<1x1x32xf32>
    %201 = vector.shape_cast %200 : vector<1x1x32xf32> to vector<1x32xf32>
    %202 = vector.broadcast %201 : vector<1x32xf32> to vector<16x32xf32>
    %203 = arith.addf %199, %202 : vector<16x32xf32>
    %c0_82 = arith.constant 0 : index
    %c8_83 = arith.constant 8 : index
    %c4_84 = arith.constant 4 : index
    %204 = vector.load %arg3[%c0_82, %c8_83, %c4_84] : memref<1x9x256xf32, #tpu.memory_space<vmem>>, vector<1x1x1xf32>
    %205 = vector.shape_cast %204 : vector<1x1x1xf32> to vector<1x1xf32>
    %206 = math.sin %203 : vector<16x32xf32>
    %207 = vector.broadcast %205 : vector<1x1xf32> to vector<16x32xf32>
    %208 = arith.mulf %207, %206 : vector<16x32xf32>
    %c0_85 = arith.constant 0 : index
    %c8_86 = arith.constant 8 : index
    %c5_87 = arith.constant 5 : index
    %209 = vector.load %arg3[%c0_85, %c8_86, %c5_87] : memref<1x9x256xf32, #tpu.memory_space<vmem>>, vector<1x1x1xf32>
    %210 = vector.shape_cast %209 : vector<1x1x1xf32> to vector<1x1xf32>
    %211 = math.cos %203 : vector<16x32xf32>
    %212 = vector.broadcast %210 : vector<1x1xf32> to vector<16x32xf32>
    %213 = arith.mulf %212, %211 : vector<16x32xf32>
    %214 = arith.addf %208, %213 : vector<16x32xf32>
    %215 = arith.addf %133, %214 : vector<16x32xf32>
    %216 = vector.shape_cast %215 : vector<16x32xf32> to vector<2x8x32xf32>
    %c0_88 = arith.constant 0 : index
    %c0_89 = arith.constant 0 : index
    %c0_90 = arith.constant 0 : index
    %217 = vector.load %arg10[%c0_88, %c0_89, %c0_90] : memref<2x8x32xf32, #tpu.memory_space<vmem>>, vector<2x8x32xf32>
    tpu.vector_store %arg10[%c0_88, %c0_89, %c0_90], %216 {strides = array<i32>} : memref<2x8x32xf32, #tpu.memory_space<vmem>>, vector<2x8x32xf32>,
    return
  }
  func.func @transform_0(%arg0: i32, %arg1: i32) -> (i32, i32, i32) {
    %c0_i32 = arith.constant 0 : i32
    %c0_i32_0 = arith.constant 0 : i32
    %c0_i32_1 = arith.constant 0 : i32
    return %arg0, %c0_i32, %c0_i32_0 : i32, i32, i32
  }
  func.func @transform_1(%arg0: i32, %arg1: i32) -> (i32, i32, i32) {
    %c0_i32 = arith.constant 0 : i32
    %c0_i32_0 = arith.constant 0 : i32
    %c0_i32_1 = arith.constant 0 : i32
    return %arg1, %c0_i32, %c0_i32_0 : i32, i32, i32
  }
  func.func @transform_2(%arg0: i32, %arg1: i32) -> (i32, i32, i32, i32) {
    %c0_i32 = arith.constant 0 : i32
    %c0_i32_0 = arith.constant 0 : i32
    %c0_i32_1 = arith.constant 0 : i32
    %c0_i32_2 = arith.constant 0 : i32
    return %arg1, %c0_i32, %c0_i32_0, %c0_i32_1 : i32, i32, i32, i32
  }
  func.func @transform_3(%arg0: i32, %arg1: i32) -> (i32, i32, i32, i32) {
    %c0_i32 = arith.constant 0 : i32
    %c0_i32_0 = arith.constant 0 : i32
    %c0_i32_1 = arith.constant 0 : i32
    %c0_i32_2 = arith.constant 0 : i32
    return %arg1, %c0_i32, %c0_i32_0, %c0_i32_1 : i32, i32, i32, i32
  }
  func.func @transform_4(%arg0: i32, %arg1: i32) -> (i32, i32, i32, i32) {
    %c0_i32 = arith.constant 0 : i32
    %c0_i32_0 = arith.constant 0 : i32
    %c0_i32_1 = arith.constant 0 : i32
    %c0_i32_2 = arith.constant 0 : i32
    return %arg1, %c0_i32, %c0_i32_0, %c0_i32_1 : i32, i32, i32, i32
  }
  func.func @transform_5(%arg0: i32, %arg1: i32) -> (i32, i32, i32) {
    %c0_i32 = arith.constant 0 : i32
    %c0_i32_0 = arith.constant 0 : i32
    %c0_i32_1 = arith.constant 0 : i32
    return %arg1, %c0_i32, %c0_i32_0 : i32, i32, i32
  }
  func.func @transform_6(%arg0: i32, %arg1: i32) -> (i32, i32, i32) {
    %c0_i32 = arith.constant 0 : i32
    %c0_i32_0 = arith.constant 0 : i32
    %c0_i32_1 = arith.constant 0 : i32
    return %arg1, %c0_i32, %c0_i32_0 : i32, i32, i32
  }
  func.func @transform_7(%arg0: i32, %arg1: i32) -> (i32, i32, i32) {
    %c0_i32 = arith.constant 0 : i32
    %c0_i32_0 = arith.constant 0 : i32
    %c0_i32_1 = arith.constant 0 : i32
    return %arg1, %c0_i32, %c0_i32_0 : i32, i32, i32
  }
  func.func @transform_8(%arg0: i32, %arg1: i32) -> (i32, i32, i32) {
    %c0_i32 = arith.constant 0 : i32
    %c0_i32_0 = arith.constant 0 : i32
    %c0_i32_1 = arith.constant 0 : i32
    return %arg0, %c0_i32, %c0_i32_0 : i32, i32, i32
  }
}

module attributes {stable_mosaic.version = 11 : i64} {
  func.func @_mlp_stack_kernel(%arg0: i32, %arg1: memref<32x16xf32, #tpu.memory_space<vmem>>, %arg2: memref<4x2xf32, #tpu.memory_space<smem>>, %arg3: memref<16x32xbf16, #tpu.memory_space<vmem>>, %arg4: memref<1x32xf32, #tpu.memory_space<vmem>>, %arg5: memref<32x32xbf16, #tpu.memory_space<vmem>>, %arg6: memref<1x32xf32, #tpu.memory_space<vmem>>, %arg7: memref<32x32xbf16, #tpu.memory_space<vmem>>, %arg8: memref<1x32xf32, #tpu.memory_space<vmem>>, %arg9: memref<32x16xbf16, #tpu.memory_space<vmem>>, %arg10: memref<1x16xf32, #tpu.memory_space<vmem>>, %arg11: memref<1x16xf32, #tpu.memory_space<vmem>>, %arg12: memref<1x16xf32, #tpu.memory_space<vmem>>, %arg13: memref<16x1xbf16, #tpu.memory_space<vmem>>, %arg14: memref<1x1xf32, #tpu.memory_space<vmem>>, %arg15: memref<32x1xf32, #tpu.memory_space<vmem>>) attributes {dimension_semantics = [#tpu.dimension_semantics<parallel>], iteration_bounds = array<i64: 1>, scalar_prefetch = 0 : i64, scratch_operands = 0 : i64, tpu.core_type = #tpu.core_type<tc>, window_params = [{transform_indices = @transform_0, window_bounds = array<i64: 32, 16>}, {transform_indices = @transform_1, window_bounds = array<i64: 4, 2>}, {pipeline_mode = #tpu.pipeline_mode<synchronous>, transform_indices = @transform_2, window_bounds = array<i64: 16, 32>}, {pipeline_mode = #tpu.pipeline_mode<synchronous>, transform_indices = @transform_3, window_bounds = array<i64: 1, 32>}, {pipeline_mode = #tpu.pipeline_mode<synchronous>, transform_indices = @transform_4, window_bounds = array<i64: 32, 32>}, {pipeline_mode = #tpu.pipeline_mode<synchronous>, transform_indices = @transform_5, window_bounds = array<i64: 1, 32>}, {pipeline_mode = #tpu.pipeline_mode<synchronous>, transform_indices = @transform_6, window_bounds = array<i64: 32, 32>}, {pipeline_mode = #tpu.pipeline_mode<synchronous>, transform_indices = @transform_7, window_bounds = array<i64: 1, 32>}, {pipeline_mode = #tpu.pipeline_mode<synchronous>, transform_indices = @transform_8, window_bounds = array<i64: 32, 16>}, {pipeline_mode = #tpu.pipeline_mode<synchronous>, transform_indices = @transform_9, window_bounds = array<i64: 1, 16>}, {pipeline_mode = #tpu.pipeline_mode<synchronous>, transform_indices = @transform_10, window_bounds = array<i64: 1, 16>}, {pipeline_mode = #tpu.pipeline_mode<synchronous>, transform_indices = @transform_11, window_bounds = array<i64: 1, 16>}, {pipeline_mode = #tpu.pipeline_mode<synchronous>, transform_indices = @transform_12, window_bounds = array<i64: 16, 1>}, {pipeline_mode = #tpu.pipeline_mode<synchronous>, transform_indices = @transform_13, window_bounds = array<i64: 1, 1>}, {transform_indices = @transform_14, window_bounds = array<i64: 32, 1>}]} {
    %c0 = arith.constant 0 : index
    %c0_0 = arith.constant 0 : index
    %0 = vector.load %arg1[%c0, %c0_0] : memref<32x16xf32, #tpu.memory_space<vmem>>, vector<32x16xf32>
    %1 = arith.truncf %0 : vector<32x16xf32> to vector<32x16xbf16>
    %c0_1 = arith.constant 0 : index
    %c0_2 = arith.constant 0 : index
    %2 = vector.load %arg3[%c0_1, %c0_2] : memref<16x32xbf16, #tpu.memory_space<vmem>>, vector<16x32xbf16>
    %cst = arith.constant dense<0.000000e+00> : vector<32x32xf32>
    %3 = tpu.matmul %1, %2, %cst {dimension_numbers = #tpu.dot_dimension_numbers<[1], [0], [0], [1], [0, 0, 1, 1], [], []>} : vector<32x16xbf16>, vector<16x32xbf16>, vector<32x32xf32> -> vector<32x32xf32>
    %c0_3 = arith.constant 0 : index
    %c0_4 = arith.constant 0 : index
    %4 = vector.load %arg4[%c0_3, %c0_4] : memref<1x32xf32, #tpu.memory_space<vmem>>, vector<1x32xf32>
    %5 = vector.broadcast %4 : vector<1x32xf32> to vector<32x32xf32>
    %6 = arith.addf %3, %5 : vector<32x32xf32>
    %c0_5 = arith.constant 0 : index
    %c0_6 = arith.constant 0 : index
    %7 = memref.load %arg2[%c0_5, %c0_6] : memref<4x2xf32, #tpu.memory_space<smem>>
    %8 = math.sin %6 : vector<32x32xf32>
    %9 = vector.broadcast %7 : f32 to vector<32x32xf32>
    %10 = arith.mulf %9, %8 : vector<32x32xf32>
    %c0_7 = arith.constant 0 : index
    %c1 = arith.constant 1 : index
    %11 = memref.load %arg2[%c0_7, %c1] : memref<4x2xf32, #tpu.memory_space<smem>>
    %12 = math.cos %6 : vector<32x32xf32>
    %13 = vector.broadcast %11 : f32 to vector<32x32xf32>
    %14 = arith.mulf %13, %12 : vector<32x32xf32>
    %15 = arith.addf %10, %14 : vector<32x32xf32>
    %16 = arith.truncf %15 : vector<32x32xf32> to vector<32x32xbf16>
    %c0_8 = arith.constant 0 : index
    %c0_9 = arith.constant 0 : index
    %17 = vector.load %arg5[%c0_8, %c0_9] : memref<32x32xbf16, #tpu.memory_space<vmem>>, vector<32x32xbf16>
    %cst_10 = arith.constant dense<0.000000e+00> : vector<32x32xf32>
    %18 = tpu.matmul %16, %17, %cst_10 {dimension_numbers = #tpu.dot_dimension_numbers<[1], [0], [0], [1], [0, 0, 1, 1], [], []>} : vector<32x32xbf16>, vector<32x32xbf16>, vector<32x32xf32> -> vector<32x32xf32>
    %c0_11 = arith.constant 0 : index
    %c0_12 = arith.constant 0 : index
    %19 = vector.load %arg6[%c0_11, %c0_12] : memref<1x32xf32, #tpu.memory_space<vmem>>, vector<1x32xf32>
    %20 = vector.broadcast %19 : vector<1x32xf32> to vector<32x32xf32>
    %21 = arith.addf %18, %20 : vector<32x32xf32>
    %c1_13 = arith.constant 1 : index
    %c0_14 = arith.constant 0 : index
    %22 = memref.load %arg2[%c1_13, %c0_14] : memref<4x2xf32, #tpu.memory_space<smem>>
    %23 = math.sin %21 : vector<32x32xf32>
    %24 = vector.broadcast %22 : f32 to vector<32x32xf32>
    %25 = arith.mulf %24, %23 : vector<32x32xf32>
    %c1_15 = arith.constant 1 : index
    %c1_16 = arith.constant 1 : index
    %26 = memref.load %arg2[%c1_15, %c1_16] : memref<4x2xf32, #tpu.memory_space<smem>>
    %27 = math.cos %21 : vector<32x32xf32>
    %28 = vector.broadcast %26 : f32 to vector<32x32xf32>
    %29 = arith.mulf %28, %27 : vector<32x32xf32>
    %30 = arith.addf %25, %29 : vector<32x32xf32>
    %31 = arith.truncf %30 : vector<32x32xf32> to vector<32x32xbf16>
    %c0_17 = arith.constant 0 : index
    %c0_18 = arith.constant 0 : index
    %32 = vector.load %arg7[%c0_17, %c0_18] : memref<32x32xbf16, #tpu.memory_space<vmem>>, vector<32x32xbf16>
    %cst_19 = arith.constant dense<0.000000e+00> : vector<32x32xf32>
    %33 = tpu.matmul %31, %32, %cst_19 {dimension_numbers = #tpu.dot_dimension_numbers<[1], [0], [0], [1], [0, 0, 1, 1], [], []>} : vector<32x32xbf16>, vector<32x32xbf16>, vector<32x32xf32> -> vector<32x32xf32>
    %c0_20 = arith.constant 0 : index
    %c0_21 = arith.constant 0 : index
    %34 = vector.load %arg8[%c0_20, %c0_21] : memref<1x32xf32, #tpu.memory_space<vmem>>, vector<1x32xf32>
    %35 = vector.broadcast %34 : vector<1x32xf32> to vector<32x32xf32>
    %36 = arith.addf %33, %35 : vector<32x32xf32>
    %c2 = arith.constant 2 : index
    %c0_22 = arith.constant 0 : index
    %37 = memref.load %arg2[%c2, %c0_22] : memref<4x2xf32, #tpu.memory_space<smem>>
    %38 = math.sin %36 : vector<32x32xf32>
    %39 = vector.broadcast %37 : f32 to vector<32x32xf32>
    %40 = arith.mulf %39, %38 : vector<32x32xf32>
    %c2_23 = arith.constant 2 : index
    %c1_24 = arith.constant 1 : index
    %41 = memref.load %arg2[%c2_23, %c1_24] : memref<4x2xf32, #tpu.memory_space<smem>>
    %42 = math.cos %36 : vector<32x32xf32>
    %43 = vector.broadcast %41 : f32 to vector<32x32xf32>
    %44 = arith.mulf %43, %42 : vector<32x32xf32>
    %45 = arith.addf %40, %44 : vector<32x32xf32>
    %46 = arith.truncf %45 : vector<32x32xf32> to vector<32x32xbf16>
    %c0_25 = arith.constant 0 : index
    %c0_26 = arith.constant 0 : index
    %47 = vector.load %arg9[%c0_25, %c0_26] : memref<32x16xbf16, #tpu.memory_space<vmem>>, vector<32x16xbf16>
    %cst_27 = arith.constant dense<0.000000e+00> : vector<32x16xf32>
    %48 = tpu.matmul %46, %47, %cst_27 {dimension_numbers = #tpu.dot_dimension_numbers<[1], [0], [0], [1], [0, 0, 1, 1], [], []>} : vector<32x32xbf16>, vector<32x16xbf16>, vector<32x16xf32> -> vector<32x16xf32>
    %c0_28 = arith.constant 0 : index
    %c0_29 = arith.constant 0 : index
    %49 = vector.load %arg10[%c0_28, %c0_29] : memref<1x16xf32, #tpu.memory_space<vmem>>, vector<1x16xf32>
    %50 = vector.broadcast %49 : vector<1x16xf32> to vector<32x16xf32>
    %51 = arith.addf %48, %50 : vector<32x16xf32>
    %c3 = arith.constant 3 : index
    %c0_30 = arith.constant 0 : index
    %52 = memref.load %arg2[%c3, %c0_30] : memref<4x2xf32, #tpu.memory_space<smem>>
    %53 = math.sin %51 : vector<32x16xf32>
    %54 = vector.broadcast %52 : f32 to vector<32x16xf32>
    %55 = arith.mulf %54, %53 : vector<32x16xf32>
    %c3_31 = arith.constant 3 : index
    %c1_32 = arith.constant 1 : index
    %56 = memref.load %arg2[%c3_31, %c1_32] : memref<4x2xf32, #tpu.memory_space<smem>>
    %57 = math.cos %51 : vector<32x16xf32>
    %58 = vector.broadcast %56 : f32 to vector<32x16xf32>
    %59 = arith.mulf %58, %57 : vector<32x16xf32>
    %60 = arith.addf %55, %59 : vector<32x16xf32>
    %c0_33 = arith.constant 0 : index
    %c0_34 = arith.constant 0 : index
    %61 = vector.load %arg11[%c0_33, %c0_34] : memref<1x16xf32, #tpu.memory_space<vmem>>, vector<1x16xf32>
    %c0_35 = arith.constant 0 : index
    %c0_36 = arith.constant 0 : index
    %62 = vector.load %arg12[%c0_35, %c0_36] : memref<1x16xf32, #tpu.memory_space<vmem>>, vector<1x16xf32>
    %cst_37 = arith.constant dense<0.000000e+00> : vector<32xf32>
    %63 = vector.multi_reduction <add>, %60, %cst_37 [1] : vector<32x16xf32> to vector<32xf32>
    %64 = vector.shape_cast %63 : vector<32xf32> to vector<32x1xf32>
    %cst_38 = arith.constant 1.600000e+01 : f32
    %65 = vector.broadcast %cst_38 : f32 to vector<32x1xf32>
    %66 = arith.divf %64, %65 : vector<32x1xf32>
    %67 = vector.broadcast %66 : vector<32x1xf32> to vector<32x16xf32>
    %68 = arith.subf %60, %67 : vector<32x16xf32>
    %69 = arith.mulf %68, %68 : vector<32x16xf32>
    %cst_39 = arith.constant dense<0.000000e+00> : vector<32xf32>
    %70 = vector.multi_reduction <add>, %69, %cst_39 [1] : vector<32x16xf32> to vector<32xf32>
    %71 = vector.shape_cast %70 : vector<32xf32> to vector<32x1xf32>
    %cst_40 = arith.constant 1.600000e+01 : f32
    %72 = vector.broadcast %cst_40 : f32 to vector<32x1xf32>
    %73 = arith.divf %71, %72 : vector<32x1xf32>
    %cst_41 = arith.constant 9.99999974E-6 : f32
    %74 = vector.broadcast %cst_41 : f32 to vector<32x1xf32>
    %75 = arith.addf %73, %74 : vector<32x1xf32>
    %76 = math.rsqrt %75 : vector<32x1xf32>
    %77 = vector.broadcast %76 : vector<32x1xf32> to vector<32x16xf32>
    %78 = arith.mulf %68, %77 : vector<32x16xf32>
    %79 = vector.broadcast %61 : vector<1x16xf32> to vector<32x16xf32>
    %80 = arith.mulf %78, %79 : vector<32x16xf32>
    %81 = vector.broadcast %62 : vector<1x16xf32> to vector<32x16xf32>
    %82 = arith.addf %80, %81 : vector<32x16xf32>
    %83 = arith.truncf %82 : vector<32x16xf32> to vector<32x16xbf16>
    %c0_42 = arith.constant 0 : index
    %c0_43 = arith.constant 0 : index
    %84 = vector.load %arg13[%c0_42, %c0_43] : memref<16x1xbf16, #tpu.memory_space<vmem>>, vector<16x1xbf16>
    %cst_44 = arith.constant dense<0.000000e+00> : vector<32x1xf32>
    %85 = tpu.matmul %83, %84, %cst_44 {dimension_numbers = #tpu.dot_dimension_numbers<[1], [0], [0], [1], [0, 0, 1, 1], [], []>} : vector<32x16xbf16>, vector<16x1xbf16>, vector<32x1xf32> -> vector<32x1xf32>
    %c0_45 = arith.constant 0 : index
    %c0_46 = arith.constant 0 : index
    %86 = vector.load %arg14[%c0_45, %c0_46] : memref<1x1xf32, #tpu.memory_space<vmem>>, vector<1x1xf32>
    %87 = vector.broadcast %86 : vector<1x1xf32> to vector<32x1xf32>
    %88 = arith.addf %85, %87 : vector<32x1xf32>
    %c0_47 = arith.constant 0 : index
    %c0_48 = arith.constant 0 : index
    %89 = vector.load %arg15[%c0_47, %c0_48] : memref<32x1xf32, #tpu.memory_space<vmem>>, vector<32x1xf32>
    tpu.vector_store %arg15[%c0_47, %c0_48], %88 {strides = array<i32>} : memref<32x1xf32, #tpu.memory_space<vmem>>, vector<32x1xf32>,
    return
  }
  func.func @transform_0(%arg0: i32) -> (i32, i32) {
    %c0_i32 = arith.constant 0 : i32
    %c0_i32_0 = arith.constant 0 : i32
    return %arg0, %c0_i32 : i32, i32
  }
  func.func @transform_1(%arg0: i32) -> (i32, i32) {
    %c0_i32 = arith.constant 0 : i32
    %c0_i32_0 = arith.constant 0 : i32
    %c0_i32_1 = arith.constant 0 : i32
    return %c0_i32, %c0_i32_0 : i32, i32
  }
  func.func @transform_2(%arg0: i32) -> (i32, i32) {
    %c0_i32 = arith.constant 0 : i32
    %c0_i32_0 = arith.constant 0 : i32
    %c0_i32_1 = arith.constant 0 : i32
    return %c0_i32, %c0_i32_0 : i32, i32
  }
  func.func @transform_3(%arg0: i32) -> (i32, i32) {
    %c0_i32 = arith.constant 0 : i32
    %c0_i32_0 = arith.constant 0 : i32
    %c0_i32_1 = arith.constant 0 : i32
    return %c0_i32, %c0_i32_0 : i32, i32
  }
  func.func @transform_4(%arg0: i32) -> (i32, i32) {
    %c0_i32 = arith.constant 0 : i32
    %c0_i32_0 = arith.constant 0 : i32
    %c0_i32_1 = arith.constant 0 : i32
    return %c0_i32, %c0_i32_0 : i32, i32
  }
  func.func @transform_5(%arg0: i32) -> (i32, i32) {
    %c0_i32 = arith.constant 0 : i32
    %c0_i32_0 = arith.constant 0 : i32
    %c0_i32_1 = arith.constant 0 : i32
    return %c0_i32, %c0_i32_0 : i32, i32
  }
  func.func @transform_6(%arg0: i32) -> (i32, i32) {
    %c0_i32 = arith.constant 0 : i32
    %c0_i32_0 = arith.constant 0 : i32
    %c0_i32_1 = arith.constant 0 : i32
    return %c0_i32, %c0_i32_0 : i32, i32
  }
  func.func @transform_7(%arg0: i32) -> (i32, i32) {
    %c0_i32 = arith.constant 0 : i32
    %c0_i32_0 = arith.constant 0 : i32
    %c0_i32_1 = arith.constant 0 : i32
    return %c0_i32, %c0_i32_0 : i32, i32
  }
  func.func @transform_8(%arg0: i32) -> (i32, i32) {
    %c0_i32 = arith.constant 0 : i32
    %c0_i32_0 = arith.constant 0 : i32
    %c0_i32_1 = arith.constant 0 : i32
    return %c0_i32, %c0_i32_0 : i32, i32
  }
  func.func @transform_9(%arg0: i32) -> (i32, i32) {
    %c0_i32 = arith.constant 0 : i32
    %c0_i32_0 = arith.constant 0 : i32
    %c0_i32_1 = arith.constant 0 : i32
    return %c0_i32, %c0_i32_0 : i32, i32
  }
  func.func @transform_10(%arg0: i32) -> (i32, i32) {
    %c0_i32 = arith.constant 0 : i32
    %c0_i32_0 = arith.constant 0 : i32
    %c0_i32_1 = arith.constant 0 : i32
    return %c0_i32, %c0_i32_0 : i32, i32
  }
  func.func @transform_11(%arg0: i32) -> (i32, i32) {
    %c0_i32 = arith.constant 0 : i32
    %c0_i32_0 = arith.constant 0 : i32
    %c0_i32_1 = arith.constant 0 : i32
    return %c0_i32, %c0_i32_0 : i32, i32
  }
  func.func @transform_12(%arg0: i32) -> (i32, i32) {
    %c0_i32 = arith.constant 0 : i32
    %c0_i32_0 = arith.constant 0 : i32
    %c0_i32_1 = arith.constant 0 : i32
    return %c0_i32, %c0_i32_0 : i32, i32
  }
  func.func @transform_13(%arg0: i32) -> (i32, i32) {
    %c0_i32 = arith.constant 0 : i32
    %c0_i32_0 = arith.constant 0 : i32
    %c0_i32_1 = arith.constant 0 : i32
    return %c0_i32, %c0_i32_0 : i32, i32
  }
  func.func @transform_14(%arg0: i32) -> (i32, i32) {
    %c0_i32 = arith.constant 0 : i32
    %c0_i32_0 = arith.constant 0 : i32
    return %arg0, %c0_i32 : i32, i32
  }
}

</mosaic_0001>

<bundles_post_ra>
// kernel: pinnsformer_forward.4
= control target key start
LH: loop header
LB: loop body
LE: loop exit
PB: predicated region body
PF: predicated region fallthrough
CT: control target
= control target key end

     0   :  { %11 = vsyncpa [#allocation3], 0  ;;  %s1456_s24 = smov [#allocation2]   ;;  %s2017_s0 = inlined_call_operand.vmem [shape: f32[32,20], index: 0, kind: input, shape index: {}]   ;;  %s2018_s1 = inlined_call_operand.vmem [shape: f32[1,2], index: 1, kind: input, shape index: {}]   ;;  %s2019_s2 = inlined_call_operand.vmem [shape: bf16[20,16], index: 2, kind: input, shape index: {}]   ;;  %s2020_s3 = inlined_call_operand.vmem [shape: f32[1,16], index: 3, kind: input, shape index: {}]   ;;  %s2021_s4 = inlined_call_operand.vmem [shape: bf16[16,16], index: 4, kind: input, shape index: {}]   ;;  %s2022_s5 = inlined_call_operand.vmem [shape: f32[1,16], index: 5, kind: input, shape index: {}]   ;;  %s2023_s6 = inlined_call_operand.vmem [shape: f32[32,16], index: 6, kind: output, shape index: {}]  }
   0x1   :  { %s19_s23 = sshll.u32 %s2018_s1, 4  ;;  %s20_s23 = int_to_ptr.vmem [resolvable:$true] %s19_s23 }
   0x2   :  { %22 = dma.vmem_to_smem %s20_s23, 16, %s1456_s24, [#allocation3]  }
   0x3   :  { %1454 = dma.done.wait [#allocation3], 16  }
   0x4   :  { %1455 = vsyncadd [#allocation3], 4294967280 }
   0x5   :  { %35 = sfence }
   0x6   :  { %v45_v0 = vld [vmem:[%s2019_s2 + $0x8] sm:$0x3]  ;;  %vm66_vm0 = vcmask 1041408   ;;  %v1427_v4 = vld [vmem:[%s2019_s2] sm:$0xff]  ;;  %v39_v7 = vld [vmem:[%s2017_s0 + $0x10] sm:$0xff]  ;;  %vm59_vm1 = vcmask 162816  }
   0x7   :  { %v55_v1 = vunpack.c.l.b16 %v45_v0  ;;  %v37_v5 = vld [vmem:[%s2017_s0] sm:$0xff]  ;;  %v38_v6 = vld [vmem:[%s2017_s0 + $0x8] sm:$0xff]  ;;  %v40_v8 = vld [vmem:[%s2017_s0 + $0x18] sm:$0xff]  ;;  %v1457_v32 = vmov 683565275   ;;  %s1920_s0 = sld [smem:[#allocation2]] }
   0x8   :  { %v41_v9 = vpack.c.bf16 %v38_v6, %v37_v5  ;;  %v42_v10 = vpack.c.bf16 %v40_v8, %v39_v7  ;;  %v1523_v11 = vld [vmem:[%s2020_s3] ss:$0 sm:$0xff]  ;;  %v1458_v34 = vmov 2475754826   ;;  %v1459_v36 = vmov 2131351028  }
   0x9   :  { %v57_v2 = vpack.c.b16 %v55_v1, %v55_v1  ;;  %v1460_v38 = vmov 2102212464   ;;  %v1461_v40 = vmov 920167782   ;;  %v1462_v49 = vmov 1326507024  }
   0xa   :  { %s1928_s3 = sld [smem:[#allocation2 + $0x1]] }
   0xb   :  { %v68_v3 = vsel %vm66_vm0, %v57_v2, 0 }
   0xc   :  { %76 = vmatpush.bf16.msra.mxu0 %v68_v3  ;;  %1429 = vmatpush.bf16.msra.mxu2 %v68_v3 }
  0x10   :  { %77 = vmatpush.bf16.msra.mxu0 %v1427_v4  ;;  %1430 = vmatpush.bf16.msra.mxu2 %v1427_v4 }
  0x13   :  { %1394 = vmatmul.msk.bf16.vlgmr.msra.gmra.mxu0 %vm59_vm1, %v41_v9  ;;  %1395 = vmatmul.msk.bf16.vlgmr.msra.gmra.mxu2 %vm59_vm1, %v42_v10 }
  0x90   :  { %v79_v12 = vpop.f32.mrf.mxu0 }
  0x91   :  { %v1526_v13 = vadd.f32 %v1523_v11, %v79_v12 }
  0x93   :  { %v90_v14 = vand.u32 2147483647, %v1526_v13  ;;  %v93_v15 = vand.u32 2139095040, %v1526_v13 }
  0x95   :  { %v94_v16 = vshrl.u32 %v93_v15, 23  ;;  %v97_v17 = vand.u32 8388607, %v90_v14 }
  0x96   :  { %v84_v18 = vpop.f32.mrf.mxu2 }
  0x97   :  { %v1396_v19 = vadd.s32 4294967169, %v94_v16  ;;  %v1533_v20 = vadd.f32 %v1523_v11, %v84_v18  ;;  %v98_v21 = vor.u32 8388608, %v97_v17 }
  0x99   :  { %v100_v22 = vadd.s32 1, %v1396_v19  ;;  %v403_v23 = vand.u32 2139095040, %v1533_v20  ;;  %v1536_v25 = vshll.u32 %v98_v21, 8  ;;  %v400_v26 = vand.u32 2147483647, %v1533_v20 }
  0x9b   :  { %vm101_vm2 = vcmp.gt.s32.totalorder %v100_v22, 0  ;;  %v404_v27 = vshrl.u32 %v403_v23, 23  ;;  %v139_v42 = vand.u32 65535, %v1536_v25  ;;  %v407_v43 = vand.u32 8388607, %v400_v26 }
  0x9c   :  { %v102_v24 = vsel %vm101_vm2, %v100_v22, 0  ;;  %v140_v57 = vshrl.u32 %v1536_v25, 16 }
  0x9d   :  { %v103_v28 = vshrl.u32 %v102_v24, 5  ;;  %v104_v29 = vand.u32 31, %v102_v24  ;;  %v1402_v30 = vadd.s32 4294967169, %v404_v27  ;;  %v408_v63 = vor.u32 8388608, %v407_v43 }
  0x9f   :  { %v105_v31 = vsub.s32 32, %v104_v29  ;;  %v107_v33 = vshll.u32 %v1457_v32, %v104_v29  ;;  %v110_v35 = vshll.u32 %v1458_v34, %v104_v29  ;;  %v113_v37 = vshll.u32 %v1459_v36, %v104_v29 }
  0xa0   :  { %v116_v39 = vshll.u32 %v1460_v38, %v104_v29  ;;  %v119_v41 = vshll.u32 %v1461_v40, %v104_v29  ;;  %vm122_vm3 = vcmp.lt.s32.totalorder %v103_v28, 1  ;;  %vm125_vm4 = vcmp.lt.s32.totalorder %v103_v28, 4 }
  0xa1   :  { %v108_v44 = vshrl.u32 %v1458_v34, %v105_v31  ;;  %v111_v45 = vshrl.u32 %v1459_v36, %v105_v31  ;;  %v114_v46 = vshrl.u32 %v1460_v38, %v105_v31  ;;  %v106_v47 = vshrl.u32 %v1457_v32, %v105_v31 }
  0xa2   :  { %v117_v48 = vshrl.u32 %v1461_v40, %v105_v31  ;;  %v120_v50 = vshrl.u32 %v1462_v49, %v105_v31  ;;  %v410_v54 = vadd.s32 1, %v1402_v30  ;;  %vm124_vm5 = vcmp.lt.s32.totalorder %v103_v28, 3 }
  0xa3   :  { %v109_v51 = vor.u32 %v108_v44, %v107_v33  ;;  %v112_v52 = vor.u32 %v111_v45, %v110_v35  ;;  %v115_v53 = vor.u32 %v114_v46, %v113_v37  ;;  %vm123_vm6 = vcmp.lt.s32.totalorder %v103_v28, 2 }
  0xa4   :  { %v118_v55 = vor.u32 %v117_v48, %v116_v39  ;;  %v121_v56 = vor.u32 %v120_v50, %v119_v41  ;;  %vm411_vm7 = vcmp.gt.s32.totalorder %v410_v54, 0  ;;  %v1562_v15 = vshll.u32 %v408_v63, 8 }
  0xa5   :  { %v127_v58 = vsel %vm125_vm4, %v115_v53, 2102212464  ;;  %v130_v59 = vsel %vm122_vm3, %v109_v51, %v112_v52  ;;  %v134_v60 = vsel %vm122_vm3, %v112_v52, %v115_v53  ;;  %v126_v0 = vsel %vm122_vm3, %v106_v47, %v109_v51 }
  0xa6   :  { %v131_v61 = vsel %vm125_vm4, %v118_v55, 920167782  ;;  %v135_v62 = vsel %vm125_vm4, %v121_v56, 1326507024  ;;  %v128_v1 = vsel %vm124_vm5, %v112_v52, %v127_v58  ;;  %v412_v6 = vsel %vm411_vm7, %v410_v54, 0 }
  0xa7   :  { %v132_v2 = vsel %vm124_vm5, %v115_v53, %v131_v61  ;;  %v136_v3 = vsel %vm124_vm5, %v118_v55, %v135_v62  ;;  %v1560_v12 = vsel %vm123_vm6, %v126_v0, %v128_v1  ;;  %v1564_v18 = vshrl.u32 %v412_v6, 5 }
  0xa8   :  { %v133_v4 = vsel %vm123_vm6, %v130_v59, %v132_v2  ;;  %v137_v5 = vsel %vm123_vm6, %v134_v60, %v136_v3  ;;  %v414_v19 = vand.u32 31, %v412_v6  ;;  %v1463_v44 = vmov 0   ;;  %v81_v6 = vpop.f32.mrf.mxu0 }
  0xa9   :  { %v141_v7 = vand.u32 65535, %v137_v5  ;;  %v142_v8 = vshrl.u32 %v137_v5, 16  ;;  %v163_v9 = vand.u32 65535, %v133_v4  ;;  %v164_v10 = vshrl.u32 %v133_v4, 16 }
  0xaa   :  { %v1566_v43 = vsub.s32 32, %v414_v19  ;;  %v417_v50 = vshll.u32 %v1457_v32, %v414_v19  ;;  %v420_v53 = vshll.u32 %v1458_v34, %v414_v19  ;;  %v423_v59 = vshll.u32 %v1459_v36, %v414_v19 }
  0xab   :  { %v144_v16 = vmul.u32 %v142_v8, %v139_v42  ;;  %v145_v17 = vmul.u32 %v141_v7, %v140_v57  ;;  %v143_v21 = vmul.u32 %v141_v7, %v139_v42  ;;  %v146_v22 = vmul.u32 %v142_v8, %v140_v57 }
  0xac   :  { %v166_v23 = vmul.u32 %v164_v10, %v139_v42  ;;  %v167_v24 = vmul.u32 %v163_v9, %v140_v57  ;;  %v165_v30 = vmul.u32 %v163_v9, %v139_v42  ;;  %v168_v31 = vmul.u32 %v164_v10, %v140_v57 }
  0xad   :  { %v147_v27 = vshll.u32 %v144_v16, 16  ;;  %v148_v29 = vshrl.u32 %v144_v16, 16  ;;  %v149_v33 = vshll.u32 %v145_v17, 16  ;;  %v150_v35 = vshrl.u32 %v145_v17, 16 }
  0xae   :  { %v169_v28 = vshll.u32 %v166_v23, 16  ;;  %v170_v37 = vshrl.u32 %v166_v23, 16  ;;  %v171_v41 = vshll.u32 %v167_v24, 16  ;;  %v172_v46 = vshrl.u32 %v167_v24, 16 }
  0xaf   :  { %vm151_vm8 = vc.u32 %v143_v21, %v147_v27  ;;  %v153_v39 = vadd.s32 %v147_v27, %v143_v21  ;;  %v418_v56 = vshrl.u32 %v1458_v34, %v1566_v43  ;;  %v421_v57 = vshrl.u32 %v1459_v36, %v1566_v43 }
  0xb0   :  { %v152_v45 = vsel %vm151_vm8, 1, %v1463_v44  ;;  %vm173_vm9 = vc.u32 %v165_v30, %v169_v28  ;;  %v175_v47 = vadd.s32 %v169_v28, %v165_v30  ;;  %v424_v60 = vshrl.u32 %v1460_v38, %v1566_v43 }
  0xb1   :  { %v154_v48 = vadd.s32 %v152_v45, %v146_v22  ;;  %vm155_vm10 = vc.u32 %v153_v39, %v149_v33  ;;  %v174_v42 = vsel %vm173_vm9, 1, %v1463_v44  ;;  %v426_v61 = vshll.u32 %v1460_v38, %v414_v19 }
  0xb2   :  { %v156_v51 = vsel %vm155_vm10, 1, %v1463_v44  ;;  %v176_v52 = vadd.s32 %v174_v42, %v168_v31  ;;  %vm177_vm11 = vc.u32 %v175_v47, %v171_v41  ;;  %v1582_v63 = vor.u32 %v418_v56, %v417_v50 }
  0xb3   :  { %v158_v54 = vadd.s32 %v156_v51, %v154_v48  ;;  %v178_v55 = vsel %vm177_vm11, 1, %v1463_v44  ;;  %v1584_v0 = vor.u32 %v421_v57, %v420_v53  ;;  %v427_v1 = vshrl.u32 %v1461_v40, %v1566_v43 }
  0xb4   :  { %v180_v58 = vadd.s32 %v178_v55, %v176_v52  ;;  %v1588_v3 = vor.u32 %v424_v60, %v423_v59  ;;  %v429_v4 = vshll.u32 %v1461_v40, %v414_v19  ;;  %v430_v5 = vshrl.u32 %v1462_v49, %v1566_v43 }
  0xb5   :  { %v159_v62 = vadd.s32 %v158_v54, %v148_v29  ;;  %v1595_v8 = vadd.s32 %v175_v47, %v171_v41  ;;  %v428_v9 = vor.u32 %v427_v1, %v426_v61  ;;  %vm432_vm12 = vcmp.lt.s32.totalorder %v1564_v18, 1 }
  0xb6   :  { %v181_v2 = vadd.s32 %v180_v58, %v170_v37  ;;  %v431_v16 = vor.u32 %v430_v5, %v429_v4  ;;  %vm435_vm13 = vcmp.lt.s32.totalorder %v1564_v18, 4  ;;  %v440_v17 = vsel %vm432_vm12, %v1582_v63, %v1584_v0 }
  0xb7   :  { %v1593_v7 = vadd.s32 %v159_v62, %v150_v35  ;;  %vm434_vm15 = vcmp.lt.s32.totalorder %v1564_v18, 3  ;;  %v441_v19 = vsel %vm435_vm13, %v428_v9, 920167782  ;;  %v1609_v21 = vadd.f32 %v1523_v11, %v81_v6 }
  0xb8   :  { %v182_v10 = vadd.s32 %v181_v2, %v172_v46  ;;  %vm433_vm0 = vcmp.lt.s32.totalorder %v1564_v18, 2  ;;  %v442_v23 = vsel %vm434_vm15, %v1588_v3, %v441_v19  ;;  %v444_v24 = vsel %vm432_vm12, %v1584_v0, %v1588_v3 }
  0xb9   :  { %vm185_vm14 = vc.u32 %v1593_v7, %v1595_v8  ;;  %v183_v27 = vmul.u32 %v1536_v25, %v1560_v12  ;;  %v443_v29 = vsel %vm433_vm0, %v440_v17, %v442_v23  ;;  %v445_v30 = vsel %vm435_vm13, %v431_v16, 1326507024 }
  0xba   :  { %v186_v22 = vadd.s32 1, %v182_v10  ;;  %v449_v31 = vand.u32 65535, %v1562_v15  ;;  %v446_v35 = vsel %vm434_vm15, %v428_v9, %v445_v30  ;;  %v473_v28 = vand.u32 65535, %v443_v29 }
  0xbb   :  { %v474_v37 = vshrl.u32 %v443_v29, 16  ;;  %v447_v41 = vsel %vm433_vm0, %v444_v24, %v446_v35  ;;  %v450_v25 = vshrl.u32 %v1562_v15, 16  ;;  %v248_v12 = vand.u32 2139095040, %v1609_v21 }
  0xbc   :  { %v187_v33 = vsel %vm185_vm14, %v186_v22, %v182_v10  ;;  %v451_v45 = vand.u32 65535, %v447_v41  ;;  %v452_v46 = vshrl.u32 %v447_v41, 16  ;;  %v475_v53 = vmul.u32 %v473_v28, %v449_v31 }
  0xbd   :  { %v188_v39 = vadd.s32 %v187_v33, %v183_v27  ;;  %v476_v47 = vmul.u32 %v474_v37, %v449_v31  ;;  %v477_v42 = vmul.u32 %v473_v28, %v450_v25  ;;  %v249_v55 = vshrl.u32 %v248_v12, 23 }
  0xbe   :  { %v454_v50 = vmul.u32 %v452_v46, %v449_v31  ;;  %v455_v51 = vmul.u32 %v451_v45, %v450_v25  ;;  %v453_v56 = vmul.u32 %v451_v45, %v449_v31  ;;  %v456_v57 = vmul.u32 %v452_v46, %v450_v25 }
  0xbf   :  { %v189_v48 = vadd.s32 536870912, %v188_v39  ;;  %v479_v54 = vshll.u32 %v476_v47, 16  ;;  %v478_v59 = vmul.u32 %v474_v37, %v450_v25  ;;  %v481_v62 = vshll.u32 %v477_v42, 16 }
  0xc0   :  { %v457_v58 = vshll.u32 %v454_v50, 16  ;;  %v459_v61 = vshll.u32 %v455_v51, 16  ;;  %v1399_v10 = vadd.s32 4294967169, %v249_v55  ;;  %v416_v16 = vshrl.u32 %v1457_v32, %v1566_v43 }
  0xc1   :  { %v1632_v52 = vshrl.u32 %v189_v48, 30  ;;  %vm483_vm1 = vc.u32 %v475_v53, %v479_v54  ;;  %v485_v4 = vadd.s32 %v479_v54, %v475_v53  ;;  %v437_v22 = vsel %vm435_vm13, %v1588_v3, 2102212464 }
  0xc2   :  { %vm461_vm2 = vc.u32 %v453_v56, %v457_v58  ;;  %v463_v1 = vadd.s32 %v457_v58, %v453_v56  ;;  %v484_v2 = vsel %vm483_vm1, 1, %v1463_v44  ;;  %v436_v24 = vsel %vm432_vm12, %v416_v16, %v1582_v63 }
  0xc3   :  { %v191_v60 = vshll.u32 %v1632_v52, 30  ;;  %v462_v6 = vsel %vm461_vm2, 1, %v1463_v44  ;;  %v486_v9 = vadd.s32 %v484_v2, %v478_v59  ;;  %vm487_vm4 = vc.u32 %v485_v4, %v481_v62 }
  0xc4   :  { %v464_v17 = vadd.s32 %v462_v6, %v456_v57  ;;  %vm465_vm3 = vc.u32 %v463_v1, %v459_v61  ;;  %v458_v27 = vshrl.u32 %v454_v50, 16  ;;  %v488_v43 = vsel %vm487_vm4, 1, %v1463_v44 }
  0xc5   :  { %v1636_v5 = vsub.s32 %v188_v39, %v191_v60  ;;  %v466_v23 = vsel %vm465_vm3, 1, %v1463_v44  ;;  %v480_v31 = vshrl.u32 %v476_v47, 16  ;;  %v490_v33 = vadd.s32 %v488_v43, %v486_v9 }
  0xc6   :  { %v468_v29 = vadd.s32 %v466_v23, %v464_v17  ;;  %v255_v35 = vadd.s32 1, %v1399_v10  ;;  %v438_v3 = vsel %vm434_vm15, %v1584_v0, %v437_v22  ;;  %v460_v37 = vshrl.u32 %v455_v51, 16 }
  0xc7   :  { %vm193_vm5 = vcmp.lt.s32.totalorder %v1636_v5, 0  ;;  %v194_v19 = vsub.s32 0, %v1636_v5  ;;  %v482_v41 = vshrl.u32 %v477_v42, 16  ;;  %v491_v25 = vadd.s32 %v490_v33, %v480_v31 }
  0xc8   :  { %v469_v39 = vadd.s32 %v468_v29, %v458_v27  ;;  %vm256_vm6 = vcmp.gt.s32.totalorder %v255_v35, 0  ;;  %v1657_v45 = vadd.s32 %v485_v4, %v481_v62  ;;  %v439_v47 = vsel %vm433_vm0, %v436_v24, %v438_v3 }
  0xc9   :  { %v195_v30 = vsel %vm193_vm5, %v194_v19, %v1636_v5  ;;  %v257_v46 = vsel %vm256_vm6, %v255_v35, 0  ;;  %v492_v48 = vadd.s32 %v491_v25, %v482_v41  ;;  %v245_v50 = vand.u32 2147483647, %v1609_v21 }
  0xca   :  { %v196_v28 = vclz %v195_v30  ;;  %v1655_v12 = vadd.s32 %v469_v39, %v460_v37  ;;  %v259_v53 = vand.u32 31, %v257_v46  ;;  %v493_v54 = vmul.u32 %v1562_v15, %v439_v47 }
  0xcb   :  { %v496_v0 = vadd.s32 1, %v492_v48  ;;  %v252_v56 = vand.u32 8388607, %v245_v50  ;;  %v1679_v4 = vshrl.u32 %v257_v46, 5  ;;  %v184_v31 = vadd.s32 %v1595_v8, %v1593_v7 }
  0xcc   :  { %v1397_v63 = vadd.s32 4294967294, %v196_v28  ;;  %vm495_vm8 = vc.u32 %v1655_v12, %v1657_v45  ;;  %v1664_v42 = vsub.s32 32, %v259_v53  ;;  %v262_v18 = vshll.u32 %v1457_v32, %v259_v53 }
  0xcd   :  { %v497_v55 = vsel %vm495_vm8, %v496_v0, %v492_v48  ;;  %v265_v59 = vshll.u32 %v1458_v34, %v259_v53  ;;  %v268_v62 = vshll.u32 %v1459_v36, %v259_v53  ;;  %v271_v1 = vshll.u32 %v1460_v38, %v259_v53 }
  0xce   :  { %vm1398_vm7 = vcmp.lt.s32.totalorder %v1397_v63, 0  ;;  %v498_v57 = vadd.s32 %v497_v55, %v493_v54  ;;  %v263_v58 = vshrl.u32 %v1458_v34, %v1664_v42  ;;  %v266_v60 = vshrl.u32 %v1459_v36, %v1664_v42 }
  0xcf   :  { %v199_v51 = vsel %vm1398_vm7, 0, %v1397_v63  ;;  %v269_v15 = vshrl.u32 %v1460_v38, %v1664_v42  ;;  %v272_v6 = vshrl.u32 %v1461_v40, %v1664_v42  ;;  %v253_v9 = vor.u32 8388608, %v252_v56 }
  0xd0   :  { %v204_v61 = vsub.s32 4294967266, %v199_v51  ;;  %v499_v2 = vadd.s32 536870912, %v498_v57  ;;  %v274_v10 = vshll.u32 %v1461_v40, %v259_v53  ;;  %v275_v16 = vshrl.u32 %v1462_v49, %v1664_v42 }
  0xd1   :  { %v1688_v19 = vor.u32 %v263_v58, %v262_v18  ;;  %v1690_v22 = vor.u32 %v266_v60, %v265_v59  ;;  %v273_v23 = vor.u32 %v272_v6, %v271_v1  ;;  %v1692_v27 = vor.u32 %v269_v15, %v268_v62 }
  0xd2   :  { %v1686_v17 = vshrl.u32 %v499_v2, 30  ;;  %v205_v24 = vadd.s32 127, %v204_v61  ;;  %v276_v29 = vor.u32 %v275_v16, %v274_v10  ;;  %v200_v43 = vsub.s32 32, %v199_v51 }
  0xd3   :  { %vm280_vm9 = vcmp.lt.s32.totalorder %v1679_v4, 4  ;;  %vm277_vm10 = vcmp.lt.s32.totalorder %v1679_v4, 1  ;;  %vm279_vm11 = vcmp.lt.s32.totalorder %v1679_v4, 3  ;;  %v1708_v3 = vshll.u32 %v253_v9, 8 }
  0xd4   :  { %v501_v30 = vshll.u32 %v1686_v17, 30  ;;  %v286_v33 = vsel %vm280_vm9, %v273_v23, 920167782  ;;  %v285_v28 = vsel %vm277_vm10, %v1688_v19, %v1690_v22  ;;  %v206_v37 = vshll.u32 %v205_v24, 23 }
  0xd5   :  { %v287_v7 = vsel %vm279_vm11, %v1692_v27, %v286_v33  ;;  %v289_v8 = vsel %vm277_vm10, %v1690_v22, %v1692_v27  ;;  %v290_v39 = vsel %vm280_vm9, %v276_v29, 1326507024  ;;  %v202_v41 = vshrl.u32 %v184_v31, %v200_v43 }
  0xd6   :  { %v1701_v35 = vsub.s32 %v498_v57, %v501_v30  ;;  %vm278_vm13 = vcmp.lt.s32.totalorder %v1679_v4, 2  ;;  %v291_v46 = vsel %vm279_vm11, %v273_v23, %v290_v39  ;;  %v201_v47 = vshll.u32 %v1636_v5, %v199_v51  ;;  %v86_v57 = vpop.f32.mrf.mxu2 }
  0xd7   :  { %v288_v63 = vsel %vm278_vm13, %v285_v28, %v287_v7  ;;  %v292_v53 = vsel %vm278_vm13, %v289_v8, %v291_v46  ;;  %v294_v0 = vand.u32 65535, %v1708_v3  ;;  %v207_v54 = vor.u32 4788187, %v206_v37 }
  0xd8   :  { %vm503_vm12 = vcmp.lt.s32.totalorder %v1701_v35, 0  ;;  %v504_v25 = vsub.s32 0, %v1701_v35  ;;  %v296_v56 = vand.u32 65535, %v292_v53  ;;  %v297_v18 = vshrl.u32 %v292_v53, 16 }
  0xd9   :  { %v203_v58 = vor.u32 %v202_v41, %v201_v47  ;;  %v295_v59 = vshrl.u32 %v1708_v3, 16  ;;  %v319_v60 = vshrl.u32 %v288_v63, 16  ;;  %v318_v15 = vand.u32 65535, %v288_v63 }
  0xda   :  { %v505_v48 = vsel %vm503_vm12, %v504_v25, %v1701_v35  ;;  %v299_v62 = vmul.u32 %v297_v18, %v294_v0  ;;  %v1733_v1 = vadd.f32 %v1523_v11, %v86_v57  ;;  %v208_v2 = vand.u32 2147483647, %v207_v54 }
  0xdb   :  { %v506_v55 = vclz %v505_v48  ;;  %v300_v5 = vmul.u32 %v296_v56, %v295_v59  ;;  %v321_v51 = vmul.u32 %v319_v60, %v294_v0  ;;  %v298_v6 = vmul.u32 %v296_v56, %v294_v0 }
  0xdc   :  { %v302_v9 = vshll.u32 %v299_v62, 16  ;;  %v210_v10 = vcvt.s32.f32 %v203_v58  ;;  %v301_v29 = vmul.u32 %v297_v18, %v295_v59  ;;  %v320_v43 = vmul.u32 %v318_v15, %v294_v0 }
  0xdd   :  { %v1403_v61 = vadd.s32 4294967294, %v506_v55  ;;  %v324_v23 = vshll.u32 %v321_v51, 16  ;;  %v304_v30 = vshll.u32 %v300_v5, 16  ;;  %v322_v28 = vmul.u32 %v318_v15, %v295_v59 }
  0xde   :  { %vm306_vm15 = vc.u32 %v298_v6, %v302_v9  ;;  %v308_v33 = vadd.s32 %v302_v9, %v298_v6  ;;  %v211_v37 = vmul.f32 %v210_v10, %v208_v2  ;;  %v558_v11 = vand.u32 2139095040, %v1733_v1 }
  0xdf   :  { %vm1404_vm14 = vcmp.lt.s32.totalorder %v1403_v61, 0  ;;  %v307_v31 = vsel %vm306_vm15, 1, %v1463_v44  ;;  %v261_v8 = vshrl.u32 %v1457_v32, %v1664_v42  ;;  %v323_v39 = vmul.u32 %v319_v60, %v295_v59 }
  0xe0   :  { %v509_v16 = vsel %vm1404_vm14, 0, %v1403_v61  ;;  %v309_v7 = vadd.s32 %v307_v31, %v301_v29  ;;  %vm310_vm0 = vc.u32 %v308_v33, %v304_v30  ;;  %vm328_vm1 = vc.u32 %v320_v43, %v324_v23 }
  0xe1   :  { %v514_v24 = vsub.s32 4294967266, %v509_v16  ;;  %v303_v25 = vshrl.u32 %v299_v62, 16  ;;  %v311_v63 = vsel %vm310_vm0, 1, %v1463_v44  ;;  %v329_v46 = vsel %vm328_vm1, 1, %v1463_v44 }
  0xe2   :  { %v313_v47 = vadd.s32 %v311_v63, %v309_v7  ;;  %v326_v48 = vshll.u32 %v322_v28, 16  ;;  %v330_v53 = vadd.s32 %v324_v23, %v320_v43  ;;  %v331_v0 = vadd.s32 %v329_v46, %v323_v39 }
  0xe3   :  { %v515_v41 = vadd.s32 127, %v514_v24  ;;  %v212_v54 = vxor.u32 2147483648, %v211_v37  ;;  %v282_v55 = vsel %vm280_vm9, %v1692_v27, 2102212464  ;;  %v559_v56 = vshrl.u32 %v558_v11, 23 }
  0xe4   :  { %vm92_vm2 = vcmp.lt.s32.totalorder %v1526_v13, 0  ;;  %v281_v42 = vsel %vm277_vm10, %v261_v8, %v1688_v19  ;;  %v314_v18 = vadd.s32 %v313_v47, %v303_v25  ;;  %vm332_vm3 = vc.u32 %v330_v53, %v326_v48 }
  0xe5   :  { %v510_v57 = vsub.s32 32, %v509_v16  ;;  %v305_v58 = vshrl.u32 %v300_v5, 16  ;;  %v333_v59 = vsel %vm332_vm3, 1, %v1463_v44  ;;  %v1405_v60 = vadd.s32 4294967169, %v559_v56 }
  0xe6   :  { %v516_v61 = vshll.u32 %v515_v41, 23  ;;  %v283_v62 = vsel %vm279_vm11, %v1690_v22, %v282_v55  ;;  %v325_v27 = vshrl.u32 %v321_v51, 16  ;;  %v335_v15 = vadd.s32 %v333_v59, %v331_v0 }
  0xe7   :  { %v213_v2 = vsel %vm92_vm2, %v212_v54, %v211_v37  ;;  %v494_v19 = vadd.s32 %v1657_v45, %v1655_v12  ;;  %v1756_v6 = vadd.s32 %v314_v18, %v305_v58  ;;  %v565_v9 = vadd.s32 1, %v1405_v60 }
  0xe8   :  { %vm1760_vm4 = vcmp.le.f32.partialorder %v90_v14, 0.7853982  ;;  %v327_v10 = vshrl.u32 %v322_v28, 16  ;;  %v336_v23 = vadd.s32 %v335_v15, %v325_v27  ;;  %v555_v22 = vand.u32 2147483647, %v1733_v1 }
  0xe9   :  { %v512_v51 = vshrl.u32 %v494_v19, %v510_v57  ;;  %v284_v24 = vsel %vm278_vm13, %v281_v42, %v283_v62  ;;  %v1767_v29 = vadd.s32 %v330_v53, %v326_v48  ;;  %vm566_vm5 = vcmp.gt.s32.totalorder %v565_v9, 0 }
  0xea   :  { %v1772_v12 = vsel %vm1760_vm4, %v1526_v13, %v213_v2  ;;  %v517_v14 = vor.u32 4788187, %v516_v61  ;;  %v337_v45 = vadd.s32 %v336_v23, %v327_v10  ;;  %v567_v43 = vsel %vm566_vm5, %v565_v9, 0 }
  0xeb   :  { %v511_v30 = vshll.u32 %v1701_v35, %v509_v16  ;;  %vm340_vm6 = vc.u32 %v1756_v6, %v1767_v29  ;;  %v569_v31 = vand.u32 31, %v567_v43  ;;  %v1779_v4 = vmul.f32 %v1772_v12, %v1772_v12 }
  0xec   :  { %v341_v33 = vadd.s32 1, %v337_v45  ;;  %v338_v37 = vmul.u32 %v1708_v3, %v284_v24  ;;  %v518_v11 = vand.u32 2147483647, %v517_v14  ;;  %v562_v39 = vand.u32 8388607, %v555_v22 }
  0xed   :  { %v513_v28 = vor.u32 %v512_v51, %v511_v30  ;;  %v1782_v7 = vsub.s32 32, %v569_v31  ;;  %v1786_v35 = vshrl.u32 %v567_v43, 5  ;;  %v581_v25 = vshll.u32 %v1460_v38, %v569_v31 }
  0xee   :  { %v342_v8 = vsel %vm340_vm6, %v341_v33, %v337_v45  ;;  %v584_v63 = vshll.u32 %v1461_v40, %v569_v31  ;;  %v572_v0 = vshll.u32 %v1457_v32, %v569_v31  ;;  %v575_v54 = vshll.u32 %v1458_v34, %v569_v31 }
  0xef   :  { %v343_v16 = vadd.s32 %v342_v8, %v338_v37  ;;  %v573_v41 = vshrl.u32 %v1458_v34, %v1782_v7  ;;  %v576_v3 = vshrl.u32 %v1459_v36, %v1782_v7  ;;  %v579_v46 = vshrl.u32 %v1460_v38, %v1782_v7 }
  0xf0   :  { %v582_v47 = vshrl.u32 %v1461_v40, %v1782_v7  ;;  %v585_v48 = vshrl.u32 %v1462_v49, %v1782_v7  ;;  %v578_v55 = vshll.u32 %v1459_v36, %v569_v31  ;;  %v520_v56 = vcvt.s32.f32 %v513_v28 }
  0xf1   :  { %v344_v53 = vadd.s32 536870912, %v343_v16  ;;  %v563_v42 = vor.u32 8388608, %v562_v39  ;;  %v1805_v38 = vor.u32 %v573_v41, %v572_v0  ;;  %v1807_v59 = vor.u32 %v576_v3, %v575_v54 }
  0xf2   :  { %v583_v18 = vor.u32 %v582_v47, %v581_v25  ;;  %v586_v57 = vor.u32 %v585_v48, %v584_v63  ;;  %v1809_v40 = vor.u32 %v579_v46, %v578_v55  ;;  %v226_v49 = vmul.f32 -0.00019511016, %v1779_v4 }
  0xf3   :  { %v1803_v58 = vshrl.u32 %v344_v53, 30  ;;  %v521_v60 = vmul.f32 %v520_v56, %v518_v11  ;;  %vm590_vm7 = vcmp.lt.s32.totalorder %v1786_v35, 4  ;;  %vm587_vm8 = vcmp.lt.s32.totalorder %v1786_v35, 1 }
  0xf4   :  { %v596_v34 = vsel %vm590_vm7, %v583_v18, 920167782  ;;  %v600_v36 = vsel %vm590_vm7, %v586_v57, 1326507024  ;;  %v1819_v62 = vshll.u32 %v563_v42, 8  ;;  %vm589_vm9 = vcmp.lt.s32.totalorder %v1786_v35, 3 }
  0xf5   :  { %v346_v61 = vshll.u32 %v1803_v58, 30  ;;  %v595_v15 = vsel %vm587_vm8, %v1805_v38, %v1807_v59  ;;  %v599_v2 = vsel %vm587_vm8, %v1807_v59, %v1809_v40  ;;  %v214_v19 = vsub.s32 4, %v1632_v52 }
  0xf6   :  { %v597_v9 = vsel %vm589_vm9, %v1809_v40, %v596_v34  ;;  %v601_v10 = vsel %vm589_vm9, %v583_v18, %v600_v36  ;;  %v227_v23 = vadd.f32 0.008332121, %v226_v49  ;;  %vm588_vm11 = vcmp.lt.s32.totalorder %v1786_v35, 2 }
  0xf7   :  { %v1821_v27 = vsub.s32 %v343_v16, %v346_v61  ;;  %v522_v24 = vxor.u32 2147483648, %v521_v60  ;;  %v598_v14 = vsel %vm588_vm11, %v595_v15, %v597_v9  ;;  %v602_v45 = vsel %vm588_vm11, %v599_v2, %v601_v10 }
  0xf8   :  { %v604_v43 = vand.u32 65535, %v1819_v62  ;;  %v605_v31 = vshrl.u32 %v1819_v62, 16  ;;  %v606_v33 = vand.u32 65535, %v602_v45  ;;  %v607_v28 = vshrl.u32 %v602_v45, 16 }
  0xf9   :  { %vm348_vm10 = vcmp.lt.s32.totalorder %v1821_v27, 0  ;;  %v349_v51 = vsub.s32 0, %v1821_v27  ;;  %vm402_vm12 = vcmp.lt.s32.totalorder %v1533_v20, 0  ;;  %v628_v11 = vand.u32 65535, %v598_v14 }
  0xfa   :  { %v629_v8 = vshrl.u32 %v598_v14, 16  ;;  %v215_v39 = vsel %vm92_vm2, %v214_v19, %v1632_v52  ;;  %v228_v16 = vmul.f32 %v227_v23, %v1779_v4  ;;  %v609_v41 = vmul.u32 %v607_v28, %v604_v43 }
  0xfb   :  { %v350_v30 = vsel %vm348_vm10, %v349_v51, %v1821_v27  ;;  %v610_v25 = vmul.u32 %v606_v33, %v605_v31  ;;  %vm1855_vm13 = vcmp.le.f32.partialorder %v400_v26, 0.7853982  ;;  %v523_v3 = vsel %vm402_vm12, %v522_v24, %v521_v60 }
  0xfc   :  { %v351_v37 = vclz %v350_v30  ;;  %v339_v46 = vadd.s32 %v1767_v29, %v1756_v6  ;;  %v631_v48 = vmul.u32 %v629_v8, %v604_v43  ;;  %v608_v53 = vmul.u32 %v606_v33, %v604_v43 }
  0xfd   :  { %v611_v52 = vmul.u32 %v607_v28, %v605_v31  ;;  %v612_v0 = vshll.u32 %v609_v41, 16  ;;  %v630_v54 = vmul.u32 %v628_v11, %v604_v43  ;;  %v613_v55 = vshrl.u32 %v609_v41, 16 }
  0xfe   :  { %v1400_v47 = vadd.s32 4294967294, %v351_v37  ;;  %v632_v56 = vmul.u32 %v628_v11, %v605_v31  ;;  %v634_v42 = vshll.u32 %v631_v48, 16  ;;  %v614_v18 = vshll.u32 %v610_v25, 16 }
  0xff   :  { %vm616_vm15 = vc.u32 %v608_v53, %v612_v0  ;;  %v618_v57 = vadd.s32 %v612_v0, %v608_v53  ;;  %v633_v34 = vmul.u32 %v629_v8, %v605_v31  ;;  %vm247_vm2 = vcmp.lt.s32.totalorder %v1609_v21, 0 }
 0x100   :  { %vm1401_vm14 = vcmp.lt.s32.totalorder %v1400_v47, 0  ;;  %v617_v60 = vsel %vm616_vm15, 1, %v1463_v44  ;;  %vm638_vm1 = vc.u32 %v630_v54, %v634_v42  ;;  %v636_v10 = vshll.u32 %v632_v56, 16 }
 0x101   :  { %v354_v26 = vsel %vm1401_vm14, 0, %v1400_v47  ;;  %v619_v29 = vadd.s32 %v617_v60, %v611_v52  ;;  %vm620_vm0 = vc.u32 %v618_v57, %v614_v18  ;;  %v639_v19 = vsel %vm638_vm1, 1, %v1463_v44 }
 0x102   :  { %v355_v49 = vsub.s32 32, %v354_v26  ;;  %v359_v61 = vsub.s32 4294967266, %v354_v26  ;;  %v356_v6 = vshll.u32 %v1821_v27, %v354_v26  ;;  %v621_v2 = vsel %vm620_vm0, 1, %v1463_v44 }
 0x103   :  { %v623_v9 = vadd.s32 %v621_v2, %v619_v29  ;;  %v640_v23 = vadd.s32 %v634_v42, %v630_v54  ;;  %v641_v51 = vadd.s32 %v639_v19, %v633_v34  ;;  %v229_v24 = vadd.f32 -0.16666654, %v228_v16 }
 0x104   :  { %v357_v36 = vshrl.u32 %v339_v46, %v355_v49  ;;  %v360_v15 = vadd.s32 127, %v359_v61  ;;  %v571_v27 = vshrl.u32 %v1457_v32, %v1782_v7  ;;  %v1873_v43 = vsel %vm1855_vm13, %v1533_v20, %v523_v3 }
 0x105   :  { %v592_v30 = vsel %vm590_vm7, %v1809_v40, 2102212464  ;;  %v624_v31 = vadd.s32 %v623_v9, %v613_v55  ;;  %vm642_vm3 = vc.u32 %v640_v23, %v636_v10  ;;  %v615_v37 = vshrl.u32 %v610_v25, 16 }
 0x106   :  { %v358_v14 = vor.u32 %v357_v36, %v356_v6  ;;  %v361_v45 = vshll.u32 %v360_v15, 23  ;;  %v591_v28 = vsel %vm587_vm8, %v571_v27, %v1805_v38  ;;  %v643_v11 = vsel %vm642_vm3, 1, %v1463_v44 }
 0x107   :  { %v369_v32 = vsub.s32 4, %v1803_v58  ;;  %v635_v7 = vshrl.u32 %v631_v48, 16  ;;  %v645_v8 = vadd.s32 %v643_v11, %v641_v51  ;;  %v219_v16 = vmul.f32 -0.001358992, %v1779_v4 }
 0x108   :  { %v362_v33 = vor.u32 4788187, %v361_v45  ;;  %v365_v3 = vcvt.s32.f32 %v358_v14  ;;  %v593_v40 = vsel %vm589_vm9, %v1807_v59, %v592_v30  ;;  %v1887_v46 = vadd.s32 %v624_v31, %v615_v37 }
 0x109   :  { %v230_v47 = vmul.f32 %v229_v24, %v1779_v4  ;;  %v637_v38 = vshrl.u32 %v632_v56, 16  ;;  %v646_v25 = vadd.s32 %v645_v8, %v635_v7  ;;  %v220_v53 = vadd.f32 0.041655596, %v219_v16 }
 0x10a   :  { %v363_v41 = vand.u32 2147483647, %v362_v33  ;;  %v217_v44 = vsel %vm1760_vm4, 0, %v215_v39  ;;  %v1894_v48 = vmul.f32 %v1873_v43, %v1873_v43  ;;  %v1896_v0 = vadd.s32 %v640_v23, %v636_v10 }
 0x10b   :  { %v370_v59 = vsel %vm247_vm2, %v369_v32, %v1803_v58  ;;  %v594_v54 = vsel %vm588_vm11, %v591_v28, %v593_v40  ;;  %v647_v55 = vadd.s32 %v646_v25, %v637_v38  ;;  %v221_v56 = vmul.f32 %v220_v53, %v1779_v4 }
 0x10c   :  { %v366_v52 = vmul.f32 %v365_v3, %v363_v41  ;;  %vm650_vm4 = vc.u32 %v1887_v46, %v1896_v0  ;;  %v231_v5 = vadd.f32 1.0, %v230_v47  ;;  %vm246_vm5 = vcmp.le.f32.partialorder %v245_v50, 0.7853982 }
 0x10d   :  { %v651_v39 = vadd.s32 1, %v647_v55  ;;  %v222_v26 = vadd.f32 -0.4999988, %v221_v56  ;;  %v234_v18 = vadd.s32 3, %v217_v44  ;;  %v372_v57 = vsel %vm246_vm5, 0, %v370_v59 }
 0x10e   :  { %v367_v42 = vxor.u32 2147483648, %v366_v52  ;;  %v648_v35 = vmul.u32 %v1819_v62, %v594_v54  ;;  %v536_v49 = vmul.f32 -0.00019511016, %v1894_v48  ;;  %v232_v50 = vmul.f32 %v231_v5, %v1772_v12 }
 0x10f   :  { %v652_v60 = vsel %vm650_vm4, %v651_v39, %v647_v55  ;;  %v223_v34 = vmul.f32 %v222_v26, %v1779_v4  ;;  %v389_v36 = vadd.s32 3, %v372_v57  ;;  %v235_v23 = vand.u32 3, %v234_v18 }
 0x110   :  { %v368_v58 = vsel %vm247_vm2, %v367_v42, %v366_v52  ;;  %v653_v29 = vadd.s32 %v652_v60, %v648_v35  ;;  %v537_v10 = vadd.f32 0.008332121, %v536_v49  ;;  %v238_v14 = vxor.u32 2147483648, %v232_v50 }
 0x111   :  { %v371_v61 = vsel %vm246_vm5, %v1609_v21, %v368_v58  ;;  %v224_v19 = vadd.f32 1.0, %v223_v34  ;;  %v1917_v45 = vand.u32 3, %v389_v36  ;;  %v860_v27 = vand.u32 3, %v217_v44  ;;  %v1428_v58 = vld [vmem:[%s2021_s4] sm:$0xff] }
 0x112   :  { %v373_v6 = vmul.f32 %v371_v61, %v371_v61  ;;  %v654_v2 = vadd.s32 536870912, %v653_v29  ;;  %v1923_v33 = vmul.f32 %v537_v10, %v1894_v48  ;;  %vm233_vm6 = vweird.f32 %v1526_v13  ;;  %1369 = vmatpush.bf16.msra.mxu1 %v1428_v58  ;;  %1431 = vmatpush.bf16.msra.mxu3 %v1428_v58 }
 0x113   :  { %v241_v12 = vxor.u32 2147483648, %v224_v19  ;;  %vm237_vm7 = vcmp.eq.s32.totalorder %v235_v23, 0  ;;  %vm236_vm8 = vcmp.lt.s32.totalorder %v235_v23, 2  ;;  %vm240_vm9 = vcmp.eq.s32.totalorder %v235_v23, 2 }
 0x114   :  { %v381_v15 = vmul.f32 -0.00019511016, %v373_v6  ;;  %v374_v9 = vmul.f32 -0.001358992, %v373_v6  ;;  %v1915_v62 = vshrl.u32 %v654_v2, 30  ;;  %v239_v11 = vsel %vm237_vm7, %v224_v19, %v238_v14 }
 0x115   :  { %vm862_vm10 = vcmp.eq.s32.totalorder %v860_v27, 0  ;;  %v1014_v7 = vand.u32 3, %v372_v57  ;;  %v242_v41 = vsel %vm240_vm9, %v241_v12, %v232_v50  ;;  %vm391_vm14 = vcmp.lt.s32.totalorder %v1917_v45, 2 }
 0x116   :  { %v382_v51 = vadd.f32 0.008332121, %v381_v15  ;;  %v375_v24 = vadd.f32 0.041655596, %v374_v9  ;;  %v656_v30 = vshll.u32 %v1915_v62, 30  ;;  %v243_v3 = vsel %vm236_vm8, %v239_v11, %v242_v41 }
 0x117   :  { %vm388_vm15 = vweird.f32 %v1609_v21  ;;  %vm392_vm0 = vcmp.eq.s32.totalorder %v1917_v45, 0  ;;  %v864_v47 = vsel %vm862_vm10, %v224_v19, %v238_v14  ;;  %vm395_vm1 = vcmp.eq.s32.totalorder %v1917_v45, 2 }
 0x118   :  { %v383_v4 = vmul.f32 %v382_v51, %v373_v6  ;;  %v376_v31 = vmul.f32 %v375_v24, %v373_v6  ;;  %v1926_v37 = vsub.s32 %v653_v29, %v656_v30  ;;  %vm865_vm2 = vcmp.eq.s32.totalorder %v860_v27, 2 }
 0x119   :  { %vm861_vm3 = vcmp.lt.s32.totalorder %v860_v27, 2  ;;  %v867_v52 = vsel %vm865_vm2, %v241_v12, %v232_v50  ;;  %v244_v54 = vsel %vm233_vm6, nan, %v243_v3  ;;  %v1940_v55 = vstv %s1920_s0 }
 0x11a   :  { %v384_v28 = vadd.f32 -0.16666654, %v383_v4  ;;  %v377_v32 = vadd.f32 -0.4999988, %v376_v31  ;;  %vm658_vm11 = vcmp.lt.s32.totalorder %v1926_v37, 0  ;;  %v659_v16 = vsub.s32 0, %v1926_v37 }
 0x11b   :  { %v868_v56 = vsel %vm861_vm3, %v864_v47, %v867_v52  ;;  %v649_v42 = vadd.s32 %v1896_v0, %v1887_v46  ;;  %vm1015_vm4 = vcmp.lt.s32.totalorder %v1014_v7, 2  ;;  %vm1016_vm5 = vcmp.eq.s32.totalorder %v1014_v7, 0 }
 0x11c   :  { %v385_v8 = vmul.f32 %v384_v28, %v373_v6  ;;  %v378_v40 = vmul.f32 %v377_v32, %v373_v6  ;;  %v660_v25 = vsel %vm658_vm11, %v659_v16, %v1926_v37  ;;  %vm1019_vm7 = vcmp.eq.s32.totalorder %v1014_v7, 2 }
 0x11d   :  { %v661_v53 = vclz %v660_v25  ;;  %v529_v18 = vmul.f32 -0.001358992, %v1894_v48  ;;  %v711_v57 = vmul.f32 %v1940_v55, %v244_v54  ;;  %v869_v35 = vsel %vm233_vm6, nan, %v868_v56 }
 0x11e   :  { %v386_v38 = vadd.f32 1.0, %v385_v8  ;;  %v379_v44 = vadd.f32 1.0, %v378_v40  ;;  %v1952_v49 = vstv %s1928_s3  ;;  %v539_v30 = vadd.f32 -0.16666654, %v1923_v33 }
 0x11f   :  { %v1406_v5 = vadd.s32 4294967294, %v661_v53  ;;  %v1333_v2 = vmul.f32 %v1952_v49, %v869_v35  ;;  %v530_v45 = vadd.f32 0.041655596, %v529_v18  ;;  %vm1355_vm6 = vcmask 130048  }
 0x120   :  { %v387_v59 = vmul.f32 %v386_v38, %v371_v61  ;;  %v396_v39 = vxor.u32 2147483648, %v379_v44  ;;  %v524_v31 = vsub.s32 4, %v1686_v17  ;;  %v540_v21 = vmul.f32 %v539_v30, %v1894_v48 }
 0x121   :  { %vm1407_vm8 = vcmp.lt.s32.totalorder %v1406_v5, 0  ;;  %v1337_v27 = vadd.f32 %v1333_v2, %v711_v57  ;;  %v531_v32 = vmul.f32 %v530_v45, %v1894_v48  ;;  %vm557_vm9 = vcmp.lt.s32.totalorder %v1733_v1, 0 }
 0x122   :  { %v393_v26 = vxor.u32 2147483648, %v387_v59  ;;  %v664_v46 = vsel %vm1407_vm8, 0, %v1406_v5  ;;  %v397_v61 = vsel %vm395_vm1, %v396_v39, %v387_v59  ;;  %v1021_v50 = vsel %vm1019_vm7, %v396_v39, %v387_v59 }
 0x123   :  { %v665_v34 = vsub.s32 32, %v664_v46  ;;  %v669_v6 = vsub.s32 4294967266, %v664_v46  ;;  %v666_v13 = vshll.u32 %v1926_v37, %v664_v46  ;;  %v525_v8 = vsel %vm402_vm12, %v524_v31, %v1686_v17 }
 0x124   :  { %v394_v0 = vsel %vm392_vm0, %v379_v44, %v393_v26  ;;  %v1018_v60 = vsel %vm1016_vm5, %v379_v44, %v393_v26  ;;  %v532_v33 = vadd.f32 -0.4999988, %v531_v32  ;;  %v679_v41 = vsub.s32 4, %v1915_v62 }
 0x125   :  { %v398_v29 = vsel %vm391_vm14, %v394_v0, %v397_v61  ;;  %v1022_v15 = vsel %vm1015_vm4, %v1018_v60, %v1021_v50  ;;  %v667_v19 = vshrl.u32 %v649_v42, %v665_v34  ;;  %v670_v9 = vadd.s32 127, %v669_v6 }
 0x126   :  { %v399_v36 = vsel %vm388_vm15, nan, %v398_v29  ;;  %v1023_v23 = vsel %vm388_vm15, nan, %v1022_v15  ;;  %v527_v3 = vsel %vm1855_vm13, 0, %v525_v8  ;;  %v541_v40 = vadd.f32 1.0, %v540_v21 }
 0x127   :  { %v712_v10 = vmul.f32 %v1940_v55, %v399_v36  ;;  %v1334_v51 = vmul.f32 %v1952_v49, %v1023_v23  ;;  %v668_v24 = vor.u32 %v667_v19, %v666_v13  ;;  %v671_v14 = vshll.u32 %v670_v9, 23 }
 0x128   :  { %vm556_vm10 = vcmp.le.f32.partialorder %v555_v22, 0.7853982  ;;  %v533_v53 = vmul.f32 %v532_v33, %v1894_v48  ;;  %v544_v17 = vadd.s32 3, %v527_v3  ;;  %v680_v44 = vsel %vm557_vm9, %v679_v41, %v1915_v62 }
 0x129   :  { %v1338_v4 = vadd.f32 %v1334_v51, %v712_v10  ;;  %v672_v12 = vor.u32 4788187, %v671_v14  ;;  %v675_v11 = vcvt.s32.f32 %v668_v24  ;;  %v542_v52 = vmul.f32 %v541_v40, %v1873_v43 }
 0x12a   :  { %v682_v56 = vsel %vm556_vm10, 0, %v680_v44  ;;  %v534_v42 = vadd.f32 1.0, %v533_v53  ;;  %v545_v39 = vand.u32 3, %v544_v17  ;;  %v1168_v26 = vand.u32 3, %v527_v3 }
 0x12b   :  { %v1341_v28 = vpack.c.bf16 %v1338_v4, %v1337_v27  ;;  %v673_v37 = vand.u32 2147483647, %v672_v12  ;;  %v548_v18 = vxor.u32 2147483648, %v542_v52  ;;  %v699_v57 = vadd.s32 3, %v682_v56 }
 0x12c   :  { %v551_v46 = vxor.u32 2147483648, %v534_v42  ;;  %vm546_vm12 = vcmp.lt.s32.totalorder %v545_v39, 2  ;;  %vm547_vm13 = vcmp.eq.s32.totalorder %v545_v39, 0  ;;  %vm1170_vm11 = vcmp.eq.s32.totalorder %v1168_v26, 0 }
 0x12d   :  { %1425 = vmatmul.msk.bf16.vlgmr.msra.gmra.mxu1 %vm1355_vm6, %v1341_v28  ;;  %v676_v7 = vmul.f32 %v675_v11, %v673_v37  ;;  %v549_v43 = vsel %vm547_vm13, %v534_v42, %v548_v18  ;;  %v1172_v61 = vsel %vm1170_vm11, %v534_v42, %v548_v18  ;;  %vm550_vm14 = vcmp.eq.s32.totalorder %v545_v39, 2 }
 0x12e   :  { %v700_v60 = vand.u32 3, %v699_v57  ;;  %vm1169_vm15 = vcmp.lt.s32.totalorder %v1168_v26, 2  ;;  %vm1173_vm0 = vcmp.eq.s32.totalorder %v1168_v26, 2  ;;  %v552_v6 = vsel %vm550_vm14, %v551_v46, %v542_v52 }
 0x12f   :  { %v677_v16 = vxor.u32 2147483648, %v676_v7  ;;  %v1175_v50 = vsel %vm1173_vm0, %v551_v46, %v542_v52  ;;  %v553_v13 = vsel %vm546_vm12, %v549_v43, %v552_v6  ;;  %v1322_v15 = vand.u32 3, %v682_v56 }
 0x130   :  { %v1176_v36 = vsel %vm1169_vm15, %v1172_v61, %v1175_v50  ;;  %vm543_vm1 = vweird.f32 %v1533_v20  ;;  %vm698_vm2 = vweird.f32 %v1733_v1  ;;  %vm701_vm3 = vcmp.lt.s32.totalorder %v700_v60, 2 }
 0x131   :  { %v678_v47 = vsel %vm557_vm9, %v677_v16, %v676_v7  ;;  %v554_v9 = vsel %vm543_vm1, nan, %v553_v13  ;;  %vm702_vm4 = vcmp.eq.s32.totalorder %v700_v60, 0  ;;  %v1177_v23 = vsel %vm543_vm1, nan, %v1176_v36  ;;  %v1441_v7 = vld [vmem:[%s2022_s5] ss:$0 sm:$0xff] }
 0x132   :  { %v681_v38 = vsel %vm556_vm10, %v1733_v1, %v678_v47  ;;  %vm705_vm5 = vcmp.eq.s32.totalorder %v700_v60, 2  ;;  %vm1323_vm7 = vcmp.lt.s32.totalorder %v1322_v15, 2  ;;  %vm1324_vm8 = vcmp.eq.s32.totalorder %v1322_v15, 0 }
 0x133   :  { %v683_v25 = vmul.f32 %v681_v38, %v681_v38  ;;  %vm1327_vm9 = vcmp.eq.s32.totalorder %v1322_v15, 2  ;;  %v713_v4 = vmul.f32 %v1940_v55, %v554_v9  ;;  %v1335_v20 = vmul.f32 %v1952_v49, %v1177_v23 }
 0x135   :  { %v691_v59 = vmul.f32 -0.00019511016, %v683_v25  ;;  %v684_v54 = vmul.f32 -0.001358992, %v683_v25  ;;  %v1339_v11 = vadd.f32 %v1335_v20, %v713_v4 }
 0x137   :  { %v692_v63 = vadd.f32 0.008332121, %v691_v59  ;;  %v685_v5 = vadd.f32 0.041655596, %v684_v54 }
 0x139   :  { %v693_v22 = vmul.f32 %v692_v63, %v683_v25  ;;  %v686_v58 = vmul.f32 %v685_v5, %v683_v25 }
 0x13b   :  { %v694_v35 = vadd.f32 -0.16666654, %v693_v22  ;;  %v687_v48 = vadd.f32 -0.4999988, %v686_v58 }
 0x13d   :  { %v695_v62 = vmul.f32 %v694_v35, %v683_v25  ;;  %v688_v0 = vmul.f32 %v687_v48, %v683_v25 }
 0x13f   :  { %v696_v34 = vadd.f32 1.0, %v695_v62  ;;  %v689_v29 = vadd.f32 1.0, %v688_v0 }
 0x141   :  { %v697_v2 = vmul.f32 %v696_v34, %v681_v38  ;;  %v706_v19 = vxor.u32 2147483648, %v689_v29 }
 0x143   :  { %v703_v10 = vxor.u32 2147483648, %v697_v2  ;;  %v707_v24 = vsel %vm705_vm5, %v706_v19, %v697_v2  ;;  %v1329_v45 = vsel %vm1327_vm9, %v706_v19, %v697_v2 }
 0x145   :  { %v704_v51 = vsel %vm702_vm4, %v689_v29, %v703_v10  ;;  %v1326_v14 = vsel %vm1324_vm8, %v689_v29, %v703_v10 }
 0x146   :  { %v708_v27 = vsel %vm701_vm3, %v704_v51, %v707_v24  ;;  %v1330_v30 = vsel %vm1323_vm7, %v1326_v14, %v1329_v45 }
 0x147   :  { %v709_v12 = vsel %vm698_vm2, nan, %v708_v27  ;;  %v1331_v31 = vsel %vm698_vm2, nan, %v1330_v30 }
 0x148   :  { %v714_v28 = vmul.f32 %v1940_v55, %v709_v12  ;;  %v1336_v37 = vmul.f32 %v1952_v49, %v1331_v31 }
 0x14a   :  { %v1340_v32 = vadd.f32 %v1336_v37, %v714_v28 }
 0x14c   :  { %v1342_v21 = vpack.c.bf16 %v1340_v32, %v1339_v11 }
 0x14e   :  { %1426 = vmatmul.msk.bf16.vlgmr.msra.gmra.mxu3 %vm1355_vm6, %v1342_v21 }
 0x1aa   :  { %v1371_v8 = vpop.f32.mrf.mxu1 }
 0x1ab   :  { %v1372_v16 = vadd.f32 %v1441_v7, %v1371_v8 }
 0x1ad   :  { %1381 = vst.msk [vmem:[%s2023_s6] sm:$0xff] %vm1355_vm6, %v1372_v16 }
 0x1b2   :  { %v1373_v1 = vpop.f32.mrf.mxu1 }
 0x1b3   :  { %v1374_v55 = vadd.f32 %v1441_v7, %v1373_v1 }
 0x1b5   :  { %1382 = vst.msk [vmem:[%s2023_s6 + $0x8] sm:$0xff] %vm1355_vm6, %v1374_v55 }
 0x1d1   :  { %v1376_v49 = vpop.f32.mrf.mxu3 }
 0x1d2   :  { %v1377_v33 = vadd.f32 %v1441_v7, %v1376_v49 }
 0x1d4   :  { %1383 = vst.msk [vmem:[%s2023_s6 + $0x10] sm:$0xff] %vm1355_vm6, %v1377_v33 }
 0x1d9   :  { %v1378_v41 = vpop.f32.mrf.mxu3 }
 0x1da   :  { %v1379_v3 = vadd.f32 %v1441_v7, %v1378_v41 }
 0x1dc   :  { %1384 = vst.msk [vmem:[%s2023_s6 + $0x18] sm:$0xff] %vm1355_vm6, %v1379_v3 }
 0x1dd   :  { %1389 = vsyncpa [#allocation3], 1 }

// kernel: pinnsformer_forward.5
= control target key start
LH: loop header
LB: loop body
LE: loop exit
PB: predicated region body
PF: predicated region fallthrough
CT: control target
= control target key end

     0   :  { %vm36_vm0 = vcmask 261120   ;;  %v4782_v6 = vmov 32.0   ;;  %vm230_vm8 = vcmask 130048   ;;  %vm325_vm9 = vcmask 1043456   ;;  %s6528_s0 = inlined_call_operand.vmem [shape: f32[2,8,32], index: 0, kind: input, shape index: {}]   ;;  %s6529_s8 = inlined_call_operand.vmem [shape: f32[2,8,32], index: 8, kind: output, shape index: {}]   ;;  %s6530_s2 = inlined_call_operand.vmem [shape: f32[1,6,1,16], index: 2, kind: input, shape index: {}]   ;;  %s6531_s3 = inlined_call_operand.vmem [shape: bf16[1,6,32,16], index: 3, kind: input, shape index: {}]   ;;  %s6532_s1 = inlined_call_operand.vmem [shape: f32[1,9,256], index: 1, kind: input, shape index: {}]   ;;  %s6533_s4 = inlined_call_operand.vmem [shape: bf16[1,2,16,32], index: 4, kind: input, shape index: {}]   ;;  %s6534_s5 = inlined_call_operand.vmem [shape: bf16[1,32,256], index: 5, kind: input, shape index: {}]   ;;  %s6535_s6 = inlined_call_operand.vmem [shape: bf16[1,256,256], index: 6, kind: input, shape index: {}]   ;;  %s6536_s7 = inlined_call_operand.vmem [shape: bf16[1,256,32], index: 7, kind: input, shape index: {}]  }
   0x1   :  { %v34_v0 = vld [vmem:[%s6528_s0] sm:$0xff]  ;;  %v35_v1 = vld [vmem:[%s6528_s0 + $0x8] sm:$0xff]  ;;  %4754 = vrcp.f32 %v4782_v6  ;;  %vm271_vm10 = vcmask 64512  }
   0x2   :  { %37 = vst.msk [vmem:[%s6529_s8] sm:$0xff] %vm36_vm0, %v34_v0  ;;  %v4663_v23 = vld [vmem:[%s6531_s3 + $0x8] sm:$0xff]  ;;  %v4662_v28 = vld [vmem:[%s6531_s3] sm:$0xff]  ;;  %v4665_v0 = vld [vmem:[%s6531_s3 + $0x18] sm:$0xff] }
   0x3   :  { %38 = vst.msk [vmem:[%s6529_s8 + $0x8] sm:$0xff] %vm36_vm0, %v35_v1  ;;  %v4667_v24 = vld [vmem:[%s6531_s3 + $0x28] sm:$0xff]  ;;  %158 = vmatpush.bf16.msra.mxu0 %v4663_v23  ;;  %v4666_v29 = vld [vmem:[%s6531_s3 + $0x20] sm:$0xff] }
   0x4   :  { %v4671_v25 = vld [vmem:[%s6531_s3 + $0x48] sm:$0xff]  ;;  %187 = vmatpush.bf16.msra.mxu1 %v4667_v24  ;;  %v4670_v30 = vld [vmem:[%s6531_s3 + $0x40] sm:$0xff] }
   0x5   :  { %216 = vmatpush.bf16.msra.mxu2 %v4671_v25  ;;  %v41_v48 = vld [vmem:[%s6532_s1] ss:$0 sm:$0xff]  ;;  %v42_v53 = vld [vmem:[%s6532_s1 + $0x1] ss:$0 sm:$0xff]  ;;  %v4749_v58 = vld [vmem:[%s6530_s2 + $0x2] ss:$0 sm:$0xff] }
   0x6   :  { %v4748_v62 = vld [vmem:[%s6530_s2] ss:$0 sm:$0xff]  ;;  %v4750_v1 = vld [vmem:[%s6530_s2 + $0x4] ss:$0 sm:$0xff] }
   0x7   :  { %v4755_v7 = vpop.eup %4754  ;;  %159 = vmatpush.bf16.msra.mxu0 %v4662_v28 }
   0x8   :  { %v51_v8 = vmul.f32 32.0, %v4755_v7  ;;  %vm55_vm1 = vweird.f32 %v4755_v7  ;;  %188 = vmatpush.bf16.msra.mxu1 %v4666_v29 }
   0x9   :  { %v4857_v2 = vld [vmem:[%s6529_s8] sm:$0xff]  ;;  %217 = vmatpush.bf16.msra.mxu2 %v4670_v30 }
   0xa   :  { %v44_v3 = vsel %vm36_vm0, %v4857_v2, 0.0  ;;  %v4864_v4 = vld [vmem:[%s6529_s8 + $0x8] sm:$0xff]  ;;  %v52_v9 = vsub.f32 1.0, %v51_v8 }
   0xb   :  { %45 = vadd.xlane.f32.xlu0 %v44_v3  ;;  %v47_v5 = vsel %vm36_vm0, %v4864_v4, 0.0 }
   0xc   :  { %v53_v10 = vmul.f32 %v4755_v7, %v52_v9 }
   0xe   :  { %v54_v11 = vadd.f32 %v4755_v7, %v53_v10 }
  0x10   :  { %v4868_v12 = vsel %vm55_vm1, %v4755_v7, %v54_v11  ;;  %v4664_v7 = vld [vmem:[%s6531_s3 + $0x10] sm:$0xff] }
  0x13   :  { %48 = vadd.xlane.f32.xlu0 %v47_v5 }
  0x7e   :  { %v46_v13 = vpop.xlane.xlu0 %45 }
  0x7f   :  { %v57_v14 = vmul.f32 %v4868_v12, %v46_v13 }
  0x81   :  { %v59_v15 = vsub.f32 %v4857_v2, %v57_v14 }
  0x83   :  { %v61_v16 = vmul.f32 %v59_v15, %v59_v15 }
  0x85   :  { %v63_v17 = vsel %vm36_vm0, %v61_v16, 0.0 }
  0x86   :  { %64 = vadd.xlane.f32.xlu1 %v63_v17  ;;  %v49_v18 = vpop.xlane.xlu0 %48 }
  0x87   :  { %v58_v19 = vmul.f32 %v4868_v12, %v49_v18 }
  0x89   :  { %v60_v20 = vsub.f32 %v4864_v4, %v58_v19 }
  0x8b   :  { %v62_v21 = vmul.f32 %v60_v20, %v60_v20 }
  0x8d   :  { %v66_v22 = vsel %vm36_vm0, %v62_v21, 0.0  ;;  %v4668_v21 = vld [vmem:[%s6531_s3 + $0x30] sm:$0xff] }
  0x8e   :  { %67 = vadd.xlane.f32.xlu1 %v66_v22 }
  0xf9   :  { %v65_v26 = vpop.xlane.xlu1 %64 }
  0xfa   :  { %v69_v27 = vmul.f32 %v65_v26, %v4868_v12 }
  0xfc   :  { %v71_v31 = vadd.f32 1e-05, %v69_v27 }
  0xfe   :  { %4756 = vrsqrt.f32 %v71_v31  ;;  %vm79_vm3 = vweird.f32 %v71_v31 }
 0x101   :  { %v68_v32 = vpop.xlane.xlu1 %67 }
 0x102   :  { %v70_v33 = vmul.f32 %v68_v32, %v4868_v12 }
 0x104   :  { %v4757_v34 = vpop.eup %4756  ;;  %v72_v35 = vadd.f32 1e-05, %v70_v33 }
 0x105   :  { %v74_v36 = vmul.f32 %v4757_v34, %v71_v31  ;;  %vm80_vm2 = vweird.f32 %v4757_v34 }
 0x106   :  { %4758 = vrsqrt.f32 %v72_v35  ;;  %vm81_vm4 = vmor %vm79_vm3, %vm80_vm2  ;;  %vm89_vm6 = vweird.f32 %v72_v35 }
 0x107   :  { %v75_v37 = vmul.f32 %v4757_v34, %v74_v36 }
 0x109   :  { %v76_v38 = vmul.f32 0.5, %v75_v37 }
 0x10b   :  { %v77_v39 = vsub.f32 1.5, %v76_v38 }
 0x10c   :  { %v4759_v40 = vpop.eup %4758 }
 0x10d   :  { %v78_v41 = vmul.f32 %v4757_v34, %v77_v39  ;;  %v84_v42 = vmul.f32 %v4759_v40, %v72_v35  ;;  %vm90_vm5 = vweird.f32 %v4759_v40  ;;  %v4752_v35 = vld [vmem:[%s6530_s2 + $0x3] ss:$0 sm:$0xff] }
 0x10e   :  { %vm91_vm7 = vmor %vm89_vm6, %vm90_vm5 }
 0x10f   :  { %v85_v43 = vmul.f32 %v4759_v40, %v84_v42  ;;  %v82_v44 = vsel %vm81_vm4, %v4757_v34, %v78_v41  ;;  %v4751_v34 = vld [vmem:[%s6530_s2 + $0x1] ss:$0 sm:$0xff] }
 0x110   :  { %v93_v47 = vmul.f32 %v82_v44, %v59_v15  ;;  %v4669_v15 = vld [vmem:[%s6531_s3 + $0x38] sm:$0xff] }
 0x111   :  { %v86_v45 = vmul.f32 0.5, %v85_v43 }
 0x112   :  { %v95_v51 = vmul.f32 %v93_v47, %v41_v48 }
 0x113   :  { %v87_v46 = vsub.f32 1.5, %v86_v45 }
 0x114   :  { %v97_v55 = vadd.f32 %v95_v51, %v42_v53 }
 0x115   :  { %v88_v49 = vmul.f32 %v4759_v40, %v87_v46 }
 0x117   :  { %v92_v50 = vsel %vm91_vm7, %v4759_v40, %v88_v49 }
 0x118   :  { %v94_v52 = vmul.f32 %v92_v50, %v60_v20 }
 0x11a   :  { %v96_v54 = vmul.f32 %v94_v52, %v41_v48 }
 0x11c   :  { %v98_v56 = vadd.f32 %v96_v54, %v42_v53 }
 0x11e   :  { %v4902_v57 = vpack.c.bf16 %v98_v56, %v97_v55 }
 0x120   :  { %4326 = vmatmul.msk.bf16.vlgmr.msra.gmra.mxu0 %vm36_vm0, %v4902_v57  ;;  %4335 = vmatmul.msk.bf16.vlgmr.msra.gmra.mxu1 %vm36_vm0, %v4902_v57 }
 0x121   :  { %4344 = vmatmul.msk.bf16.vlgmr.msra.gmra.mxu2 %vm36_vm0, %v4902_v57 }
 0x19d   :  { %v190_v59 = vpop.f32.mrf.mxu1  ;;  %v161_v61 = vpop.f32.mrf.mxu0 }
 0x19e   :  { %v191_v60 = vadd.f32 %v4749_v58, %v190_v59  ;;  %v162_v5 = vadd.f32 %v4748_v62, %v161_v61 }
 0x1a0   :  { %v226_v63 = vpack.c.bf16 %v191_v60, %v191_v60  ;;  %v224_v13 = vpack.c.bf16 %v162_v5, %v162_v5 }
 0x1a2   :  { %v235_v3 = vsel %vm230_vm8, %v226_v63, 0 }
 0x1a3   :  { %244 = vmatpush.bf16.xpose.msra.mxu3 %v235_v3 }
 0x1a4   :  { %v219_v6 = vpop.f32.mrf.mxu2 }
 0x1a5   :  { %v220_v8 = vadd.f32 %v4750_v1, %v219_v6  ;;  %v192_v9 = vpop.f32.mrf.mxu1  ;;  %v163_v16 = vpop.f32.mrf.mxu0 }
 0x1a6   :  { %v193_v10 = vadd.f32 %v4749_v58, %v192_v9  ;;  %v164_v19 = vadd.f32 %v4748_v62, %v163_v16 }
 0x1a7   :  { %v228_v11 = vpack.c.bf16 %v220_v8, %v220_v8 }
 0x1a8   :  { %v227_v14 = vpack.c.bf16 %v193_v10, %v193_v10  ;;  %v225_v24 = vpack.c.bf16 %v164_v19, %v164_v19 }
 0x1a9   :  { %v327_v17 = vsel %vm325_vm9, %v228_v11, 0 }
 0x1aa   :  { %336 = vmatpush.bf16.msrb.mxu1 %v327_v17  ;;  %4345 = vmatmul.msk.bf16.vlgmr.msra.gmra.mxu3 %vm230_vm8, %v224_v13  ;;  %v254_v18 = vsel %vm230_vm8, %v227_v14, 0 }
 0x1ab   :  { %383 = vmatpush.bf16.msrb.mxu3 %v4665_v0  ;;  %263 = vmatpush.bf16.xpose.msrb.mxu0 %v254_v18  ;;  %v4673_v0 = vld [vmem:[%s6531_s3 + $0x58] sm:$0xff] }
 0x1ac   :  { %v221_v20 = vpop.f32.mrf.mxu2 }
 0x1ad   :  { %v222_v22 = vadd.f32 %v4750_v1, %v221_v20  ;;  %v4672_v1 = vld [vmem:[%s6531_s3 + $0x50] sm:$0xff] }
 0x1ae   :  { %441 = vmatpush.bf16.msra.mxu1 %v4673_v0 }
 0x1af   :  { %384 = vmatpush.bf16.msrb.mxu3 %v4664_v7  ;;  %v229_v23 = vpack.c.bf16 %v222_v22, %v222_v22 }
 0x1b1   :  { %v346_v25 = vsel %vm325_vm9, %v229_v23, 0 }
 0x1b2   :  { %355 = vmatpush.bf16.msrb.mxu2 %v346_v25  ;;  %4346 = vmatmul.msk.bf16.vlgmr.msrb.gmra.mxu0 %vm230_vm8, %v225_v24 }
 0x1b3   :  { %412 = vmatpush.bf16.msra.mxu0 %v4669_v15  ;;  %442 = vmatpush.bf16.msra.mxu1 %v4672_v1 }
 0x1b7   :  { %413 = vmatpush.bf16.msra.mxu0 %v4668_v21 }
 0x1ba   :  { %4357 = vmatmul.msk.bf16.vlgmr.msrb.gmra.mxu3 %vm36_vm0, %v4902_v57 }
 0x1c2   :  { %4366 = vmatmul.msk.bf16.vlgmr.msra.gmra.mxu0 %vm36_vm0, %v4902_v57 }
 0x22d   :  { %v246_v26 = vpop.f32.mrf.mxu3 }
 0x22e   :  { %v269_v27 = vmul.f32 0.25, %v246_v26 }
 0x22f   :  { %v265_v28 = vpop.f32.mrf.mxu0 }
 0x230   :  { %v270_v29 = vmul.f32 0.25, %v265_v28  ;;  %v272_v30 = vsel %vm271_vm10, %v269_v27, -inf }
 0x231   :  { %273 = vmax.xlane.f32.xlu0 %v272_v30 }
 0x232   :  { %v275_v31 = vsel %vm271_vm10, %v270_v29, -inf }
 0x233   :  { %276 = vmax.xlane.f32.xlu2 %v275_v31 }
 0x235   :  { %v248_v32 = vpop.f32.mrf.mxu3 }
 0x236   :  { %v4674_v32 = vld [vmem:[%s6533_s4] sm:$0xff] }
 0x237   :  { %v267_v33 = vpop.f32.mrf.mxu0 }
 0x23d   :  { %v386_v36 = vpop.f32.mrf.mxu3 }
 0x23e   :  { %v4949_v37 = vadd.f32 %v4751_v34, %v386_v36 }
 0x23f   :  { %v415_v38 = vpop.f32.mrf.mxu0 }
 0x240   :  { %v416_v39 = vadd.f32 %v4752_v35, %v415_v38  ;;  %v449_v31 = vpack.c.bf16 %v4949_v37, %v4949_v37  ;;  %v4753_v37 = vld [vmem:[%s6530_s2 + $0x5] ss:$0 sm:$0xff] }
 0x242   :  { %v451_v40 = vpack.c.bf16 %v416_v39, %v416_v39 }
 0x244   :  { %v459_v41 = vsel %vm230_vm8, %v451_v40, 0 }
 0x245   :  { %468 = vmatpush.bf16.xpose.msra.mxu2 %v459_v41  ;;  %v388_v45 = vpop.f32.mrf.mxu3 }
 0x246   :  { %v389_v47 = vadd.f32 %v4751_v34, %v388_v45 }
 0x247   :  { %v417_v42 = vpop.f32.mrf.mxu0 }
 0x248   :  { %v418_v43 = vadd.f32 %v4752_v35, %v417_v42  ;;  %v450_v48 = vpack.c.bf16 %v389_v47, %v389_v47 }
 0x24a   :  { %v452_v44 = vpack.c.bf16 %v418_v43, %v418_v43 }
 0x24c   :  { %v478_v46 = vsel %vm230_vm8, %v452_v44, 0 }
 0x24d   :  { %487 = vmatpush.bf16.xpose.msra.mxu3 %v478_v46 }
 0x254   :  { %4377 = vmatmul.msk.bf16.vlgmr.msra.gmra.mxu3 %vm230_vm8, %v450_v48 }
 0x255   :  { %623 = vmatpush.bf16.msrb.mxu3 %v4674_v32 }
 0x2a4   :  { %v274_v49 = vpop.xlane.xlu0 %273 }
 0x2a5   :  { %v278_v50 = vsub.f32 %v269_v27, %v274_v49 }
 0x2a6   :  { %v277_v51 = vpop.xlane.xlu2 %276 }
 0x2a7   :  { %v280_v52 = vmul.f32 1.442695, %v278_v50  ;;  %v279_v53 = vsub.f32 %v270_v29, %v277_v51 }
 0x2a9   :  { %4760 = vpow2.f32 %v280_v52  ;;  %v282_v54 = vmul.f32 1.442695, %v279_v53 }
 0x2ab   :  { %4762 = vpow2.f32 %v282_v54 }
 0x2af   :  { %v4761_v55 = vpop.eup %4760 }
 0x2b0   :  { %v284_v56 = vsel %vm271_vm10, %v4761_v55, 0.0 }
 0x2b1   :  { %v4763_v58 = vpop.eup %4762  ;;  %285 = vadd.xlane.f32.xlu1 %v284_v56 }
 0x2b2   :  { %v287_v59 = vsel %vm271_vm10, %v4763_v58, 0.0 }
 0x2b3   :  { %288 = vadd.xlane.f32.xlu2 %v287_v59 }
 0x2d7   :  { %v489_v60 = vpop.f32.mrf.mxu3 }
 0x2d8   :  { %v4956_v61 = vmul.f32 0.25, %v489_v60 }
 0x2da   :  { %v498_v62 = vsel %vm271_vm10, %v4956_v61, -inf }
 0x2db   :  { %499 = vmax.xlane.f32.xlu0 %v498_v62 }
 0x2df   :  { %v491_v63 = vpop.f32.mrf.mxu3 }
 0x324   :  { %v286_v3 = vpop.xlane.xlu1 %285 }
 0x325   :  { %4764 = vrcp.f32 %v286_v3  ;;  %v301_v11 = vand.u32 2147483648, %v286_v3  ;;  %v299_v14 = vand.u32 2147483647, %v286_v3  ;;  %vm295_vm12 = vweird.f32 %v286_v3 }
 0x326   :  { %v289_v5 = vpop.xlane.xlu2 %288 }
 0x327   :  { %4766 = vrcp.f32 %v289_v5  ;;  %v316_v16 = vand.u32 2147483648, %v289_v5  ;;  %v314_v19 = vand.u32 2147483647, %v289_v5  ;;  %v302_v20 = vor.u32 1.1754944e-38, %v301_v11 }
 0x328   :  { %vm300_vm15 = vcmp.eq.f32.partialorder %v299_v14, 8.507059e+37  ;;  %vm310_vm1 = vweird.f32 %v289_v5  ;;  %v4675_v14 = vld [vmem:[%s6533_s4 + $0x8] sm:$0xff] }
 0x329   :  { %v317_v23 = vor.u32 1.1754944e-38, %v316_v16  ;;  %vm315_vm3 = vcmp.eq.f32.partialorder %v314_v19, 8.507059e+37 }
 0x32b   :  { %v4765_v6 = vpop.eup %4764 }
 0x32c   :  { %v291_v7 = vmul.f32 %v4765_v6, %v286_v3  ;;  %vm296_vm11 = vweird.f32 %v4765_v6 }
 0x32d   :  { %v4767_v8 = vpop.eup %4766  ;;  %vm297_vm14 = vmor %vm295_vm12, %vm296_vm11 }
 0x32e   :  { %v292_v9 = vsub.f32 1.0, %v291_v7  ;;  %v306_v10 = vmul.f32 %v4767_v8, %v289_v5  ;;  %vm311_vm13 = vweird.f32 %v4767_v8 }
 0x32f   :  { %vm312_vm2 = vmor %vm310_vm1, %vm311_vm13 }
 0x330   :  { %v293_v13 = vmul.f32 %v4765_v6, %v292_v9  ;;  %v307_v15 = vsub.f32 1.0, %v306_v10 }
 0x332   :  { %v294_v17 = vadd.f32 %v4765_v6, %v293_v13  ;;  %v308_v18 = vmul.f32 %v4767_v8, %v307_v15 }
 0x334   :  { %v309_v21 = vadd.f32 %v4767_v8, %v308_v18  ;;  %v298_v22 = vsel %vm297_vm14, %v4765_v6, %v294_v17 }
 0x335   :  { %v303_v24 = vsel %vm300_vm15, %v302_v20, %v298_v22 }
 0x336   :  { %v304_v25 = vmul.f32 %v4761_v55, %v303_v24  ;;  %v313_v26 = vsel %vm312_vm2, %v4767_v8, %v309_v21 }
 0x337   :  { %v318_v27 = vsel %vm315_vm3, %v317_v23, %v313_v26 }
 0x338   :  { %v320_v28 = vpack.c.bf16 %v304_v25, %v304_v25  ;;  %v319_v29 = vmul.f32 %v4763_v58, %v318_v27 }
 0x33a   :  { %4347 = vmatmul.msk.bf16.vlgmr.msrb.gmra.mxu1 %vm271_vm10, %v320_v28  ;;  %v321_v30 = vpack.c.bf16 %v319_v29, %v319_v29 }
 0x33c   :  { %4348 = vmatmul.msk.bf16.vlgmr.msrb.gmra.mxu2 %vm271_vm10, %v321_v30 }
 0x33d   :  { %600 = vmatpush.bf16.msrb.mxu2 %v4675_v14 }
 0x34a   :  { %4375 = vmatmul.msk.bf16.vlgmr.msra.gmra.mxu1 %vm36_vm0, %v4902_v57 }
 0x34c   :  { %4376 = vmatmul.msk.bf16.vlgmr.msra.gmra.mxu2 %vm230_vm8, %v449_v31 }
 0x34e   :  { %v500_v38 = vpop.xlane.xlu0 %499 }
 0x34f   :  { %v502_v41 = vsub.f32 %v4956_v61, %v500_v38 }
 0x351   :  { %v505_v44 = vmul.f32 1.442695, %v502_v41 }
 0x353   :  { %4768 = vpow2.f32 %v505_v44 }
 0x359   :  { %v4769_v52 = vpop.eup %4768 }
 0x35a   :  { %v510_v54 = vsel %vm271_vm10, %v4769_v52, 0.0 }
 0x3b7   :  { %v338_v33 = vpop.f32.mrf.mxu1 }
 0x3bf   :  { %v340_v34 = vpop.f32.mrf.mxu1  ;;  %v357_v35 = vpop.f32.mrf.mxu2 }
 0x3c0   :  { %v361_v36 = vpack.c.bf16 %v357_v35, %v338_v33  ;;  %v632_v35 = vld [vmem:[%s6532_s1 + $0x4] ss:$0 sm:$0xff] }
 0x3c2   :  { %4389 = vmatmul.msk.bf16.vlgmr.msrb.gmra.mxu3 %vm230_vm8, %v361_v36 }
 0x3c7   :  { %v359_v39 = vpop.f32.mrf.mxu2  ;;  %v444_v57 = vpop.f32.mrf.mxu1 }
 0x3c8   :  { %v445_v40 = vadd.f32 %v4753_v37, %v444_v57 }
 0x3ca   :  { %v453_v42 = vpack.c.bf16 %v445_v40, %v445_v40 }
 0x3cc   :  { %v549_v43 = vsel %vm325_vm9, %v453_v42, 0 }
 0x3cd   :  { %558 = vmatpush.bf16.msrb.mxu0 %v549_v43 }
 0x3cf   :  { %v446_v45 = vpop.f32.mrf.mxu1  ;;  %v470_v46 = vpop.f32.mrf.mxu2 }
 0x3d0   :  { %v447_v47 = vadd.f32 %v4753_v37, %v446_v45  ;;  %v493_v48 = vmul.f32 0.25, %v470_v46 }
 0x3d2   :  { %v454_v49 = vpack.c.bf16 %v447_v47, %v447_v47  ;;  %v495_v50 = vsel %vm271_vm10, %v493_v48, -inf }
 0x3d3   :  { %496 = vmax.xlane.f32.xlu2 %v495_v50 }
 0x3d4   :  { %v568_v51 = vsel %vm325_vm9, %v454_v49, 0 }
 0x3d5   :  { %577 = vmatpush.bf16.msrb.mxu1 %v568_v51 }
 0x3d7   :  { %v472_v53 = vpop.f32.mrf.mxu2 }
 0x3d8   :  { %v4679_v53 = vld [vmem:[%s6534_s5 + $0x14] sm:$0xf0] }
 0x3db   :  { %511 = vadd.xlane.f32.xlu2 %v510_v54  ;;  %v4678_v54 = vld [vmem:[%s6534_s5 + $0x14] sm:$0xf] }
 0x445   :  { %v625_v32 = vpop.f32.mrf.mxu3 }
 0x446   :  { %v497_v55 = vpop.xlane.xlu2 %496 }
 0x447   :  { %v501_v56 = vsub.f32 %v493_v48, %v497_v55 }
 0x449   :  { %v503_v58 = vmul.f32 1.442695, %v501_v56  ;;  %v4403_v56 = vld [vmem:[%s6534_s5 + $0x18] sm:$0xf0] }
 0x44b   :  { %4770 = vpow2.f32 %v503_v58 }
 0x44d   :  { %v627_v39 = vpop.f32.mrf.mxu3 }
 0x44e   :  { %v512_v59 = vpop.xlane.xlu2 %511 }
 0x44f   :  { %4772 = vrcp.f32 %v512_v59  ;;  %v539_v1 = vand.u32 2147483648, %v512_v59  ;;  %v537_v5 = vand.u32 2147483647, %v512_v59  ;;  %vm533_vm5 = vweird.f32 %v512_v59 }
 0x451   :  { %v4771_v60 = vpop.eup %4770  ;;  %v540_v7 = vor.u32 1.1754944e-38, %v539_v1  ;;  %vm538_vm7 = vcmp.eq.f32.partialorder %v537_v5, 8.507059e+37 }
 0x452   :  { %v507_v61 = vsel %vm271_vm10, %v4771_v60, 0.0 }
 0x453   :  { %508 = vadd.xlane.f32.xlu1 %v507_v61  ;;  %v4393_v61 = vld [vmem:[%s6534_s5] sm:$0xf] }
 0x455   :  { %v4773_v62 = vpop.eup %4772 }
 0x456   :  { %v529_v63 = vmul.f32 %v4773_v62, %v512_v59  ;;  %vm534_vm4 = vweird.f32 %v4773_v62  ;;  %v4406_v59 = vor.u32 %v4678_v54, %v4403_v56 }
 0x457   :  { %vm535_vm6 = vmor %vm533_vm5, %vm534_vm4 }
 0x458   :  { %v530_v0 = vsub.f32 1.0, %v529_v63  ;;  %740 = vmatpush.bf16.msra.mxu1 %v4406_v59  ;;  %v4676_v63 = vld [vmem:[%s6534_s5 + $0x4] sm:$0xf] }
 0x45a   :  { %v531_v3 = vmul.f32 %v4773_v62, %v530_v0 }
 0x45c   :  { %v532_v6 = vadd.f32 %v4773_v62, %v531_v3  ;;  %v4395_v3 = vld [vmem:[%s6534_s5 + $0x8] sm:$0xf0] }
 0x45d   :  { %v4398_v5 = vor.u32 %v4676_v63, %v4395_v3 }
 0x45e   :  { %v536_v8 = vsel %vm535_vm6, %v4773_v62, %v532_v6  ;;  %v4677_v62 = vld [vmem:[%s6534_s5 + $0x4] sm:$0xf0]  ;;  %v748_v6 = vld [vmem:[%s6532_s1 + $0x10] ss:$0 sm:$0xff] }
 0x45f   :  { %v541_v9 = vsel %vm538_vm7, %v540_v7, %v536_v8  ;;  %v4394_v1 = vor.u32 %v4677_v62, %v4393_v61  ;;  %741 = vmatpush.bf16.msra.mxu1 %v4398_v5  ;;  %v4783_v8 = vmov 0  }
 0x460   :  { %v542_v10 = vmul.f32 %v4769_v52, %v541_v9  ;;  %v4401_v52 = vld [vmem:[%s6534_s5 + $0x10] sm:$0xf]  ;;  %4741 = vset.pattern.permute.xlu1 %v4783_v8 }
 0x461   :  { %v4402_v55 = vor.u32 %v4679_v53, %v4401_v52 }
 0x462   :  { %v544_v11 = vpack.c.bf16 %v542_v10, %v542_v10 }
 0x463   :  { %726 = vmatpush.bf16.msra.mxu0 %v4402_v55 }
 0x464   :  { %4379 = vmatmul.msk.bf16.vlgmr.msrb.gmra.mxu1 %vm271_vm10, %v544_v11 }
 0x467   :  { %727 = vmatpush.bf16.msra.mxu0 %v4394_v1 }
 0x4c6   :  { %v509_v13 = vpop.xlane.xlu1 %508 }
 0x4c7   :  { %4774 = vrcp.f32 %v509_v13  ;;  %v524_v18 = vand.u32 2147483648, %v509_v13  ;;  %v522_v20 = vand.u32 2147483647, %v509_v13  ;;  %vm518_vm11 = vweird.f32 %v509_v13 }
 0x4c9   :  { %v525_v22 = vor.u32 1.1754944e-38, %v524_v18  ;;  %vm523_vm13 = vcmp.eq.f32.partialorder %v522_v20, 8.507059e+37 }
 0x4cd   :  { %v4775_v15 = vpop.eup %4774 }
 0x4ce   :  { %v514_v16 = vmul.f32 %v4775_v15, %v509_v13  ;;  %vm519_vm9 = vweird.f32 %v4775_v15 }
 0x4cf   :  { %vm520_vm12 = vmor %vm518_vm11, %vm519_vm9 }
 0x4d0   :  { %v515_v17 = vsub.f32 1.0, %v514_v16 }
 0x4d2   :  { %v516_v19 = vmul.f32 %v4775_v15, %v515_v17 }
 0x4d4   :  { %v517_v21 = vadd.f32 %v4775_v15, %v516_v19 }
 0x4d6   :  { %v521_v23 = vsel %vm520_vm12, %v4775_v15, %v517_v21 }
 0x4d7   :  { %v526_v24 = vsel %vm523_vm13, %v525_v22, %v521_v23 }
 0x4d8   :  { %v527_v25 = vmul.f32 %v4771_v60, %v526_v24  ;;  %v635_v24 = vld [vmem:[%s6532_s1 + $0x2] ss:$0 sm:$0xff] }
 0x4da   :  { %v543_v26 = vpack.c.bf16 %v527_v25, %v527_v25 }
 0x4dc   :  { %4378 = vmatmul.msk.bf16.vlgmr.msrb.gmra.mxu0 %vm271_vm10, %v543_v26 }
 0x4e1   :  { %v579_v27 = vpop.f32.mrf.mxu1 }
 0x4e9   :  { %v581_v28 = vpop.f32.mrf.mxu1 }
 0x559   :  { %v560_v29 = vpop.f32.mrf.mxu0 }
 0x55a   :  { %v583_v30 = vpack.c.bf16 %v579_v27, %v560_v29  ;;  %v636_v29 = vld [vmem:[%s6532_s1 + $0x3] ss:$0 sm:$0xff] }
 0x55c   :  { %4384 = vmatmul.msk.bf16.vlgmr.msrb.gmra.mxu2 %vm230_vm8, %v583_v30 }
 0x561   :  { %v562_v31 = vpop.f32.mrf.mxu0 }
 0x5df   :  { %v602_v33 = vpop.f32.mrf.mxu2 }
 0x5e0   :  { %v626_v34 = vadd.f32 %v625_v32, %v602_v33 }
 0x5e2   :  { %v630_v36 = vadd.f32 %v626_v34, %v4857_v2  ;;  %v5052_v34 = vld [vmem:[%s6532_s1 + $0x5] ss:$8 sm:$0x3] }
 0x5e4   :  { %v4996_v37 = vadd.f32 %v632_v35, %v630_v36  ;;  %v694_v36 = vperm.slane %v5052_v34, 1 }
 0x5e6   :  { %v637_v38 = vsel %vm36_vm0, %v4996_v37, 0.0 }
 0x5e7   :  { %638 = vadd.xlane.f32.xlu0 %v637_v38  ;;  %v604_v57 = vpop.f32.mrf.mxu2  ;;  %v4784_v38 = vmov 1  }
 0x5e8   :  { %v628_v40 = vadd.f32 %v627_v39, %v604_v57  ;;  %4742 = vset.pattern.permute.xlu2 %v4784_v38 }
 0x5ea   :  { %v631_v41 = vadd.f32 %v628_v40, %v4864_v4 }
 0x5ec   :  { %v5001_v42 = vadd.f32 %v632_v35, %v631_v41  ;;  %v693_v35 = vperm.slane %v5052_v34, 0 }
 0x5ee   :  { %v640_v43 = vsel %vm36_vm0, %v5001_v42, 0.0 }
 0x5ef   :  { %641 = vadd.xlane.f32.xlu1 %v640_v43 }
 0x608   :  { %1371 = vperm.xlu1 %4741, %v748_v6  }
 0x65a   :  { %v639_v44 = vpop.xlane.xlu0 %638 }
 0x65b   :  { %v643_v2 = vmul.f32 %v639_v44, %v4868_v12 }
 0x65d   :  { %v645_v45 = vsub.f32 %v4996_v37, %v643_v2 }
 0x65f   :  { %v647_v46 = vmul.f32 %v645_v45, %v645_v45 }
 0x661   :  { %v649_v47 = vsel %vm36_vm0, %v647_v46, 0.0 }
 0x662   :  { %650 = vadd.xlane.f32.xlu2 %v649_v47  ;;  %v642_v48 = vpop.xlane.xlu1 %641 }
 0x663   :  { %v644_v49 = vmul.f32 %v642_v48, %v4868_v12 }
 0x665   :  { %v646_v4 = vsub.f32 %v5001_v42, %v644_v49 }
 0x667   :  { %v648_v50 = vmul.f32 %v646_v4, %v646_v4 }
 0x669   :  { %v652_v51 = vsel %vm36_vm0, %v648_v50, 0.0 }
 0x66a   :  { %653 = vadd.xlane.f32.xlu0 %v652_v51 }
 0x67a   :  { %1995 = vperm.xlu2 %4742, %v748_v6   ;;  %v4785_v6 = vmov 683565275  }
 0x6d5   :  { %v651_v58 = vpop.xlane.xlu2 %650 }
 0x6d6   :  { %v655_v60 = vmul.f32 %v651_v58, %v4868_v12 }
 0x6d8   :  { %v657_v0 = vadd.f32 1e-05, %v655_v60 }
 0x6da   :  { %4776 = vrsqrt.f32 %v657_v0  ;;  %vm665_vm10 = vweird.f32 %v657_v0 }
 0x6dd   :  { %v654_v7 = vpop.xlane.xlu0 %653 }
 0x6de   :  { %v656_v9 = vmul.f32 %v654_v7, %v4868_v12 }
 0x6e0   :  { %v4777_v10 = vpop.eup %4776  ;;  %v658_v11 = vadd.f32 1e-05, %v656_v9  ;;  %v4786_v9 = vmov 2475754826  }
 0x6e1   :  { %v660_v13 = vmul.f32 %v4777_v10, %v657_v0  ;;  %vm666_vm8 = vweird.f32 %v4777_v10 }
 0x6e2   :  { %4778 = vrsqrt.f32 %v658_v11  ;;  %vm667_vm14 = vmor %vm665_vm10, %vm666_vm8  ;;  %vm675_vm1 = vweird.f32 %v658_v11 }
 0x6e3   :  { %v661_v14 = vmul.f32 %v4777_v10, %v660_v13 }
 0x6e5   :  { %v662_v15 = vmul.f32 0.5, %v661_v14  ;;  %v4787_v14 = vmov 2131351028  }
 0x6e7   :  { %v663_v16 = vsub.f32 1.5, %v662_v15 }
 0x6e8   :  { %v4779_v17 = vpop.eup %4778 }
 0x6e9   :  { %v664_v18 = vmul.f32 %v4777_v10, %v663_v16  ;;  %v670_v19 = vmul.f32 %v4779_v17, %v658_v11  ;;  %vm676_vm15 = vweird.f32 %v4779_v17 }
 0x6ea   :  { %vm677_vm2 = vmor %vm675_vm1, %vm676_vm15 }
 0x6eb   :  { %v671_v20 = vmul.f32 %v4779_v17, %v670_v19  ;;  %v668_v21 = vsel %vm667_vm14, %v4777_v10, %v664_v18 }
 0x6ec   :  { %v679_v12 = vmul.f32 %v668_v21, %v645_v45 }
 0x6ed   :  { %v672_v22 = vmul.f32 0.5, %v671_v20  ;;  %v4789_v20 = vmov 920167782  }
 0x6ee   :  { %v681_v27 = vmul.f32 %v679_v12, %v635_v24 }
 0x6ef   :  { %v673_v23 = vsub.f32 1.5, %v672_v22 }
 0x6f0   :  { %v683_v31 = vadd.f32 %v681_v27, %v636_v29 }
 0x6f1   :  { %v674_v25 = vmul.f32 %v4779_v17, %v673_v23  ;;  %v4790_v23 = vmov 1326507024  }
 0x6f3   :  { %v678_v26 = vsel %vm677_vm2, %v4779_v17, %v674_v25  ;;  %v4788_v17 = vmov 2102212464  }
 0x6f4   :  { %v680_v28 = vmul.f32 %v678_v26, %v646_v4 }
 0x6f6   :  { %v682_v30 = vmul.f32 %v680_v28, %v635_v24 }
 0x6f8   :  { %v684_v32 = vadd.f32 %v682_v30, %v636_v29 }
 0x6fa   :  { %v685_v33 = vpack.c.bf16 %v684_v32, %v683_v31 }
 0x6fc   :  { %4407 = vmatmul.msk.bf16.vlgmr.msra.gmra.mxu0 %vm36_vm0, %v685_v33  ;;  %4408 = vmatmul.msk.bf16.vlgmr.msra.gmra.mxu1 %vm36_vm0, %v685_v33 }
 0x779   :  { %v729_v39 = vpop.f32.mrf.mxu0  ;;  %v743_v57 = vpop.f32.mrf.mxu1 }
 0x77a   :  { %v5056_v40 = vadd.f32 %v729_v39, %v693_v35  ;;  %v5060_v41 = vadd.f32 %v743_v57, %v694_v36 }
 0x77c   :  { %v749_v43 = vand.u32 2147483647, %v5056_v40  ;;  %v752_v44 = vand.u32 2139095040, %v5056_v40  ;;  %v904_v2 = vand.u32 2147483647, %v5060_v41  ;;  %v907_v45 = vand.u32 2139095040, %v5060_v41 }
 0x77e   :  { %v753_v46 = vshrl.u32 %v752_v44, 23  ;;  %v756_v47 = vand.u32 8388607, %v749_v43  ;;  %v908_v48 = vshrl.u32 %v907_v45, 23  ;;  %v911_v49 = vand.u32 8388607, %v904_v2 }
 0x780   :  { %v4409_v4 = vadd.s32 4294967169, %v753_v46  ;;  %v757_v50 = vor.u32 8388608, %v756_v47  ;;  %v4412_v51 = vadd.s32 4294967169, %v908_v48  ;;  %v912_v52 = vor.u32 8388608, %v911_v49 }
 0x781   :  { %v731_v56 = vpop.f32.mrf.mxu0 }
 0x782   :  { %v759_v53 = vadd.s32 1, %v4409_v4  ;;  %v914_v54 = vadd.s32 1, %v4412_v51  ;;  %v5070_v55 = vshll.u32 %v757_v50, 8  ;;  %v5072_v59 = vshll.u32 %v912_v52, 8 }
 0x783   :  { %v5074_v62 = vadd.f32 %v731_v56, %v693_v35 }
 0x784   :  { %vm760_vm3 = vcmp.gt.s32.totalorder %v759_v53, 0  ;;  %vm915_vm4 = vcmp.gt.s32.totalorder %v914_v54, 0  ;;  %v5077_v0 = vand.u32 65535, %v5070_v55  ;;  %v5080_v1 = vshrl.u32 %v5070_v55, 16 }
 0x785   :  { %v761_v58 = vsel %vm760_vm3, %v759_v53, 0  ;;  %v916_v61 = vsel %vm915_vm4, %v914_v54, 0  ;;  %v5089_v11 = vand.u32 65535, %v5072_v59 }
 0x786   :  { %v763_v60 = vand.u32 31, %v761_v58  ;;  %v5082_v3 = vand.u32 31, %v916_v61  ;;  %v5084_v5 = vshrl.u32 %v761_v58, 5  ;;  %v5131_v56 = vshrl.u32 %v916_v61, 5 }
 0x788   :  { %v764_v63 = vsub.s32 32, %v763_v60  ;;  %v766_v7 = vshll.u32 %v4785_v6, %v763_v60  ;;  %v769_v10 = vshll.u32 %v4786_v9, %v763_v60  ;;  %v772_v16 = vshll.u32 %v4787_v14, %v763_v60 }
 0x789   :  { %v775_v19 = vshll.u32 %v4788_v17, %v763_v60  ;;  %v778_v22 = vshll.u32 %v4789_v20, %v763_v60  ;;  %v5100_v27 = vsub.s32 32, %v5082_v3  ;;  %vm781_vm5 = vcmp.lt.s32.totalorder %v5084_v5, 1 }
 0x78a   :  { %v767_v13 = vshrl.u32 %v4786_v9, %v764_v63  ;;  %v770_v15 = vshrl.u32 %v4787_v14, %v764_v63  ;;  %v773_v18 = vshrl.u32 %v4788_v17, %v764_v63  ;;  %v776_v21 = vshrl.u32 %v4789_v20, %v764_v63 }
 0x78b   :  { %v779_v12 = vshrl.u32 %v4790_v23, %v764_v63  ;;  %vm782_vm6 = vcmp.lt.s32.totalorder %v5084_v5, 2  ;;  %v765_v30 = vshrl.u32 %v4785_v6, %v764_v63  ;;  %vm784_vm7 = vcmp.lt.s32.totalorder %v5084_v5, 4 }
 0x78c   :  { %v768_v24 = vor.u32 %v767_v13, %v766_v7  ;;  %v771_v25 = vor.u32 %v770_v15, %v769_v10  ;;  %v774_v26 = vor.u32 %v773_v18, %v772_v16  ;;  %v777_v28 = vor.u32 %v776_v21, %v775_v19 }
 0x78d   :  { %v780_v29 = vor.u32 %v779_v12, %v778_v22  ;;  %vm783_vm9 = vcmp.lt.s32.totalorder %v5084_v5, 3  ;;  %v921_v38 = vshll.u32 %v4785_v6, %v5082_v3  ;;  %v922_v45 = vshrl.u32 %v4786_v9, %v5100_v27 }
 0x78e   :  { %v789_v31 = vsel %vm781_vm5, %v768_v24, %v771_v25  ;;  %v793_v32 = vsel %vm781_vm5, %v771_v25, %v774_v26  ;;  %v790_v33 = vsel %vm784_vm7, %v777_v28, 920167782  ;;  %v786_v39 = vsel %vm784_vm7, %v774_v26, 2102212464 }
 0x78f   :  { %v794_v35 = vsel %vm784_vm7, %v780_v29, 1326507024  ;;  %v791_v57 = vsel %vm783_vm9, %v774_v26, %v790_v33  ;;  %v924_v48 = vshll.u32 %v4786_v9, %v5082_v3  ;;  %v925_v49 = vshrl.u32 %v4787_v14, %v5100_v27 }
 0x790   :  { %v795_v44 = vsel %vm783_vm9, %v777_v28, %v794_v35  ;;  %v792_v46 = vsel %vm782_vm6, %v789_v31, %v791_v57  ;;  %v785_v53 = vsel %vm781_vm5, %v765_v30, %v768_v24  ;;  %v787_v54 = vsel %vm783_vm9, %v771_v25, %v786_v39 }
 0x791   :  { %v796_v47 = vsel %vm782_vm6, %v793_v32, %v795_v44  ;;  %v822_v51 = vand.u32 65535, %v792_v46  ;;  %v823_v52 = vshrl.u32 %v792_v46, 16  ;;  %v5133_v58 = vor.u32 %v922_v45, %v921_v38 }
 0x792   :  { %v800_v4 = vand.u32 65535, %v796_v47  ;;  %v801_v50 = vshrl.u32 %v796_v47, 16  ;;  %v5137_v7 = vor.u32 %v925_v49, %v924_v48  ;;  %v928_v10 = vshrl.u32 %v4788_v17, %v5100_v27 }
 0x793   :  { %v825_v15 = vmul.u32 %v823_v52, %v5077_v0  ;;  %v826_v16 = vmul.u32 %v822_v51, %v5080_v1  ;;  %v927_v61 = vshll.u32 %v4787_v14, %v5082_v3  ;;  %v824_v21 = vmul.u32 %v822_v51, %v5077_v0 }
 0x794   :  { %v803_v60 = vmul.u32 %v801_v50, %v5077_v0  ;;  %v804_v63 = vmul.u32 %v800_v4, %v5080_v1  ;;  %v802_v13 = vmul.u32 %v800_v4, %v5077_v0  ;;  %v805_v18 = vmul.u32 %v801_v50, %v5080_v1 }
 0x795   :  { %v827_v22 = vmul.u32 %v823_v52, %v5080_v1  ;;  %v828_v26 = vshll.u32 %v825_v15, 16  ;;  %v830_v29 = vshll.u32 %v826_v16, 16  ;;  %v929_v30 = vor.u32 %v928_v10, %v927_v61 }
 0x796   :  { %v806_v19 = vshll.u32 %v803_v60, 16  ;;  %v807_v12 = vshrl.u32 %v803_v60, 16  ;;  %v808_v24 = vshll.u32 %v804_v63, 16  ;;  %v809_v25 = vshrl.u32 %v804_v63, 16 }
 0x797   :  { %vm832_vm12 = vc.u32 %v824_v21, %v828_v26  ;;  %v834_v32 = vadd.s32 %v828_v26, %v824_v21  ;;  %v931_v33 = vshrl.u32 %v4789_v20, %v5100_v27  ;;  %v930_v1 = vshll.u32 %v4788_v17, %v5082_v3 }
 0x798   :  { %vm810_vm11 = vc.u32 %v802_v13, %v806_v19  ;;  %v812_v28 = vadd.s32 %v806_v19, %v802_v13  ;;  %v833_v0 = vsel %vm832_vm12, 1, %v4783_v8  ;;  %v933_v57 = vshll.u32 %v4789_v20, %v5082_v3 }
 0x799   :  { %v811_v31 = vsel %vm810_vm11, 1, %v4783_v8  ;;  %v835_v39 = vadd.s32 %v833_v0, %v827_v22  ;;  %vm836_vm8 = vc.u32 %v834_v32, %v830_v29  ;;  %v932_v46 = vor.u32 %v931_v33, %v930_v1 }
 0x79a   :  { %v813_v35 = vadd.s32 %v811_v31, %v805_v18  ;;  %vm814_vm13 = vc.u32 %v812_v28, %v808_v24  ;;  %v837_v45 = vsel %vm836_vm8, 1, %v4783_v8  ;;  %v934_v47 = vshrl.u32 %v4790_v23, %v5100_v27 }
 0x79b   :  { %v815_v38 = vsel %vm814_vm13, 1, %v4783_v8  ;;  %v829_v48 = vshrl.u32 %v825_v15, 16  ;;  %v831_v49 = vshrl.u32 %v826_v16, 16  ;;  %v5161_v4 = vadd.s32 %v834_v32, %v830_v29 }
 0x79c   :  { %v817_v44 = vadd.s32 %v815_v38, %v813_v35  ;;  %v839_v50 = vadd.s32 %v837_v45, %v835_v39  ;;  %v935_v52 = vor.u32 %v934_v47, %v933_v57  ;;  %vm936_vm10 = vcmp.lt.s32.totalorder %v5131_v56, 1 }
 0x79d   :  { %vm939_vm14 = vcmp.lt.s32.totalorder %v5131_v56, 4  ;;  %vm938_vm15 = vcmp.lt.s32.totalorder %v5131_v56, 3  ;;  %v944_v3 = vsel %vm936_vm10, %v5133_v58, %v5137_v7  ;;  %vm937_vm1 = vcmp.lt.s32.totalorder %v5131_v56, 2 }
 0x79e   :  { %v818_v51 = vadd.s32 %v817_v44, %v807_v12  ;;  %v840_v60 = vadd.s32 %v839_v50, %v829_v48  ;;  %v945_v63 = vsel %vm939_vm14, %v932_v46, 920167782  ;;  %v948_v15 = vsel %vm936_vm10, %v5137_v7, %v929_v30 }
 0x79f   :  { %v946_v13 = vsel %vm938_vm15, %v929_v30, %v945_v63  ;;  %v788_v16 = vsel %vm782_vm6, %v785_v53, %v787_v54  ;;  %v949_v19 = vsel %vm939_vm14, %v935_v52, 1326507024  ;;  %v954_v22 = vshrl.u32 %v5072_v59, 16 }
 0x7a0   :  { %v5172_v10 = vadd.s32 %v818_v51, %v809_v25  ;;  %v841_v61 = vadd.s32 %v840_v60, %v831_v49  ;;  %v947_v18 = vsel %vm937_vm1, %v944_v3, %v946_v13  ;;  %v950_v21 = vsel %vm938_vm15, %v932_v46, %v949_v19 }
 0x7a1   :  { %v977_v12 = vand.u32 65535, %v947_v18  ;;  %v951_v5 = vsel %vm937_vm1, %v948_v15, %v950_v21  ;;  %v978_v53 = vshrl.u32 %v947_v18, 16  ;;  %v1062_v54 = vand.u32 2139095040, %v5074_v62 }
 0x7a2   :  { %vm844_vm2 = vc.u32 %v5172_v10, %v5161_v4  ;;  %v845_v24 = vadd.s32 1, %v841_v61  ;;  %v842_v25 = vmul.u32 %v5070_v55, %v788_v16  ;;  %v955_v26 = vand.u32 65535, %v951_v5 }
 0x7a3   :  { %v956_v28 = vshrl.u32 %v951_v5, 16  ;;  %v920_v31 = vshrl.u32 %v4785_v6, %v5100_v27  ;;  %v980_v32 = vmul.u32 %v978_v53, %v5089_v11  ;;  %v981_v33 = vmul.u32 %v977_v12, %v954_v22 }
 0x7a4   :  { %v846_v29 = vsel %vm844_vm2, %v845_v24, %v841_v61  ;;  %v941_v0 = vsel %vm939_vm14, %v929_v30, 2102212464  ;;  %v959_v38 = vmul.u32 %v955_v26, %v954_v22  ;;  %v979_v39 = vmul.u32 %v977_v12, %v5089_v11 }
 0x7a5   :  { %v847_v35 = vadd.s32 %v846_v29, %v842_v25  ;;  %v958_v1 = vmul.u32 %v956_v28, %v5089_v11  ;;  %v982_v57 = vmul.u32 %v978_v53, %v954_v22  ;;  %v983_v55 = vshll.u32 %v980_v32, 16 }
 0x7a6   :  { %v1063_v44 = vshrl.u32 %v1062_v54, 23  ;;  %v957_v46 = vmul.u32 %v955_v26, %v5089_v11  ;;  %v960_v47 = vmul.u32 %v956_v28, %v954_v22  ;;  %v963_v48 = vshll.u32 %v959_v38, 16 }
 0x7a7   :  { %v848_v45 = vadd.s32 536870912, %v847_v35  ;;  %v961_v27 = vshll.u32 %v958_v1, 16  ;;  %v985_v49 = vshll.u32 %v981_v33, 16  ;;  %vm987_vm3 = vc.u32 %v979_v39, %v983_v55 }
 0x7a8   :  { %v989_v50 = vadd.s32 %v983_v55, %v979_v39  ;;  %v988_v52 = vsel %vm987_vm3, 1, %v4783_v8  ;;  %v940_v60 = vsel %vm936_vm10, %v920_v31, %v5133_v58  ;;  %v942_v13 = vsel %vm938_vm15, %v5137_v7, %v941_v0 }
 0x7a9   :  { %v5203_v51 = vshrl.u32 %v848_v45, 30  ;;  %vm965_vm4 = vc.u32 %v957_v46, %v961_v27  ;;  %v967_v30 = vadd.s32 %v961_v27, %v957_v46  ;;  %v990_v63 = vadd.s32 %v988_v52, %v982_v57 }
 0x7aa   :  { %v966_v3 = vsel %vm965_vm4, 1, %v4783_v8  ;;  %vm991_vm5 = vc.u32 %v989_v50, %v985_v49  ;;  %v984_v61 = vshrl.u32 %v980_v32, 16  ;;  %v4415_v19 = vadd.s32 4294967169, %v1063_v44 }
 0x7ab   :  { %v850_v11 = vshll.u32 %v5203_v51, 30  ;;  %v968_v15 = vadd.s32 %v966_v3, %v960_v47  ;;  %vm969_vm6 = vc.u32 %v967_v30, %v963_v48  ;;  %v992_v18 = vsel %vm991_vm5, 1, %v4783_v8 }
 0x7ac   :  { %v970_v16 = vsel %vm969_vm6, 1, %v4783_v8  ;;  %v962_v58 = vshrl.u32 %v958_v1, 16  ;;  %v994_v12 = vadd.s32 %v992_v18, %v990_v63  ;;  %v964_v24 = vshrl.u32 %v959_v38, 16 }
 0x7ad   :  { %v5216_v21 = vsub.s32 %v847_v35, %v850_v11  ;;  %v972_v22 = vadd.s32 %v970_v16, %v968_v15  ;;  %v986_v5 = vshrl.u32 %v981_v33, 16  ;;  %v1059_v53 = vand.u32 2147483647, %v5074_v62 }
 0x7ae   :  { %v1069_v54 = vadd.s32 1, %v4415_v19  ;;  %v995_v26 = vadd.s32 %v994_v12, %v984_v61  ;;  %v943_v28 = vsel %vm937_vm1, %v940_v60, %v942_v13  ;;  %v5223_v29 = vadd.s32 %v989_v50, %v985_v49 }
 0x7af   :  { %vm852_vm7 = vcmp.lt.s32.totalorder %v5216_v21, 0  ;;  %v853_v7 = vsub.s32 0, %v5216_v21  ;;  %v973_v25 = vadd.s32 %v972_v22, %v962_v58  ;;  %v1066_v1 = vand.u32 8388607, %v1059_v53 }
 0x7b0   :  { %vm1070_vm9 = vcmp.gt.s32.totalorder %v1069_v54, 0  ;;  %v996_v33 = vadd.s32 %v995_v26, %v986_v5  ;;  %v997_v57 = vmul.u32 %v5072_v59, %v943_v28  ;;  %vm751_vm6 = vcmp.lt.s32.totalorder %v5056_v40, 0 }
 0x7b1   :  { %v854_v31 = vsel %vm852_vm7, %v853_v7, %v5216_v21  ;;  %v5226_v32 = vadd.s32 %v973_v25, %v964_v24  ;;  %v1071_v35 = vsel %vm1070_vm9, %v1069_v54, 0  ;;  %v1067_v46 = vor.u32 8388608, %v1066_v1 }
 0x7b2   :  { %v855_v0 = vclz %v854_v31  ;;  %v1073_v38 = vand.u32 31, %v1071_v35  ;;  %v1000_v39 = vadd.s32 1, %v996_v33  ;;  %v5243_v52 = vshrl.u32 %v1071_v35, 5 }
 0x7b3   :  { %vm999_vm11 = vc.u32 %v5226_v32, %v5223_v29  ;;  %v843_v24 = vadd.s32 %v5161_v4, %v5172_v10  ;;  %v5264_v26 = vshll.u32 %v1067_v46, 8  ;;  %vm5323_vm7 = vcmp.le.f32.partialorder %v749_v43, 0.7853982 }
 0x7b4   :  { %v4410_v56 = vadd.s32 4294967294, %v855_v0  ;;  %v5233_v55 = vsub.s32 32, %v1073_v38  ;;  %v1001_v44 = vsel %vm999_vm11, %v1000_v39, %v996_v33  ;;  %v1076_v60 = vshll.u32 %v4785_v6, %v1073_v38  ;;  %v745_v33 = vpop.f32.mrf.mxu1 }
 0x7b5   :  { %v1002_v45 = vadd.s32 %v1001_v44, %v997_v57  ;;  %v1079_v3 = vshll.u32 %v4786_v9, %v1073_v38  ;;  %v1082_v63 = vshll.u32 %v4787_v14, %v1073_v38  ;;  %v1085_v11 = vshll.u32 %v4788_v17, %v1073_v38 }
 0x7b6   :  { %vm4411_vm12 = vcmp.lt.s32.totalorder %v4410_v56, 0  ;;  %v1077_v47 = vshrl.u32 %v4786_v9, %v5233_v55  ;;  %v1080_v48 = vshrl.u32 %v4787_v14, %v5233_v55  ;;  %v1083_v49 = vshrl.u32 %v4788_v17, %v5233_v55 }
 0x7b7   :  { %v858_v27 = vsel %vm4411_vm12, 0, %v4410_v56  ;;  %v1086_v50 = vshrl.u32 %v4789_v20, %v5233_v55  ;;  %v1003_v30 = vadd.s32 536870912, %v1002_v45  ;;  %v1088_v13 = vshll.u32 %v4789_v20, %v1073_v38 }
 0x7b8   :  { %v863_v59 = vsub.s32 4294967266, %v858_v27  ;;  %v859_v15 = vsub.s32 32, %v858_v27  ;;  %v1089_v18 = vshrl.u32 %v4790_v23, %v5233_v55  ;;  %v5254_v19 = vor.u32 %v1077_v47, %v1076_v60 }
 0x7b9   :  { %v5250_v61 = vshrl.u32 %v1003_v30, 30  ;;  %v5256_v58 = vor.u32 %v1080_v48, %v1079_v3  ;;  %v5258_v22 = vor.u32 %v1083_v49, %v1082_v63  ;;  %v1087_v12 = vor.u32 %v1086_v50, %v1085_v11 }
 0x7ba   :  { %v864_v16 = vadd.s32 127, %v863_v59  ;;  %v860_v7 = vshll.u32 %v5216_v21, %v858_v27  ;;  %v1090_v25 = vor.u32 %v1089_v18, %v1088_v13  ;;  %v861_v28 = vshrl.u32 %v843_v24, %v859_v15 }
 0x7bb   :  { %v1005_v54 = vshll.u32 %v5250_v61, 30  ;;  %vm1091_vm13 = vcmp.lt.s32.totalorder %v5243_v52, 1  ;;  %vm1094_vm8 = vcmp.lt.s32.totalorder %v5243_v52, 4  ;;  %vm1093_vm14 = vcmp.lt.s32.totalorder %v5243_v52, 3 }
 0x7bc   :  { %v865_v5 = vshll.u32 %v864_v16, 23  ;;  %v1099_v4 = vsel %vm1091_vm13, %v5254_v19, %v5256_v58  ;;  %v1100_v10 = vsel %vm1094_vm8, %v1087_v12, 920167782  ;;  %v1103_v21 = vsel %vm1091_vm13, %v5256_v58, %v5258_v22 }
 0x7bd   :  { %v1006_v31 = vsub.s32 %v1002_v45, %v1005_v54  ;;  %v1104_v35 = vsel %vm1094_vm8, %v1090_v25, 1326507024  ;;  %vm1092_vm15 = vcmp.lt.s32.totalorder %v5243_v52, 2  ;;  %v1101_v38 = vsel %vm1093_vm14, %v5258_v22, %v1100_v10 }
 0x7be   :  { %v866_v0 = vor.u32 4788187, %v865_v5  ;;  %v1105_v39 = vsel %vm1093_vm14, %v1087_v12, %v1104_v35  ;;  %v5289_v56 = vadd.f32 %v745_v33, %v694_v36  ;;  %v862_v57 = vor.u32 %v861_v28, %v860_v7 }
 0x7bf   :  { %vm1007_vm10 = vcmp.lt.s32.totalorder %v1006_v31, 0  ;;  %v1008_v1 = vsub.s32 0, %v1006_v31  ;;  %v1102_v45 = vsel %vm1092_vm15, %v1099_v4, %v1101_v38  ;;  %v1106_v46 = vsel %vm1092_vm15, %v1103_v21, %v1105_v39 }
 0x7c0   :  { %v1108_v27 = vand.u32 65535, %v5264_v26  ;;  %v1110_v48 = vand.u32 65535, %v1106_v46  ;;  %v1111_v49 = vshrl.u32 %v1106_v46, 16  ;;  %v867_v50 = vand.u32 2147483647, %v866_v0 }
 0x7c1   :  { %v1009_v44 = vsel %vm1007_vm10, %v1008_v1, %v1006_v31  ;;  %v1109_v59 = vshrl.u32 %v5264_v26, 16  ;;  %v1133_v30 = vshrl.u32 %v1102_v45, 16  ;;  %v869_v60 = vcvt.s32.f32 %v862_v57 }
 0x7c2   :  { %v1010_v47 = vclz %v1009_v44  ;;  %v1113_v36 = vmul.u32 %v1111_v49, %v1108_v27  ;;  %v998_v3 = vadd.s32 %v5223_v29, %v5226_v32  ;;  %v1214_v11 = vand.u32 2147483647, %v5289_v56 }
 0x7c3   :  { %v1114_v63 = vmul.u32 %v1110_v48, %v1109_v59  ;;  %v1112_v13 = vmul.u32 %v1110_v48, %v1108_v27  ;;  %v1132_v16 = vand.u32 65535, %v1102_v45  ;;  %v870_v18 = vmul.f32 %v869_v60, %v867_v50 }
 0x7c4   :  { %v4413_v34 = vadd.s32 4294967294, %v1010_v47  ;;  %v1116_v15 = vshll.u32 %v1113_v36, 16  ;;  %v1075_v24 = vshrl.u32 %v4785_v6, %v5233_v55  ;;  %v1135_v5 = vmul.u32 %v1133_v30, %v1108_v27 }
 0x7c5   :  { %v1115_v25 = vmul.u32 %v1111_v49, %v1109_v59  ;;  %v1118_v33 = vshll.u32 %v1114_v63, 16  ;;  %v1136_v35 = vmul.u32 %v1132_v16, %v1109_v59  ;;  %v1134_v0 = vmul.u32 %v1132_v16, %v1108_v27 }
 0x7c6   :  { %vm4414_vm1 = vcmp.lt.s32.totalorder %v4413_v34, 0  ;;  %vm1120_vm2 = vc.u32 %v1112_v13, %v1116_v15  ;;  %v1122_v32 = vadd.s32 %v1116_v15, %v1112_v13  ;;  %v1138_v1 = vshll.u32 %v1135_v5, 16 }
 0x7c7   :  { %v1013_v12 = vsel %vm4414_vm1, 0, %v4413_v34  ;;  %v1121_v29 = vsel %vm1120_vm2, 1, %v4783_v8  ;;  %v1217_v38 = vand.u32 2139095040, %v5289_v56  ;;  %v1096_v57 = vsel %vm1094_vm8, %v5258_v22, 2102212464 }
 0x7c8   :  { %v1014_v54 = vsub.s32 32, %v1013_v12  ;;  %v1018_v7 = vsub.s32 4294967266, %v1013_v12  ;;  %v1015_v28 = vshll.u32 %v1006_v31, %v1013_v12  ;;  %v1123_v21 = vadd.s32 %v1121_v29, %v1115_v25 }
 0x7c9   :  { %vm1124_vm3 = vc.u32 %v1122_v32, %v1118_v33  ;;  %v1117_v44 = vshrl.u32 %v1113_v36, 16  ;;  %v1137_v46 = vmul.u32 %v1133_v30, %v1109_v59  ;;  %vm1142_vm4 = vc.u32 %v1134_v0, %v1138_v1 }
 0x7ca   :  { %v1016_v4 = vshrl.u32 %v998_v3, %v1014_v54  ;;  %v1019_v10 = vadd.s32 127, %v1018_v7  ;;  %v1125_v31 = vsel %vm1124_vm3, 1, %v4783_v8  ;;  %v1140_v48 = vshll.u32 %v1136_v35, 16 }
 0x7cb   :  { %v1127_v45 = vadd.s32 %v1125_v31, %v1123_v21  ;;  %v1143_v49 = vsel %vm1142_vm4, 1, %v4783_v8  ;;  %v1144_v27 = vadd.s32 %v1138_v1, %v1134_v0  ;;  %v871_v50 = vxor.u32 2147483648, %v870_v18 }
 0x7cc   :  { %v1017_v55 = vor.u32 %v1016_v4, %v1015_v28  ;;  %v1020_v39 = vshll.u32 %v1019_v10, 23  ;;  %v1145_v60 = vadd.s32 %v1143_v49, %v1137_v46  ;;  %v1218_v3 = vshrl.u32 %v1217_v38, 23 }
 0x7cd   :  { %v1128_v34 = vadd.s32 %v1127_v45, %v1117_v44  ;;  %v1095_v22 = vsel %vm1091_vm13, %v1075_v24, %v5254_v19  ;;  %vm1146_vm5 = vc.u32 %v1144_v27, %v1140_v48  ;;  %v1097_v59 = vsel %vm1093_vm14, %v5256_v58, %v1096_v57 }
 0x7ce   :  { %v1021_v47 = vor.u32 4788187, %v1020_v39  ;;  %v1024_v15 = vcvt.s32.f32 %v1017_v55  ;;  %v1119_v30 = vshrl.u32 %v1114_v63, 16  ;;  %v1147_v36 = vsel %vm1146_vm5, 1, %v4783_v8 }
 0x7cf   :  { %v4418_v16 = vadd.s32 4294967169, %v1218_v3  ;;  %v1139_v54 = vshrl.u32 %v1135_v5, 16  ;;  %v1149_v7 = vadd.s32 %v1147_v36, %v1145_v60  ;;  %v872_v25 = vsel %vm751_vm6, %v871_v50, %v870_v18 }
 0x7d0   :  { %v1022_v13 = vand.u32 2147483647, %v1021_v47  ;;  %v5319_v28 = vadd.s32 %v1128_v34, %v1119_v30  ;;  %v1098_v58 = vsel %vm1092_vm15, %v1095_v22, %v1097_v59  ;;  %v1141_v63 = vshrl.u32 %v1136_v35, 16 }
 0x7d1   :  { %v1224_v19 = vadd.s32 1, %v4418_v16  ;;  %v1150_v33 = vadd.s32 %v1149_v7, %v1139_v54  ;;  %v5329_v5 = vadd.s32 %v1144_v27, %v1140_v48  ;;  %v1221_v18 = vand.u32 8388607, %v1214_v11 }
 0x7d2   :  { %v1025_v12 = vmul.f32 %v1024_v15, %v1022_v13  ;;  %v5336_v32 = vsel %vm5323_vm7, %v5056_v40, %v872_v25  ;;  %vm5342_vm12 = vcmp.le.f32.partialorder %v904_v2, 0.7853982  ;;  %vm906_vm13 = vcmp.lt.s32.totalorder %v5060_v41, 0 }
 0x7d3   :  { %vm1225_vm9 = vcmp.gt.s32.totalorder %v1224_v19, 0  ;;  %v1151_v43 = vadd.s32 %v1150_v33, %v1141_v63  ;;  %vm1154_vm11 = vc.u32 %v5319_v28, %v5329_v5  ;;  %v1152_v21 = vmul.u32 %v5264_v26, %v1098_v58 }
 0x7d4   :  { %v1026_v29 = vxor.u32 2147483648, %v1025_v12  ;;  %v1226_v4 = vsel %vm1225_vm9, %v1224_v19, 0  ;;  %v5350_v0 = vmul.f32 %v5336_v32, %v5336_v32  ;;  %v1222_v38 = vor.u32 8388608, %v1221_v18 }
 0x7d5   :  { %v1228_v52 = vand.u32 31, %v1226_v4  ;;  %v1155_v35 = vadd.s32 1, %v1151_v43  ;;  %v5354_v57 = vshrl.u32 %v1226_v4, 5 }
 0x7d6   :  { %v1027_v1 = vsel %vm906_vm13, %v1026_v29, %v1025_v12  ;;  %v885_v13 = vmul.f32 -0.00019511016, %v5350_v0  ;;  %v5379_v16 = vshll.u32 %v1222_v38, 8 }
 0x7d7   :  { %v1229_v55 = vsub.s32 32, %v1228_v52  ;;  %v1156_v39 = vsel %vm1154_vm11, %v1155_v35, %v1151_v43  ;;  %v1231_v2 = vshll.u32 %v4785_v6, %v1228_v52  ;;  %v1234_v31 = vshll.u32 %v4786_v9, %v1228_v52 }
 0x7d8   :  { %v1157_v44 = vadd.s32 %v1156_v39, %v1152_v21  ;;  %v1237_v46 = vshll.u32 %v4787_v14, %v1228_v52  ;;  %v1240_v48 = vshll.u32 %v4788_v17, %v1228_v52  ;;  %v1243_v3 = vshll.u32 %v4789_v20, %v1228_v52 }
 0x7d9   :  { %v1232_v26 = vshrl.u32 %v4786_v9, %v1229_v55  ;;  %v1235_v45 = vshrl.u32 %v4787_v14, %v1229_v55  ;;  %v1238_v47 = vshrl.u32 %v4788_v17, %v1229_v55  ;;  %v1241_v49 = vshrl.u32 %v4789_v20, %v1229_v55 }
 0x7da   :  { %v1244_v27 = vshrl.u32 %v4790_v23, %v1229_v55  ;;  %v1158_v50 = vadd.s32 536870912, %v1157_v44  ;;  %v5374_v15 = vsel %vm5342_vm12, %v5060_v41, %v1027_v1  ;;  %vm1246_vm8 = vcmp.lt.s32.totalorder %v5354_v57, 1 }
 0x7db   :  { %v5365_v34 = vor.u32 %v1232_v26, %v1231_v2  ;;  %v5367_v60 = vor.u32 %v1235_v45, %v1234_v31  ;;  %v1239_v22 = vor.u32 %v1238_v47, %v1237_v46  ;;  %v1242_v59 = vor.u32 %v1241_v49, %v1240_v48 }
 0x7dc   :  { %v5376_v30 = vshrl.u32 %v1158_v50, 30  ;;  %v1245_v36 = vor.u32 %v1244_v27, %v1243_v3  ;;  %vm1249_vm10 = vcmp.lt.s32.totalorder %v5354_v57, 4  ;;  %v5388_v54 = vmul.f32 %v5374_v15, %v5374_v15 }
 0x7dd   :  { %v1254_v12 = vsel %vm1246_vm8, %v5365_v34, %v5367_v60  ;;  %vm1248_vm14 = vcmp.lt.s32.totalorder %v5354_v57, 3  ;;  %v1255_v25 = vsel %vm1249_vm10, %v1242_v59, 920167782  ;;  %v886_v19 = vadd.f32 0.008332121, %v885_v13 }
 0x7de   :  { %v1160_v7 = vshll.u32 %v5376_v30, 30  ;;  %vm1247_vm15 = vcmp.lt.s32.totalorder %v5354_v57, 2  ;;  %v1256_v58 = vsel %vm1248_vm14, %v1239_v22, %v1255_v25  ;;  %v1258_v63 = vsel %vm1246_vm8, %v5367_v60, %v1239_v22  ;;  %v4492_v57 = vld [vmem:[%s6535_s6 + $0x70] sm:$0xf] }
 0x7df   :  { %v1257_v29 = vsel %vm1247_vm15, %v1254_v12, %v1256_v58  ;;  %v1259_v18 = vsel %vm1249_vm10, %v1245_v36, 1326507024  ;;  %v1263_v43 = vand.u32 65535, %v5379_v16  ;;  %v1264_v52 = vshrl.u32 %v5379_v16, 16 }
 0x7e0   :  { %v1161_v33 = vsub.s32 %v1157_v44, %v1160_v7  ;;  %v1260_v4 = vsel %vm1248_vm14, %v1242_v59, %v1259_v18  ;;  %v1287_v21 = vand.u32 65535, %v1257_v29  ;;  %v1288_v35 = vshrl.u32 %v1257_v29, 16 }
 0x7e1   :  { %v1040_v1 = vmul.f32 -0.00019511016, %v5388_v54  ;;  %v1261_v39 = vsel %vm1247_vm15, %v1258_v63, %v1260_v4  ;;  %v887_v2 = vmul.f32 %v886_v19, %v5350_v0  ;;  %v1153_v26 = vadd.s32 %v5329_v5, %v5319_v28 }
 0x7e2   :  { %vm1162_vm1 = vcmp.lt.s32.totalorder %v1161_v33, 0  ;;  %v1163_v38 = vsub.s32 0, %v1161_v33  ;;  %v1265_v31 = vand.u32 65535, %v1261_v39  ;;  %v1266_v44 = vshrl.u32 %v1261_v39, 16 }
 0x7e3   :  { %v1290_v46 = vmul.u32 %v1288_v35, %v1263_v43  ;;  %v1291_v47 = vmul.u32 %v1287_v21, %v1264_v52  ;;  %v1230_v49 = vshrl.u32 %v4785_v6, %v1229_v55  ;;  %v1041_v3 = vadd.f32 0.008332121, %v1040_v1 }
 0x7e4   :  { %v1164_v45 = vsel %vm1162_vm1, %v1163_v38, %v1161_v33  ;;  %v1268_v27 = vmul.u32 %v1266_v44, %v1263_v43  ;;  %v1269_v50 = vmul.u32 %v1265_v31, %v1264_v52  ;;  %v1289_v13 = vmul.u32 %v1287_v21, %v1263_v43 }
 0x7e5   :  { %v1165_v48 = vclz %v1164_v45  ;;  %v1292_v59 = vmul.u32 %v1288_v35, %v1264_v52  ;;  %v1293_v36 = vshll.u32 %v1290_v46, 16  ;;  %v1267_v7 = vmul.u32 %v1265_v31, %v1263_v43 }
 0x7e6   :  { %v1270_v25 = vmul.u32 %v1266_v44, %v1264_v52  ;;  %v1271_v19 = vshll.u32 %v1268_v27, 16  ;;  %v1273_v58 = vshll.u32 %v1269_v50, 16  ;;  %v1295_v63 = vshll.u32 %v1291_v47, 16 }
 0x7e7   :  { %v4416_v12 = vadd.s32 4294967294, %v1165_v48  ;;  %vm1297_vm2 = vc.u32 %v1289_v13, %v1293_v36  ;;  %v1299_v28 = vadd.s32 %v1293_v36, %v1289_v13  ;;  %v1251_v43 = vsel %vm1249_vm10, %v1239_v22, 2102212464 }
 0x7e8   :  { %vm1275_vm4 = vc.u32 %v1267_v7, %v1271_v19  ;;  %v1277_v5 = vadd.s32 %v1271_v19, %v1267_v7  ;;  %v1298_v29 = vsel %vm1297_vm2, 1, %v4783_v8  ;;  %v1294_v38 = vshrl.u32 %v1290_v46, 16 }
 0x7e9   :  { %vm4417_vm3 = vcmp.lt.s32.totalorder %v4416_v12, 0  ;;  %v1276_v18 = vsel %vm1275_vm4, 1, %v4783_v8  ;;  %v1300_v4 = vadd.s32 %v1298_v29, %v1292_v59  ;;  %vm1301_vm5 = vc.u32 %v1299_v28, %v1295_v63 }
 0x7ea   :  { %v1168_v55 = vsel %vm4417_vm3, 0, %v4416_v12  ;;  %v1278_v52 = vadd.s32 %v1276_v18, %v1270_v25  ;;  %vm1279_vm9 = vc.u32 %v1277_v5, %v1273_v58  ;;  %v1302_v39 = vsel %vm1301_vm5, 1, %v4783_v8 }
 0x7eb   :  { %v1169_v21 = vsub.s32 32, %v1168_v55  ;;  %v1173_v35 = vsub.s32 4294967266, %v1168_v55  ;;  %v1170_v1 = vshll.u32 %v1161_v33, %v1168_v55  ;;  %v1280_v45 = vsel %vm1279_vm9, 1, %v4783_v8 }
 0x7ec   :  { %v1304_v48 = vadd.s32 %v1302_v39, %v1300_v4  ;;  %v1250_v13 = vsel %vm1246_vm8, %v1230_v49, %v5365_v34  ;;  %v1252_v59 = vsel %vm1248_vm14, %v5367_v60, %v1251_v43  ;;  %v1272_v22 = vshrl.u32 %v1268_v27, 16  ;;  %v4494_v43 = vld [vmem:[%s6535_s6 + $0x78] sm:$0xf0] }
 0x7ed   :  { %v1171_v31 = vshrl.u32 %v1153_v26, %v1169_v21  ;;  %v1174_v44 = vadd.s32 127, %v1173_v35  ;;  %v1282_v36 = vadd.s32 %v1280_v45, %v1278_v52  ;;  %v1296_v46 = vshrl.u32 %v1291_v47, 16  ;;  %v4711_v21 = vld [vmem:[%s6535_s6 + $0xf4] sm:$0xf0]  ;;  %v4694_v35 = vld [vmem:[%s6535_s6 + $0x74] sm:$0xf] }
 0x7ee   :  { %v1305_v7 = vadd.s32 %v1304_v48, %v1294_v38  ;;  %v1274_v25 = vshrl.u32 %v1269_v50, 16  ;;  %v888_v19 = vadd.f32 -0.16666654, %v887_v2  ;;  %vm5429_vm11 = vcmp.le.f32.partialorder %v1059_v53, 0.7853982 }
 0x7ef   :  { %v1172_v33 = vor.u32 %v1171_v31, %v1170_v1  ;;  %v1175_v12 = vshll.u32 %v1174_v44, 23  ;;  %v1283_v26 = vadd.s32 %v1282_v36, %v1272_v22  ;;  %v1253_v49 = vsel %vm1247_vm15, %v1250_v13, %v1252_v59  ;;  %v4710_v31 = vld [vmem:[%s6535_s6 + $0xf4] sm:$0xf]  ;;  %v4558_v44 = vld [vmem:[%s6535_s6 + $0xf8] sm:$0xf0] }
 0x7f0   :  { %v1306_v60 = vadd.s32 %v1305_v7, %v1296_v46  ;;  %v1042_v27 = vmul.f32 %v1041_v3, %v5388_v54  ;;  %vm1061_vm8 = vcmp.lt.s32.totalorder %v5074_v62, 0  ;;  %v5439_v50 = vadd.s32 %v1299_v28, %v1295_v63  ;;  %v4695_v3 = vld [vmem:[%s6535_s6 + $0x74] sm:$0xf0]  ;;  %v4556_v63 = vld [vmem:[%s6535_s6 + $0xf0] sm:$0xf] }
 0x7f1   :  { %v1176_v34 = vor.u32 4788187, %v1175_v12  ;;  %v5437_v47 = vadd.s32 %v1283_v26, %v1274_v25  ;;  %v873_v2 = vsub.s32 4, %v5203_v51  ;;  %v1179_v53 = vcvt.s32.f32 %v1172_v33  ;;  %v4484_v33 = vld [vmem:[%s6535_s6 + $0x60] sm:$0xf] }
 0x7f2   :  { %v1310_v29 = vadd.s32 1, %v1306_v60  ;;  %v1307_v55 = vmul.u32 %v5379_v16, %v1253_v49  ;;  %v889_v28 = vmul.f32 %v888_v19, %v5350_v0  ;;  %v4493_v16 = vor.u32 %v4695_v3, %v4492_v57  ;;  %v4693_v12 = vld [vmem:[%s6535_s6 + $0x64] sm:$0xf0]  ;;  %v4548_v25 = vld [vmem:[%s6535_s6 + $0xe0] sm:$0xf] }
 0x7f3   :  { %v1177_v5 = vand.u32 2147483647, %v1176_v34  ;;  %vm1309_vm10 = vc.u32 %v5437_v47, %v5439_v50  ;;  %v5464_v52 = vadd.f32 -0.16666654, %v1042_v27  ;;  %v4557_v38 = vor.u32 %v4711_v21, %v4556_v63  ;;  %v4709_v26 = vld [vmem:[%s6535_s6 + $0xe4] sm:$0xf0] }
 0x7f4   :  { %v1311_v4 = vsel %vm1309_vm10, %v1310_v29, %v1306_v60  ;;  %v4497_v39 = vor.u32 %v4694_v35, %v4494_v43  ;;  %2207 = vmatpush.bf16.msra.mxu2 %v4493_v16  ;;  %v4561_v48 = vor.u32 %v4710_v31, %v4558_v44  ;;  %v878_v13 = vmul.f32 -0.001358992, %v5350_v0  ;;  %v4692_v19 = vld [vmem:[%s6535_s6 + $0x64] sm:$0xf]  ;;  %v4550_v57 = vld [vmem:[%s6535_s6 + $0xe8] sm:$0xf0] }
 0x7f5   :  { %v1180_v18 = vmul.f32 %v1179_v53, %v1177_v5  ;;  %v1312_v1 = vadd.s32 %v1311_v4, %v1307_v55  ;;  %v1033_v59 = vmul.f32 -0.001358992, %v5388_v54  ;;  %v1028_v22 = vsub.s32 4, %v5250_v61  ;;  %2221 = vmatpush.bf16.msra.mxu3 %v4557_v38  ;;  %v4486_v5 = vld [vmem:[%s6535_s6 + $0x68] sm:$0xf0] }
 0x7f6   :  { %2235 = vmatpush.bf16.msrb.mxu0 %v4497_v39  ;;  %2249 = vmatpush.bf16.msrb.mxu1 %v4561_v48  ;;  %v4485_v7 = vor.u32 %v4693_v12, %v4484_v33  ;;  %v5492_v34 = vadd.f32 1.0, %v889_v28  ;;  %v4549_v27 = vor.u32 %v4709_v26, %v4548_v25  ;;  %v4708_v53 = vld [vmem:[%s6535_s6 + $0xe4] sm:$0xf]  ;;  %v4489_v55 = vor.u32 %v4692_v19, %v4486_v5  ;;  %v4476_v16 = vld [vmem:[%s6535_s6 + $0x50] sm:$0xf] }
 0x7f7   :  { %v1181_v45 = vxor.u32 2147483648, %v1180_v18  ;;  %v1313_v36 = vadd.s32 536870912, %v1312_v1  ;;  %v879_v3 = vadd.f32 0.041655596, %v878_v13  ;;  %v5514_v63 = vadd.f32 0.041655596, %v1033_v59 }
 0x7f8   :  { %2208 = vmatpush.bf16.msra.mxu2 %v4485_v7  ;;  %v1183_v28 = vsub.s32 4, %v5376_v30  ;;  %v4553_v4 = vor.u32 %v4708_v53, %v4550_v57  ;;  %v4691_v21 = vld [vmem:[%s6535_s6 + $0x54] sm:$0xf0]  ;;  %v4540_v38 = vld [vmem:[%s6535_s6 + $0xd0] sm:$0xf]  ;;  %v1044_v19 = vmul.f32 %v5464_v52, %v5388_v54  ;;  %v1308_v24 = vadd.s32 %v5439_v50, %v5437_v47 }
 0x7f9   :  { %v1182_v46 = vsel %vm1061_vm8, %v1181_v45, %v1180_v18  ;;  %v5499_v60 = vshrl.u32 %v1313_v36, 30  ;;  %2222 = vmatpush.bf16.msra.mxu3 %v4549_v27  ;;  %v4477_v43 = vor.u32 %v4691_v21, %v4476_v16  ;;  %v4707_v39 = vld [vmem:[%s6535_s6 + $0xd4] sm:$0xf0]  ;;  %v880_v31 = vmul.f32 %v879_v3, %v5350_v0  ;;  %v4690_v48 = vld [vmem:[%s6535_s6 + $0x54] sm:$0xf] }
 0x7fa   :  { %v5497_v49 = vsel %vm5429_vm11, %v5074_v62, %v1182_v46  ;;  %2236 = vmatpush.bf16.msrb.mxu0 %v4489_v55  ;;  %2250 = vmatpush.bf16.msrb.mxu1 %v4553_v4  ;;  %v4541_v45 = vor.u32 %v4707_v39, %v4540_v38  ;;  %v4478_v13 = vld [vmem:[%s6535_s6 + $0x58] sm:$0xf0]  ;;  %v4706_v59 = vld [vmem:[%s6535_s6 + $0xd4] sm:$0xf]  ;;  %v4468_v25 = vld [vmem:[%s6535_s6 + $0x40] sm:$0xf]  ;;  %v874_v39 = vsel %vm751_vm6, %v873_v2, %v5203_v51  ;;  %vm892_vm10 = vweird.f32 %v5056_v40 }
 0x7fb   :  { %v5509_v29 = vmul.f32 %v5497_v49, %v5497_v49  ;;  %v1315_v18 = vshll.u32 %v5499_v60, 30  ;;  %v4481_v33 = vor.u32 %v4690_v48, %v4478_v13  ;;  %v881_v12 = vadd.f32 -0.4999988, %v880_v31  ;;  %v4689_v26 = vld [vmem:[%s6535_s6 + $0x44] sm:$0xf0] }
 0x7fc   :  { %2209 = vmatpush.bf16.msra.mxu2 %v4477_v43  ;;  %v4469_v5 = vor.u32 %v4689_v26, %v4468_v25  ;;  %v4532_v53 = vld [vmem:[%s6535_s6 + $0xc0] sm:$0xf]  ;;  %v4705_v55 = vld [vmem:[%s6535_s6 + $0xc4] sm:$0xf0]  ;;  %v4688_v57 = vld [vmem:[%s6535_s6 + $0x44] sm:$0xf]  ;;  %v1029_v31 = vsel %vm906_vm13, %v1028_v22, %v5250_v61  ;;  %v1184_v2 = vsel %vm1061_vm8, %v1183_v28, %v5376_v30 }
 0x7fd   :  { %v1195_v35 = vmul.f32 -0.00019511016, %v5509_v29  ;;  %v5532_v44 = vsub.s32 %v1312_v1, %v1315_v18  ;;  %v4542_v1 = vld [vmem:[%s6535_s6 + $0xd8] sm:$0xf0]  ;;  %2223 = vmatpush.bf16.msra.mxu3 %v4541_v45  ;;  %v4533_v52 = vor.u32 %v4705_v55, %v4532_v53  ;;  %v4470_v18 = vld [vmem:[%s6535_s6 + $0x48] sm:$0xf0]  ;;  %v882_v10 = vmul.f32 %v881_v12, %v5350_v0 }
 0x7fe   :  { %v4545_v7 = vor.u32 %v4706_v59, %v4542_v1  ;;  %2237 = vmatpush.bf16.msrb.mxu0 %v4481_v33  ;;  %v4704_v4 = vld [vmem:[%s6535_s6 + $0xc4] sm:$0xf]  ;;  %v4534_v16 = vld [vmem:[%s6535_s6 + $0xc8] sm:$0xf0]  ;;  %v4473_v43 = vor.u32 %v4688_v57, %v4470_v18  ;;  %v4460_v45 = vld [vmem:[%s6535_s6 + $0x30] sm:$0xf]  ;;  %v5606_v33 = vmul.f32 %v5492_v34, %v5336_v32 }
 0x7ff   :  { %v1196_v36 = vadd.f32 0.008332121, %v1195_v35  ;;  %vm1317_vm14 = vcmp.lt.s32.totalorder %v5532_v44, 0  ;;  %v1318_v46 = vsub.s32 0, %v5532_v44  ;;  %v4537_v38 = vor.u32 %v4704_v4, %v4534_v16  ;;  %v4687_v48 = vld [vmem:[%s6535_s6 + $0x34] sm:$0xf0] }
 0x800   :  { %2251 = vmatpush.bf16.msrb.mxu1 %v4545_v7  ;;  %2210 = vmatpush.bf16.msra.mxu2 %v4469_v5  ;;  %v4524_v13 = vld [vmem:[%s6535_s6 + $0xb0] sm:$0xf]  ;;  %v1045_v51 = vadd.f32 1.0, %v1044_v19  ;;  %v4461_v61 = vor.u32 %v4687_v48, %v4460_v45  ;;  %v4703_v22 = vld [vmem:[%s6535_s6 + $0xb4] sm:$0xf0]  ;;  %vm1216_vm6 = vcmp.lt.s32.totalorder %v5289_v56, 0 }
 0x801   :  { %v1197_v27 = vmul.f32 %v1196_v36, %v5509_v29  ;;  %v1319_v3 = vsel %vm1317_vm14, %v1318_v46, %v5532_v44  ;;  %2224 = vmatpush.bf16.msra.mxu3 %v4533_v52  ;;  %v4686_v36 = vld [vmem:[%s6535_s6 + $0x34] sm:$0xf]  ;;  %v4525_v30 = vor.u32 %v4703_v22, %v4524_v13  ;;  %v4462_v28 = vld [vmem:[%s6535_s6 + $0x38] sm:$0xf0]  ;;  %v876_v25 = vsel %vm5323_vm7, 0, %v874_v39 }
 0x802   :  { %v1320_v35 = vclz %v1319_v3  ;;  %2238 = vmatpush.bf16.msrb.mxu0 %v4473_v43  ;;  %v4702_v46 = vld [vmem:[%s6535_s6 + $0xb4] sm:$0xf]  ;;  %v4526_v7 = vld [vmem:[%s6535_s6 + $0xb8] sm:$0xf0]  ;;  %v4465_v32 = vor.u32 %v4686_v36, %v4462_v28  ;;  %v1031_v19 = vsel %vm5342_vm12, 0, %v1029_v31  ;;  %v1186_v5 = vsel %vm5429_vm11, 0, %v1184_v2 }
 0x803   :  { %v1198_v21 = vadd.f32 -0.16666654, %v1197_v27  ;;  %v4529_v34 = vor.u32 %v4702_v46, %v4526_v7  ;;  %v1035_v27 = vmul.f32 %v5514_v63, %v5388_v54  ;;  %vm5629_vm15 = vcmp.le.f32.partialorder %v1214_v11, 0.7853982  ;;  %v4701_v40 = vld [vmem:[%s6535_s6 + $0xa4] sm:$0xf0] }
 0x804   :  { %v4419_v59 = vadd.s32 4294967294, %v1320_v35  ;;  %2252 = vmatpush.bf16.msrb.mxu1 %v4537_v38  ;;  %2211 = vmatpush.bf16.msra.mxu2 %v4461_v61  ;;  %v1188_v63 = vmul.f32 -0.001358992, %v5509_v29  ;;  %v1522_v58 = vand.u32 3, %v876_v25  ;;  %v893_v52 = vadd.s32 3, %v876_v25 }
 0x805   :  { %v1199_v1 = vmul.f32 %v1198_v21, %v5509_v29  ;;  %2225 = vmatpush.bf16.msra.mxu3 %v4525_v30  ;;  %v1338_v16 = vsub.s32 4, %v5499_v60  ;;  %v5640_v21 = vmul.f32 %v1045_v51, %v5374_v15  ;;  %v1036_v47 = vadd.f32 -0.4999988, %v1035_v27 }
 0x806   :  { %vm4420_vm13 = vcmp.lt.s32.totalorder %v4419_v59, 0  ;;  %2239 = vmatpush.bf16.msrb.mxu0 %v4465_v32  ;;  %v1189_v50 = vadd.f32 0.041655596, %v1188_v63  ;;  %v1830_v35 = vand.u32 3, %v1186_v5  ;;  %v883_v12 = vadd.f32 1.0, %v882_v10 }
 0x807   :  { %v1323_v26 = vsel %vm4420_vm13, 0, %v4419_v59  ;;  %v1200_v3 = vadd.f32 1.0, %v1199_v1  ;;  %v5642_v38 = vand.u32 3, %v1031_v19  ;;  %vm1523_vm7 = vcmp.lt.s32.totalorder %v1522_v58, 2 }
 0x808   :  { %v1324_v55 = vsub.s32 32, %v1323_v26  ;;  %v1328_v57 = vsub.s32 4294967266, %v1323_v26  ;;  %2253 = vmatpush.bf16.msrb.mxu1 %v4529_v34  ;;  %v1325_v18 = vshll.u32 %v5532_v44, %v1323_v26  ;;  %v1190_v44 = vmul.f32 %v1189_v50, %v5509_v29 }
 0x809   :  { %v5645_v39 = vmul.f32 %v1200_v3, %v5497_v49  ;;  %vm1524_vm12 = vcmp.eq.s32.totalorder %v1522_v58, 0  ;;  %vm1527_vm1 = vcmp.eq.s32.totalorder %v1522_v58, 2  ;;  %v1339_v15 = vsel %vm1216_vm6, %v1338_v16, %v5499_v60  ;;  %v4452_v58 = vld [vmem:[%s6535_s6 + $0x20] sm:$0xf] }
 0x80a   :  { %v1326_v11 = vshrl.u32 %v1308_v24, %v1324_v55  ;;  %v1329_v4 = vadd.s32 127, %v1328_v57  ;;  %v897_v45 = vxor.u32 2147483648, %v5606_v33  ;;  %v894_v48 = vand.u32 3, %v893_v52 }
 0x80b   :  { %v1037_v13 = vmul.f32 %v1036_v47, %v5388_v54  ;;  %v1191_v51 = vadd.f32 -0.4999988, %v1190_v44  ;;  %vm1831_vm2 = vcmp.lt.s32.totalorder %v1830_v35, 2  ;;  %v1048_v2 = vadd.s32 3, %v1031_v19 }
 0x80c   :  { %v1327_v43 = vor.u32 %v1326_v11, %v1325_v18  ;;  %v1330_v0 = vshll.u32 %v1329_v4, 23  ;;  %v900_v61 = vxor.u32 2147483648, %v883_v12  ;;  %vm1832_vm3 = vcmp.eq.s32.totalorder %v1830_v35, 0  ;;  %v4685_v18 = vld [vmem:[%s6535_s6 + $0x24] sm:$0xf0]  ;;  %v5704_v4 = vpop.permute.xlu2 %1995 }
 0x80d   :  { %v1192_v22 = vmul.f32 %v1191_v51, %v5509_v29  ;;  %v1207_v36 = vxor.u32 2147483648, %v5645_v39  ;;  %v5657_v1 = vsel %vm5629_vm15, 0, %v1339_v15  ;;  %vm1835_vm4 = vcmp.eq.s32.totalorder %v1830_v35, 2  ;;  %v4516_v11 = vld [vmem:[%s6535_s6 + $0xa0] sm:$0xf] }
 0x80e   :  { %v1331_v31 = vor.u32 4788187, %v1330_v0  ;;  %v1334_v59 = vcvt.s32.f32 %v1327_v43  ;;  %v1052_v30 = vxor.u32 2147483648, %v5640_v21  ;;  %v1526_v54 = vsel %vm1524_vm12, %v883_v12, %v897_v45  ;;  %v4684_v35 = vld [vmem:[%s6535_s6 + $0x24] sm:$0xf] }
 0x80f   :  { %vm1678_vm5 = vcmp.eq.s32.totalorder %v5642_v38, 0  ;;  %vm896_vm9 = vcmp.eq.s32.totalorder %v894_v48, 0  ;;  %v5662_v28 = vadd.f32 1.0, %v1037_v13  ;;  %v1193_v46 = vadd.f32 1.0, %v1192_v22  ;;  %v4454_v43 = vld [vmem:[%s6535_s6 + $0x28] sm:$0xf0] }
 0x810   :  { %v1332_v49 = vand.u32 2147483647, %v1331_v31  ;;  %v898_v7 = vsel %vm896_vm9, %v883_v12, %v897_v45  ;;  %v1203_v29 = vadd.s32 3, %v1186_v5  ;;  %v1529_v34 = vsel %vm1527_vm1, %v900_v61, %v5606_v33  ;;  %v4700_v31 = vld [vmem:[%s6535_s6 + $0xa4] sm:$0xf] }
 0x811   :  { %v5667_v25 = vand.u32 3, %v5657_v1  ;;  %vm899_vm11 = vcmp.eq.s32.totalorder %v894_v48, 2  ;;  %v1210_v26 = vxor.u32 2147483648, %v1193_v46  ;;  %v1834_v19 = vsel %vm1832_vm3, %v1193_v46, %v1207_v36  ;;  %v4518_v15 = vld [vmem:[%s6535_s6 + $0xa8] sm:$0xf0] }
 0x812   :  { %v1335_v60 = vmul.f32 %v1334_v59, %v1332_v49  ;;  %vm895_vm8 = vcmp.lt.s32.totalorder %v894_v48, 2  ;;  %v901_v27 = vsel %vm899_vm11, %v900_v61, %v5606_v33  ;;  %v1530_v55 = vsel %vm1523_vm7, %v1526_v54, %v1529_v34  ;;  %v4444_v45 = vld [vmem:[%s6535_s6 + $0x10] sm:$0xf]  ;;  %v4683_v51 = vld [vmem:[%s6535_s6 + $0x14] sm:$0xf0]  ;;  %v5748_v54 = vpop.permute.xlu1 %1371 }
 0x813   :  { %v902_v5 = vsel %vm895_vm8, %v898_v7, %v901_v27  ;;  %v1204_v57 = vand.u32 3, %v1203_v29  ;;  %v1055_v3 = vxor.u32 2147483648, %v5662_v28  ;;  %v1837_v63 = vsel %vm1835_vm4, %v1210_v26, %v5645_v39  ;;  %v4682_v29 = vld [vmem:[%s6535_s6 + $0x14] sm:$0xf] }
 0x814   :  { %v1336_v32 = vxor.u32 2147483648, %v1335_v60  ;;  %v5682_v52 = vand.u32 3, %v1048_v2  ;;  %vm1202_vm14 = vweird.f32 %v5074_v62  ;;  %v1838_v53 = vsel %vm1831_vm2, %v1834_v19, %v1837_v63  ;;  %v4508_v2 = vld [vmem:[%s6535_s6 + $0x90] sm:$0xf]  ;;  %v4698_v27 = vld [vmem:[%s6535_s6 + $0x94] sm:$0xf] }
 0x815   :  { %v1531_v16 = vsel %vm892_vm10, nan, %v1530_v55  ;;  %v1839_v47 = vsel %vm1202_vm14, nan, %v1838_v53  ;;  %v903_v50 = vsel %vm892_vm10, nan, %v902_v5  ;;  %vm1206_vm13 = vcmp.eq.s32.totalorder %v1204_v57, 0  ;;  %v4436_v55 = vld [vmem:[%s6535_s6] sm:$0xf] }
 0x816   :  { %v1337_v24 = vsel %vm1216_vm6, %v1336_v32, %v1335_v60  ;;  %vm1681_vm6 = vcmp.eq.s32.totalorder %v5642_v38, 2  ;;  %v1208_v44 = vsel %vm1206_vm13, %v1193_v46, %v1207_v36  ;;  %v5730_v48 = vsel %vm1678_vm5, %v5662_v28, %v1052_v30  ;;  %v4699_v36 = vld [vmem:[%s6535_s6 + $0x94] sm:$0xf0]  ;;  %v4446_v32 = vld [vmem:[%s6535_s6 + $0x18] sm:$0xf0] }
 0x817   :  { %v5677_v10 = vsel %vm5629_vm15, %v5289_v56, %v1337_v24  ;;  %vm1209_vm15 = vcmp.eq.s32.totalorder %v1204_v57, 2  ;;  %vm1051_vm7 = vcmp.eq.s32.totalorder %v5682_v52, 0  ;;  %vm1205_vm12 = vcmp.lt.s32.totalorder %v1204_v57, 2  ;;  %v4510_v24 = vld [vmem:[%s6535_s6 + $0x98] sm:$0xf0] }
 0x818   :  { %v5686_v33 = vmul.f32 %v5677_v10, %v5677_v10  ;;  %v1211_v13 = vsel %vm1209_vm15, %v1210_v26, %v5645_v39  ;;  %vm1677_vm1 = vcmp.lt.s32.totalorder %v5642_v38, 2  ;;  %v1998_v61 = vmul.f32 %v5704_v4, %v1531_v16  ;;  %v4681_v53 = vld [vmem:[%s6535_s6 + $0x4] sm:$0xf0] }
 0x819   :  { %v1212_v22 = vsel %vm1205_vm12, %v1208_v44, %v1211_v13  ;;  %v2000_v39 = vmul.f32 %v5704_v4, %v1839_v47  ;;  %v4453_v46 = vor.u32 %v4685_v18, %v4452_v58  ;;  %v4517_v7 = vor.u32 %v4701_v40, %v4516_v11  ;;  %v4500_v58 = vld [vmem:[%s6535_s6 + $0x80] sm:$0xf]  ;;  %v4697_v47 = vld [vmem:[%s6535_s6 + $0x84] sm:$0xf0]  ;;  %v4680_v44 = vld [vmem:[%s6535_s6 + $0x4] sm:$0xf] }
 0x81a   :  { %v1350_v0 = vmul.f32 -0.00019511016, %v5686_v33  ;;  %v1343_v12 = vmul.f32 -0.001358992, %v5686_v33  ;;  %v1213_v60 = vsel %vm1202_vm14, nan, %v1212_v22  ;;  %v4457_v62 = vor.u32 %v4684_v35, %v4454_v43 }
 0x81b   :  { %v1376_v19 = vmul.f32 %v5748_v54, %v1213_v60  ;;  %2212 = vmatpush.bf16.msra.mxu2 %v4453_v46  ;;  %2226 = vmatpush.bf16.msra.mxu3 %v4517_v7  ;;  %v4521_v5 = vor.u32 %v4700_v31, %v4518_v15  ;;  %v4445_v57 = vor.u32 %v4683_v51, %v4444_v45  ;;  %v4791_v35 = vmov 2   ;;  %v4438_v31 = vld [vmem:[%s6535_s6 + $0x8] sm:$0xf0]  ;;  %v5807_v51 = vld [vmem:[%s6532_s1 + $0x10] ss:$0 sm:$0xff] }
 0x81c   :  { %v1351_v49 = vadd.f32 0.008332121, %v1350_v0  ;;  %v1344_v59 = vadd.f32 0.041655596, %v1343_v12  ;;  %v4509_v63 = vor.u32 %v4699_v36, %v4508_v2  ;;  %v1374_v40 = vmul.f32 %v5748_v54, %v903_v50  ;;  %2240 = vmatpush.bf16.msrb.mxu0 %v4457_v62  ;;  %4743 = vset.pattern.permute.xlu0 %v4791_v35 }
 0x81d   :  { %v4449_v16 = vor.u32 %v4682_v29, %v4446_v32  ;;  %v1683_v43 = vsel %vm1681_vm6, %v1055_v3, %v5640_v21  ;;  %v1053_v50 = vsel %vm1051_vm7, %v5662_v28, %v1052_v30  ;;  %v1358_v0 = vadd.s32 3, %v5657_v1  ;;  %2254 = vmatpush.bf16.msrb.mxu1 %v4521_v5  ;;  %v4696_v1 = vld [vmem:[%s6535_s6 + $0x84] sm:$0xf]  ;;  %v4502_v30 = vld [vmem:[%s6535_s6 + $0x88] sm:$0xf0]  ;;  %2884 = vperm.xlu0 %4743, %v5807_v51  }
 0x81e   :  { %v1352_v34 = vmul.f32 %v1351_v49, %v5686_v33  ;;  %v1345_v26 = vmul.f32 %v1344_v59, %v5686_v33  ;;  %v4513_v12 = vor.u32 %v4698_v27, %v4510_v24  ;;  %vm1054_vm2 = vcmp.eq.s32.totalorder %v5682_v52, 2 }
 0x81f   :  { %v2004_v13 = vadd.f32 %v2000_v39, %v1376_v19  ;;  %vm1050_vm3 = vcmp.lt.s32.totalorder %v5682_v52, 2  ;;  %2213 = vmatpush.bf16.msra.mxu2 %v4445_v57  ;;  %2227 = vmatpush.bf16.msra.mxu3 %v4509_v63  ;;  %v4437_v2 = vor.u32 %v4681_v53, %v4436_v55  ;;  %v4501_v49 = vor.u32 %v4697_v47, %v4500_v58  ;;  %v5836_v53 = vld [vmem:[%s6532_s1 + $0x6] ss:$8 sm:$0x3] }
 0x820   :  { %v1353_v18 = vadd.f32 -0.16666654, %v1352_v34  ;;  %v1346_v11 = vadd.f32 -0.4999988, %v1345_v26  ;;  %v2002_v36 = vadd.f32 %v1998_v61, %v1374_v40  ;;  %2241 = vmatpush.bf16.msrb.mxu0 %v4449_v16  ;;  %v4441_v39 = vor.u32 %v4680_v44, %v4438_v31 }
 0x821   :  { %v1684_v60 = vsel %vm1677_vm1, %v5730_v48, %v1683_v43  ;;  %v1359_v7 = vand.u32 3, %v1358_v0  ;;  %2255 = vmatpush.bf16.msrb.mxu1 %v4513_v12  ;;  %v4505_v52 = vor.u32 %v4696_v1, %v4502_v30  ;;  %vm1047_vm4 = vweird.f32 %v5060_v41 }
 0x822   :  { %v1354_v15 = vmul.f32 %v1353_v18, %v5686_v33  ;;  %v1347_v45 = vmul.f32 %v1346_v11, %v5686_v33  ;;  %v1056_v33 = vsel %vm1054_vm2, %v1055_v3, %v5640_v21  ;;  %v2006_v3 = vpack.c.bf16 %v2004_v13, %v2002_v36 }
 0x823   :  { %v1057_v46 = vsel %vm1050_vm3, %v1053_v50, %v1056_v33  ;;  %vm1357_vm5 = vweird.f32 %v5289_v56  ;;  %vm1985_vm9 = vcmp.lt.s32.totalorder %v5667_v25, 2  ;;  %2214 = vmatpush.bf16.msra.mxu2 %v4437_v2  ;;  %2228 = vmatpush.bf16.msra.mxu3 %v4501_v49  ;;  %v1685_v29 = vsel %vm1047_vm4, nan, %v1684_v60 }
 0x824   :  { %v1355_v59 = vadd.f32 1.0, %v1354_v15  ;;  %v1348_v22 = vadd.f32 1.0, %v1347_v45  ;;  %vm1986_vm11 = vcmp.eq.s32.totalorder %v5667_v25, 0  ;;  %v1058_v38 = vsel %vm1047_vm4, nan, %v1057_v46  ;;  %2242 = vmatpush.bf16.msrb.mxu0 %v4441_v39 }
 0x825   :  { %vm1989_vm8 = vcmp.eq.s32.totalorder %v5667_v25, 2  ;;  %vm1360_vm10 = vcmp.lt.s32.totalorder %v1359_v7, 2  ;;  %vm1361_vm14 = vcmp.eq.s32.totalorder %v1359_v7, 0  ;;  %vm1364_vm6 = vcmp.eq.s32.totalorder %v1359_v7, 2  ;;  %2256 = vmatpush.bf16.msrb.mxu1 %v4505_v52 }
 0x826   :  { %v1356_v28 = vmul.f32 %v1355_v59, %v5677_v10  ;;  %v1365_v21 = vxor.u32 2147483648, %v1348_v22  ;;  %2215 = vmatmul.bf16.vlgmr.msra.gmra.mxu2 %v2006_v3  ;;  %v1999_v26 = vmul.f32 %v5704_v4, %v1685_v29  ;;  %v1375_v62 = vmul.f32 %v5748_v54, %v1058_v38 }
 0x827   :  { %2243 = vmatmul.bf16.vlgmr.msrb.gmra.mxu0 %v2006_v3  ;;  %v2044_v58 = vperm.slane %v5836_v53, 1  ;;  %v2043_v56 = vperm.slane %v5836_v53, 0 }
 0x828   :  { %v1362_v61 = vxor.u32 2147483648, %v1356_v28  ;;  %v1991_v41 = vsel %vm1989_vm8, %v1365_v21, %v1356_v28  ;;  %v1366_v32 = vsel %vm1364_vm6, %v1365_v21, %v1356_v28  ;;  %v2003_v57 = vadd.f32 %v1999_v26, %v1375_v62 }
 0x82a   :  { %v1988_v10 = vsel %vm1986_vm11, %v1348_v22, %v1362_v61  ;;  %v1363_v48 = vsel %vm1361_vm14, %v1348_v22, %v1362_v61 }
 0x82b   :  { %v1992_v34 = vsel %vm1985_vm9, %v1988_v10, %v1991_v41  ;;  %v1367_v19 = vsel %vm1360_vm10, %v1363_v48, %v1366_v32 }
 0x82c   :  { %v1993_v27 = vsel %vm1357_vm5, nan, %v1992_v34  ;;  %v1368_v24 = vsel %vm1357_vm5, nan, %v1367_v19 }
 0x82d   :  { %v2001_v55 = vmul.f32 %v5704_v4, %v1993_v27  ;;  %v1377_v5 = vmul.f32 %v5748_v54, %v1368_v24 }
 0x82f   :  { %v2005_v63 = vadd.f32 %v2001_v55, %v1377_v5 }
 0x831   :  { %v2007_v25 = vpack.c.bf16 %v2005_v63, %v2003_v57 }
 0x833   :  { %2229 = vmatmul.bf16.vlgmr.msra.gmra.mxu3 %v2007_v25  ;;  %2257 = vmatmul.bf16.vlgmr.msrb.gmra.mxu1 %v2007_v25 }
 0x8a4   :  { %v2244_v18 = vpop.f32.mrf.mxu0 }
 0x8a5   :  { %v2245_v11 = vadd.f32 %v2244_v18, %v2044_v58 }
 0x8a9   :  { %v2216_v4 = vpop.f32.mrf.mxu2 }
 0x8aa   :  { %v2217_v35 = vadd.f32 %v2216_v4, %v2043_v56 }
 0x8ac   :  { %v2246_v43 = vpop.f32.mrf.mxu0 }
 0x8ad   :  { %v2247_v45 = vadd.f32 %v2246_v43, %v2044_v58 }
 0x8b0   :  { %v2258_v40 = vpop.f32.mrf.mxu1 }
 0x8b1   :  { %v5840_v16 = vadd.f32 %v2258_v40, %v2245_v11 }
 0x8b3   :  { %v2418_v54 = vand.u32 2147483647, %v5840_v16  ;;  %v2421_v47 = vand.u32 2139095040, %v5840_v16 }
 0x8b5   :  { %v2422_v50 = vshrl.u32 %v2421_v47, 23  ;;  %v2425_v0 = vand.u32 8388607, %v2418_v54 }
 0x8b6   :  { %v2230_v12 = vpop.f32.mrf.mxu3 }
 0x8b7   :  { %v4565_v44 = vadd.s32 4294967169, %v2422_v50  ;;  %v2426_v31 = vor.u32 8388608, %v2425_v0  ;;  %v5848_v15 = vadd.f32 %v2230_v12, %v2217_v35 }
 0x8b8   :  { %v2260_v33 = vpop.f32.mrf.mxu1 }
 0x8b9   :  { %v2428_v13 = vadd.s32 1, %v4565_v44  ;;  %v2263_v1 = vand.u32 2147483647, %v5848_v15  ;;  %v2266_v30 = vand.u32 2139095040, %v5848_v15  ;;  %v5852_v2 = vshll.u32 %v2426_v31, 8 }
 0x8ba   :  { %v5854_v49 = vadd.f32 %v2260_v33, %v2247_v45 }
 0x8bb   :  { %vm2429_vm13 = vcmp.gt.s32.totalorder %v2428_v13, 0  ;;  %v2267_v22 = vshrl.u32 %v2266_v30, 23  ;;  %v2270_v36 = vand.u32 8388607, %v2263_v1  ;;  %v2467_v7 = vand.u32 65535, %v5852_v2 }
 0x8bc   :  { %v2430_v59 = vsel %vm2429_vm13, %v2428_v13, 0  ;;  %v2731_v28 = vand.u32 2139095040, %v5854_v49  ;;  %v2468_v0 = vshrl.u32 %v5852_v2, 16 }
 0x8bd   :  { %v2432_v39 = vand.u32 31, %v2430_v59  ;;  %v2431_v60 = vshrl.u32 %v2430_v59, 5  ;;  %v4562_v52 = vadd.s32 4294967169, %v2267_v22  ;;  %v2271_v29 = vor.u32 8388608, %v2270_v36 }
 0x8be   :  { %v5882_v59 = vshrl.u32 %v2731_v28, 23 }
 0x8bf   :  { %v2433_v46 = vsub.s32 32, %v2432_v39  ;;  %v2435_v21 = vshll.u32 %v4785_v6, %v2432_v39  ;;  %v2438_v3 = vshll.u32 %v4786_v9, %v2432_v39  ;;  %v2441_v61 = vshll.u32 %v4787_v14, %v2432_v39 }
 0x8c0   :  { %v2444_v48 = vshll.u32 %v4788_v17, %v2432_v39  ;;  %v2447_v34 = vshll.u32 %v4789_v20, %v2432_v39  ;;  %vm2450_vm15 = vcmp.lt.s32.totalorder %v2431_v60, 1  ;;  %v2273_v24 = vadd.s32 1, %v4562_v52 }
 0x8c1   :  { %v2436_v38 = vshrl.u32 %v4786_v9, %v2433_v46  ;;  %v2439_v10 = vshrl.u32 %v4787_v14, %v2433_v46  ;;  %v2442_v41 = vshrl.u32 %v4788_v17, %v2433_v46  ;;  %v2445_v32 = vshrl.u32 %v4789_v20, %v2433_v46 }
 0x8c2   :  { %v2448_v26 = vshrl.u32 %v4790_v23, %v2433_v46  ;;  %vm2451_vm7 = vcmp.lt.s32.totalorder %v2431_v60, 2  ;;  %vm2453_vm12 = vcmp.lt.s32.totalorder %v2431_v60, 4  ;;  %v2434_v57 = vshrl.u32 %v4785_v6, %v2433_v46 }
 0x8c3   :  { %v2437_v19 = vor.u32 %v2436_v38, %v2435_v21  ;;  %v2440_v62 = vor.u32 %v2439_v10, %v2438_v3  ;;  %v2443_v27 = vor.u32 %v2442_v41, %v2441_v61  ;;  %v2446_v55 = vor.u32 %v2445_v32, %v2444_v48 }
 0x8c4   :  { %v2449_v5 = vor.u32 %v2448_v26, %v2447_v34  ;;  %vm2452_vm1 = vcmp.lt.s32.totalorder %v2431_v60, 3  ;;  %vm2274_vm2 = vcmp.gt.s32.totalorder %v2273_v24, 0  ;;  %v5880_v33 = vshll.u32 %v2271_v29, 8 }
 0x8c5   :  { %v2455_v63 = vsel %vm2453_vm12, %v2443_v27, 2102212464  ;;  %v2458_v25 = vsel %vm2450_vm15, %v2437_v19, %v2440_v62  ;;  %v2462_v58 = vsel %vm2450_vm15, %v2440_v62, %v2443_v27  ;;  %v2459_v18 = vsel %vm2453_vm12, %v2446_v55, 920167782 }
 0x8c6   :  { %v2463_v11 = vsel %vm2453_vm12, %v2449_v5, 1326507024  ;;  %v2454_v40 = vsel %vm2450_vm15, %v2434_v57, %v2437_v19  ;;  %v2456_v4 = vsel %vm2452_vm1, %v2440_v62, %v2455_v63  ;;  %v2460_v47 = vsel %vm2452_vm1, %v2443_v27, %v2459_v18 }
 0x8c7   :  { %v2464_v35 = vsel %vm2452_vm1, %v2446_v55, %v2463_v11  ;;  %v2461_v43 = vsel %vm2451_vm7, %v2458_v25, %v2460_v47  ;;  %v2275_v12 = vsel %vm2274_vm2, %v2273_v24, 0  ;;  %v5878_v30 = vsel %vm2451_vm7, %v2454_v40, %v2456_v4 }
 0x8c8   :  { %v2465_v50 = vsel %vm2451_vm7, %v2462_v58, %v2464_v35  ;;  %v2491_v45 = vand.u32 65535, %v2461_v43  ;;  %v2492_v13 = vshrl.u32 %v2461_v43, 16  ;;  %v5884_v39 = vshrl.u32 %v2275_v12, 5 }
 0x8c9   :  { %v2469_v44 = vand.u32 65535, %v2465_v50  ;;  %v2470_v31 = vshrl.u32 %v2465_v50, 16  ;;  %v2277_v46 = vand.u32 31, %v2275_v12 }
 0x8ca   :  { %v2494_v3 = vmul.u32 %v2492_v13, %v2467_v7  ;;  %v2495_v61 = vmul.u32 %v2491_v45, %v2468_v0  ;;  %v2493_v41 = vmul.u32 %v2491_v45, %v2467_v7  ;;  %v2496_v48 = vmul.u32 %v2492_v13, %v2468_v0 }
 0x8cb   :  { %v2472_v22 = vmul.u32 %v2470_v31, %v2467_v7  ;;  %v2473_v36 = vmul.u32 %v2469_v44, %v2468_v0  ;;  %v2471_v52 = vmul.u32 %v2469_v44, %v2467_v7  ;;  %v2474_v21 = vmul.u32 %v2470_v31, %v2468_v0 }
 0x8cc   :  { %v2497_v34 = vshll.u32 %v2494_v3, 16  ;;  %v2498_v29 = vshrl.u32 %v2494_v3, 16  ;;  %v2499_v26 = vshll.u32 %v2495_v61, 16  ;;  %v2278_v19 = vsub.s32 32, %v2277_v46 }
 0x8cd   :  { %v2475_v38 = vshll.u32 %v2472_v22, 16  ;;  %v2476_v10 = vshrl.u32 %v2472_v22, 16  ;;  %v2477_v60 = vshll.u32 %v2473_v36, 16  ;;  %v2478_v32 = vshrl.u32 %v2473_v36, 16 }
 0x8ce   :  { %v2500_v27 = vshrl.u32 %v2495_v61, 16  ;;  %vm2501_vm4 = vc.u32 %v2493_v41, %v2497_v34  ;;  %v2503_v24 = vadd.s32 %v2497_v34, %v2493_v41  ;;  %v2280_v7 = vshll.u32 %v4785_v6, %v2277_v46 }
 0x8cf   :  { %vm2479_vm3 = vc.u32 %v2471_v52, %v2475_v38  ;;  %v2481_v28 = vadd.s32 %v2475_v38, %v2471_v52  ;;  %v2502_v5 = vsel %vm2501_vm4, 1, %v4783_v8  ;;  %v2283_v25 = vshll.u32 %v4786_v9, %v2277_v46 }
 0x8d0   :  { %v2480_v62 = vsel %vm2479_vm3, 1, %v4783_v8  ;;  %v2504_v63 = vadd.s32 %v2502_v5, %v2496_v48  ;;  %vm2505_vm9 = vc.u32 %v2503_v24, %v2499_v26  ;;  %v2281_v11 = vshrl.u32 %v4786_v9, %v2278_v19 }
 0x8d1   :  { %v2482_v55 = vadd.s32 %v2480_v62, %v2474_v21  ;;  %vm2483_vm5 = vc.u32 %v2481_v28, %v2477_v60  ;;  %v2506_v18 = vsel %vm2505_vm9, 1, %v4783_v8  ;;  %v2284_v40 = vshrl.u32 %v4787_v14, %v2278_v19 }
 0x8d2   :  { %v2484_v57 = vsel %vm2483_vm5, 1, %v4783_v8  ;;  %v2508_v4 = vadd.s32 %v2506_v18, %v2504_v63  ;;  %v2286_v47 = vshll.u32 %v4787_v14, %v2277_v46  ;;  %v2287_v35 = vshrl.u32 %v4788_v17, %v2278_v19 }
 0x8d3   :  { %v2486_v58 = vadd.s32 %v2484_v57, %v2482_v55  ;;  %v2289_v43 = vshll.u32 %v4788_v17, %v2277_v46  ;;  %v2282_v0 = vor.u32 %v2281_v11, %v2280_v7  ;;  %v2285_v12 = vor.u32 %v2284_v40, %v2283_v25 }
 0x8d4   :  { %v2290_v44 = vshrl.u32 %v4789_v20, %v2278_v19  ;;  %v2509_v31 = vadd.s32 %v2508_v4, %v2498_v29  ;;  %v2288_v45 = vor.u32 %v2287_v35, %v2286_v47  ;;  %v2292_v13 = vshll.u32 %v4789_v20, %v2277_v46 }
 0x8d5   :  { %v2487_v50 = vadd.s32 %v2486_v58, %v2476_v10  ;;  %v2293_v22 = vshrl.u32 %v4790_v23, %v2278_v19  ;;  %v5902_v52 = vadd.s32 %v2503_v24, %v2499_v26  ;;  %vm2295_vm11 = vcmp.lt.s32.totalorder %v5884_v39, 1 }
 0x8d6   :  { %v2291_v21 = vor.u32 %v2290_v44, %v2289_v43  ;;  %v2510_v3 = vadd.s32 %v2509_v31, %v2500_v27  ;;  %vm2298_vm8 = vcmp.lt.s32.totalorder %v5884_v39, 4  ;;  %v2303_v38 = vsel %vm2295_vm11, %v2282_v0, %v2285_v12 }
 0x8d7   :  { %v5900_v36 = vadd.s32 %v2487_v50, %v2478_v32  ;;  %v2294_v61 = vor.u32 %v2293_v22, %v2292_v13  ;;  %v2511_v10 = vmul.u32 %v5852_v2, %v5878_v30  ;;  %vm2297_vm14 = vcmp.lt.s32.totalorder %v5884_v39, 3 }
 0x8d8   :  { %v2304_v46 = vsel %vm2298_vm8, %v2291_v21, 920167782  ;;  %v2514_v41 = vadd.s32 1, %v2510_v3  ;;  %vm2296_vm6 = vcmp.lt.s32.totalorder %v5884_v39, 2  ;;  %v2307_v60 = vsel %vm2295_vm11, %v2285_v12, %v2288_v45 }
 0x8d9   :  { %vm2513_vm10 = vc.u32 %v5900_v36, %v5902_v52  ;;  %v2305_v48 = vsel %vm2297_vm14, %v2288_v45, %v2304_v46  ;;  %v2279_v32 = vshrl.u32 %v4785_v6, %v2278_v19  ;;  %v2308_v30 = vsel %vm2298_vm8, %v2294_v61, 1326507024 }
 0x8da   :  { %v2306_v2 = vsel %vm2296_vm6, %v2303_v38, %v2305_v48  ;;  %v2312_v34 = vand.u32 65535, %v5880_v33  ;;  %v2515_v29 = vsel %vm2513_vm10, %v2514_v41, %v2510_v3  ;;  %v2309_v28 = vsel %vm2297_vm14, %v2291_v21, %v2308_v30 }
 0x8db   :  { %v2336_v26 = vand.u32 65535, %v2306_v2  ;;  %v2337_v62 = vshrl.u32 %v2306_v2, 16  ;;  %v2516_v27 = vadd.s32 %v2515_v29, %v2511_v10  ;;  %v2300_v24 = vsel %vm2298_vm8, %v2288_v45, 2102212464 }
 0x8dc   :  { %v2310_v19 = vsel %vm2296_vm6, %v2307_v60, %v2309_v28  ;;  %v2313_v55 = vshrl.u32 %v5880_v33, 16  ;;  %v2299_v25 = vsel %vm2295_vm11, %v2279_v32, %v2282_v0  ;;  %v2728_v18 = vand.u32 2147483647, %v5854_v49 }
 0x8dd   :  { %v2314_v5 = vand.u32 65535, %v2310_v19  ;;  %v2315_v7 = vshrl.u32 %v2310_v19, 16  ;;  %v2339_v57 = vmul.u32 %v2337_v62, %v2312_v34  ;;  %v2517_v63 = vadd.s32 536870912, %v2516_v27 }
 0x8de   :  { %v2340_v58 = vmul.u32 %v2336_v26, %v2313_v55  ;;  %v2301_v11 = vsel %vm2297_vm14, %v2285_v12, %v2300_v24  ;;  %v4571_v47 = vadd.s32 4294967169, %v5882_v59  ;;  %v2338_v43 = vmul.u32 %v2336_v26, %v2312_v34 }
 0x8df   :  { %v2317_v40 = vmul.u32 %v2315_v7, %v2312_v34  ;;  %v2318_v4 = vmul.u32 %v2314_v5, %v2313_v55  ;;  %v5939_v35 = vshrl.u32 %v2517_v63, 30  ;;  %v2341_v50 = vmul.u32 %v2337_v62, %v2313_v55 }
 0x8e0   :  { %v2342_v44 = vshll.u32 %v2339_v57, 16  ;;  %v2316_v31 = vmul.u32 %v2314_v5, %v2312_v34  ;;  %v2319_v45 = vmul.u32 %v2315_v7, %v2313_v55  ;;  %v2344_v22 = vshll.u32 %v2340_v58, 16 }
 0x8e1   :  { %v2320_v13 = vshll.u32 %v2317_v40, 16  ;;  %v2519_v0 = vshll.u32 %v5939_v35, 30  ;;  %v2322_v21 = vshll.u32 %v2318_v4, 16  ;;  %v2738_v38 = vadd.s32 1, %v4571_v47 }
 0x8e2   :  { %vm2346_vm13 = vc.u32 %v2338_v43, %v2342_v44  ;;  %v2348_v3 = vadd.s32 %v2342_v44, %v2338_v43  ;;  %v2343_v48 = vshrl.u32 %v2339_v57, 16  ;;  %v2321_v34 = vshrl.u32 %v2317_v40, 16 }
 0x8e3   :  { %vm2324_vm15 = vc.u32 %v2316_v31, %v2320_v13  ;;  %v2326_v12 = vadd.s32 %v2320_v13, %v2316_v31  ;;  %v2347_v61 = vsel %vm2346_vm13, 1, %v4783_v8  ;;  %v5943_v59 = vsub.s32 %v2516_v27, %v2519_v0 }
 0x8e4   :  { %v2325_v10 = vsel %vm2324_vm15, 1, %v4783_v8  ;;  %v2349_v46 = vadd.s32 %v2347_v61, %v2341_v50  ;;  %vm2350_vm7 = vc.u32 %v2348_v3, %v2344_v22  ;;  %vm2739_vm2 = vcmp.gt.s32.totalorder %v2738_v38, 0 }
 0x8e5   :  { %v2327_v41 = vadd.s32 %v2325_v10, %v2319_v45  ;;  %vm2328_vm12 = vc.u32 %v2326_v12, %v2322_v21  ;;  %v2351_v60 = vsel %vm2350_vm7, 1, %v4783_v8  ;;  %vm2521_vm1 = vcmp.lt.s32.totalorder %v5943_v59, 0 }
 0x8e6   :  { %v2522_v32 = vsub.s32 0, %v5943_v59  ;;  %v2329_v2 = vsel %vm2328_vm12, 1, %v4783_v8  ;;  %v2353_v30 = vadd.s32 %v2351_v60, %v2349_v46  ;;  %v2345_v26 = vshrl.u32 %v2340_v58, 16 }
 0x8e7   :  { %v2331_v29 = vadd.s32 %v2329_v2, %v2327_v41  ;;  %v2740_v27 = vsel %vm2739_vm2, %v2738_v38, 0  ;;  %v4792_v24 = vmov 3   ;;  %v2323_v55 = vshrl.u32 %v2318_v4, 16 }
 0x8e8   :  { %v2523_v28 = vsel %vm2521_vm1, %v2522_v32, %v5943_v59  ;;  %v2354_v62 = vadd.s32 %v2353_v30, %v2343_v48  ;;  %4744 = vset.pattern.permute.xlu2 %v4792_v24  ;;  %v2742_v7 = vand.u32 31, %v2740_v27  ;;  %v2302_v57 = vsel %vm2296_vm6, %v2299_v25, %v2301_v11 }
 0x8e9   :  { %v2524_v19 = vclz %v2523_v28  ;;  %v2332_v5 = vadd.s32 %v2331_v29, %v2321_v34  ;;  %3508 = vperm.xlu2 %4744, %v5807_v51   ;;  %v5956_v47 = vadd.s32 %v2348_v3, %v2344_v22  ;;  %v2735_v58 = vand.u32 8388607, %v2728_v18 }
 0x8ea   :  { %v2355_v63 = vadd.s32 %v2354_v62, %v2345_v26  ;;  %v5960_v43 = vsub.s32 32, %v2742_v7  ;;  %v2356_v4 = vmul.u32 %v5880_v33, %v2302_v57  ;;  %v2745_v45 = vshll.u32 %v4785_v6, %v2742_v7  ;;  %v2218_v62 = vpop.f32.mrf.mxu2 }
 0x8eb   :  { %v5954_v40 = vadd.s32 %v2332_v5, %v2323_v55  ;;  %v4566_v50 = vadd.s32 4294967294, %v2524_v19  ;;  %v2736_v31 = vor.u32 8388608, %v2735_v58  ;;  %v2748_v13 = vshll.u32 %v4786_v9, %v2742_v7 }
 0x8ec   :  { %v2359_v44 = vadd.s32 1, %v2355_v63  ;;  %v2746_v39 = vshrl.u32 %v4786_v9, %v5960_v43  ;;  %v2749_v25 = vshrl.u32 %v4787_v14, %v5960_v43  ;;  %v2752_v33 = vshrl.u32 %v4788_v17, %v5960_v43 }
 0x8ed   :  { %vm2358_vm3 = vc.u32 %v5954_v40, %v5956_v47  ;;  %vm4567_vm4 = vcmp.lt.s32.totalorder %v4566_v50, 0  ;;  %v2754_v22 = vshll.u32 %v4788_v17, %v2742_v7  ;;  %v2755_v0 = vshrl.u32 %v4789_v20, %v5960_v43 }
 0x8ee   :  { %v2360_v51 = vsel %vm2358_vm3, %v2359_v44, %v2355_v63  ;;  %v5976_v3 = vshrl.u32 %v2740_v27, 5  ;;  %v5978_v12 = vor.u32 %v2746_v39, %v2745_v45  ;;  %v2751_v61 = vshll.u32 %v4787_v14, %v2742_v7 }
 0x8ef   :  { %v2361_v11 = vadd.s32 %v2360_v51, %v2356_v4  ;;  %v5981_v38 = vor.u32 %v2749_v25, %v2748_v13  ;;  %v2756_v10 = vor.u32 %v2755_v0, %v2754_v22  ;;  %v2757_v46 = vshll.u32 %v4789_v20, %v2742_v7  ;;  %v2232_v22 = vpop.f32.mrf.mxu3 }
 0x8f0   :  { %v2758_v41 = vshrl.u32 %v4790_v23, %v5960_v43  ;;  %v5986_v48 = vsel %vm4567_vm4, 0, %v4566_v50  ;;  %v2753_v32 = vor.u32 %v2752_v33, %v2751_v61  ;;  %vm2760_vm5 = vcmp.lt.s32.totalorder %v5976_v3, 1 }
 0x8f1   :  { %v2362_v21 = vadd.s32 536870912, %v2361_v11  ;;  %vm2763_vm9 = vcmp.lt.s32.totalorder %v5976_v3, 4  ;;  %v5993_v34 = vshll.u32 %v2736_v31, 8  ;;  %v2532_v29 = vsub.s32 4294967266, %v5986_v48 }
 0x8f2   :  { %v2759_v2 = vor.u32 %v2758_v41, %v2757_v46  ;;  %vm2762_vm11 = vcmp.lt.s32.totalorder %v5976_v3, 3  ;;  %v2768_v28 = vsel %vm2760_vm5, %v5978_v12, %v5981_v38  ;;  %v2769_v26 = vsel %vm2763_vm9, %v2756_v10, 920167782 }
 0x8f3   :  { %v5988_v60 = vshrl.u32 %v2362_v21, 30  ;;  %vm2761_vm8 = vcmp.lt.s32.totalorder %v5976_v3, 2  ;;  %v2770_v24 = vsel %vm2762_vm11, %v2753_v32, %v2769_v26  ;;  %v2772_v19 = vsel %vm2760_vm5, %v5981_v38, %v2753_v32 }
 0x8f4   :  { %v2771_v55 = vsel %vm2761_vm8, %v2768_v28, %v2770_v24  ;;  %v2773_v5 = vsel %vm2763_vm9, %v2759_v2, 1326507024  ;;  %v2219_v63 = vadd.f32 %v2218_v62, %v2043_v56  ;;  %v2533_v58 = vadd.s32 127, %v2532_v29 }
 0x8f5   :  { %v2364_v30 = vshll.u32 %v5988_v60, 30  ;;  %v2774_v57 = vsel %vm2762_vm11, %v2756_v10, %v2773_v5  ;;  %v2777_v44 = vand.u32 65535, %v5993_v34  ;;  %v2802_v4 = vshrl.u32 %v2771_v55, 16 }
 0x8f6   :  { %v2775_v50 = vsel %vm2761_vm8, %v2772_v19, %v2774_v57  ;;  %v2778_v39 = vshrl.u32 %v5993_v34, 16  ;;  %v2801_v45 = vand.u32 65535, %v2771_v55  ;;  %v2512_v53 = vadd.s32 %v5902_v52, %v5900_v36 }
 0x8f7   :  { %v6003_v27 = vsub.s32 %v2361_v11, %v2364_v30  ;;  %v2779_v25 = vand.u32 65535, %v2775_v50  ;;  %v2780_v11 = vshrl.u32 %v2775_v50, 16  ;;  %v2804_v13 = vmul.u32 %v2802_v4, %v2777_v44 }
 0x8f8   :  { %v2528_v0 = vsub.s32 32, %v5986_v48  ;;  %v2534_v21 = vshll.u32 %v2533_v58, 23  ;;  %v6029_v10 = vadd.f32 %v2232_v22, %v2219_v63  ;;  %v2529_v46 = vshll.u32 %v5943_v59, %v5986_v48 }
 0x8f9   :  { %vm2366_vm10 = vcmp.lt.s32.totalorder %v6003_v27, 0  ;;  %v2367_v7 = vsub.s32 0, %v6003_v27  ;;  %v2782_v56 = vmul.u32 %v2780_v11, %v2777_v44  ;;  %v2783_v33 = vmul.u32 %v2779_v25, %v2778_v39 }
 0x8fa   :  { %v2744_v41 = vshrl.u32 %v4785_v6, %v5960_v43  ;;  %v2781_v2 = vmul.u32 %v2779_v25, %v2777_v44  ;;  %v2803_v29 = vmul.u32 %v2801_v45, %v2777_v44  ;;  %v2805_v36 = vmul.u32 %v2801_v45, %v2778_v39 }
 0x8fb   :  { %v2368_v51 = vsel %vm2366_vm10, %v2367_v7, %v6003_v27  ;;  %v2785_v30 = vshll.u32 %v2782_v56, 16  ;;  %v2807_v52 = vshll.u32 %v2804_v13, 16  ;;  %v2784_v28 = vmul.u32 %v2780_v11, %v2778_v39 }
 0x8fc   :  { %v2369_v31 = vclz %v2368_v51  ;;  %v2787_v26 = vshll.u32 %v2783_v33, 16  ;;  %v2530_v24 = vshrl.u32 %v2512_v53, %v2528_v0  ;;  %v2535_v19 = vor.u32 4788187, %v2534_v21 }
 0x8fd   :  { %vm2789_vm6 = vc.u32 %v2781_v2, %v2785_v30  ;;  %v2791_v62 = vadd.s32 %v2785_v30, %v2781_v2  ;;  %v2806_v5 = vmul.u32 %v2802_v4, %v2778_v39  ;;  %vm2811_vm15 = vc.u32 %v2803_v29, %v2807_v52 }
 0x8fe   :  { %v4563_v61 = vadd.s32 4294967294, %v2369_v31  ;;  %v2790_v55 = vsel %vm2789_vm6, 1, %v4783_v8  ;;  %v2765_v43 = vsel %vm2763_vm9, %v2753_v32, 2102212464  ;;  %v2786_v48 = vshrl.u32 %v2782_v56, 16 }
 0x8ff   :  { %v2792_v59 = vadd.s32 %v2790_v55, %v2784_v28  ;;  %vm2793_vm13 = vc.u32 %v2791_v62, %v2787_v26  ;;  %v2812_v63 = vsel %vm2811_vm15, 1, %v4783_v8  ;;  %v2809_v50 = vshll.u32 %v2805_v36, 16 }
 0x900   :  { %vm4564_vm14 = vcmp.lt.s32.totalorder %v4563_v61, 0  ;;  %v2794_v57 = vsel %vm2793_vm13, 1, %v4783_v8  ;;  %v2813_v44 = vadd.s32 %v2807_v52, %v2803_v29  ;;  %v2814_v51 = vadd.s32 %v2812_v63, %v2806_v5 }
 0x901   :  { %v2372_v7 = vsel %vm4564_vm14, 0, %v4563_v61  ;;  %v2796_v58 = vadd.s32 %v2794_v57, %v2792_v59  ;;  %v2576_v11 = vand.u32 2139095040, %v6029_v10  ;;  %v2531_v4 = vor.u32 %v2530_v24, %v2529_v46 }
 0x902   :  { %v2377_v25 = vsub.s32 4294967266, %v2372_v7  ;;  %v2764_v39 = vsel %vm2760_vm5, %v2744_v41, %v5978_v12  ;;  %vm2815_vm7 = vc.u32 %v2813_v44, %v2809_v50  ;;  %v2766_v32 = vsel %vm2762_vm11, %v5981_v38, %v2765_v43 }
 0x903   :  { %v2797_v31 = vadd.s32 %v2796_v58, %v2786_v48  ;;  %v2788_v45 = vshrl.u32 %v2783_v33, 16  ;;  %v2816_v53 = vsel %vm2815_vm7, 1, %v4783_v8  ;;  %v2577_v56 = vshrl.u32 %v2576_v11, 23 }
 0x904   :  { %v2536_v22 = vand.u32 2147483647, %v2535_v19  ;;  %v2373_v0 = vsub.s32 32, %v2372_v7  ;;  %v2808_v21 = vshrl.u32 %v2804_v13, 16  ;;  %v2818_v61 = vadd.s32 %v2816_v53, %v2814_v51 }
 0x905   :  { %v2378_v2 = vadd.s32 127, %v2377_v25  ;;  %v6048_v46 = vadd.s32 %v2797_v31, %v2788_v45  ;;  %v2573_v30 = vand.u32 2147483647, %v6029_v10  ;;  %v4568_v12 = vadd.s32 4294967169, %v2577_v56 }
 0x906   :  { %v2538_v41 = vcvt.s32.f32 %v2531_v4  ;;  %v2357_v29 = vadd.s32 %v5956_v47, %v5954_v40  ;;  %v2810_v52 = vshrl.u32 %v2805_v36, 16  ;;  %v2819_v38 = vadd.s32 %v2818_v61, %v2808_v21 }
 0x907   :  { %v6053_v33 = vadd.s32 %v2813_v44, %v2809_v50  ;;  %v2583_v28 = vadd.s32 1, %v4568_v12  ;;  %v2767_v13 = vsel %vm2761_vm8, %v2764_v39, %v2766_v32  ;;  %v2379_v19 = vshll.u32 %v2378_v2, 23 }
 0x908   :  { %v2539_v26 = vmul.f32 %v2538_v41, %v2536_v22  ;;  %v2375_v62 = vshrl.u32 %v2357_v29, %v2373_v0  ;;  %v2820_v24 = vadd.s32 %v2819_v38, %v2810_v52  ;;  %v2580_v55 = vand.u32 8388607, %v2573_v30 }
 0x909   :  { %vm2823_vm12 = vc.u32 %v6048_v46, %v6053_v33  ;;  %vm2584_vm1 = vcmp.gt.s32.totalorder %v2583_v28, 0  ;;  %v2374_v40 = vshll.u32 %v6003_v27, %v2372_v7  ;;  %v2821_v5 = vmul.u32 %v5993_v34, %v2767_v13 }
 0x90a   :  { %v2824_v47 = vadd.s32 1, %v2820_v24  ;;  %v2585_v36 = vsel %vm2584_vm1, %v2583_v28, 0  ;;  %v2540_v43 = vxor.u32 2147483648, %v2539_v26  ;;  %v2380_v57 = vor.u32 4788187, %v2379_v19 }
 0x90b   :  { %v2587_v59 = vand.u32 31, %v2585_v36  ;;  %v2376_v48 = vor.u32 %v2375_v62, %v2374_v40  ;;  %v2581_v58 = vor.u32 8388608, %v2580_v55  ;;  %v6065_v44 = vshrl.u32 %v2585_v36, 5 }
 0x90c   :  { %v2825_v3 = vsel %vm2823_vm12, %v2824_v47, %v2820_v24  ;;  %vm2420_vm2 = vcmp.lt.s32.totalorder %v5840_v16, 0  ;;  %v2381_v12 = vand.u32 2147483647, %v2380_v57  ;;  %vm6125_vm8 = vcmp.le.f32.partialorder %v2418_v54, 0.7853982 }
 0x90d   :  { %v2826_v63 = vadd.s32 %v2825_v3, %v2821_v5  ;;  %v6063_v50 = vsub.s32 32, %v2587_v59  ;;  %v2590_v51 = vshll.u32 %v4785_v6, %v2587_v59  ;;  %v2593_v25 = vshll.u32 %v4786_v9, %v2587_v59 }
 0x90e   :  { %v2596_v27 = vshll.u32 %v4787_v14, %v2587_v59  ;;  %v2599_v4 = vshll.u32 %v4788_v17, %v2587_v59  ;;  %v2602_v32 = vshll.u32 %v4789_v20, %v2587_v59  ;;  %v6089_v0 = vshll.u32 %v2581_v58, 8 }
 0x90f   :  { %v2827_v34 = vadd.s32 536870912, %v2826_v63  ;;  %v2591_v7 = vshrl.u32 %v4786_v9, %v6063_v50  ;;  %v2594_v11 = vshrl.u32 %v4787_v14, %v6063_v50  ;;  %v2597_v39 = vshrl.u32 %v4788_v17, %v6063_v50 }
 0x910   :  { %v2600_v31 = vshrl.u32 %v4789_v20, %v6063_v50  ;;  %v2603_v45 = vshrl.u32 %v4790_v23, %v6063_v50  ;;  %vm2605_vm3 = vcmp.lt.s32.totalorder %v6065_v44, 1  ;;  %vm2608_vm4 = vcmp.lt.s32.totalorder %v6065_v44, 4 }
 0x911   :  { %v6083_v53 = vshrl.u32 %v2827_v34, 30  ;;  %v6085_v56 = vor.u32 %v2591_v7, %v2590_v51  ;;  %v6087_v22 = vor.u32 %v2594_v11, %v2593_v25  ;;  %v6091_v21 = vor.u32 %v2597_v39, %v2596_v27 }
 0x912   :  { %v2601_v61 = vor.u32 %v2600_v31, %v2599_v4  ;;  %v2604_v2 = vor.u32 %v2603_v45, %v2602_v32  ;;  %vm2607_vm5 = vcmp.lt.s32.totalorder %v6065_v44, 3  ;;  %vm2606_vm9 = vcmp.lt.s32.totalorder %v6065_v44, 2  ;;  %v4726_v44 = vld [vmem:[%s6536_s7 + $0x70] sm:$0xff] }
 0x913   :  { %v2829_v41 = vshll.u32 %v6083_v53, 30  ;;  %v2613_v29 = vsel %vm2605_vm3, %v6085_v56, %v6087_v22  ;;  %v2617_v38 = vsel %vm2605_vm3, %v6087_v22, %v6091_v21  ;;  %v2622_v40 = vand.u32 65535, %v6089_v0 }
 0x914   :  { %v2614_v52 = vsel %vm2608_vm4, %v2601_v61, 920167782  ;;  %v2618_v28 = vsel %vm2608_vm4, %v2604_v2, 1326507024  ;;  %v2623_v47 = vshrl.u32 %v6089_v0, 16  ;;  %v2541_v3 = vsel %vm2420_vm2, %v2540_v43, %v2539_v26 }
 0x915   :  { %v2830_v62 = vsub.s32 %v2826_v63, %v2829_v41  ;;  %v2615_v13 = vsel %vm2607_vm5, %v6091_v21, %v2614_v52  ;;  %v2619_v24 = vsel %vm2607_vm5, %v2601_v61, %v2618_v28  ;;  %v2383_v57 = vcvt.s32.f32 %v2376_v48 }
 0x916   :  { %v2616_v19 = vsel %vm2606_vm9, %v2613_v29, %v2615_v13  ;;  %v2620_v55 = vsel %vm2606_vm9, %v2617_v38, %v2619_v24  ;;  %v6132_v39 = vsel %vm6125_vm8, %v5840_v16, %v2541_v3  ;;  %v2822_v26 = vadd.s32 %v6053_v33, %v6048_v46 }
 0x917   :  { %vm2831_vm11 = vcmp.lt.s32.totalorder %v2830_v62, 0  ;;  %v2832_v36 = vsub.s32 0, %v2830_v62  ;;  %v2624_v5 = vand.u32 65535, %v2620_v55  ;;  %v2625_v59 = vshrl.u32 %v2620_v55, 16 }
 0x918   :  { %v2646_v63 = vand.u32 65535, %v2616_v19  ;;  %v2647_v58 = vshrl.u32 %v2616_v19, 16  ;;  %v2384_v7 = vmul.f32 %v2383_v57, %v2381_v12  ;;  %vm2265_vm7 = vcmp.lt.s32.totalorder %v5848_v15, 0 }
 0x919   :  { %v2833_v51 = vsel %vm2831_vm11, %v2832_v36, %v2830_v62  ;;  %v2627_v25 = vmul.u32 %v2625_v59, %v2622_v40  ;;  %v2628_v27 = vmul.u32 %v2624_v5, %v2623_v47  ;;  %v2626_v43 = vmul.u32 %v2624_v5, %v2622_v40 }
 0x91a   :  { %v2834_v11 = vclz %v2833_v51  ;;  %v2649_v4 = vmul.u32 %v2647_v58, %v2622_v40  ;;  %v2629_v32 = vmul.u32 %v2625_v59, %v2623_v47  ;;  %v2648_v45 = vmul.u32 %v2646_v63, %v2622_v40 }
 0x91b   :  { %v2630_v48 = vshll.u32 %v2627_v25, 16  ;;  %v2632_v61 = vshll.u32 %v2628_v27, 16  ;;  %v2650_v12 = vmul.u32 %v2646_v63, %v2623_v47  ;;  %v2385_v41 = vxor.u32 2147483648, %v2384_v7 }
 0x91c   :  { %v4572_v31 = vadd.s32 4294967294, %v2834_v11  ;;  %v2652_v54 = vshll.u32 %v2649_v4, 16  ;;  %v2631_v29 = vshrl.u32 %v2627_v25, 16  ;;  %v2651_v24 = vmul.u32 %v2647_v58, %v2623_v47 }
 0x91d   :  { %vm2634_vm10 = vc.u32 %v2626_v43, %v2630_v48  ;;  %v2636_v2 = vadd.s32 %v2630_v48, %v2626_v43  ;;  %v2654_v55 = vshll.u32 %v2650_v12, 16  ;;  %v2589_v63 = vshrl.u32 %v4785_v6, %v6063_v50 }
 0x91e   :  { %vm4573_vm14 = vcmp.lt.s32.totalorder %v4572_v31, 0  ;;  %v2635_v52 = vsel %vm2634_vm10, 1, %v4783_v8  ;;  %vm2656_vm13 = vc.u32 %v2648_v45, %v2652_v54  ;;  %v2658_v36 = vadd.s32 %v2652_v54, %v2648_v45 }
 0x91f   :  { %v2837_v38 = vsel %vm4573_vm14, 0, %v4572_v31  ;;  %v2637_v28 = vadd.s32 %v2635_v52, %v2629_v32  ;;  %vm2638_vm6 = vc.u32 %v2636_v2, %v2632_v61  ;;  %v2657_v40 = vsel %vm2656_vm13, 1, %v4783_v8 }
 0x920   :  { %v2838_v46 = vsub.s32 32, %v2837_v38  ;;  %v2842_v33 = vsub.s32 4294967266, %v2837_v38  ;;  %v2639_v13 = vsel %vm2638_vm6, 1, %v4783_v8  ;;  %v2839_v5 = vshll.u32 %v2830_v62, %v2837_v38 }
 0x921   :  { %v2641_v19 = vadd.s32 %v2639_v13, %v2637_v28  ;;  %v2659_v57 = vadd.s32 %v2657_v40, %v2651_v24  ;;  %v2610_v51 = vsel %vm2608_vm4, %v6091_v21, 2102212464  ;;  %vm2660_vm15 = vc.u32 %v2658_v36, %v2654_v55 }
 0x922   :  { %v2840_v59 = vshrl.u32 %v2822_v26, %v2838_v46  ;;  %v2843_v3 = vadd.s32 127, %v2842_v33  ;;  %v2633_v58 = vshrl.u32 %v2628_v27, 16  ;;  %v2661_v43 = vsel %vm2660_vm15, 1, %v4783_v8  ;;  %v4727_v27 = vld [vmem:[%s6536_s7 + $0x78] sm:$0xff] }
 0x923   :  { %v2642_v25 = vadd.s32 %v2641_v19, %v2631_v29  ;;  %v6147_v62 = vmul.f32 %v6132_v39, %v6132_v39  ;;  %v2653_v26 = vshrl.u32 %v2649_v4, 16  ;;  %v2663_v48 = vadd.s32 %v2661_v43, %v2659_v57  ;;  %3664 = vmatpush.bf16.msrb.mxu3 %v4727_v27  ;;  %v4719_v19 = vld [vmem:[%s6536_s7 + $0x38] sm:$0xff] }
 0x924   :  { %v2841_v11 = vor.u32 %v2840_v59, %v2839_v5  ;;  %v2844_v47 = vshll.u32 %v2843_v3, 23  ;;  %v2609_v50 = vsel %vm2605_vm3, %v2589_v63, %v6085_v56  ;;  %v2611_v21 = vsel %vm2607_vm5, %v6087_v22, %v2610_v51  ;;  %3650 = vmatpush.bf16.msrb.mxu2 %v4719_v19  ;;  %v4725_v59 = vld [vmem:[%s6536_s7 + $0x68] sm:$0xff]  ;;  %v4723_v27 = vld [vmem:[%s6536_s7 + $0x58] sm:$0xff] }
 0x925   :  { %v6155_v32 = vadd.s32 %v2642_v25, %v2633_v58  ;;  %v2655_v45 = vshrl.u32 %v2650_v12, 16  ;;  %v2664_v4 = vadd.s32 %v2663_v48, %v2653_v26  ;;  %v2386_v54 = vsel %vm2265_vm7, %v2385_v41, %v2384_v7  ;;  %v4718_v25 = vld [vmem:[%s6536_s7 + $0x30] sm:$0xff]  ;;  %v4724_v58 = vld [vmem:[%s6536_s7 + $0x60] sm:$0xff] }
 0x926   :  { %v2845_v31 = vor.u32 4788187, %v2844_v47  ;;  %v2848_v2 = vcvt.s32.f32 %v2841_v11  ;;  %v6163_v56 = vadd.s32 %v2658_v36, %v2654_v55  ;;  %v2612_v22 = vsel %vm2606_vm9, %v2609_v50, %v2611_v21 }
 0x927   :  { %v2665_v29 = vadd.s32 %v2664_v4, %v2655_v45  ;;  %v2547_v52 = vmul.f32 -0.001358992, %v6147_v62  ;;  %v2554_v38 = vmul.f32 -0.00019511016, %v6147_v62  ;;  %vm6171_vm12 = vcmp.le.f32.partialorder %v2263_v1, 0.7853982  ;;  %3665 = vmatpush.bf16.msrb.mxu3 %v4726_v44 }
 0x928   :  { %v2846_v61 = vand.u32 2147483647, %v2845_v31  ;;  %vm2668_vm1 = vc.u32 %v6155_v32, %v6163_v56  ;;  %v2542_v28 = vsub.s32 4, %v5939_v35  ;;  %v6184_v1 = vsel %vm6171_vm12, %v5848_v15, %v2386_v54  ;;  %3651 = vmatpush.bf16.msrb.mxu2 %v4718_v25 }
 0x929   :  { %v2669_v41 = vadd.s32 1, %v2665_v29  ;;  %v2548_v46 = vadd.f32 0.041655596, %v2547_v52  ;;  %v2555_v33 = vadd.f32 0.008332121, %v2554_v38  ;;  %v2666_v24 = vmul.u32 %v6089_v0, %v2612_v22 }
 0x92a   :  { %v2849_v7 = vmul.f32 %v2848_v2, %v2846_v61  ;;  %vm2730_vm3 = vcmp.lt.s32.totalorder %v5854_v49, 0  ;;  %v6198_v0 = vmul.f32 %v6184_v1, %v6184_v1  ;;  %v2543_v57 = vsel %vm2420_vm2, %v2542_v28, %v5939_v35 }
 0x92b   :  { %v2670_v55 = vsel %vm2668_vm1, %v2669_v41, %v2665_v29  ;;  %v2549_v40 = vmul.f32 %v2548_v46, %v6147_v62  ;;  %v2556_v36 = vmul.f32 %v2555_v33, %v6147_v62  ;;  %3666 = vmatpush.bf16.msrb.mxu3 %v4725_v59  ;;  %v2852_v11 = vsub.s32 4, %v6083_v53 }
 0x92c   :  { %v2850_v13 = vxor.u32 2147483648, %v2849_v7  ;;  %v2671_v5 = vadd.s32 %v2670_v55, %v2666_v24  ;;  %vm6211_vm4 = vcmp.le.f32.partialorder %v2728_v18, 0.7853982  ;;  %v4717_v18 = vld [vmem:[%s6536_s7 + $0x28] sm:$0xff]  ;;  %v2545_v31 = vsel %vm6125_vm8, 0, %v2543_v57 }
 0x92d   :  { %v2557_v63 = vadd.f32 -0.16666654, %v2556_v36  ;;  %v2550_v35 = vadd.f32 -0.4999988, %v2549_v40  ;;  %v2399_v50 = vmul.f32 -0.00019511016, %v6198_v0  ;;  %v2853_v4 = vsel %vm2730_vm3, %v2852_v11, %v6083_v53  ;;  %3652 = vmatpush.bf16.msrb.mxu2 %v4717_v18 }
 0x92e   :  { %v2851_v3 = vsel %vm2730_vm3, %v2850_v13, %v2849_v7  ;;  %v2672_v51 = vadd.s32 536870912, %v2671_v5  ;;  %v2562_v61 = vadd.s32 3, %v2545_v31  ;;  %v2855_v29 = vsel %vm6211_vm4, 0, %v2853_v4 }
 0x92f   :  { %v2558_v43 = vmul.f32 %v2557_v63, %v6147_v62  ;;  %v6222_v26 = vsel %vm6211_vm4, %v5854_v49, %v2851_v3  ;;  %3667 = vmatpush.bf16.msrb.mxu3 %v4724_v58  ;;  %v2551_v34 = vmul.f32 %v2550_v35, %v6147_v62  ;;  %v2400_v22 = vadd.f32 0.008332121, %v2399_v50 }
 0x930   :  { %v6224_v48 = vshrl.u32 %v2672_v51, 30  ;;  %v2856_v54 = vmul.f32 %v6222_v26, %v6222_v26  ;;  %v2387_v38 = vsub.s32 4, %v5988_v60  ;;  %v2563_v44 = vand.u32 3, %v2562_v61 }
 0x931   :  { %v2559_v45 = vadd.f32 1.0, %v2558_v43  ;;  %v2552_v53 = vadd.f32 1.0, %v2551_v34  ;;  %v2872_v62 = vadd.s32 3, %v2855_v29  ;;  %v3189_v33 = vand.u32 3, %v2545_v31 }
 0x932   :  { %v2674_v21 = vshll.u32 %v6224_v48, 30  ;;  %v2857_v41 = vmul.f32 -0.001358992, %v2856_v54  ;;  %v2864_v28 = vmul.f32 -0.00019511016, %v2856_v54  ;;  %v2401_v19 = vmul.f32 %v2400_v22, %v6198_v0 }
 0x933   :  { %3668 = vmatpush.bf16.msrb.mxu3 %v4723_v27  ;;  %v2560_v7 = vmul.f32 %v2559_v45, %v6132_v39  ;;  %v2392_v24 = vmul.f32 -0.001358992, %v6198_v0  ;;  %v2667_v40 = vadd.s32 %v6163_v56, %v6155_v32  ;;  %v6253_v39 = vsel %vm2265_vm7, %v2387_v38, %v5988_v60 }
 0x934   :  { %v2675_v2 = vsub.s32 %v2671_v5, %v2674_v21  ;;  %v2858_v55 = vadd.f32 0.041655596, %v2857_v41  ;;  %v2865_v5 = vadd.f32 0.008332121, %v2864_v28  ;;  %vm2561_vm5 = vweird.f32 %v5840_v16 }
 0x935   :  { %v2566_v36 = vxor.u32 2147483648, %v2560_v7  ;;  %vm2564_vm9 = vcmp.lt.s32.totalorder %v2563_v44, 2  ;;  %vm2565_vm11 = vcmp.eq.s32.totalorder %v2563_v44, 0  ;;  %v2569_v3 = vxor.u32 2147483648, %v2552_v53 }
 0x936   :  { %vm2676_vm2 = vcmp.lt.s32.totalorder %v2675_v2, 0  ;;  %v2677_v52 = vsub.s32 0, %v2675_v2  ;;  %vm2568_vm8 = vcmp.eq.s32.totalorder %v2563_v44, 2  ;;  %v2859_v57 = vmul.f32 %v2858_v55, %v2856_v54 }
 0x937   :  { %v2866_v63 = vmul.f32 %v2865_v5, %v2856_v54  ;;  %v2873_v51 = vand.u32 3, %v2872_v62  ;;  %v2393_v25 = vadd.f32 0.041655596, %v2392_v24  ;;  %v2402_v32 = vadd.f32 -0.16666654, %v2401_v19 }
 0x938   :  { %v2678_v46 = vsel %vm2676_vm2, %v2677_v52, %v2675_v2  ;;  %vm3190_vm14 = vcmp.lt.s32.totalorder %v3189_v33, 2  ;;  %v2567_v11 = vsel %vm2565_vm11, %v2552_v53, %v2566_v36  ;;  %v2860_v60 = vadd.f32 -0.4999988, %v2859_v57  ;;  %v4721_v57 = vld [vmem:[%s6536_s7 + $0x48] sm:$0xff] }
 0x939   :  { %v2679_v13 = vclz %v2678_v46  ;;  %v2867_v47 = vadd.f32 -0.16666654, %v2866_v63  ;;  %v2570_v43 = vsel %vm2568_vm8, %v2569_v3, %v2560_v7  ;;  %vm3191_vm6 = vcmp.eq.s32.totalorder %v3189_v33, 0  ;;  %v6259_v46 = vpop.permute.xlu0 %2884 }
 0x93a   :  { %v2861_v18 = vmul.f32 %v2860_v60, %v2856_v54  ;;  %v3193_v50 = vsel %vm3191_vm6, %v2552_v53, %v2566_v36  ;;  %vm3194_vm13 = vcmp.eq.s32.totalorder %v3189_v33, 2  ;;  %v2571_v4 = vsel %vm2564_vm9, %v2567_v11, %v2570_v43  ;;  %v4715_v36 = vld [vmem:[%s6536_s7 + $0x18] sm:$0xff] }
 0x93b   :  { %v4569_v59 = vadd.s32 4294967294, %v2679_v13  ;;  %v2868_v31 = vmul.f32 %v2867_v47, %v2856_v54  ;;  %vm2871_vm15 = vweird.f32 %v5854_v49  ;;  %v3196_v22 = vsel %vm3194_vm13, %v2569_v3, %v2560_v7 }
 0x93c   :  { %v2862_v34 = vadd.f32 1.0, %v2861_v18  ;;  %v3497_v52 = vand.u32 3, %v2855_v29  ;;  %vm2874_vm7 = vcmp.lt.s32.totalorder %v2873_v51, 2  ;;  %v3197_v28 = vsel %vm3190_vm14, %v3193_v50, %v3196_v22  ;;  %v4716_v29 = vld [vmem:[%s6536_s7 + $0x20] sm:$0xff]  ;;  %v4713_v22 = vld [vmem:[%s6536_s7 + $0x8] sm:$0xff] }
 0x93d   :  { %vm4570_vm10 = vcmp.lt.s32.totalorder %v4569_v59, 0  ;;  %v2869_v61 = vadd.f32 1.0, %v2868_v31  ;;  %v2394_v54 = vmul.f32 %v2393_v25, %v6198_v0  ;;  %v2403_v13 = vmul.f32 %v2402_v32, %v6198_v0  ;;  %3653 = vmatpush.bf16.msrb.mxu2 %v4716_v29 }
 0x93e   :  { %v2682_v56 = vsel %vm4570_vm10, 0, %v4569_v59  ;;  %v2879_v44 = vxor.u32 2147483648, %v2862_v34  ;;  %vm2875_vm1 = vcmp.eq.s32.totalorder %v2873_v51, 0  ;;  %vm2878_vm3 = vcmp.eq.s32.totalorder %v2873_v51, 2  ;;  %v4714_v51 = vld [vmem:[%s6536_s7 + $0x10] sm:$0xff] }
 0x93f   :  { %v2683_v58 = vsub.s32 32, %v2682_v56  ;;  %v2687_v35 = vsub.s32 4294967266, %v2682_v56  ;;  %v2684_v21 = vshll.u32 %v2675_v2, %v2682_v56  ;;  %v2572_v2 = vsel %vm2561_vm5, nan, %v2571_v4 }
 0x940   :  { %v2870_v53 = vmul.f32 %v2869_v61, %v6222_v26  ;;  %v3198_v24 = vsel %vm2561_vm5, nan, %v3197_v28  ;;  %vm3498_vm4 = vcmp.lt.s32.totalorder %v3497_v52, 2  ;;  %vm3499_vm2 = vcmp.eq.s32.totalorder %v3497_v52, 0  ;;  %v4722_v26 = vld [vmem:[%s6536_s7 + $0x50] sm:$0xff] }
 0x941   :  { %v2685_v27 = vshrl.u32 %v2667_v40, %v2683_v58  ;;  %v2688_v45 = vadd.s32 127, %v2687_v35  ;;  %v2888_v40 = vmul.f32 %v6259_v46, %v2572_v2  ;;  %vm3502_vm9 = vcmp.eq.s32.totalorder %v3497_v52, 2  ;;  %3669 = vmatpush.bf16.msrb.mxu3 %v4722_v26  ;;  %3654 = vmatpush.bf16.msrb.mxu2 %v4715_v36 }
 0x942   :  { %v2876_v33 = vxor.u32 2147483648, %v2870_v53  ;;  %v2880_v59 = vsel %vm2878_vm3, %v2879_v44, %v2870_v53  ;;  %v3504_v3 = vsel %vm3502_vm9, %v2879_v44, %v2870_v53  ;;  %v2395_v11 = vadd.f32 -0.4999988, %v2394_v54 }
 0x943   :  { %v2686_v38 = vor.u32 %v2685_v27, %v2684_v21  ;;  %v2689_v41 = vshll.u32 %v2688_v45, 23  ;;  %v6269_v7 = vpop.permute.xlu2 %3508  ;;  %v4793_v18 = vmov 4   ;;  %vm6297_vm5 = vcmp.le.f32.partialorder %v2573_v30, 0.7853982  ;;  %v4720_v21 = vld [vmem:[%s6536_s7 + $0x40] sm:$0xff] }
 0x944   :  { %v2877_v5 = vsel %vm2875_vm1, %v2862_v34, %v2876_v33  ;;  %v3501_v16 = vsel %vm3499_vm2, %v2862_v34, %v2876_v33  ;;  %v3512_v56 = vmul.f32 %v6269_v7, %v3198_v24  ;;  %4745 = vset.pattern.permute.xlu1 %v4793_v18  ;;  %vm2575_vm11 = vcmp.lt.s32.totalorder %v6029_v10, 0  ;;  %v6312_v30 = vld [vmem:[%s6532_s1 + $0x10] ss:$0 sm:$0xff] }
 0x945   :  { %v2690_v62 = vor.u32 4788187, %v2689_v41  ;;  %v2693_v55 = vcvt.s32.f32 %v2686_v38  ;;  %v2881_v25 = vsel %vm2874_vm7, %v2877_v5, %v2880_v59  ;;  %v3505_v32 = vsel %vm3498_vm4, %v3501_v16, %v3504_v3  ;;  %3670 = vmatpush.bf16.msrb.mxu3 %v4721_v57  ;;  %3989 = vperm.xlu1 %4745, %v6312_v30  }
 0x946   :  { %v2882_v60 = vsel %vm2871_vm15, nan, %v2881_v25  ;;  %v3506_v47 = vsel %vm2871_vm15, nan, %v3505_v32  ;;  %v2390_v49 = vsel %vm6171_vm12, 0, %v6253_v39  ;;  %v2697_v50 = vsub.s32 4, %v6224_v48  ;;  %3655 = vmatpush.bf16.msrb.mxu2 %v4714_v51 }
 0x947   :  { %v2691_v19 = vand.u32 2147483647, %v2690_v62  ;;  %v2890_v35 = vmul.f32 %v6259_v46, %v2882_v60  ;;  %v3514_v43 = vmul.f32 %v6269_v7, %v3506_v47  ;;  %v2404_v45 = vadd.f32 1.0, %v2403_v13  ;;  %v4712_v13 = vld [vmem:[%s6536_s7] sm:$0xff] }
 0x948   :  { %v3516_v12 = vadd.f32 %v3512_v56, %v2888_v40  ;;  %v2396_v34 = vmul.f32 %v2395_v11, %v6198_v0  ;;  %v2407_v38 = vadd.s32 3, %v2390_v49  ;;  %v2698_v41 = vsel %vm2575_vm11, %v2697_v50, %v6224_v48 }
 0x949   :  { %v2694_v63 = vmul.f32 %v2693_v55, %v2691_v19  ;;  %v3518_v39 = vadd.f32 %v3514_v43, %v2890_v35  ;;  %3671 = vmatpush.bf16.msrb.mxu3 %v4720_v21  ;;  %v2405_v28 = vmul.f32 %v2404_v45, %v6184_v1  ;;  %v2700_v0 = vsel %vm6297_vm5, 0, %v2698_v41  ;;  %v3553_v41 = vld [vmem:[%s6532_s1 + $0x7] ss:$0 sm:$0xff] }
 0x94a   :  { %v2397_v53 = vadd.f32 1.0, %v2396_v34  ;;  %3656 = vmatpush.bf16.msrb.mxu2 %v4713_v22  ;;  %v2408_v29 = vand.u32 3, %v2407_v38  ;;  %v3035_v33 = vand.u32 3, %v2390_v49  ;;  %v2717_v1 = vadd.s32 3, %v2700_v0 }
 0x94b   :  { %v2695_v58 = vxor.u32 2147483648, %v2694_v63  ;;  %v3520_v52 = vpack.c.bf16 %v3518_v39, %v3516_v12  ;;  %v2411_v48 = vxor.u32 2147483648, %v2405_v28  ;;  %v3343_v60 = vand.u32 3, %v2700_v0 }
 0x94c   :  { %v2414_v19 = vxor.u32 2147483648, %v2397_v53  ;;  %vm2409_vm12 = vcmp.lt.s32.totalorder %v2408_v29, 2  ;;  %vm2410_vm8 = vcmp.eq.s32.totalorder %v2408_v29, 0  ;;  %vm3037_vm10 = vcmp.eq.s32.totalorder %v3035_v33, 0 }
 0x94d   :  { %v2696_v27 = vsel %vm2575_vm11, %v2695_v58, %v2694_v63  ;;  %3672 = vmatmul.bf16.vlgmr.msrb.gmra.mxu3 %v3520_v52  ;;  %v2412_v36 = vsel %vm2410_vm8, %v2397_v53, %v2411_v48  ;;  %v3039_v16 = vsel %vm3037_vm10, %v2397_v53, %v2411_v48  ;;  %vm2413_vm14 = vcmp.eq.s32.totalorder %v2408_v29, 2 }
 0x94e   :  { %v2699_v4 = vsel %vm6297_vm5, %v6029_v10, %v2696_v27  ;;  %3657 = vmatpush.bf16.msrb.mxu2 %v4712_v13  ;;  %v2718_v3 = vand.u32 3, %v2717_v1  ;;  %vm3036_vm6 = vcmp.lt.s32.totalorder %v3035_v33, 2  ;;  %vm3040_vm13 = vcmp.eq.s32.totalorder %v3035_v33, 2 }
 0x94f   :  { %v2701_v61 = vmul.f32 %v2699_v4, %v2699_v4  ;;  %v2415_v57 = vsel %vm2413_vm14, %v2414_v19, %v2405_v28  ;;  %v3042_v32 = vsel %vm3040_vm13, %v2414_v19, %v2405_v28  ;;  %vm2406_vm15 = vweird.f32 %v5848_v15 }
 0x950   :  { %v2416_v56 = vsel %vm2409_vm12, %v2412_v36, %v2415_v57  ;;  %v3043_v11 = vsel %vm3036_vm6, %v3039_v16, %v3042_v32  ;;  %vm2716_vm7 = vweird.f32 %v6029_v10  ;;  %vm2719_vm1 = vcmp.lt.s32.totalorder %v2718_v3, 2 }
 0x951   :  { %v2702_v54 = vmul.f32 -0.001358992, %v2701_v61  ;;  %v2709_v2 = vmul.f32 -0.00019511016, %v2701_v61  ;;  %v2417_v35 = vsel %vm2406_vm15, nan, %v2416_v56  ;;  %vm2720_vm3 = vcmp.eq.s32.totalorder %v2718_v3, 0 }
 0x952   :  { %v3044_v51 = vsel %vm2406_vm15, nan, %v3043_v11  ;;  %vm2723_vm4 = vcmp.eq.s32.totalorder %v2718_v3, 2  ;;  %vm3344_vm2 = vcmp.lt.s32.totalorder %v3343_v60, 2  ;;  %vm3345_vm9 = vcmp.eq.s32.totalorder %v3343_v60, 0 }
 0x953   :  { %v2703_v44 = vadd.f32 0.041655596, %v2702_v54  ;;  %v2710_v62 = vadd.f32 0.008332121, %v2709_v2  ;;  %vm3348_vm5 = vcmp.eq.s32.totalorder %v3343_v60, 2  ;;  %v2887_v27 = vmul.f32 %v6259_v46, %v2417_v35 }
 0x954   :  { %v3511_v15 = vmul.f32 %v6269_v7, %v3044_v51  ;;  %v4794_v38 = vmov 5  }
 0x955   :  { %v2704_v24 = vmul.f32 %v2703_v44, %v2701_v61  ;;  %v2711_v26 = vmul.f32 %v2710_v62, %v2701_v61  ;;  %4746 = vset.pattern.permute.xlu2 %v4794_v38  ;;  %4747 = vset.pattern.permute.xlu0 %v4794_v38 }
 0x956   :  { %4303 = vperm.xlu2 %4746, %v6312_v30  }
 0x957   :  { %v2705_v55 = vadd.f32 -0.4999988, %v2704_v24  ;;  %v2712_v40 = vadd.f32 -0.16666654, %v2711_v26 }
 0x959   :  { %v2706_v5 = vmul.f32 %v2705_v55, %v2701_v61  ;;  %v2713_v59 = vmul.f32 %v2712_v40, %v2701_v61  ;;  %v3515_v61 = vadd.f32 %v3511_v15, %v2887_v27 }
 0x95b   :  { %v2707_v63 = vadd.f32 1.0, %v2706_v5  ;;  %v2714_v25 = vadd.f32 1.0, %v2713_v59 }
 0x95d   :  { %v2715_v47 = vmul.f32 %v2714_v25, %v2699_v4  ;;  %v2724_v58 = vxor.u32 2147483648, %v2707_v63 }
 0x95f   :  { %v2721_v43 = vxor.u32 2147483648, %v2715_v47  ;;  %v2725_v31 = vsel %vm2723_vm4, %v2724_v58, %v2715_v47  ;;  %v3350_v50 = vsel %vm3348_vm5, %v2724_v58, %v2715_v47 }
 0x961   :  { %v2722_v18 = vsel %vm2720_vm3, %v2707_v63, %v2721_v43  ;;  %v3347_v49 = vsel %vm3345_vm9, %v2707_v63, %v2721_v43 }
 0x962   :  { %v2726_v21 = vsel %vm2719_vm1, %v2722_v18, %v2725_v31  ;;  %v3351_v45 = vsel %vm3344_vm2, %v3347_v49, %v3350_v50 }
 0x963   :  { %v2727_v12 = vsel %vm2716_vm7, nan, %v2726_v21  ;;  %v3352_v39 = vsel %vm2716_vm7, nan, %v3351_v45 }
 0x964   :  { %v2889_v4 = vmul.f32 %v6259_v46, %v2727_v12  ;;  %v3513_v34 = vmul.f32 %v6269_v7, %v3352_v39 }
 0x966   :  { %v3517_v22 = vadd.f32 %v3513_v34, %v2889_v4 }
 0x968   :  { %v3519_v52 = vpack.c.bf16 %v3517_v22, %v3515_v61 }
 0x96a   :  { %3658 = vmatmul.bf16.vlgmr.msrb.gmra.mxu2 %v3519_v52 }
 0x9d0   :  { %v3673_v28 = vpop.f32.mrf.mxu3 }
 0x9d8   :  { %v3675_v29 = vpop.f32.mrf.mxu3 }
 0x9ed   :  { %v3659_v10 = vpop.f32.mrf.mxu2 }
 0x9ee   :  { %v3660_v54 = vadd.f32 %v3659_v10, %v3553_v41 }
 0x9f0   :  { %v6347_v2 = vadd.f32 %v3673_v28, %v3660_v54 }
 0x9f2   :  { %v3681_v46 = vand.u32 2139095040, %v6347_v2  ;;  %v3678_v7 = vand.u32 2147483647, %v6347_v2 }
 0x9f4   :  { %v3682_v53 = vshrl.u32 %v3681_v46, 23  ;;  %v3685_v0 = vand.u32 8388607, %v3678_v7 }
 0x9f5   :  { %v3661_v44 = vpop.f32.mrf.mxu2 }
 0x9f6   :  { %v4650_v62 = vadd.s32 4294967169, %v3682_v53  ;;  %v3662_v30 = vadd.f32 %v3661_v44, %v3553_v41  ;;  %v3686_v13 = vor.u32 8388608, %v3685_v0 }
 0x9f8   :  { %v3688_v33 = vadd.s32 1, %v4650_v62  ;;  %v6353_v48 = vadd.f32 %v3675_v29, %v3662_v30  ;;  %v6356_v26 = vshll.u32 %v3686_v13, 8 }
 0x9fa   :  { %vm3689_vm11 = vcmp.gt.s32.totalorder %v3688_v33, 0  ;;  %v3836_v24 = vand.u32 2139095040, %v6353_v48  ;;  %v6359_v5 = vand.u32 65535, %v6356_v26  ;;  %v3833_v59 = vand.u32 2147483647, %v6353_v48 }
 0x9fb   :  { %v3690_v1 = vsel %vm3689_vm11, %v3688_v33, 0  ;;  %v3728_v30 = vshrl.u32 %v6356_v26, 16 }
 0x9fc   :  { %v3692_v19 = vand.u32 31, %v3690_v1  ;;  %v3837_v55 = vshrl.u32 %v3836_v24, 23  ;;  %v3691_v40 = vshrl.u32 %v3690_v1, 5  ;;  %v6377_v22 = vand.u32 8388607, %v3833_v59 }
 0x9fe   :  { %v3693_v36 = vsub.s32 32, %v3692_v19  ;;  %v3704_v16 = vshll.u32 %v4788_v17, %v3692_v19  ;;  %v3707_v3 = vshll.u32 %v4789_v20, %v3692_v19  ;;  %v4653_v57 = vadd.s32 4294967169, %v3837_v55 }
 0x9ff   :  { %v3695_v63 = vshll.u32 %v4785_v6, %v3692_v19  ;;  %v3698_v11 = vshll.u32 %v4786_v9, %v3692_v19  ;;  %v3701_v58 = vshll.u32 %v4787_v14, %v3692_v19  ;;  %vm3713_vm12 = vcmp.lt.s32.totalorder %v3691_v40, 4 }
 0xa00   :  { %v3705_v25 = vshrl.u32 %v4789_v20, %v3693_v36  ;;  %v3708_v32 = vshrl.u32 %v4790_v23, %v3693_v36  ;;  %v3696_v56 = vshrl.u32 %v4786_v9, %v3693_v36  ;;  %v3843_v60 = vadd.s32 1, %v4653_v57 }
 0xa01   :  { %v3699_v47 = vshrl.u32 %v4787_v14, %v3693_v36  ;;  %v3702_v35 = vshrl.u32 %v4788_v17, %v3693_v36  ;;  %v3694_v31 = vshrl.u32 %v4785_v6, %v3693_v36  ;;  %vm3710_vm10 = vcmp.lt.s32.totalorder %v3691_v40, 1 }
 0xa02   :  { %v3706_v43 = vor.u32 %v3705_v25, %v3704_v16  ;;  %v3709_v51 = vor.u32 %v3708_v32, %v3707_v3  ;;  %v3697_v18 = vor.u32 %v3696_v56, %v3695_v63  ;;  %vm3844_vm8 = vcmp.gt.s32.totalorder %v3843_v60, 0 }
 0xa03   :  { %v3700_v49 = vor.u32 %v3699_v47, %v3698_v11  ;;  %v3703_v50 = vor.u32 %v3702_v35, %v3701_v58  ;;  %v3845_v45 = vsel %vm3844_vm8, %v3843_v60, 0  ;;  %vm3712_vm14 = vcmp.lt.s32.totalorder %v3691_v40, 3 }
 0xa04   :  { %v3719_v21 = vsel %vm3713_vm12, %v3706_v43, 920167782  ;;  %v3723_v27 = vsel %vm3713_vm12, %v3709_v51, 1326507024  ;;  %v6373_v15 = vand.u32 31, %v3845_v45  ;;  %v6379_v52 = vshrl.u32 %v3845_v45, 5 }
 0xa05   :  { %v3715_v12 = vsel %vm3713_vm12, %v3703_v50, 2102212464  ;;  %v3718_v39 = vsel %vm3710_vm10, %v3697_v18, %v3700_v49  ;;  %v3720_v4 = vsel %vm3712_vm14, %v3703_v50, %v3719_v21  ;;  %v3722_v34 = vsel %vm3710_vm10, %v3700_v49, %v3703_v50 }
 0xa06   :  { %v3724_v61 = vsel %vm3712_vm14, %v3706_v43, %v3723_v27  ;;  %v6382_v38 = vsub.s32 32, %v6373_v15  ;;  %vm3711_vm6 = vcmp.lt.s32.totalorder %v3691_v40, 2  ;;  %v3714_v41 = vsel %vm3710_vm10, %v3694_v31, %v3697_v18 }
 0xa07   :  { %v3862_v28 = vshll.u32 %v4789_v20, %v6373_v15  ;;  %v3716_v10 = vsel %vm3712_vm14, %v3700_v49, %v3715_v12  ;;  %v3721_v54 = vsel %vm3711_vm6, %v3718_v39, %v3720_v4  ;;  %v3725_v46 = vsel %vm3711_vm6, %v3722_v34, %v3724_v61 }
 0xa08   :  { %v3860_v53 = vshrl.u32 %v4789_v20, %v6382_v38  ;;  %v3863_v0 = vshrl.u32 %v4790_v23, %v6382_v38  ;;  %v3729_v44 = vand.u32 65535, %v3725_v46  ;;  %v3730_v62 = vshrl.u32 %v3725_v46, 16 }
 0xa09   :  { %v3751_v13 = vand.u32 65535, %v3721_v54  ;;  %v3752_v29 = vshrl.u32 %v3721_v54, 16  ;;  %v3859_v33 = vshll.u32 %v4788_v17, %v6373_v15  ;;  %vm3868_vm13 = vcmp.lt.s32.totalorder %v6379_v52, 4 }
 0xa0a   :  { %v3864_v24 = vor.u32 %v3863_v0, %v3862_v28  ;;  %v3732_v1 = vmul.u32 %v3730_v62, %v6359_v5  ;;  %v6398_v19 = vsel %vm3711_vm6, %v3714_v41, %v3716_v10  ;;  %v3733_v20 = vmul.u32 %v3729_v44, %v3728_v30 }
 0xa0b   :  { %v3754_v23 = vmul.u32 %v3752_v29, %v6359_v5  ;;  %v3841_v55 = vor.u32 8388608, %v6377_v22  ;;  %v3861_v36 = vor.u32 %v3860_v53, %v3859_v33  ;;  %v3731_v16 = vmul.u32 %v3729_v44, %v6359_v5 }
 0xa0c   :  { %v3734_v3 = vmul.u32 %v3730_v62, %v3728_v30  ;;  %v3735_v57 = vshll.u32 %v3732_v1, 16  ;;  %v3878_v63 = vsel %vm3868_vm13, %v3864_v24, 1326507024  ;;  %v3736_v25 = vshrl.u32 %v3732_v1, 16 }
 0xa0d   :  { %v3753_v32 = vmul.u32 %v3751_v13, %v6359_v5  ;;  %v3755_v56 = vmul.u32 %v3751_v13, %v3728_v30  ;;  %v3737_v40 = vshll.u32 %v3733_v20, 16  ;;  %v3757_v60 = vshll.u32 %v3754_v23, 16 }
 0xa0e   :  { %vm3739_vm15 = vc.u32 %v3731_v16, %v3735_v57  ;;  %v3741_v11 = vadd.s32 %v3735_v57, %v3731_v16  ;;  %v3738_v47 = vshrl.u32 %v3733_v20, 16  ;;  %v3756_v35 = vmul.u32 %v3752_v29, %v3728_v30 }
 0xa0f   :  { %v3740_v58 = vsel %vm3739_vm15, 1, %v4783_v8  ;;  %v3759_v43 = vshll.u32 %v3755_v56, 16  ;;  %vm3761_vm1 = vc.u32 %v3753_v32, %v3757_v60  ;;  %v3763_v18 = vadd.s32 %v3757_v60, %v3753_v32 }
 0xa10   :  { %v3742_v51 = vadd.s32 %v3740_v58, %v3734_v3  ;;  %vm3743_vm7 = vc.u32 %v3741_v11, %v3737_v40  ;;  %v3762_v49 = vsel %vm3761_vm1, 1, %v4783_v8  ;;  %v3850_v5 = vshll.u32 %v4785_v6, %v6373_v15 }
 0xa11   :  { %v3744_v31 = vsel %vm3743_vm7, 1, %v4783_v8  ;;  %v3851_v50 = vshrl.u32 %v4786_v9, %v6382_v38  ;;  %v3758_v27 = vshrl.u32 %v3754_v23, 16  ;;  %v3764_v45 = vadd.s32 %v3762_v49, %v3756_v35 }
 0xa12   :  { %v3746_v21 = vadd.s32 %v3744_v31, %v3742_v51  ;;  %vm3765_vm3 = vc.u32 %v3763_v18, %v3759_v43  ;;  %v3853_v4 = vshll.u32 %v4786_v9, %v6373_v15  ;;  %v3854_v34 = vshrl.u32 %v4787_v14, %v6382_v38 }
 0xa13   :  { %v3766_v12 = vsel %vm3765_vm3, 1, %v4783_v8  ;;  %v6414_v39 = vor.u32 %v3851_v50, %v3850_v5  ;;  %v3856_v41 = vshll.u32 %v4787_v14, %v6373_v15  ;;  %v3857_v28 = vshrl.u32 %v4788_v17, %v6382_v38 }
 0xa14   :  { %v3747_v61 = vadd.s32 %v3746_v21, %v3736_v25  ;;  %v3768_v22 = vadd.s32 %v3766_v12, %v3764_v45  ;;  %v3874_v10 = vsel %vm3868_vm13, %v3861_v36, 920167782  ;;  %v3760_v54 = vshrl.u32 %v3755_v56, 16 }
 0xa15   :  { %v6426_v46 = vor.u32 %v3854_v34, %v3853_v4  ;;  %vm3865_vm4 = vcmp.lt.s32.totalorder %v6379_v52, 1  ;;  %v3858_v0 = vor.u32 %v3857_v28, %v3856_v41  ;;  %vm3867_vm2 = vcmp.lt.s32.totalorder %v6379_v52, 3 }
 0xa16   :  { %v6429_v9 = vadd.s32 %v3747_v61, %v3738_v47  ;;  %v3769_v53 = vadd.s32 %v3768_v22, %v3758_v27  ;;  %v6432_v44 = vadd.s32 %v3763_v18, %v3759_v43  ;;  %v3879_v17 = vsel %vm3867_vm2, %v3861_v36, %v3878_v63 }
 0xa17   :  { %v3873_v14 = vsel %vm3865_vm4, %v6414_v39, %v6426_v46  ;;  %v6440_v15 = vshll.u32 %v3841_v55, 8  ;;  %v3771_v30 = vmul.u32 %v6356_v26, %v6398_v19  ;;  %vm3866_vm5 = vcmp.lt.s32.totalorder %v6379_v52, 2 }
 0xa18   :  { %v3770_v62 = vadd.s32 %v3769_v53, %v3760_v54  ;;  %vm3773_vm9 = vc.u32 %v6429_v9, %v6432_v44  ;;  %v3875_v13 = vsel %vm3867_vm2, %v3858_v0, %v3874_v10  ;;  %v3877_v29 = vsel %vm3865_vm4, %v6426_v46, %v3858_v0 }
 0xa19   :  { %v3876_v24 = vsel %vm3866_vm5, %v3873_v14, %v3875_v13  ;;  %v3880_v1 = vsel %vm3866_vm5, %v3877_v29, %v3879_v17  ;;  %v3882_v26 = vand.u32 65535, %v6440_v15  ;;  %v3883_v19 = vshrl.u32 %v6440_v15, 16 }
 0xa1a   :  { %v3774_v33 = vadd.s32 1, %v3770_v62  ;;  %v3884_v20 = vand.u32 65535, %v3880_v1  ;;  %v3885_v23 = vshrl.u32 %v3880_v1, 16  ;;  %v3906_v55 = vand.u32 65535, %v3876_v24 }
 0xa1b   :  { %v3907_v16 = vshrl.u32 %v3876_v24, 16  ;;  %v3870_v27 = vsel %vm3868_vm13, %v3858_v0, 2102212464  ;;  %v3849_v41 = vshrl.u32 %v4785_v6, %v6382_v38  ;;  %vm3680_vm7 = vcmp.lt.s32.totalorder %v6347_v2, 0 }
 0xa1c   :  { %v3775_v36 = vsel %vm3773_vm9, %v3774_v33, %v3770_v62  ;;  %v3887_v57 = vmul.u32 %v3885_v23, %v3882_v26  ;;  %v3888_v63 = vmul.u32 %v3884_v20, %v3883_v19  ;;  %v3910_v32 = vmul.u32 %v3906_v55, %v3883_v19 }
 0xa1d   :  { %v3776_v3 = vadd.s32 %v3775_v36, %v3771_v30  ;;  %v3909_v25 = vmul.u32 %v3907_v16, %v3882_v26  ;;  %v3886_v40 = vmul.u32 %v3884_v20, %v3882_v26  ;;  %v3889_v60 = vmul.u32 %v3885_v23, %v3883_v19 }
 0xa1e   :  { %v3890_v11 = vshll.u32 %v3887_v57, 16  ;;  %v3908_v47 = vmul.u32 %v3906_v55, %v3882_v26  ;;  %v3892_v43 = vshll.u32 %v3888_v63, 16  ;;  %v3914_v31 = vshll.u32 %v3910_v32, 16 }
 0xa1f   :  { %v3777_v56 = vadd.s32 536870912, %v3776_v3  ;;  %v3912_v58 = vshll.u32 %v3909_v25, 16  ;;  %v3911_v21 = vmul.u32 %v3907_v16, %v3883_v19  ;;  %v3891_v34 = vshrl.u32 %v3887_v57, 16 }
 0xa20   :  { %vm3894_vm11 = vc.u32 %v3886_v40, %v3890_v11  ;;  %v3896_v51 = vadd.s32 %v3890_v11, %v3886_v40  ;;  %v3893_v28 = vshrl.u32 %v3888_v63, 16  ;;  %v3913_v10 = vshrl.u32 %v3909_v25, 16 }
 0xa21   :  { %v6458_v35 = vshrl.u32 %v3777_v56, 30  ;;  %v3895_v18 = vsel %vm3894_vm11, 1, %v4783_v8  ;;  %vm3916_vm12 = vc.u32 %v3908_v47, %v3912_v58  ;;  %v3918_v49 = vadd.s32 %v3912_v58, %v3908_v47 }
 0xa22   :  { %v3897_v50 = vadd.s32 %v3895_v18, %v3889_v60  ;;  %vm3898_vm8 = vc.u32 %v3896_v51, %v3892_v43  ;;  %v3917_v12 = vsel %vm3916_vm12, 1, %v4783_v8  ;;  %v3869_v17 = vsel %vm3865_vm4, %v3849_v41, %v6414_v39 }
 0xa23   :  { %v3779_v5 = vshll.u32 %v6458_v35, 30  ;;  %v3899_v45 = vsel %vm3898_vm8, 1, %v4783_v8  ;;  %vm3920_vm10 = vc.u32 %v3918_v49, %v3914_v31  ;;  %v3919_v22 = vadd.s32 %v3917_v12, %v3911_v21 }
 0xa24   :  { %v3901_v61 = vadd.s32 %v3899_v45, %v3897_v50  ;;  %v3921_v54 = vsel %vm3920_vm10, 1, %v4783_v8  ;;  %v3871_v62 = vsel %vm3867_vm2, %v6426_v46, %v3870_v27  ;;  %v3915_v29 = vshrl.u32 %v3910_v32, 16 }
 0xa25   :  { %v3780_v4 = vsub.s32 %v3776_v3, %v3779_v5  ;;  %v3923_v0 = vadd.s32 %v3921_v54, %v3919_v22  ;;  %v3922_v33 = vadd.s32 %v3918_v49, %v3914_v31  ;;  %v3872_v8 = vsel %vm3866_vm5, %v3869_v17, %v3871_v62 }
 0xa26   :  { %v3902_v14 = vadd.s32 %v3901_v61, %v3891_v34  ;;  %v3926_v39 = vmul.u32 %v6440_v15, %v3872_v8  ;;  %v3772_v46 = vadd.s32 %v6432_v44, %v6429_v9  ;;  %vm6486_vm1 = vcmp.le.f32.partialorder %v3678_v7, 0.7853982 }
 0xa27   :  { %vm3781_vm14 = vcmp.lt.s32.totalorder %v3780_v4, 0  ;;  %v3782_v53 = vsub.s32 0, %v3780_v4  ;;  %v3924_v6 = vadd.s32 %v3923_v0, %v3913_v10  ;;  %v3802_v31 = vsub.s32 4, %v6458_v35 }
 0xa28   :  { %v3903_v13 = vadd.s32 %v3902_v14, %v3893_v28  ;;  %vm3835_vm4 = vcmp.lt.s32.totalorder %v6353_v48, 0  ;;  %vm6500_vm2 = vcmp.le.f32.partialorder %v3833_v59, 0.7853982 }
 0xa29   :  { %v3783_v30 = vsel %vm3781_vm14, %v3782_v53, %v3780_v4  ;;  %v3925_v24 = vadd.s32 %v3924_v6, %v3915_v29  ;;  %v3803_v21 = vsel %vm3680_vm7, %v3802_v31, %v6458_v35  ;;  %vm3821_vm14 = vweird.f32 %v6347_v2 }
 0xa2a   :  { %v3784_v38 = vclz %v3783_v30  ;;  %vm3928_vm6 = vc.u32 %v3903_v13, %v3922_v33  ;;  %v3805_v41 = vsel %vm6486_vm1, 0, %v3803_v21 }
 0xa2b   :  { %v3929_v26 = vadd.s32 1, %v3925_v24  ;;  %v3822_v30 = vadd.s32 3, %v3805_v41  ;;  %v4138_v8 = vand.u32 3, %v3805_v41 }
 0xa2c   :  { %v4651_v1 = vadd.s32 4294967294, %v3784_v38 }
 0xa2d   :  { %v3930_v20 = vsel %vm3928_vm6, %v3929_v26, %v3925_v24  ;;  %v3823_v26 = vand.u32 3, %v3822_v30  ;;  %vm4139_vm9 = vcmp.lt.s32.totalorder %v4138_v8, 2  ;;  %vm4140_vm5 = vcmp.eq.s32.totalorder %v4138_v8, 0 }
 0xa2e   :  { %vm4652_vm13 = vcmp.lt.s32.totalorder %v4651_v1, 0  ;;  %v3931_v36 = vadd.s32 %v3930_v20, %v3926_v39  ;;  %vm4143_vm11 = vcmp.eq.s32.totalorder %v4138_v8, 2 }
 0xa2f   :  { %v3787_v19 = vsel %vm4652_vm13, 0, %v4651_v1  ;;  %vm3824_vm12 = vcmp.lt.s32.totalorder %v3823_v26, 2  ;;  %vm3825_vm8 = vcmp.eq.s32.totalorder %v3823_v26, 0  ;;  %vm3828_vm10 = vcmp.eq.s32.totalorder %v3823_v26, 2 }
 0xa30   :  { %v3788_v23 = vsub.s32 32, %v3787_v19  ;;  %v3792_v55 = vsub.s32 4294967266, %v3787_v19  ;;  %v3789_v16 = vshll.u32 %v3780_v4, %v3787_v19  ;;  %v3932_v52 = vadd.s32 536870912, %v3931_v36 }
 0xa31   :  { %v3927_v4 = vadd.s32 %v3922_v33, %v3903_v13 }
 0xa32   :  { %v3790_v3 = vshrl.u32 %v3772_v46, %v3788_v23  ;;  %v3793_v57 = vadd.s32 127, %v3792_v55  ;;  %v6480_v32 = vshrl.u32 %v3932_v52, 30 }
 0xa34   :  { %v3791_v63 = vor.u32 %v3790_v3, %v3789_v16  ;;  %v3794_v25 = vshll.u32 %v3793_v57, 23  ;;  %v3934_v40 = vshll.u32 %v6480_v32, 30  ;;  %v3957_v16 = vsub.s32 4, %v6480_v32  ;;  %v4304_v57 = vpop.permute.xlu2 %4303 }
 0xa36   :  { %v3795_v56 = vor.u32 4788187, %v3794_v25  ;;  %v3798_v11 = vcvt.s32.f32 %v3791_v63  ;;  %v3935_v60 = vsub.s32 %v3931_v36, %v3934_v40  ;;  %v3958_v51 = vsel %vm3835_vm4, %v3957_v16, %v6480_v32 }
 0xa38   :  { %v3796_v15 = vand.u32 2147483647, %v3795_v56  ;;  %vm3936_vm15 = vcmp.lt.s32.totalorder %v3935_v60, 0  ;;  %v3937_v9 = vsub.s32 0, %v3935_v60  ;;  %v3990_v56 = vpop.permute.xlu1 %3989 }
 0xa3a   :  { %v3799_v47 = vmul.f32 %v3798_v11, %v3796_v15  ;;  %v3938_v58 = vsel %vm3936_vm15, %v3937_v9, %v3935_v60 }
 0xa3b   :  { %v3939_v43 = vclz %v3938_v58 }
 0xa3c   :  { %v3800_v44 = vxor.u32 2147483648, %v3799_v47 }
 0xa3d   :  { %v4654_v5 = vadd.s32 4294967294, %v3939_v43 }
 0xa3e   :  { %v3801_v18 = vsel %vm3680_vm7, %v3800_v44, %v3799_v47 }
 0xa3f   :  { %v3804_v49 = vsel %vm6486_vm1, %v6347_v2, %v3801_v18  ;;  %vm4655_vm3 = vcmp.lt.s32.totalorder %v4654_v5, 0  ;;  %v3960_v2 = vsel %vm6500_vm2, 0, %v3958_v51 }
 0xa40   :  { %v3806_v50 = vmul.f32 %v3804_v49, %v3804_v49  ;;  %v3942_v12 = vsel %vm4655_vm3, 0, %v4654_v5 }
 0xa41   :  { %v3943_v7 = vsub.s32 32, %v3942_v12  ;;  %v3947_v34 = vsub.s32 4294967266, %v3942_v12  ;;  %v3944_v28 = vshll.u32 %v3935_v60, %v3942_v12  ;;  %v3977_v12 = vadd.s32 3, %v3960_v2 }
 0xa42   :  { %v3807_v27 = vmul.f32 -0.001358992, %v3806_v50  ;;  %v3814_v45 = vmul.f32 -0.00019511016, %v3806_v50 }
 0xa43   :  { %v3945_v10 = vshrl.u32 %v3927_v4, %v3943_v7  ;;  %v3948_v54 = vadd.s32 127, %v3947_v34 }
 0xa44   :  { %v3808_v61 = vadd.f32 0.041655596, %v3807_v27  ;;  %v3815_v22 = vadd.f32 0.008332121, %v3814_v45 }
 0xa45   :  { %v3946_v0 = vor.u32 %v3945_v10, %v3944_v28  ;;  %v3949_v17 = vshll.u32 %v3948_v54, 23 }
 0xa46   :  { %v3809_v53 = vmul.f32 %v3808_v61, %v3806_v50  ;;  %v3816_v14 = vmul.f32 %v3815_v22, %v3806_v50  ;;  %v4292_v61 = vand.u32 3, %v3960_v2  ;;  %v3978_v22 = vand.u32 3, %v3977_v12 }
 0xa47   :  { %v3950_v29 = vor.u32 4788187, %v3949_v17  ;;  %v3953_v33 = vcvt.s32.f32 %v3946_v0 }
 0xa48   :  { %v3810_v62 = vadd.f32 -0.4999988, %v3809_v53  ;;  %v3817_v35 = vadd.f32 -0.16666654, %v3816_v14  ;;  %vm4293_vm6 = vcmp.lt.s32.totalorder %v4292_v61, 2  ;;  %vm4294_vm13 = vcmp.eq.s32.totalorder %v4292_v61, 0 }
 0xa49   :  { %v3951_v38 = vand.u32 2147483647, %v3950_v29  ;;  %vm4297_vm15 = vcmp.eq.s32.totalorder %v4292_v61, 2  ;;  %vm3979_vm7 = vcmp.lt.s32.totalorder %v3978_v22, 2  ;;  %vm3980_vm1 = vcmp.eq.s32.totalorder %v3978_v22, 0 }
 0xa4a   :  { %v3811_v6 = vmul.f32 %v3810_v62, %v3806_v50  ;;  %v3818_v13 = vmul.f32 %v3817_v35, %v3806_v50  ;;  %vm3983_vm3 = vcmp.eq.s32.totalorder %v3978_v22, 2 }
 0xa4b   :  { %v3954_v39 = vmul.f32 %v3953_v33, %v3951_v38 }
 0xa4c   :  { %v3812_v24 = vadd.f32 1.0, %v3811_v6  ;;  %v3819_v1 = vadd.f32 1.0, %v3818_v13 }
 0xa4d   :  { %v3955_v23 = vxor.u32 2147483648, %v3954_v39 }
 0xa4e   :  { %v3820_v19 = vmul.f32 %v3819_v1, %v3804_v49  ;;  %v3829_v20 = vxor.u32 2147483648, %v3812_v24 }
 0xa4f   :  { %v3956_v36 = vsel %vm3835_vm4, %v3955_v23, %v3954_v39  ;;  %vm3976_vm4 = vweird.f32 %v6353_v48 }
 0xa50   :  { %v3826_v55 = vxor.u32 2147483648, %v3820_v19  ;;  %v4145_v3 = vsel %vm4143_vm11, %v3829_v20, %v3820_v19  ;;  %v3959_v59 = vsel %vm6500_vm2, %v6353_v48, %v3956_v36  ;;  %v3830_v25 = vsel %vm3828_vm10, %v3829_v20, %v3820_v19 }
 0xa51   :  { %v3961_v40 = vmul.f32 %v3959_v59, %v3959_v59 }
 0xa52   :  { %v4142_v52 = vsel %vm4140_vm5, %v3812_v24, %v3826_v55  ;;  %v3827_v63 = vsel %vm3825_vm8, %v3812_v24, %v3826_v55 }
 0xa53   :  { %v4146_v15 = vsel %vm4139_vm9, %v4142_v52, %v4145_v3  ;;  %v3831_v11 = vsel %vm3824_vm12, %v3827_v63, %v3830_v25  ;;  %v3962_v9 = vmul.f32 -0.001358992, %v3961_v40  ;;  %v3969_v44 = vmul.f32 -0.00019511016, %v3961_v40 }
 0xa54   :  { %v4147_v60 = vsel %vm3821_vm14, nan, %v4146_v15  ;;  %v3832_v47 = vsel %vm3821_vm14, nan, %v3831_v11 }
 0xa55   :  { %v4306_v58 = vmul.f32 %v4304_v57, %v4147_v60  ;;  %v3992_v43 = vmul.f32 %v3990_v56, %v3832_v47  ;;  %v3963_v18 = vadd.f32 0.041655596, %v3962_v9  ;;  %v3970_v31 = vadd.f32 0.008332121, %v3969_v44 }
 0xa57   :  { %v4308_v49 = vadd.f32 %v4306_v58, %v3992_v43  ;;  %v3964_v5 = vmul.f32 %v3963_v18, %v3961_v40  ;;  %v3971_v50 = vmul.f32 %v3970_v31, %v3961_v40 }
 0xa59   :  { %v4310_v21 = vadd.f32 %v4308_v49, %v4996_v37  ;;  %v3965_v27 = vadd.f32 -0.4999988, %v3964_v5  ;;  %v3972_v45 = vadd.f32 -0.16666654, %v3971_v50 }
 0xa5b   :  { %4312 = vst.msk [vmem:[%s6529_s8] sm:$0xff] %vm36_vm0, %v4310_v21  ;;  %v3966_v4 = vmul.f32 %v3965_v27, %v3961_v40  ;;  %v3973_v32 = vmul.f32 %v3972_v45, %v3961_v40 }
 0xa5d   :  { %v3967_v7 = vadd.f32 1.0, %v3966_v4  ;;  %v3974_v34 = vadd.f32 1.0, %v3973_v32 }
 0xa5f   :  { %v3975_v41 = vmul.f32 %v3974_v34, %v3959_v59  ;;  %v3984_v28 = vxor.u32 2147483648, %v3967_v7 }
 0xa61   :  { %v3981_v10 = vxor.u32 2147483648, %v3975_v41  ;;  %v4299_v54 = vsel %vm4297_vm15, %v3984_v28, %v3975_v41  ;;  %v3985_v14 = vsel %vm3983_vm3, %v3984_v28, %v3975_v41 }
 0xa63   :  { %v4296_v37 = vsel %vm4294_vm13, %v3967_v7, %v3981_v10  ;;  %v3982_v53 = vsel %vm3980_vm1, %v3967_v7, %v3981_v10 }
 0xa64   :  { %v4300_v0 = vsel %vm4293_vm6, %v4296_v37, %v4299_v54  ;;  %v3986_v17 = vsel %vm3979_vm7, %v3982_v53, %v3985_v14 }
 0xa65   :  { %v4301_v62 = vsel %vm3976_vm4, nan, %v4300_v0  ;;  %v3987_v35 = vsel %vm3976_vm4, nan, %v3986_v17 }
 0xa66   :  { %v4307_v30 = vmul.f32 %v4304_v57, %v4301_v62  ;;  %v3993_v29 = vmul.f32 %v3990_v56, %v3987_v35 }
 0xa68   :  { %v4309_v6 = vadd.f32 %v4307_v30, %v3993_v29 }
 0xa6a   :  { %v4311_v13 = vadd.f32 %v4309_v6, %v5001_v42 }
 0xa6c   :  { %4313 = vst.msk [vmem:[%s6529_s8 + $0x8] sm:$0xff] %vm36_vm0, %v4311_v13 }

// kernel: pinnsformer_forward.7
= control target key start
LH: loop header
LB: loop body
LE: loop exit
PB: predicated region body
PF: predicated region fallthrough
CT: control target
= control target key end

     0   :  { %s7620_s0 = inlined_call_operand.vmem [shape: f32[32,16], index: 0, kind: input, shape index: {}]   ;;  %s7621_s1 = inlined_call_operand.vmem [shape: f32[4,2], index: 1, kind: input, shape index: {}]   ;;  %s7622_s2 = inlined_call_operand.vmem [shape: bf16[16,32], index: 2, kind: input, shape index: {}]   ;;  %s7623_s3 = inlined_call_operand.vmem [shape: f32[1,32], index: 3, kind: input, shape index: {}]   ;;  %s7624_s4 = inlined_call_operand.vmem [shape: bf16[32,32], index: 4, kind: input, shape index: {}]   ;;  %s7625_s5 = inlined_call_operand.vmem [shape: f32[1,32], index: 5, kind: input, shape index: {}]   ;;  %s7626_s6 = inlined_call_operand.vmem [shape: bf16[32,32], index: 6, kind: input, shape index: {}]   ;;  %s7627_s7 = inlined_call_operand.vmem [shape: f32[1,32], index: 7, kind: input, shape index: {}]   ;;  %s7628_s8 = inlined_call_operand.vmem [shape: bf16[32,16], index: 8, kind: input, shape index: {}]   ;;  %s7629_s9 = inlined_call_operand.vmem [shape: f32[1,16], index: 9, kind: input, shape index: {}]   ;;  %s7630_s10 = inlined_call_operand.vmem [shape: f32[1,16], index: 10, kind: input, shape index: {}]   ;;  %s7631_s11 = inlined_call_operand.vmem [shape: f32[1,16], index: 11, kind: input, shape index: {}]   ;;  %s7632_s12 = inlined_call_operand.vmem [shape: bf16[16,1], index: 12, kind: input, shape index: {}]   ;;  %s7633_s13 = inlined_call_operand.<no memory space> [shape: f32[1,1], index: 13, kind: input, shape index: {}]   ;;  %s7634_s14 = inlined_call_operand.vmem [shape: f32[32,1], index: 14, kind: output, shape index: {}]  }
   0x1   :  { %v19_v0 = vstv %s7633_s13 }
   0x2   :  { %20 = vst [vmem:[#allocation2] sm:$0x1] %v19_v0 }
   0x3   :  { %21 = vsyncpa [#allocation4], 0  ;;  %s29_s17 = sshll.u32 %s7621_s1, 4  ;;  %s5611_s18 = smov [#allocation3]   ;;  %s30_s17 = int_to_ptr.vmem [resolvable:$true] %s29_s17 }
   0x4   :  { %32 = dma.vmem_to_smem %s30_s17, 64, %s5611_s18, [#allocation4]  }
   0x5   :  { %5609 = dma.done.wait [#allocation4], 64  }
   0x6   :  { %5610 = vsyncadd [#allocation4], 4294967232 }
   0x7   :  { %61 = sfence }
   0x8   :  { %v5562_v1 = vld [vmem:[%s7622_s2] sm:$0xff]  ;;  %v64_v3 = vld [vmem:[%s7620_s0 + $0x8] sm:$0xff]  ;;  %v65_v5 = vld [vmem:[%s7620_s0 + $0x10] sm:$0xff]  ;;  %vm7635_vm0 = vcmask 130048   ;;  %v5612_v40 = vmov 683565275  }
   0x9   :  { %v63_v2 = vld [vmem:[%s7620_s0] sm:$0xff]  ;;  %v66_v6 = vld [vmem:[%s7620_s0 + $0x18] sm:$0xff]  ;;  %95 = vmatpush.bf16.msra.mxu0 %v5562_v1  ;;  %5570 = vmatpush.bf16.msra.mxu1 %v5562_v1  ;;  %v5613_v42 = vmov 2475754826   ;;  %v5614_v46 = vmov 2131351028  }
   0xa   :  { %v67_v4 = vpack.c.bf16 %v64_v3, %v63_v2  ;;  %v68_v7 = vpack.c.bf16 %v66_v6, %v65_v5  ;;  %v5721_v8 = vld [vmem:[%s7623_s3] ss:$0 sm:$0xff]  ;;  %v5615_v49 = vmov 2102212464   ;;  %v5616_v52 = vmov 920167782  }
   0xb   :  { %v5617_v55 = vmov 1326507024   ;;  %s6157_s0 = sld [smem:[#allocation3]] }
   0xc   :  { %5421 = vmatmul.msk.bf16.vlgmr.msra.gmra.mxu0 %vm7635_vm0, %v67_v4  ;;  %5422 = vmatmul.msk.bf16.vlgmr.msra.gmra.mxu1 %vm7635_vm0, %v68_v7  ;;  %s6159_s3 = sld [smem:[#allocation3 + $0x1]] }
   0xd   :  { %s6651_s18 = sld [smem:[#allocation3 + $0x80]] }
   0xe   :  { %s6661_s21 = sld [smem:[#allocation3 + $0x81]] }
   0xf   :  { %s7107_s1 = sld [smem:[#allocation3 + $0x101]] }
  0x10   :  { %s7452_s2 = sld [smem:[#allocation3 + $0x181]] }
  0x89   :  { %v97_v9 = vpop.f32.mrf.mxu0  ;;  %v102_v10 = vpop.f32.mrf.mxu1 }
  0x8a   :  { %v5724_v11 = vadd.f32 %v5721_v8, %v97_v9  ;;  %v5727_v12 = vadd.f32 %v5721_v8, %v102_v10 }
  0x8c   :  { %v108_v13 = vand.u32 2147483647, %v5724_v11  ;;  %v111_v14 = vand.u32 2139095040, %v5724_v11  ;;  %v418_v15 = vand.u32 2147483647, %v5727_v12  ;;  %v421_v16 = vand.u32 2139095040, %v5727_v12 }
  0x8e   :  { %v112_v17 = vshrl.u32 %v111_v14, 23  ;;  %v115_v18 = vand.u32 8388607, %v108_v13  ;;  %v422_v19 = vshrl.u32 %v421_v16, 23  ;;  %v425_v20 = vand.u32 8388607, %v418_v15 }
  0x90   :  { %v5423_v21 = vadd.s32 4294967169, %v112_v17  ;;  %v116_v22 = vor.u32 8388608, %v115_v18  ;;  %v5429_v23 = vadd.s32 4294967169, %v422_v19  ;;  %v426_v24 = vor.u32 8388608, %v425_v20 }
  0x91   :  { %v99_v29 = vpop.f32.mrf.mxu0 }
  0x92   :  { %v118_v25 = vadd.s32 1, %v5423_v21  ;;  %v5737_v26 = vshll.u32 %v116_v22, 8  ;;  %v428_v27 = vadd.s32 1, %v5429_v23  ;;  %v5739_v28 = vshll.u32 %v426_v24, 8 }
  0x93   :  { %v5745_v34 = vadd.f32 %v5721_v8, %v99_v29 }
  0x94   :  { %vm119_vm1 = vcmp.gt.s32.totalorder %v118_v25, 0  ;;  %vm429_vm2 = vcmp.gt.s32.totalorder %v428_v27, 0  ;;  %v5742_v33 = vand.u32 65535, %v5737_v26  ;;  %v5748_v36 = vshrl.u32 %v5737_v26, 16 }
  0x95   :  { %v120_v30 = vsel %vm119_vm1, %v118_v25, 0  ;;  %v430_v32 = vsel %vm429_vm2, %v428_v27, 0  ;;  %v5753_v38 = vand.u32 65535, %v5739_v28  ;;  %v5760_v44 = vshrl.u32 %v5739_v28, 16 }
  0x96   :  { %v122_v31 = vand.u32 31, %v120_v30  ;;  %v5750_v37 = vand.u32 31, %v430_v32  ;;  %v5755_v39 = vshrl.u32 %v120_v30, 5  ;;  %v5802_v24 = vshrl.u32 %v430_v32, 5 }
  0x98   :  { %v123_v35 = vsub.s32 32, %v122_v31  ;;  %v125_v41 = vshll.u32 %v5612_v40, %v122_v31  ;;  %v128_v43 = vshll.u32 %v5613_v42, %v122_v31  ;;  %v131_v48 = vshll.u32 %v5614_v46, %v122_v31 }
  0x99   :  { %v134_v51 = vshll.u32 %v5615_v49, %v122_v31  ;;  %v137_v54 = vshll.u32 %v5616_v52, %v122_v31  ;;  %v5771_v60 = vsub.s32 32, %v5750_v37  ;;  %vm140_vm3 = vcmp.lt.s32.totalorder %v5755_v39, 1 }
  0x9a   :  { %v126_v45 = vshrl.u32 %v5613_v42, %v123_v35  ;;  %v129_v47 = vshrl.u32 %v5614_v46, %v123_v35  ;;  %v132_v50 = vshrl.u32 %v5615_v49, %v123_v35  ;;  %v135_v53 = vshrl.u32 %v5616_v52, %v123_v35 }
  0x9b   :  { %v138_v56 = vshrl.u32 %v5617_v55, %v123_v35  ;;  %vm141_vm4 = vcmp.lt.s32.totalorder %v5755_v39, 2  ;;  %vm142_vm5 = vcmp.lt.s32.totalorder %v5755_v39, 3  ;;  %vm143_vm6 = vcmp.lt.s32.totalorder %v5755_v39, 4 }
  0x9c   :  { %v127_v57 = vor.u32 %v126_v45, %v125_v41  ;;  %v130_v58 = vor.u32 %v129_v47, %v128_v43  ;;  %v133_v59 = vor.u32 %v132_v50, %v131_v48  ;;  %v136_v61 = vor.u32 %v135_v53, %v134_v51 }
  0x9d   :  { %v139_v62 = vor.u32 %v138_v56, %v137_v54  ;;  %v435_v3 = vshll.u32 %v5612_v40, %v5750_v37  ;;  %v438_v4 = vshll.u32 %v5613_v42, %v5750_v37  ;;  %v436_v9 = vshrl.u32 %v5613_v42, %v5771_v60 }
  0x9e   :  { %v148_v63 = vsel %vm140_vm3, %v127_v57, %v130_v58  ;;  %v152_v0 = vsel %vm140_vm3, %v130_v58, %v133_v59  ;;  %v149_v1 = vsel %vm143_vm6, %v136_v61, 920167782  ;;  %v145_v5 = vsel %vm143_vm6, %v133_v59, 2102212464 }
  0x9f   :  { %v153_v2 = vsel %vm143_vm6, %v139_v62, 1326507024  ;;  %v150_v6 = vsel %vm142_vm5, %v133_v59, %v149_v1  ;;  %v124_v10 = vshrl.u32 %v5612_v40, %v123_v35  ;;  %v439_v17 = vshrl.u32 %v5614_v46, %v5771_v60 }
  0xa0   :  { %v154_v7 = vsel %vm142_vm5, %v136_v61, %v153_v2  ;;  %v151_v14 = vsel %vm141_vm4, %v148_v63, %v150_v6  ;;  %v146_v23 = vsel %vm142_vm5, %v130_v58, %v145_v5  ;;  %v5804_v25 = vor.u32 %v436_v9, %v435_v3 }
  0xa1   :  { %v155_v16 = vsel %vm141_vm4, %v152_v0, %v154_v7  ;;  %v181_v20 = vand.u32 65535, %v151_v14  ;;  %v182_v21 = vshrl.u32 %v151_v14, 16  ;;  %v144_v22 = vsel %vm140_vm3, %v124_v10, %v127_v57 }
  0xa2   :  { %v159_v18 = vand.u32 65535, %v155_v16  ;;  %v160_v19 = vshrl.u32 %v155_v16, 16  ;;  %v5808_v30 = vor.u32 %v439_v17, %v438_v4  ;;  %v441_v31 = vshll.u32 %v5614_v46, %v5750_v37 }
  0xa3   :  { %v184_v41 = vmul.u32 %v182_v21, %v5742_v33  ;;  %v185_v43 = vmul.u32 %v181_v20, %v5748_v36  ;;  %v442_v32 = vshrl.u32 %v5615_v49, %v5771_v60  ;;  %v183_v48 = vmul.u32 %v181_v20, %v5742_v33 }
  0xa4   :  { %v162_v27 = vmul.u32 %v160_v19, %v5742_v33  ;;  %v163_v29 = vmul.u32 %v159_v18, %v5748_v36  ;;  %v161_v35 = vmul.u32 %v159_v18, %v5742_v33  ;;  %v164_v45 = vmul.u32 %v160_v19, %v5748_v36 }
  0xa5   :  { %v186_v50 = vmul.u32 %v182_v21, %v5748_v36  ;;  %v187_v56 = vshll.u32 %v184_v41, 16  ;;  %v189_v58 = vshll.u32 %v185_v43, 16  ;;  %v444_v59 = vshll.u32 %v5615_v49, %v5750_v37 }
  0xa6   :  { %v165_v47 = vshll.u32 %v162_v27, 16  ;;  %v166_v51 = vshrl.u32 %v162_v27, 16  ;;  %v167_v53 = vshll.u32 %v163_v29, 16  ;;  %v168_v54 = vshrl.u32 %v163_v29, 16 }
  0xa7   :  { %v5618_v61 = vmov 0   ;;  %vm191_vm8 = vc.u32 %v183_v48, %v187_v56  ;;  %v193_v63 = vadd.s32 %v187_v56, %v183_v48  ;;  %v445_v33 = vshrl.u32 %v5616_v52, %v5771_v60 }
  0xa8   :  { %vm169_vm7 = vc.u32 %v161_v35, %v165_v47  ;;  %v171_v57 = vadd.s32 %v165_v47, %v161_v35  ;;  %v192_v36 = vsel %vm191_vm8, 1, %v5618_v61  ;;  %v447_v1 = vshll.u32 %v5616_v52, %v5750_v37 }
  0xa9   :  { %v170_v62 = vsel %vm169_vm7, 1, %v5618_v61  ;;  %v194_v3 = vadd.s32 %v192_v36, %v186_v50  ;;  %vm195_vm10 = vc.u32 %v193_v63, %v189_v58  ;;  %v443_v4 = vor.u32 %v442_v32, %v441_v31 }
  0xaa   :  { %v172_v0 = vadd.s32 %v170_v62, %v164_v45  ;;  %vm173_vm9 = vc.u32 %v171_v57, %v167_v53  ;;  %v196_v6 = vsel %vm195_vm10, 1, %v5618_v61  ;;  %v446_v7 = vor.u32 %v445_v33, %v444_v59 }
  0xab   :  { %v174_v2 = vsel %vm173_vm9, 1, %v5618_v61  ;;  %v448_v9 = vshrl.u32 %v5617_v55, %v5771_v60  ;;  %v188_v10 = vshrl.u32 %v184_v41, 16  ;;  %v198_v14 = vadd.s32 %v196_v6, %v194_v3 }
  0xac   :  { %v176_v5 = vadd.s32 %v174_v2, %v172_v0  ;;  %vm450_vm11 = vcmp.lt.s32.totalorder %v5802_v24, 1  ;;  %vm452_vm12 = vcmp.lt.s32.totalorder %v5802_v24, 3  ;;  %vm451_vm13 = vcmp.lt.s32.totalorder %v5802_v24, 2 }
  0xad   :  { %v449_v37 = vor.u32 %v448_v9, %v447_v1  ;;  %vm453_vm14 = vcmp.lt.s32.totalorder %v5802_v24, 4  ;;  %v190_v17 = vshrl.u32 %v185_v43, 16  ;;  %v199_v18 = vadd.s32 %v198_v14, %v188_v10 }
  0xae   :  { %v177_v16 = vadd.s32 %v176_v5, %v166_v51  ;;  %v458_v19 = vsel %vm450_vm11, %v5804_v25, %v5808_v30  ;;  %v459_v20 = vsel %vm453_vm14, %v446_v7, 920167782  ;;  %v5844_v27 = vadd.s32 %v193_v63, %v189_v58 }
  0xaf   :  { %v460_v29 = vsel %vm452_vm12, %v443_v4, %v459_v20  ;;  %v462_v31 = vsel %vm450_vm11, %v5808_v30, %v443_v4  ;;  %v147_v35 = vsel %vm141_vm4, %v144_v22, %v146_v23  ;;  %v200_v41 = vadd.s32 %v199_v18, %v190_v17 }
  0xb0   :  { %v5842_v21 = vadd.s32 %v177_v16, %v168_v54  ;;  %v461_v43 = vsel %vm451_vm13, %v458_v19, %v460_v29  ;;  %v463_v32 = vsel %vm453_vm14, %v449_v37, 1326507024  ;;  %v201_v22 = vmul.u32 %v5737_v26, %v147_v35 }
  0xb1   :  { %v464_v45 = vsel %vm452_vm12, %v446_v7, %v463_v32  ;;  %v491_v47 = vand.u32 65535, %v461_v43  ;;  %v204_v48 = vadd.s32 1, %v200_v41  ;;  %v492_v39 = vshrl.u32 %v461_v43, 16 }
  0xb2   :  { %vm203_vm15 = vc.u32 %v5842_v21, %v5844_v27  ;;  %v465_v50 = vsel %vm451_vm13, %v462_v31, %v464_v45  ;;  %v266_v58 = vand.u32 2139095040, %v5745_v34  ;;  %v434_v6 = vshrl.u32 %v5612_v40, %v5771_v60 }
  0xb3   :  { %v469_v23 = vand.u32 65535, %v465_v50  ;;  %v470_v51 = vshrl.u32 %v465_v50, 16  ;;  %v495_v53 = vmul.u32 %v491_v47, %v5760_v44  ;;  %v205_v54 = vsel %vm203_vm15, %v204_v48, %v200_v41 }
  0xb4   :  { %v493_v56 = vmul.u32 %v491_v47, %v5753_v38  ;;  %v494_v57 = vmul.u32 %v492_v39, %v5753_v38  ;;  %v206_v59 = vadd.s32 %v205_v54, %v201_v22  ;;  %v496_v26 = vmul.u32 %v492_v39, %v5760_v44 }
  0xb5   :  { %v471_v62 = vmul.u32 %v469_v23, %v5753_v38  ;;  %v472_v63 = vmul.u32 %v470_v51, %v5753_v38  ;;  %v473_v33 = vmul.u32 %v469_v23, %v5760_v44  ;;  %v499_v36 = vshll.u32 %v495_v53, 16 }
  0xb6   :  { %v497_v0 = vshll.u32 %v494_v57, 16  ;;  %v207_v1 = vadd.s32 536870912, %v206_v59  ;;  %v474_v2 = vmul.u32 %v470_v51, %v5760_v44  ;;  %v267_v9 = vshrl.u32 %v266_v58, 23 }
  0xb7   :  { %v475_v3 = vshll.u32 %v472_v63, 16  ;;  %v477_v5 = vshll.u32 %v473_v33, 16  ;;  %v455_v17 = vsel %vm453_vm14, %v443_v4, 2102212464  ;;  %v454_v31 = vsel %vm450_vm11, %v434_v6, %v5804_v25 }
  0xb8   :  { %vm501_vm1 = vc.u32 %v493_v56, %v497_v0  ;;  %v503_v7 = vadd.s32 %v497_v0, %v493_v56  ;;  %v5875_v10 = vshrl.u32 %v207_v1, 30  ;;  %v5426_v20 = vadd.s32 4294967169, %v267_v9 }
  0xb9   :  { %vm479_vm2 = vc.u32 %v471_v62, %v475_v3  ;;  %v481_v38 = vadd.s32 %v475_v3, %v471_v62  ;;  %v502_v14 = vsel %vm501_vm1, 1, %v5618_v61  ;;  %v456_v43 = vsel %vm452_vm12, %v5808_v30, %v455_v17 }
  0xba   :  { %v480_v16 = vsel %vm479_vm2, 1, %v5618_v61  ;;  %v504_v37 = vadd.s32 %v502_v14, %v496_v26  ;;  %vm505_vm3 = vc.u32 %v503_v7, %v499_v36  ;;  %v209_v44 = vshll.u32 %v5875_v10, 30 }
  0xbb   :  { %v482_v18 = vadd.s32 %v480_v16, %v474_v2  ;;  %vm483_vm4 = vc.u32 %v481_v38, %v477_v5  ;;  %v506_v19 = vsel %vm505_vm3, 1, %v5618_v61  ;;  %v476_v4 = vshrl.u32 %v472_v63, 16 }
  0xbc   :  { %v484_v60 = vsel %vm483_vm4, 1, %v5618_v61  ;;  %v5884_v29 = vsub.s32 %v206_v59, %v209_v44  ;;  %v508_v41 = vadd.s32 %v506_v19, %v504_v37  ;;  %v498_v32 = vshrl.u32 %v494_v57, 16 }
  0xbd   :  { %v486_v35 = vadd.s32 %v484_v60, %v482_v18  ;;  %v273_v45 = vadd.s32 1, %v5426_v20  ;;  %v478_v48 = vshrl.u32 %v473_v33, 16  ;;  %v500_v39 = vshrl.u32 %v495_v53, 16 }
  0xbe   :  { %vm211_vm5 = vcmp.lt.s32.totalorder %v5884_v29, 0  ;;  %v212_v47 = vsub.s32 0, %v5884_v29  ;;  %v509_v22 = vadd.s32 %v508_v41, %v498_v32  ;;  %v457_v23 = vsel %vm451_vm13, %v454_v31, %v456_v43 }
  0xbf   :  { %v487_v50 = vadd.s32 %v486_v35, %v476_v4  ;;  %vm274_vm6 = vcmp.gt.s32.totalorder %v273_v45, 0  ;;  %v5899_v56 = vadd.s32 %v503_v7, %v499_v36  ;;  %v263_v62 = vand.u32 2147483647, %v5745_v34 }
  0xc0   :  { %v213_v25 = vsel %vm211_vm5, %v212_v47, %v5884_v29  ;;  %v275_v51 = vsel %vm274_vm6, %v273_v45, 0  ;;  %v510_v57 = vadd.s32 %v509_v22, %v500_v39  ;;  %v511_v63 = vmul.u32 %v5739_v28, %v457_v23 }
  0xc1   :  { %v214_v54 = vclz %v213_v25  ;;  %v5897_v30 = vadd.s32 %v487_v50, %v478_v48  ;;  %v277_v58 = vand.u32 31, %v275_v51  ;;  %v270_v1 = vand.u32 8388607, %v263_v62 }
  0xc2   :  { %v514_v53 = vadd.s32 1, %v510_v57  ;;  %v5919_v38 = vshrl.u32 %v275_v51, 5  ;;  %v202_v4 = vadd.s32 %v5844_v27, %v5842_v21  ;;  %vm110_vm4 = vcmp.lt.s32.totalorder %v5724_v11, 0 }
  0xc3   :  { %v5424_v59 = vadd.s32 4294967294, %v214_v54  ;;  %vm513_vm7 = vc.u32 %v5897_v30, %v5899_v56  ;;  %v5905_v33 = vsub.s32 32, %v277_v58  ;;  %v280_v2 = vshll.u32 %v5612_v40, %v277_v58 }
  0xc4   :  { %v515_v24 = vsel %vm513_vm7, %v514_v53, %v510_v57  ;;  %v283_v28 = vshll.u32 %v5613_v42, %v277_v58  ;;  %v289_v14 = vshll.u32 %v5615_v49, %v277_v58  ;;  %v286_v18 = vshll.u32 %v5614_v46, %v277_v58 }
  0xc5   :  { %vm5425_vm8 = vcmp.lt.s32.totalorder %v5424_v59, 0  ;;  %v516_v0 = vadd.s32 %v515_v24, %v511_v63  ;;  %v281_v36 = vshrl.u32 %v5613_v42, %v5905_v33  ;;  %v284_v3 = vshrl.u32 %v5614_v46, %v5905_v33 }
  0xc6   :  { %v217_v26 = vsel %vm5425_vm8, 0, %v5424_v59  ;;  %v287_v6 = vshrl.u32 %v5615_v49, %v5905_v33  ;;  %v290_v7 = vshrl.u32 %v5616_v52, %v5905_v33  ;;  %v293_v16 = vshrl.u32 %v5617_v55, %v5905_v33 }
  0xc7   :  { %v517_v5 = vadd.s32 536870912, %v516_v0  ;;  %v222_v9 = vsub.s32 4294967266, %v217_v26  ;;  %v5926_v44 = vor.u32 %v281_v36, %v280_v2  ;;  %v5928_v17 = vor.u32 %v284_v3, %v283_v28 }
  0xc8   :  { %v271_v60 = vor.u32 8388608, %v270_v1  ;;  %v291_v19 = vor.u32 %v290_v7, %v289_v14  ;;  %v292_v20 = vshll.u32 %v5616_v52, %v277_v58  ;;  %v288_v35 = vor.u32 %v287_v6, %v286_v18  ;;  %v104_v7 = vpop.f32.mrf.mxu1 }
  0xc9   :  { %v5924_v37 = vshrl.u32 %v517_v5, 30  ;;  %v223_v41 = vadd.s32 127, %v222_v9  ;;  %vm295_vm9 = vcmp.lt.s32.totalorder %v5919_v38, 1  ;;  %vm298_vm10 = vcmp.lt.s32.totalorder %v5919_v38, 4 }
  0xca   :  { %v294_v43 = vor.u32 %v293_v16, %v292_v20  ;;  %v303_v45 = vsel %vm295_vm9, %v5926_v44, %v5928_v17  ;;  %v218_v47 = vsub.s32 32, %v217_v26  ;;  %vm297_vm11 = vcmp.lt.s32.totalorder %v5919_v38, 3 }
  0xcb   :  { %v519_v31 = vshll.u32 %v5924_v37, 30  ;;  %v304_v48 = vsel %vm298_vm10, %v291_v19, 920167782  ;;  %v5946_v50 = vshll.u32 %v271_v60, 8  ;;  %vm296_vm13 = vcmp.lt.s32.totalorder %v5919_v38, 2 }
  0xcc   :  { %v305_v27 = vsel %vm297_vm11, %v288_v35, %v304_v48  ;;  %v224_v39 = vshll.u32 %v223_v41, 23  ;;  %v307_v25 = vsel %vm295_vm9, %v5928_v17, %v288_v35  ;;  %v308_v23 = vsel %vm298_vm10, %v294_v43, 1326507024 }
  0xcd   :  { %v5936_v32 = vsub.s32 %v516_v0, %v519_v31  ;;  %v306_v22 = vsel %vm296_vm13, %v303_v45, %v305_v27  ;;  %v309_v54 = vsel %vm297_vm11, %v291_v19, %v308_v23  ;;  %v220_v58 = vshrl.u32 %v202_v4, %v218_v47 }
  0xce   :  { %v337_v57 = vshrl.u32 %v306_v22, 16  ;;  %v310_v59 = vsel %vm296_vm13, %v307_v25, %v309_v54  ;;  %v312_v53 = vand.u32 65535, %v5946_v50  ;;  %v313_v24 = vshrl.u32 %v5946_v50, 16 }
  0xcf   :  { %vm521_vm12 = vcmp.lt.s32.totalorder %v5936_v32, 0  ;;  %v522_v21 = vsub.s32 0, %v5936_v32  ;;  %v314_v0 = vand.u32 65535, %v310_v59  ;;  %v315_v36 = vshrl.u32 %v310_v59, 16 }
  0xd0   :  { %v219_v1 = vshll.u32 %v5884_v29, %v217_v26  ;;  %v225_v2 = vor.u32 4788187, %v224_v39  ;;  %v336_v3 = vand.u32 65535, %v306_v22  ;;  %v339_v6 = vmul.u32 %v337_v57, %v312_v53 }
  0xd1   :  { %v523_v51 = vsel %vm521_vm12, %v522_v21, %v5936_v32  ;;  %v317_v5 = vmul.u32 %v315_v36, %v312_v53  ;;  %v318_v28 = vmul.u32 %v314_v0, %v313_v24  ;;  %v316_v16 = vmul.u32 %v314_v0, %v312_v53 }
  0xd2   :  { %v524_v63 = vclz %v523_v51  ;;  %v221_v9 = vor.u32 %v220_v58, %v219_v1  ;;  %v226_v60 = vand.u32 2147483647, %v225_v2  ;;  %v319_v19 = vmul.u32 %v315_v36, %v313_v24 }
  0xd3   :  { %v320_v18 = vshll.u32 %v317_v5, 16  ;;  %v340_v20 = vmul.u32 %v336_v3, %v313_v24  ;;  %v5969_v31 = vadd.f32 %v5721_v8, %v104_v7  ;;  %v322_v41 = vshll.u32 %v318_v28, 16 }
  0xd4   :  { %v5430_v14 = vadd.s32 4294967294, %v524_v63  ;;  %v342_v29 = vshll.u32 %v339_v6, 16  ;;  %v228_v26 = vcvt.s32.f32 %v221_v9  ;;  %v279_v4 = vshrl.u32 %v5612_v40, %v5905_v33 }
  0xd5   :  { %vm324_vm14 = vc.u32 %v316_v16, %v320_v18  ;;  %v326_v43 = vadd.s32 %v320_v18, %v316_v16  ;;  %v300_v45 = vsel %vm298_vm10, %v288_v35, 2102212464  ;;  %v338_v21 = vmul.u32 %v336_v3, %v312_v53 }
  0xd6   :  { %v325_v47 = vsel %vm324_vm14, 1, %v5618_v61  ;;  %vm5431_vm15 = vcmp.lt.s32.totalorder %v5430_v14, 0  ;;  %v229_v27 = vmul.f32 %v228_v26, %v226_v60  ;;  %v321_v8 = vshrl.u32 %v317_v5, 16 }
  0xd7   :  { %v327_v48 = vadd.s32 %v325_v47, %v319_v19  ;;  %vm328_vm1 = vc.u32 %v326_v43, %v322_v41  ;;  %v341_v22 = vmul.u32 %v337_v57, %v313_v24  ;;  %v344_v23 = vshll.u32 %v340_v20, 16 }
  0xd8   :  { %v329_v39 = vsel %vm328_vm1, 1, %v5618_v61  ;;  %vm346_vm2 = vc.u32 %v338_v21, %v342_v29  ;;  %v348_v51 = vadd.s32 %v342_v29, %v338_v21  ;;  %v527_v54 = vsel %vm5431_vm15, 0, %v5430_v14 }
  0xd9   :  { %v331_v25 = vadd.s32 %v329_v39, %v327_v48  ;;  %v347_v33 = vsel %vm346_vm2, 1, %v5618_v61  ;;  %v299_v35 = vsel %vm295_vm9, %v279_v4, %v5926_v44  ;;  %v230_v53 = vxor.u32 2147483648, %v229_v27 }
  0xda   :  { %v349_v59 = vadd.s32 %v347_v33, %v341_v22  ;;  %vm350_vm3 = vc.u32 %v348_v51, %v344_v23  ;;  %v301_v63 = vsel %vm297_vm11, %v5928_v17, %v300_v45  ;;  %v323_v57 = vshrl.u32 %v318_v28, 16 }
  0xdb   :  { %v332_v58 = vadd.s32 %v331_v25, %v321_v8  ;;  %v351_v24 = vsel %vm350_vm3, 1, %v5618_v61  ;;  %v532_v0 = vsub.s32 4294967266, %v527_v54  ;;  %v343_v36 = vshrl.u32 %v339_v6, 16 }
  0xdc   :  { %v353_v1 = vadd.s32 %v351_v24, %v349_v59  ;;  %v576_v2 = vand.u32 2139095040, %v5969_v31  ;;  %v345_v44 = vshrl.u32 %v340_v20, 16  ;;  %v231_v9 = vsel %vm110_vm4, %v230_v53, %v229_v27 }
  0xdd   :  { %v5986_v3 = vadd.s32 %v332_v58, %v323_v57  ;;  %v302_v17 = vsel %vm296_vm13, %v299_v35, %v301_v63  ;;  %v5993_v28 = vadd.s32 %v348_v51, %v344_v23  ;;  %v528_v14 = vsub.s32 32, %v527_v54 }
  0xde   :  { %v354_v5 = vadd.s32 %v353_v1, %v343_v36  ;;  %v577_v7 = vshrl.u32 %v576_v2, 23  ;;  %v533_v6 = vadd.s32 127, %v532_v0  ;;  %vm5999_vm6 = vcmp.le.f32.partialorder %v108_v13, 0.7853982 }
  0xdf   :  { %vm358_vm5 = vc.u32 %v5986_v3, %v5993_v28  ;;  %v512_v19 = vadd.s32 %v5899_v56, %v5897_v30  ;;  %v6008_v41 = vsel %vm5999_vm6, %v5724_v11, %v231_v9  ;;  %v356_v43 = vmul.u32 %v5946_v50, %v302_v17 }
  0xe0   :  { %v355_v16 = vadd.s32 %v354_v5, %v345_v44  ;;  %v5432_v18 = vadd.s32 4294967169, %v577_v7  ;;  %v573_v29 = vand.u32 2147483647, %v5969_v31  ;;  %v534_v4 = vshll.u32 %v533_v6, 23 }
  0xe1   :  { %v530_v26 = vshrl.u32 %v512_v19, %v528_v14  ;;  %v529_v48 = vshll.u32 %v5936_v32, %v527_v54  ;;  %v6015_v56 = vmul.f32 %v6008_v41, %v6008_v41  ;;  %vm420_vm12 = vcmp.lt.s32.totalorder %v5727_v12, 0 }
  0xe2   :  { %v359_v38 = vadd.s32 1, %v355_v16  ;;  %v583_v20 = vadd.s32 1, %v5432_v18  ;;  %v535_v8 = vor.u32 4788187, %v534_v4  ;;  %v580_v50 = vand.u32 8388607, %v573_v29 }
  0xe3   :  { %v531_v27 = vor.u32 %v530_v26, %v529_v48  ;;  %v244_v0 = vmul.f32 -0.00019511016, %v6015_v56  ;;  %v232_v19 = vsub.s32 4, %v5875_v10  ;;  %vm6080_vm15 = vcmp.le.f32.partialorder %v418_v15, 0.7853982 }
  0xe4   :  { %v360_v13 = vsel %vm358_vm5, %v359_v38, %v355_v16  ;;  %vm584_vm7 = vcmp.gt.s32.totalorder %v583_v20, 0  ;;  %v536_v57 = vand.u32 2147483647, %v535_v8  ;;  %v581_v2 = vor.u32 8388608, %v580_v50 }
  0xe5   :  { %v361_v45 = vadd.s32 %v360_v13, %v356_v43  ;;  %v585_v47 = vsel %vm584_vm7, %v583_v20, 0  ;;  %v538_v36 = vcvt.s32.f32 %v531_v27  ;;  %v245_v26 = vadd.f32 0.008332121, %v244_v0 }
  0xe6   :  { %v587_v30 = vand.u32 31, %v585_v47  ;;  %v6029_v59 = vshrl.u32 %v585_v47, 5  ;;  %v6046_v18 = vshll.u32 %v581_v2, 8  ;;  %vm265_vm7 = vcmp.lt.s32.totalorder %v5745_v34, 0 }
  0xe7   :  { %v362_v21 = vadd.s32 536870912, %v361_v45  ;;  %v539_v6 = vmul.f32 %v538_v36, %v536_v57 }
  0xe8   :  { %v588_v39 = vsub.s32 32, %v587_v30  ;;  %v590_v25 = vshll.u32 %v5612_v40, %v587_v30  ;;  %v593_v23 = vshll.u32 %v5613_v42, %v587_v30  ;;  %v596_v32 = vshll.u32 %v5614_v46, %v587_v30 }
  0xe9   :  { %v6019_v22 = vshrl.u32 %v362_v21, 30  ;;  %v599_v35 = vshll.u32 %v5615_v49, %v587_v30  ;;  %v602_v63 = vshll.u32 %v5616_v52, %v587_v30  ;;  %vm605_vm9 = vcmp.lt.s32.totalorder %v6029_v59, 1 }
  0xea   :  { %v591_v51 = vshrl.u32 %v5613_v42, %v588_v39  ;;  %v594_v54 = vshrl.u32 %v5614_v46, %v588_v39  ;;  %v597_v33 = vshrl.u32 %v5615_v49, %v588_v39  ;;  %v600_v53 = vshrl.u32 %v5616_v52, %v588_v39 }
  0xeb   :  { %v364_v58 = vshll.u32 %v6019_v22, 30  ;;  %v603_v24 = vshrl.u32 %v5617_v55, %v588_v39  ;;  %vm607_vm10 = vcmp.lt.s32.totalorder %v6029_v59, 3  ;;  %vm608_vm11 = vcmp.lt.s32.totalorder %v6029_v59, 4 }
  0xec   :  { %v6035_v44 = vor.u32 %v591_v51, %v590_v25  ;;  %v6037_v5 = vor.u32 %v594_v54, %v593_v23  ;;  %v6039_v7 = vor.u32 %v597_v33, %v596_v32  ;;  %v601_v9 = vor.u32 %v600_v53, %v599_v35 }
  0xed   :  { %v365_v1 = vsub.s32 %v361_v45, %v364_v58  ;;  %v604_v14 = vor.u32 %v603_v24, %v602_v63  ;;  %vm606_vm13 = vcmp.lt.s32.totalorder %v6029_v59, 2  ;;  %v540_v47 = vxor.u32 2147483648, %v539_v6 }
  0xee   :  { %v613_v20 = vsel %vm605_vm9, %v6035_v44, %v6037_v5  ;;  %v614_v43 = vsel %vm608_vm11, %v601_v9, 920167782  ;;  %v617_v13 = vsel %vm605_vm9, %v6037_v5, %v6039_v7  ;;  %v622_v8 = vand.u32 65535, %v6046_v18 }
  0xef   :  { %vm366_vm8 = vcmp.lt.s32.totalorder %v365_v1, 0  ;;  %v367_v17 = vsub.s32 0, %v365_v1  ;;  %v615_v4 = vsel %vm607_vm10, %v6039_v7, %v614_v43  ;;  %v618_v45 = vsel %vm608_vm11, %v604_v14, 1326507024 }
  0xf0   :  { %v616_v30 = vsel %vm606_vm13, %v613_v20, %v615_v4  ;;  %v619_v21 = vsel %vm607_vm10, %v601_v9, %v618_v45  ;;  %v623_v23 = vshrl.u32 %v6046_v18, 16  ;;  %v246_v54 = vmul.f32 %v245_v26, %v6015_v56 }
  0xf1   :  { %v368_v16 = vsel %vm366_vm8, %v367_v17, %v365_v1  ;;  %v620_v27 = vsel %vm606_vm13, %v617_v13, %v619_v21  ;;  %v646_v50 = vand.u32 65535, %v616_v30  ;;  %v647_v25 = vshrl.u32 %v616_v30, 16 }
  0xf2   :  { %v369_v38 = vclz %v368_v16  ;;  %v624_v32 = vand.u32 65535, %v620_v27  ;;  %v625_v51 = vshrl.u32 %v620_v27, 16  ;;  %v357_v33 = vadd.s32 %v5993_v28, %v5986_v3 }
  0xf3   :  { %v649_v58 = vmul.u32 %v647_v25, %v622_v8  ;;  %v541_v53 = vsel %vm420_vm12, %v540_v47, %v539_v6  ;;  %v650_v24 = vmul.u32 %v646_v50, %v623_v23  ;;  %v589_v0 = vshrl.u32 %v5612_v40, %v588_v39 }
  0xf4   :  { %v5427_v48 = vadd.s32 4294967294, %v369_v38  ;;  %v627_v36 = vmul.u32 %v625_v51, %v622_v8  ;;  %v628_v2 = vmul.u32 %v624_v32, %v623_v23  ;;  %v648_v9 = vmul.u32 %v646_v50, %v622_v8 }
  0xf5   :  { %v652_v38 = vshll.u32 %v649_v58, 16  ;;  %v626_v28 = vmul.u32 %v624_v32, %v622_v8  ;;  %v629_v6 = vmul.u32 %v625_v51, %v623_v23  ;;  %v651_v43 = vmul.u32 %v647_v25, %v623_v23 }
  0xf6   :  { %vm5428_vm14 = vcmp.lt.s32.totalorder %v5427_v48, 0  ;;  %v630_v20 = vshll.u32 %v627_v36, 16  ;;  %v632_v39 = vshll.u32 %v628_v2, 16  ;;  %v654_v13 = vshll.u32 %v650_v24, 16 }
  0xf7   :  { %v372_v35 = vsel %vm5428_vm14, 0, %v5427_v48  ;;  %vm656_vm2 = vc.u32 %v648_v9, %v652_v38  ;;  %v610_v15 = vsel %vm608_vm11, %v6039_v7, 2102212464  ;;  %v631_v32 = vshrl.u32 %v627_v36, 16 }
  0xf8   :  { %v373_v63 = vsub.s32 32, %v372_v35  ;;  %v377_v57 = vsub.s32 4294967266, %v372_v35  ;;  %v374_v17 = vshll.u32 %v365_v1, %v372_v35  ;;  %vm634_vm1 = vc.u32 %v626_v28, %v630_v20 }
  0xf9   :  { %v636_v45 = vadd.s32 %v630_v20, %v626_v28  ;;  %v658_v1 = vadd.s32 %v652_v38, %v648_v9  ;;  %v635_v48 = vsel %vm634_vm1, 1, %v5618_v61  ;;  %v657_v30 = vsel %vm656_vm2, 1, %v5618_v61 }
  0xfa   :  { %v375_v14 = vshrl.u32 %v357_v33, %v373_v63  ;;  %v378_v16 = vadd.s32 127, %v377_v57  ;;  %v637_v21 = vadd.s32 %v635_v48, %v629_v6  ;;  %v659_v27 = vadd.s32 %v657_v30, %v651_v43 }
  0xfb   :  { %vm638_vm3 = vc.u32 %v636_v45, %v632_v39  ;;  %vm660_vm5 = vc.u32 %v658_v1, %v654_v13  ;;  %v653_v33 = vshrl.u32 %v649_v58, 16  ;;  %v247_v63 = vadd.f32 -0.16666654, %v246_v54 }
  0xfc   :  { %v376_v26 = vor.u32 %v375_v14, %v374_v17  ;;  %v379_v4 = vshll.u32 %v378_v16, 23  ;;  %v639_v25 = vsel %vm638_vm3, 1, %v5618_v61  ;;  %v661_v23 = vsel %vm660_vm5, 1, %v5618_v61 }
  0xfd   :  { %v641_v51 = vadd.s32 %v639_v25, %v637_v21  ;;  %v663_v35 = vadd.s32 %v661_v23, %v659_v27  ;;  %v609_v57 = vsel %vm605_vm9, %v589_v0, %v6035_v44  ;;  %v611_v9 = vsel %vm607_vm10, %v6037_v5, %v610_v15 }
  0xfe   :  { %v380_v47 = vor.u32 4788187, %v379_v4  ;;  %v383_v50 = vcvt.s32.f32 %v376_v26  ;;  %v633_v17 = vshrl.u32 %v628_v2, 16  ;;  %v655_v16 = vshrl.u32 %v650_v24, 16 }
  0xff   :  { %v642_v14 = vadd.s32 %v641_v51, %v631_v32  ;;  %v664_v38 = vadd.s32 %v663_v35, %v653_v33  ;;  %v6100_v36 = vsel %vm6080_vm15, %v5727_v12, %v541_v53  ;;  %v387_v58 = vsub.s32 4, %v6019_v22 }
 0x100   :  { %v381_v8 = vand.u32 2147483647, %v380_v47  ;;  %v612_v44 = vsel %vm606_vm13, %v609_v57, %v611_v9  ;;  %v6108_v5 = vadd.s32 %v658_v1, %v654_v13  ;;  %v233_v53 = vsel %vm110_vm4, %v232_v19, %v5875_v10 }
 0x101   :  { %v6106_v0 = vadd.s32 %v642_v14, %v633_v17  ;;  %v665_v2 = vadd.s32 %v664_v38, %v655_v16  ;;  %v248_v24 = vmul.f32 %v247_v63, %v6015_v56  ;;  %vm6118_vm8 = vcmp.le.f32.partialorder %v263_v62, 0.7853982 }
 0x102   :  { %v384_v7 = vmul.f32 %v383_v50, %v381_v8  ;;  %v6124_v6 = vmul.f32 %v6100_v36, %v6100_v36  ;;  %v388_v19 = vsel %vm265_vm7, %v387_v58, %v6019_v22  ;;  %v666_v62 = vmul.u32 %v6046_v18, %v612_v44 }
 0x103   :  { %vm668_vm4 = vc.u32 %v6106_v0, %v6108_v5  ;;  %v669_v10 = vadd.s32 1, %v665_v2  ;;  %v237_v26 = vmul.f32 -0.001358992, %v6015_v56  ;;  %v235_v39 = vsel %vm5999_vm6, 0, %v233_v53 }
 0x104   :  { %v385_v54 = vxor.u32 2147483648, %v384_v7  ;;  %v249_v47 = vadd.f32 1.0, %v248_v24  ;;  %v554_v15 = vmul.f32 -0.00019511016, %v6124_v6  ;;  %v390_v48 = vsel %vm6118_vm8, 0, %v388_v19 }
 0x105   :  { %v670_v4 = vsel %vm668_vm4, %v669_v10, %v665_v2  ;;  %v238_v1 = vadd.f32 0.041655596, %v237_v26  ;;  %v252_v18 = vadd.s32 3, %v235_v39  ;;  %v407_v8 = vadd.s32 3, %v390_v48 }
 0x106   :  { %v386_v59 = vsel %vm265_vm7, %v385_v54, %v384_v7  ;;  %v671_v45 = vadd.s32 %v670_v4, %v666_v62  ;;  %v250_v25 = vmul.f32 %v249_v47, %v6008_v41  ;;  %v555_v23 = vadd.f32 0.008332121, %v554_v15 }
 0x107   :  { %v389_v20 = vsel %vm6118_vm8, %v5745_v34, %v386_v59  ;;  %v239_v21 = vmul.f32 %v238_v1, %v6015_v56  ;;  %v253_v35 = vand.u32 3, %v252_v18  ;;  %v6145_v57 = vand.u32 3, %v407_v8  ;;  %v5564_v1 = vld [vmem:[%s7624_s4 + $0x8] sm:$0xff] }
 0x108   :  { %v391_v43 = vmul.f32 %v389_v20, %v389_v20  ;;  %v672_v22 = vadd.s32 536870912, %v671_v45  ;;  %vm251_vm6 = vweird.f32 %v5724_v11  ;;  %v256_v14 = vxor.u32 2147483648, %v250_v25  ;;  %1394 = vmatpush.bf16.msrb.mxu1 %v5564_v1 }
 0x109   :  { %v240_v60 = vadd.f32 -0.4999988, %v239_v21  ;;  %v878_v16 = vand.u32 3, %v235_v39  ;;  %v6151_v41 = vmul.f32 %v555_v23, %v6124_v6  ;;  %v6153_v58 = vand.u32 3, %v390_v48 }
 0x10a   :  { %v399_v13 = vmul.f32 -0.00019511016, %v391_v43  ;;  %v6140_v50 = vshrl.u32 %v672_v22, 30  ;;  %v392_v63 = vmul.f32 -0.001358992, %v391_v43  ;;  %vm254_vm10 = vcmp.lt.s32.totalorder %v253_v35, 2 }
 0x10b   :  { %v241_v33 = vmul.f32 %v240_v60, %v6015_v56  ;;  %vm255_vm11 = vcmp.eq.s32.totalorder %v253_v35, 0  ;;  %vm258_vm13 = vcmp.eq.s32.totalorder %v253_v35, 2  ;;  %vm410_vm14 = vcmp.eq.s32.totalorder %v6145_v57, 0 }
 0x10c   :  { %v400_v30 = vadd.f32 0.008332121, %v399_v13  ;;  %v674_v51 = vshll.u32 %v6140_v50, 30  ;;  %v393_v38 = vadd.f32 0.041655596, %v392_v63  ;;  %vm879_vm1 = vcmp.lt.s32.totalorder %v878_v16, 2 }
 0x10d   :  { %v242_v17 = vadd.f32 1.0, %v241_v33  ;;  %vm880_vm2 = vcmp.eq.s32.totalorder %v878_v16, 0  ;;  %vm409_vm3 = vcmp.lt.s32.totalorder %v6145_v57, 2  ;;  %vm883_vm5 = vcmp.eq.s32.totalorder %v878_v16, 2 }
 0x10e   :  { %v401_v27 = vmul.f32 %v400_v30, %v391_v43  ;;  %v6147_v9 = vsub.s32 %v671_v45, %v674_v51  ;;  %v394_v2 = vmul.f32 %v393_v38, %v391_v43  ;;  %vm406_vm7 = vweird.f32 %v5745_v34 }
 0x10f   :  { %v259_v44 = vxor.u32 2147483648, %v242_v17  ;;  %v257_v10 = vsel %vm255_vm11, %v242_v17, %v256_v14  ;;  %v882_v62 = vsel %vm880_vm2, %v242_v17, %v256_v14  ;;  %vm413_vm8 = vcmp.eq.s32.totalorder %v6145_v57, 2 }
 0x110   :  { %v402_v32 = vadd.f32 -0.16666654, %v401_v27  ;;  %vm676_vm9 = vcmp.lt.s32.totalorder %v6147_v9, 0  ;;  %v677_v56 = vsub.s32 0, %v6147_v9  ;;  %v395_v59 = vadd.f32 -0.4999988, %v394_v2 }
 0x111   :  { %v260_v19 = vsel %vm258_vm13, %v259_v44, %v250_v25  ;;  %v885_v39 = vsel %vm883_vm5, %v259_v44, %v250_v25  ;;  %vm1033_vm4 = vcmp.lt.s32.totalorder %v6153_v58, 2  ;;  %vm1034_vm11 = vcmp.eq.s32.totalorder %v6153_v58, 0  ;;  %v5563_v27 = vld [vmem:[%s7624_s4] sm:$0xff] }
 0x112   :  { %v403_v7 = vmul.f32 %v402_v32, %v391_v43  ;;  %v678_v24 = vsel %vm676_vm9, %v677_v56, %v6147_v9  ;;  %v396_v4 = vmul.f32 %v395_v59, %v391_v43  ;;  %v886_v45 = vsel %vm879_vm1, %v882_v62, %v885_v39  ;;  %1395 = vmatpush.bf16.msrb.mxu1 %v5563_v27 }
 0x113   :  { %v679_v28 = vclz %v678_v24  ;;  %v547_v15 = vmul.f32 -0.001358992, %v6124_v6  ;;  %v667_v43 = vadd.s32 %v6108_v5, %v6106_v0  ;;  %v6178_v22 = vstv %s6157_s0 }
 0x114   :  { %v404_v54 = vadd.f32 1.0, %v403_v7  ;;  %v397_v47 = vadd.f32 1.0, %v396_v4  ;;  %v887_v8 = vsel %vm251_vm6, nan, %v886_v45  ;;  %v6186_v60 = vstv %s6159_s3 }
 0x115   :  { %v5433_v26 = vadd.s32 4294967294, %v679_v28  ;;  %v548_v33 = vadd.f32 0.041655596, %v547_v15  ;;  %v1351_v7 = vmul.f32 %v6186_v60, %v887_v8  ;;  %v557_v56 = vadd.f32 -0.16666654, %v6151_v41 }
 0x116   :  { %v405_v53 = vmul.f32 %v404_v54, %v389_v20  ;;  %v261_v20 = vsel %vm254_vm10, %v257_v10, %v260_v19  ;;  %v414_v5 = vxor.u32 2147483648, %v397_v47  ;;  %vm1037_vm10 = vcmp.eq.s32.totalorder %v6153_v58, 2 }
 0x117   :  { %vm5434_vm9 = vcmp.lt.s32.totalorder %v5433_v26, 0  ;;  %v262_v30 = vsel %vm251_vm6, nan, %v261_v20  ;;  %v542_v24 = vsub.s32 4, %v5924_v37  ;;  %v549_v57 = vmul.f32 %v548_v33, %v6124_v6 }
 0x118   :  { %v411_v13 = vxor.u32 2147483648, %v405_v53  ;;  %v682_v48 = vsel %vm5434_vm9, 0, %v5433_v26  ;;  %v415_v35 = vsel %vm413_vm8, %v414_v5, %v405_v53  ;;  %v729_v11 = vmul.f32 %v6178_v22, %v262_v30 }
 0x119   :  { %v683_v21 = vsub.s32 32, %v682_v48  ;;  %v687_v18 = vsub.s32 4294967266, %v682_v48  ;;  %v684_v23 = vshll.u32 %v6147_v9, %v682_v48  ;;  %v1039_v63 = vsel %vm1037_vm10, %v414_v5, %v405_v53 }
 0x11a   :  { %v412_v0 = vsel %vm410_vm14, %v397_v47, %v411_v13  ;;  %v1036_v25 = vsel %vm1034_vm11, %v397_v47, %v411_v13  ;;  %v1355_v59 = vadd.f32 %v1351_v7, %v729_v11  ;;  %vm1381_vm6 = vcmask 261120  }
 0x11b   :  { %v685_v32 = vshrl.u32 %v667_v43, %v683_v21  ;;  %v688_v51 = vadd.s32 127, %v687_v18  ;;  %v416_v16 = vsel %vm409_vm3, %v412_v0, %v415_v35  ;;  %v1040_v9 = vsel %vm1033_vm4, %v1036_v25, %v1039_v63 }
 0x11c   :  { %v417_v38 = vsel %vm406_vm7, nan, %v416_v16  ;;  %v1041_v54 = vsel %vm406_vm7, nan, %v1040_v9  ;;  %v558_v19 = vmul.f32 %v557_v56, %v6124_v6  ;;  %v543_v41 = vsel %vm420_vm12, %v542_v24, %v5924_v37 }
 0x11d   :  { %v686_v17 = vor.u32 %v685_v32, %v684_v23  ;;  %v689_v14 = vshll.u32 %v688_v51, 23  ;;  %v730_v2 = vmul.f32 %v6178_v22, %v417_v38  ;;  %v1352_v53 = vmul.f32 %v6186_v60, %v1041_v54 }
 0x11e   :  { %v550_v20 = vadd.f32 -0.4999988, %v549_v57  ;;  %vm575_vm13 = vcmp.lt.s32.totalorder %v5969_v31, 0  ;;  %v697_v4 = vsub.s32 4, %v6140_v50  ;;  %v545_v39 = vsel %vm6080_vm15, 0, %v543_v41 }
 0x11f   :  { %v690_v44 = vor.u32 4788187, %v689_v14  ;;  %v693_v58 = vcvt.s32.f32 %v686_v17  ;;  %v1356_v10 = vadd.f32 %v1352_v53, %v730_v2  ;;  %v559_v13 = vadd.f32 1.0, %v558_v19 }
 0x120   :  { %vm574_vm14 = vcmp.le.f32.partialorder %v573_v29, 0.7853982  ;;  %v551_v37 = vmul.f32 %v550_v20, %v6124_v6  ;;  %v562_v15 = vadd.s32 3, %v545_v39  ;;  %v698_v43 = vsel %vm575_vm13, %v697_v4, %v6140_v50 }
 0x121   :  { %v691_v28 = vand.u32 2147483647, %v690_v44  ;;  %v1359_v62 = vpack.c.bf16 %v1356_v10, %v1355_v59  ;;  %v560_v48 = vmul.f32 %v559_v13, %v6100_v36  ;;  %v700_v18 = vsel %vm574_vm14, 0, %v698_v43 }
 0x122   :  { %v552_v27 = vadd.f32 1.0, %v551_v37  ;;  %v563_v0 = vand.u32 3, %v562_v15  ;;  %v1186_v5 = vand.u32 3, %v545_v39  ;;  %v717_v32 = vadd.s32 3, %v700_v18 }
 0x123   :  { %v694_v34 = vmul.f32 %v693_v58, %v691_v28  ;;  %5456 = vmatmul.msk.bf16.vlgmr.msrb.gmra.mxu1 %vm1381_vm6, %v1359_v62  ;;  %v566_v25 = vxor.u32 2147483648, %v560_v48  ;;  %v1340_v54 = vand.u32 3, %v700_v18  ;;  %vm561_vm7 = vweird.f32 %v5727_v12 }
 0x124   :  { %v569_v33 = vxor.u32 2147483648, %v552_v27  ;;  %vm564_vm12 = vcmp.lt.s32.totalorder %v563_v0, 2  ;;  %vm565_vm15 = vcmp.eq.s32.totalorder %v563_v0, 0  ;;  %vm1188_vm1 = vcmp.eq.s32.totalorder %v1186_v5, 0 }
 0x125   :  { %v695_v26 = vxor.u32 2147483648, %v694_v34  ;;  %v567_v36 = vsel %vm565_vm15, %v552_v27, %v566_v25  ;;  %v1190_v11 = vsel %vm1188_vm1, %v552_v27, %v566_v25  ;;  %vm568_vm2 = vcmp.eq.s32.totalorder %v563_v0, 2 }
 0x126   :  { %v718_v63 = vand.u32 3, %v717_v32  ;;  %vm1187_vm3 = vcmp.lt.s32.totalorder %v1186_v5, 2  ;;  %vm1191_vm5 = vcmp.eq.s32.totalorder %v1186_v5, 2  ;;  %v570_v17 = vsel %vm568_vm2, %v569_v33, %v560_v48 }
 0x127   :  { %v696_v45 = vsel %vm575_vm13, %v695_v26, %v694_v34  ;;  %v1193_v16 = vsel %vm1191_vm5, %v569_v33, %v560_v48  ;;  %v571_v9 = vsel %vm564_vm12, %v567_v36, %v570_v17  ;;  %vm716_vm8 = vweird.f32 %v5969_v31 }
 0x128   :  { %v699_v1 = vsel %vm574_vm14, %v5969_v31, %v696_v45  ;;  %v1194_v38 = vsel %vm1187_vm3, %v1190_v11, %v1193_v16  ;;  %vm719_vm4 = vcmp.lt.s32.totalorder %v718_v63, 2  ;;  %v572_v2 = vsel %vm561_vm7, nan, %v571_v9  ;;  %v6238_v45 = vld [vmem:[%s7625_s5] ss:$0 sm:$0xff] }
 0x129   :  { %v701_v47 = vmul.f32 %v699_v1, %v699_v1  ;;  %vm720_vm9 = vcmp.eq.s32.totalorder %v718_v63, 0  ;;  %v1195_v24 = vsel %vm561_vm7, nan, %v1194_v38  ;;  %vm723_vm11 = vcmp.eq.s32.totalorder %v718_v63, 2 }
 0x12a   :  { %vm1341_vm10 = vcmp.lt.s32.totalorder %v1340_v54, 2  ;;  %vm1342_vm13 = vcmp.eq.s32.totalorder %v1340_v54, 0  ;;  %vm1345_vm14 = vcmp.eq.s32.totalorder %v1340_v54, 2  ;;  %v731_v19 = vmul.f32 %v6178_v22, %v572_v2 }
 0x12b   :  { %v709_v30 = vmul.f32 -0.00019511016, %v701_v47  ;;  %v702_v21 = vmul.f32 -0.001358992, %v701_v47  ;;  %v1353_v12 = vmul.f32 %v6186_v60, %v1195_v24 }
 0x12d   :  { %v710_v3 = vadd.f32 0.008332121, %v709_v30  ;;  %v703_v8 = vadd.f32 0.041655596, %v702_v21  ;;  %v1357_v4 = vadd.f32 %v1353_v12, %v731_v19 }
 0x12f   :  { %v711_v29 = vmul.f32 %v710_v3, %v701_v47  ;;  %v704_v23 = vmul.f32 %v703_v8, %v701_v47 }
 0x131   :  { %v712_v51 = vadd.f32 -0.16666654, %v711_v29  ;;  %v705_v6 = vadd.f32 -0.4999988, %v704_v23 }
 0x133   :  { %v713_v50 = vmul.f32 %v712_v51, %v701_v47  ;;  %v706_v35 = vmul.f32 %v705_v6, %v701_v47 }
 0x135   :  { %v714_v7 = vadd.f32 1.0, %v713_v50  ;;  %v707_v14 = vadd.f32 1.0, %v706_v35 }
 0x137   :  { %v715_v56 = vmul.f32 %v714_v7, %v699_v1  ;;  %v724_v44 = vxor.u32 2147483648, %v707_v14 }
 0x139   :  { %v721_v53 = vxor.u32 2147483648, %v715_v56  ;;  %v725_v28 = vsel %vm723_vm11, %v724_v44, %v715_v56  ;;  %v1347_v59 = vsel %vm1345_vm14, %v724_v44, %v715_v56 }
 0x13b   :  { %v722_v57 = vsel %vm720_vm9, %v707_v14, %v721_v53  ;;  %v1344_v58 = vsel %vm1342_vm13, %v707_v14, %v721_v53 }
 0x13c   :  { %v726_v10 = vsel %vm719_vm4, %v722_v57, %v725_v28  ;;  %v1348_v34 = vsel %vm1341_vm10, %v1344_v58, %v1347_v59 }
 0x13d   :  { %v727_v62 = vsel %vm716_vm8, nan, %v726_v10  ;;  %v1349_v41 = vsel %vm716_vm8, nan, %v1348_v34 }
 0x13e   :  { %v732_v26 = vmul.f32 %v6178_v22, %v727_v62  ;;  %v1354_v20 = vmul.f32 %v6186_v60, %v1349_v41 }
 0x140   :  { %v1358_v39 = vadd.f32 %v1354_v20, %v732_v26 }
 0x142   :  { %v1360_v13 = vpack.c.bf16 %v1358_v39, %v1357_v4 }
 0x144   :  { %5457 = vmatmul.msk.bf16.gmra.mxu1 %vm1381_vm6, %v1360_v13 }
 0x1a0   :  { %v1397_v1 = vpop.f32.mrf.mxu1 }
 0x1a1   :  { %v6241_v47 = vadd.f32 %v6238_v45, %v1397_v1 }
 0x1a3   :  { %v1411_v31 = vand.u32 2139095040, %v6241_v47  ;;  %v1408_v60 = vand.u32 2147483647, %v6241_v47 }
 0x1a5   :  { %v1412_v37 = vshrl.u32 %v1411_v31, 23  ;;  %v1415_v43 = vand.u32 8388607, %v1408_v60 }
 0x1a7   :  { %v5459_v22 = vadd.s32 4294967169, %v1412_v37  ;;  %v1416_v18 = vor.u32 8388608, %v1415_v43 }
 0x1a8   :  { %v1399_v14 = vpop.f32.mrf.mxu1 }
 0x1a9   :  { %v1418_v15 = vadd.s32 1, %v5459_v22  ;;  %v6260_v63 = vshll.u32 %v1416_v18, 8  ;;  %v6278_v56 = vadd.f32 %v6238_v45, %v1399_v14 }
 0x1ab   :  { %vm1419_vm12 = vcmp.gt.s32.totalorder %v1418_v15, 0  ;;  %v1457_v53 = vand.u32 65535, %v6260_v63  ;;  %v1458_v24 = vshrl.u32 %v6260_v63, 16  ;;  %v1566_v12 = vand.u32 2139095040, %v6278_v56 }
 0x1ac   :  { %v1420_v48 = vsel %vm1419_vm12, %v1418_v15, 0  ;;  %v1563_v13 = vand.u32 2147483647, %v6278_v56 }
 0x1ad   :  { %v1422_v30 = vand.u32 31, %v1420_v48  ;;  %v6247_v3 = vshrl.u32 %v1420_v48, 5  ;;  %v1567_v48 = vshrl.u32 %v1566_v12, 23 }
 0x1af   :  { %v1423_v21 = vsub.s32 32, %v1422_v30  ;;  %v1425_v27 = vshll.u32 %v5612_v40, %v1422_v30  ;;  %v1428_v8 = vshll.u32 %v5613_v42, %v1422_v30  ;;  %v1431_v29 = vshll.u32 %v5614_v46, %v1422_v30 }
 0x1b0   :  { %v1434_v23 = vshll.u32 %v5615_v49, %v1422_v30  ;;  %v1437_v51 = vshll.u32 %v5616_v52, %v1422_v30  ;;  %vm1440_vm15 = vcmp.lt.s32.totalorder %v6247_v3, 1  ;;  %vm1443_vm1 = vcmp.lt.s32.totalorder %v6247_v3, 4 }
 0x1b1   :  { %v1426_v0 = vshrl.u32 %v5613_v42, %v1423_v21  ;;  %v1429_v5 = vshrl.u32 %v5614_v46, %v1423_v21  ;;  %v1432_v25 = vshrl.u32 %v5615_v49, %v1423_v21  ;;  %v1435_v32 = vshrl.u32 %v5616_v52, %v1423_v21 }
 0x1b2   :  { %v1438_v33 = vshrl.u32 %v5617_v55, %v1423_v21  ;;  %vm1442_vm2 = vcmp.lt.s32.totalorder %v6247_v3, 3  ;;  %vm1441_vm3 = vcmp.lt.s32.totalorder %v6247_v3, 2  ;;  %v1424_v10 = vshrl.u32 %v5612_v40, %v1423_v21 }
 0x1b3   :  { %v1427_v6 = vor.u32 %v1426_v0, %v1425_v27  ;;  %v1430_v50 = vor.u32 %v1429_v5, %v1428_v8  ;;  %v1433_v36 = vor.u32 %v1432_v25, %v1431_v29  ;;  %v1436_v35 = vor.u32 %v1435_v32, %v1434_v23 }
 0x1b4   :  { %v1439_v11 = vor.u32 %v1438_v33, %v1437_v51  ;;  %v5462_v0 = vadd.s32 4294967169, %v1567_v48 }
 0x1b5   :  { %v1448_v7 = vsel %vm1440_vm15, %v1427_v6, %v1430_v50  ;;  %v1452_v17 = vsel %vm1440_vm15, %v1430_v50, %v1433_v36  ;;  %v1449_v16 = vsel %vm1443_vm1, %v1436_v35, 920167782  ;;  %v1444_v62 = vsel %vm1440_vm15, %v1424_v10, %v1427_v6 }
 0x1b6   :  { %v1453_v9 = vsel %vm1443_vm1, %v1439_v11, 1326507024  ;;  %v1450_v38 = vsel %vm1442_vm2, %v1433_v36, %v1449_v16  ;;  %v1445_v20 = vsel %vm1443_vm1, %v1433_v36, 2102212464  ;;  %v1573_v33 = vadd.s32 1, %v5462_v0 }
 0x1b7   :  { %v1454_v54 = vsel %vm1442_vm2, %v1436_v35, %v1453_v9  ;;  %v1451_v44 = vsel %vm1441_vm3, %v1448_v7, %v1450_v38  ;;  %v1446_v5 = vsel %vm1442_vm2, %v1430_v50, %v1445_v20  ;;  %v1570_v35 = vand.u32 8388607, %v1563_v13 }
 0x1b8   :  { %v1455_v2 = vsel %vm1441_vm3, %v1452_v17, %v1454_v54  ;;  %v1481_v58 = vand.u32 65535, %v1451_v44  ;;  %v1482_v59 = vshrl.u32 %v1451_v44, 16  ;;  %v1447_v11 = vsel %vm1441_vm3, %v1444_v62, %v1446_v5 }
 0x1b9   :  { %v1459_v57 = vand.u32 65535, %v1455_v2  ;;  %v1460_v28 = vshrl.u32 %v1455_v2, 16  ;;  %vm1574_vm9 = vcmp.gt.s32.totalorder %v1573_v33, 0 }
 0x1ba   :  { %v1484_v41 = vmul.u32 %v1482_v59, %v1457_v53  ;;  %v1485_v26 = vmul.u32 %v1481_v58, %v1458_v24  ;;  %v1483_v31 = vmul.u32 %v1481_v58, %v1457_v53  ;;  %v1486_v37 = vmul.u32 %v1482_v59, %v1458_v24 }
 0x1bb   :  { %v1462_v19 = vmul.u32 %v1460_v28, %v1457_v53  ;;  %v1463_v34 = vmul.u32 %v1459_v57, %v1458_v24  ;;  %v1461_v4 = vmul.u32 %v1459_v57, %v1457_v53  ;;  %v1464_v1 = vmul.u32 %v1460_v28, %v1458_v24 }
 0x1bc   :  { %v1487_v22 = vshll.u32 %v1484_v41, 16  ;;  %v1489_v21 = vshll.u32 %v1485_v26, 16  ;;  %v1488_v6 = vshrl.u32 %v1484_v41, 16  ;;  %v1490_v50 = vshrl.u32 %v1485_v26, 16 }
 0x1bd   :  { %v1465_v39 = vshll.u32 %v1462_v19, 16  ;;  %v1467_v15 = vshll.u32 %v1463_v34, 16  ;;  %v1466_v23 = vshrl.u32 %v1462_v19, 16  ;;  %v1468_v7 = vshrl.u32 %v1463_v34, 16 }
 0x1be   :  { %vm1491_vm7 = vc.u32 %v1483_v31, %v1487_v22  ;;  %v1493_v18 = vadd.s32 %v1487_v22, %v1483_v31  ;;  %v1575_v16 = vsel %vm1574_vm9, %v1573_v33, 0  ;;  %v1501_v53 = vmul.u32 %v6260_v63, %v1447_v11 }
 0x1bf   :  { %vm1469_vm5 = vc.u32 %v1461_v4, %v1465_v39  ;;  %v1471_v43 = vadd.s32 %v1465_v39, %v1461_v4  ;;  %v1492_v8 = vsel %vm1491_vm7, 1, %v5618_v61  ;;  %v1577_v44 = vand.u32 31, %v1575_v16 }
 0x1c0   :  { %v1470_v30 = vsel %vm1469_vm5, 1, %v5618_v61  ;;  %v1494_v25 = vadd.s32 %v1492_v8, %v1486_v37  ;;  %vm1495_vm4 = vc.u32 %v1493_v18, %v1489_v21  ;;  %v6305_v54 = vadd.s32 %v1493_v18, %v1489_v21 }
 0x1c1   :  { %v1472_v27 = vadd.s32 %v1470_v30, %v1464_v1  ;;  %vm1473_vm8 = vc.u32 %v1471_v43, %v1467_v15  ;;  %v1496_v51 = vsel %vm1495_vm4, 1, %v5618_v61  ;;  %v1402_v9 = vpop.f32.mrf.mxu1  ;;  %v1571_v24 = vor.u32 8388608, %v1570_v35 }
 0x1c2   :  { %v1474_v29 = vsel %vm1473_vm8, 1, %v5618_v61  ;;  %v1498_v36 = vadd.s32 %v1496_v51, %v1494_v25  ;;  %v6310_v3 = vshrl.u32 %v1575_v16, 5  ;;  %v1578_v57 = vsub.s32 32, %v1577_v44 }
 0x1c3   :  { %v1476_v32 = vadd.s32 %v1474_v29, %v1472_v27  ;;  %v6313_v28 = vadd.f32 %v6238_v45, %v1402_v9  ;;  %v1580_v59 = vshll.u32 %v5612_v40, %v1577_v44  ;;  %v1583_v10 = vshll.u32 %v5613_v42, %v1577_v44 }
 0x1c4   :  { %v1499_v14 = vadd.s32 %v1498_v36, %v1488_v6  ;;  %v1586_v19 = vshll.u32 %v5614_v46, %v1577_v44  ;;  %v1581_v34 = vshrl.u32 %v5613_v42, %v1578_v57  ;;  %v1584_v63 = vshrl.u32 %v5614_v46, %v1578_v57 }
 0x1c5   :  { %v1477_v17 = vadd.s32 %v1476_v32, %v1466_v23  ;;  %v1587_v12 = vshrl.u32 %v5615_v49, %v1578_v57  ;;  %v1589_v62 = vshll.u32 %v5615_v49, %v1577_v44  ;;  %v1590_v26 = vshrl.u32 %v5616_v52, %v1578_v57 }
 0x1c6   :  { %v1500_v2 = vadd.s32 %v1499_v14, %v1490_v50  ;;  %v1592_v20 = vshll.u32 %v5616_v52, %v1577_v44  ;;  %v1593_v4 = vshrl.u32 %v5617_v55, %v1578_v57  ;;  %v6325_v1 = vor.u32 %v1581_v34, %v1580_v59 }
 0x1c7   :  { %v6303_v38 = vadd.s32 %v1477_v17, %v1468_v7  ;;  %v6327_v31 = vor.u32 %v1584_v63, %v1583_v10  ;;  %v1588_v37 = vor.u32 %v1587_v12, %v1586_v19  ;;  %v1591_v22 = vor.u32 %v1590_v26, %v1589_v62 }
 0x1c8   :  { %v1504_v58 = vadd.s32 1, %v1500_v2  ;;  %v1594_v15 = vor.u32 %v1593_v4, %v1592_v20  ;;  %v1721_v43 = vand.u32 2139095040, %v6313_v28  ;;  %vm1595_vm10 = vcmp.lt.s32.totalorder %v6310_v3, 1 }
 0x1c9   :  { %vm1503_vm11 = vc.u32 %v6303_v38, %v6305_v54  ;;  %vm1598_vm13 = vcmp.lt.s32.totalorder %v6310_v3, 4  ;;  %v6332_v30 = vshll.u32 %v1571_v24, 8  ;;  %vm1597_vm14 = vcmp.lt.s32.totalorder %v6310_v3, 3 }
 0x1ca   :  { %v1505_v41 = vsel %vm1503_vm11, %v1504_v58, %v1500_v2  ;;  %v1603_v21 = vsel %vm1595_vm10, %v6325_v1, %v6327_v31  ;;  %v1604_v18 = vsel %vm1598_vm13, %v1591_v22, 920167782  ;;  %v1607_v27 = vsel %vm1595_vm10, %v6327_v31, %v1588_v37 }
 0x1cb   :  { %v1506_v39 = vadd.s32 %v1505_v41, %v1501_v53  ;;  %vm1596_vm12 = vcmp.lt.s32.totalorder %v6310_v3, 2  ;;  %v1605_v0 = vsel %vm1597_vm14, %v1588_v37, %v1604_v18  ;;  %v1608_v5 = vsel %vm1598_vm13, %v1594_v15, 1326507024 }
 0x1cc   :  { %v1606_v29 = vsel %vm1596_vm12, %v1603_v21, %v1605_v0  ;;  %v1609_v25 = vsel %vm1597_vm14, %v1591_v22, %v1608_v5  ;;  %v1722_v23 = vshrl.u32 %v1721_v43, 23  ;;  %v1612_v33 = vand.u32 65535, %v6332_v30 }
 0x1cd   :  { %v1507_v48 = vadd.s32 536870912, %v1506_v39  ;;  %v1610_v51 = vsel %vm1596_vm12, %v1607_v27, %v1609_v25  ;;  %v1636_v6 = vand.u32 65535, %v1606_v29  ;;  %v1613_v36 = vshrl.u32 %v6332_v30, 16 }
 0x1ce   :  { %v1614_v35 = vand.u32 65535, %v1610_v51  ;;  %v1615_v11 = vshrl.u32 %v1610_v51, 16  ;;  %v1637_v7 = vshrl.u32 %v1606_v29, 16  ;;  %v1579_v50 = vshrl.u32 %v5612_v40, %v1578_v57 }
 0x1cf   :  { %v6344_v8 = vshrl.u32 %v1507_v48, 30  ;;  %v5465_v9 = vadd.s32 4294967169, %v1722_v23  ;;  %v1640_v53 = vmul.u32 %v1636_v6, %v1613_v36  ;;  %v1600_v24 = vsel %vm1598_vm13, %v1588_v37, 2102212464 }
 0x1d0   :  { %v1617_v14 = vmul.u32 %v1615_v11, %v1612_v33  ;;  %v1618_v16 = vmul.u32 %v1614_v35, %v1613_v36  ;;  %v1639_v2 = vmul.u32 %v1637_v7, %v1612_v33  ;;  %v1616_v58 = vmul.u32 %v1614_v35, %v1612_v33 }
 0x1d1   :  { %v1509_v32 = vshll.u32 %v6344_v8, 30  ;;  %v1638_v10 = vmul.u32 %v1636_v6, %v1612_v33  ;;  %v1619_v34 = vmul.u32 %v1615_v11, %v1613_v36  ;;  %v1641_v41 = vmul.u32 %v1637_v7, %v1613_v36 }
 0x1d2   :  { %v1620_v59 = vshll.u32 %v1617_v14, 16  ;;  %v1622_v63 = vshll.u32 %v1618_v16, 16  ;;  %v1642_v57 = vshll.u32 %v1639_v2, 16  ;;  %v1644_v20 = vshll.u32 %v1640_v53, 16 }
 0x1d3   :  { %v6360_v17 = vsub.s32 %v1506_v39, %v1509_v32  ;;  %v1718_v48 = vand.u32 2147483647, %v6313_v28  ;;  %v1599_v21 = vsel %vm1595_vm10, %v1579_v50, %v6325_v1  ;;  %v1621_v18 = vshrl.u32 %v1617_v14, 16 }
 0x1d4   :  { %vm1624_vm1 = vc.u32 %v1616_v58, %v1620_v59  ;;  %v1626_v62 = vadd.s32 %v1620_v59, %v1616_v58  ;;  %vm1646_vm2 = vc.u32 %v1638_v10, %v1642_v57  ;;  %v1648_v4 = vadd.s32 %v1642_v57, %v1638_v10 }
 0x1d5   :  { %vm1511_vm15 = vcmp.lt.s32.totalorder %v6360_v17, 0  ;;  %v1512_v44 = vsub.s32 0, %v6360_v17  ;;  %v1625_v26 = vsel %vm1624_vm1, 1, %v5618_v61  ;;  %v1647_v37 = vsel %vm1646_vm2, 1, %v5618_v61 }
 0x1d6   :  { %v1627_v22 = vadd.s32 %v1625_v26, %v1619_v34  ;;  %vm1628_vm3 = vc.u32 %v1626_v62, %v1622_v63  ;;  %v1649_v43 = vadd.s32 %v1647_v37, %v1641_v41  ;;  %vm1650_vm5 = vc.u32 %v1648_v4, %v1644_v20 }
 0x1d7   :  { %v1513_v19 = vsel %vm1511_vm15, %v1512_v44, %v6360_v17  ;;  %v1629_v15 = vsel %vm1628_vm3, 1, %v5618_v61  ;;  %v1651_v0 = vsel %vm1650_vm5, 1, %v5618_v61  ;;  %v1601_v5 = vsel %vm1597_vm14, %v6327_v31, %v1600_v24 }
 0x1d8   :  { %v1514_v12 = vclz %v1513_v19  ;;  %v1631_v27 = vadd.s32 %v1629_v15, %v1627_v22  ;;  %v1643_v29 = vshrl.u32 %v1639_v2, 16  ;;  %v1653_v25 = vadd.s32 %v1651_v0, %v1649_v43 }
 0x1d9   :  { %v1728_v23 = vadd.s32 1, %v5465_v9  ;;  %v1623_v32 = vshrl.u32 %v1618_v16, 16  ;;  %v1645_v33 = vshrl.u32 %v1640_v53, 16  ;;  %v1725_v36 = vand.u32 8388607, %v1718_v48 }
 0x1da   :  { %v5460_v39 = vadd.s32 4294967294, %v1514_v12  ;;  %v1632_v51 = vadd.s32 %v1631_v27, %v1621_v18  ;;  %v1654_v6 = vadd.s32 %v1653_v25, %v1643_v29  ;;  %v1602_v1 = vsel %vm1596_vm12, %v1599_v21, %v1601_v5 }
 0x1db   :  { %vm1729_vm8 = vcmp.gt.s32.totalorder %v1728_v23, 0  ;;  %v6385_v11 = vadd.s32 %v1648_v4, %v1644_v20  ;;  %v1656_v16 = vmul.u32 %v6332_v30, %v1602_v1  ;;  %v1726_v44 = vor.u32 8388608, %v1725_v36 }
 0x1dc   :  { %vm5461_vm7 = vcmp.lt.s32.totalorder %v5460_v39, 0  ;;  %v6383_v35 = vadd.s32 %v1632_v51, %v1623_v32  ;;  %v1730_v31 = vsel %vm1729_vm8, %v1728_v23, 0  ;;  %v1655_v50 = vadd.s32 %v1654_v6, %v1645_v33 }
 0x1dd   :  { %v1517_v7 = vsel %vm5461_vm7, 0, %v5460_v39  ;;  %v1732_v14 = vand.u32 31, %v1730_v31  ;;  %v6392_v3 = vshrl.u32 %v1730_v31, 5  ;;  %v1502_v18 = vadd.s32 %v6305_v54, %v6303_v38 }
 0x1de   :  { %vm1658_vm4 = vc.u32 %v6383_v35, %v6385_v11  ;;  %v1659_v9 = vadd.s32 1, %v1655_v50  ;;  %v1522_v53 = vsub.s32 4294967266, %v1517_v7  ;;  %v1518_v22 = vsub.s32 32, %v1517_v7 }
 0x1df   :  { %v6390_v2 = vsub.s32 32, %v1732_v14  ;;  %v1735_v24 = vshll.u32 %v5612_v40, %v1732_v14  ;;  %v1738_v58 = vshll.u32 %v5613_v42, %v1732_v14  ;;  %v1741_v30 = vshll.u32 %v5614_v46, %v1732_v14 }
 0x1e0   :  { %v1660_v59 = vsel %vm1658_vm4, %v1659_v9, %v1655_v50  ;;  %v1744_v57 = vshll.u32 %v5615_v49, %v1732_v14  ;;  %v1747_v26 = vshll.u32 %v5616_v52, %v1732_v14  ;;  %v1523_v43 = vadd.s32 127, %v1522_v53 }
 0x1e1   :  { %v1736_v10 = vshrl.u32 %v5613_v42, %v6390_v2  ;;  %v1739_v19 = vshrl.u32 %v5614_v46, %v6390_v2  ;;  %v1661_v34 = vadd.s32 %v1660_v59, %v1656_v16  ;;  %v1742_v63 = vshrl.u32 %v5615_v49, %v6390_v2 }
 0x1e2   :  { %v1745_v12 = vshrl.u32 %v5616_v52, %v6390_v2  ;;  %v1748_v20 = vshrl.u32 %v5617_v55, %v6390_v2  ;;  %vm1750_vm9 = vcmp.lt.s32.totalorder %v6392_v3, 1  ;;  %vm1753_vm11 = vcmp.lt.s32.totalorder %v6392_v3, 4 }
 0x1e3   :  { %v6406_v62 = vor.u32 %v1736_v10, %v1735_v24  ;;  %v6408_v41 = vor.u32 %v1739_v19, %v1738_v58  ;;  %v1662_v4 = vadd.s32 536870912, %v1661_v34  ;;  %v6413_v37 = vor.u32 %v1742_v63, %v1741_v30  ;;  %v1404_v24 = vpop.f32.mrf.mxu1 }
 0x1e4   :  { %v1746_v39 = vor.u32 %v1745_v12, %v1744_v57  ;;  %v1749_v15 = vor.u32 %v1748_v20, %v1747_v26  ;;  %v6427_v5 = vshll.u32 %v1726_v44, 8  ;;  %vm1752_vm10 = vcmp.lt.s32.totalorder %v6392_v3, 3 }
 0x1e5   :  { %v6415_v21 = vshrl.u32 %v1662_v4, 30  ;;  %v1758_v27 = vsel %vm1750_vm9, %v6406_v62, %v6408_v41  ;;  %v1520_v25 = vshrl.u32 %v1502_v18, %v1518_v22  ;;  %vm1751_vm13 = vcmp.lt.s32.totalorder %v6392_v3, 2 }
 0x1e6   :  { %v1759_v0 = vsel %vm1753_vm11, %v1746_v39, 920167782  ;;  %v1763_v54 = vsel %vm1753_vm11, %v1749_v15, 1326507024  ;;  %v1524_v23 = vshll.u32 %v1523_v43, 23  ;;  %v1762_v33 = vsel %vm1750_vm9, %v6408_v41, %v6413_v37 }
 0x1e7   :  { %v1664_v29 = vshll.u32 %v6415_v21, 30  ;;  %v1760_v38 = vsel %vm1752_vm10, %v6413_v37, %v1759_v0  ;;  %v1519_v6 = vshll.u32 %v6360_v17, %v1517_v7  ;;  %v1764_v36 = vsel %vm1752_vm10, %v1746_v39, %v1763_v54 }
 0x1e8   :  { %v1761_v51 = vsel %vm1751_vm13, %v1758_v27, %v1760_v38  ;;  %v1767_v1 = vand.u32 65535, %v6427_v5  ;;  %v1768_v14 = vshrl.u32 %v6427_v5, 16  ;;  %v1765_v9 = vsel %vm1751_vm13, %v1762_v33, %v1764_v36 }
 0x1e9   :  { %v1665_v32 = vsub.s32 %v1661_v34, %v1664_v29  ;;  %v1792_v31 = vshrl.u32 %v1761_v51, 16  ;;  %v1521_v16 = vor.u32 %v1520_v25, %v1519_v6  ;;  %v1791_v44 = vand.u32 65535, %v1761_v51 }
 0x1ea   :  { %v1525_v58 = vor.u32 4788187, %v1524_v23  ;;  %v1769_v17 = vand.u32 65535, %v1765_v9  ;;  %v1770_v7 = vshrl.u32 %v1765_v9, 16  ;;  %v1657_v30 = vadd.s32 %v6385_v11, %v6383_v35 }
 0x1eb   :  { %vm1666_vm14 = vcmp.lt.s32.totalorder %v1665_v32, 0  ;;  %v1667_v50 = vsub.s32 0, %v1665_v32  ;;  %v1794_v53 = vmul.u32 %v1792_v31, %v1767_v1  ;;  %v6453_v57 = vadd.f32 %v6238_v45, %v1404_v24 }
 0x1ec   :  { %v1772_v34 = vmul.u32 %v1770_v7, %v1767_v1  ;;  %v1773_v63 = vmul.u32 %v1769_v17, %v1768_v14  ;;  %v1528_v12 = vcvt.s32.f32 %v1521_v16  ;;  %v1793_v20 = vmul.u32 %v1791_v44, %v1767_v1 }
 0x1ed   :  { %v1668_v59 = vsel %vm1666_vm14, %v1667_v50, %v1665_v32  ;;  %v1797_v19 = vshll.u32 %v1794_v53, 16  ;;  %v1795_v4 = vmul.u32 %v1791_v44, %v1768_v14  ;;  %v1526_v39 = vand.u32 2147483647, %v1525_v58 }
 0x1ee   :  { %v1669_v10 = vclz %v1668_v59  ;;  %v1771_v22 = vmul.u32 %v1769_v17, %v1767_v1  ;;  %v1775_v15 = vshll.u32 %v1772_v34, 16  ;;  %v1796_v43 = vmul.u32 %v1792_v31, %v1768_v14 }
 0x1ef   :  { %v1774_v18 = vmul.u32 %v1770_v7, %v1768_v14  ;;  %v1777_v27 = vshll.u32 %v1773_v63, 16  ;;  %vm1801_vm15 = vc.u32 %v1793_v20, %v1797_v19  ;;  %v1803_v11 = vadd.s32 %v1797_v19, %v1793_v20 }
 0x1f0   :  { %v5463_v26 = vadd.s32 4294967294, %v1669_v10  ;;  %vm1779_vm1 = vc.u32 %v1771_v22, %v1775_v15  ;;  %v1781_v35 = vadd.s32 %v1775_v15, %v1771_v22  ;;  %v1799_v38 = vshll.u32 %v1795_v4, 16 }
 0x1f1   :  { %v1780_v45 = vsel %vm1779_vm1, 1, %v5618_v61  ;;  %v1802_v51 = vsel %vm1801_vm15, 1, %v5618_v61  ;;  %v1755_v31 = vsel %vm1753_vm11, %v6413_v37, 2102212464  ;;  %v1776_v50 = vshrl.u32 %v1772_v34, 16 }
 0x1f2   :  { %vm5464_vm12 = vcmp.lt.s32.totalorder %v5463_v26, 0  ;;  %v1782_v23 = vadd.s32 %v1780_v45, %v1774_v18  ;;  %vm1783_vm2 = vc.u32 %v1781_v35, %v1777_v27  ;;  %v1804_v1 = vadd.s32 %v1802_v51, %v1796_v43 }
 0x1f3   :  { %v1672_v0 = vsel %vm5464_vm12, 0, %v5463_v26  ;;  %v1784_v36 = vsel %vm1783_vm2, 1, %v5618_v61  ;;  %vm1805_vm3 = vc.u32 %v1803_v11, %v1799_v38  ;;  %v1778_v24 = vshrl.u32 %v1773_v63, 16 }
 0x1f4   :  { %v1673_v29 = vsub.s32 32, %v1672_v0  ;;  %v1677_v25 = vsub.s32 4294967266, %v1672_v0  ;;  %v1674_v54 = vshll.u32 %v1665_v32, %v1672_v0  ;;  %v1786_v14 = vadd.s32 %v1784_v36, %v1782_v23 }
 0x1f5   :  { %v1734_v32 = vshrl.u32 %v5612_v40, %v6390_v2  ;;  %v1806_v44 = vsel %vm1805_vm3, 1, %v5618_v61  ;;  %v1798_v59 = vshrl.u32 %v1794_v53, 16  ;;  %v1756_v37 = vsel %vm1752_vm10, %v6408_v41, %v1755_v31 }
 0x1f6   :  { %v1675_v33 = vshrl.u32 %v1657_v30, %v1673_v29  ;;  %v1678_v6 = vadd.s32 127, %v1677_v25  ;;  %v1787_v58 = vadd.s32 %v1786_v14, %v1776_v50  ;;  %v1808_v17 = vadd.s32 %v1806_v44, %v1804_v1 }
 0x1f7   :  { %v1754_v10 = vsel %vm1750_vm9, %v1734_v32, %v6406_v62  ;;  %v1876_v19 = vand.u32 2139095040, %v6453_v57  ;;  %v1529_v30 = vmul.f32 %v1528_v12, %v1526_v39  ;;  %v1800_v2 = vshrl.u32 %v1795_v4, 16 }
 0x1f8   :  { %v1676_v16 = vor.u32 %v1675_v33, %v1674_v54  ;;  %v1679_v9 = vshll.u32 %v1678_v6, 23  ;;  %v6471_v34 = vadd.s32 %v1787_v58, %v1778_v24  ;;  %v1809_v26 = vadd.s32 %v1808_v17, %v1798_v59 }
 0x1f9   :  { %v6473_v53 = vadd.s32 %v1803_v11, %v1799_v38  ;;  %v1877_v22 = vshrl.u32 %v1876_v19, 23  ;;  %v1757_v15 = vsel %vm1751_vm13, %v1754_v10, %v1756_v37  ;;  %v1873_v12 = vand.u32 2147483647, %v6453_v57 }
 0x1fa   :  { %v1680_v7 = vor.u32 4788187, %v1679_v9  ;;  %v1683_v20 = vcvt.s32.f32 %v1676_v16  ;;  %v1810_v62 = vadd.s32 %v1809_v26, %v1800_v2  ;;  %v1530_v39 = vxor.u32 2147483648, %v1529_v30 }
 0x1fb   :  { %vm1813_vm5 = vc.u32 %v6471_v34, %v6473_v53  ;;  %v5468_v41 = vadd.s32 4294967169, %v1877_v22  ;;  %v1811_v4 = vmul.u32 %v6427_v5, %v1757_v15  ;;  %vm1410_vm8 = vcmp.lt.s32.totalorder %v6241_v47, 0 }
 0x1fc   :  { %v1681_v63 = vand.u32 2147483647, %v1680_v7  ;;  %v1814_v18 = vadd.s32 1, %v1810_v62  ;;  %v1880_v3 = vand.u32 8388607, %v1873_v12  ;;  %v1531_v25 = vsel %vm1410_vm8, %v1530_v39, %v1529_v30 }
 0x1fd   :  { %v1883_v27 = vadd.s32 1, %v5468_v41  ;;  %vm1565_vm4 = vcmp.lt.s32.totalorder %v6278_v56, 0  ;;  %vm6491_vm9 = vcmp.le.f32.partialorder %v1408_v60, 0.7853982  ;;  %vm6506_vm11 = vcmp.le.f32.partialorder %v1563_v13, 0.7853982 }
 0x1fe   :  { %v1684_v43 = vmul.f32 %v1683_v20, %v1681_v63  ;;  %v1815_v35 = vsel %vm1813_vm5, %v1814_v18, %v1810_v62  ;;  %v6502_v33 = vsel %vm6491_vm9, %v6241_v47, %v1531_v25  ;;  %v1881_v36 = vor.u32 8388608, %v1880_v3 }
 0x1ff   :  { %v1816_v11 = vadd.s32 %v1815_v35, %v1811_v4  ;;  %vm1884_vm7 = vcmp.gt.s32.totalorder %v1883_v27, 0  ;;  %v6541_v37 = vmul.f32 %v6502_v33, %v6502_v33 }
 0x200   :  { %v1685_v0 = vxor.u32 2147483648, %v1684_v43  ;;  %v1885_v29 = vsel %vm1884_vm7, %v1883_v27, 0  ;;  %v6551_v22 = vshll.u32 %v1881_v36, 8 }
 0x201   :  { %v1817_v45 = vadd.s32 536870912, %v1816_v11  ;;  %v1887_v38 = vand.u32 31, %v1885_v29  ;;  %v6528_v44 = vshrl.u32 %v1885_v29, 5 }
 0x202   :  { %v1686_v5 = vsel %vm1565_vm4, %v1685_v0, %v1684_v43  ;;  %v1544_v43 = vmul.f32 -0.00019511016, %v6541_v37  ;;  %v1922_v3 = vand.u32 65535, %v6551_v22 }
 0x203   :  { %v6495_v23 = vshrl.u32 %v1817_v45, 30  ;;  %v6497_v51 = vsub.s32 32, %v1887_v38  ;;  %v6513_v60 = vsel %vm6506_vm11, %v6278_v56, %v1686_v5  ;;  %v1890_v31 = vshll.u32 %v5612_v40, %v1887_v38 }
 0x204   :  { %v1893_v50 = vshll.u32 %v5613_v42, %v1887_v38  ;;  %v1896_v24 = vshll.u32 %v5614_v46, %v1887_v38  ;;  %v1899_v7 = vshll.u32 %v5615_v49, %v1887_v38  ;;  %v1902_v10 = vshll.u32 %v5616_v52, %v1887_v38 }
 0x205   :  { %v1819_v1 = vshll.u32 %v6495_v23, 30  ;;  %v1891_v14 = vshrl.u32 %v5613_v42, %v6497_v51  ;;  %v1894_v13 = vshrl.u32 %v5614_v46, %v6497_v51  ;;  %v1897_v16 = vshrl.u32 %v5615_v49, %v6497_v51 }
 0x206   :  { %v1900_v9 = vshrl.u32 %v5616_v52, %v6497_v51  ;;  %v1903_v58 = vshrl.u32 %v5617_v55, %v6497_v51  ;;  %v6547_v63 = vmul.f32 %v6513_v60, %v6513_v60  ;;  %vm1905_vm13 = vcmp.lt.s32.totalorder %v6528_v44, 1 }
 0x207   :  { %v6526_v32 = vsub.s32 %v1816_v11, %v1819_v1  ;;  %v6533_v59 = vor.u32 %v1891_v14, %v1890_v31  ;;  %v6535_v17 = vor.u32 %v1894_v13, %v1893_v50  ;;  %v1898_v30 = vor.u32 %v1897_v16, %v1896_v24 }
 0x208   :  { %v1901_v2 = vor.u32 %v1900_v9, %v1899_v7  ;;  %v1904_v26 = vor.u32 %v1903_v58, %v1902_v10  ;;  %vm1908_vm14 = vcmp.lt.s32.totalorder %v6528_v44, 4  ;;  %vm1907_vm12 = vcmp.lt.s32.totalorder %v6528_v44, 3 }
 0x209   :  { %vm1821_vm10 = vcmp.lt.s32.totalorder %v6526_v32, 0  ;;  %v1822_v19 = vsub.s32 0, %v6526_v32  ;;  %v1913_v62 = vsel %vm1905_vm13, %v6533_v59, %v6535_v17  ;;  %v1917_v18 = vsel %vm1905_vm13, %v6535_v17, %v1898_v30 }
 0x20a   :  { %v1914_v41 = vsel %vm1908_vm14, %v1901_v2, 920167782  ;;  %vm1906_vm15 = vcmp.lt.s32.totalorder %v6528_v44, 2  ;;  %v1918_v27 = vsel %vm1908_vm14, %v1904_v26, 1326507024  ;;  %v1923_v5 = vshrl.u32 %v6551_v22, 16 }
 0x20b   :  { %v1823_v20 = vsel %vm1821_vm10, %v1822_v19, %v6526_v32  ;;  %v1915_v4 = vsel %vm1907_vm12, %v1898_v30, %v1914_v41  ;;  %v1699_v0 = vmul.f32 -0.00019511016, %v6547_v63  ;;  %v1919_v11 = vsel %vm1907_vm12, %v1901_v2, %v1918_v27 }
 0x20c   :  { %v1824_v15 = vclz %v1823_v20  ;;  %v1916_v35 = vsel %vm1906_vm15, %v1913_v62, %v1915_v4  ;;  %v1920_v29 = vsel %vm1906_vm15, %v1917_v18, %v1919_v11  ;;  %v1532_v31 = vsub.s32 4, %v6344_v8 }
 0x20d   :  { %v1946_v25 = vand.u32 65535, %v1916_v35  ;;  %v1947_v45 = vshrl.u32 %v1916_v35, 16  ;;  %v1924_v36 = vand.u32 65535, %v1920_v29  ;;  %v1925_v1 = vshrl.u32 %v1920_v29, 16 }
 0x20e   :  { %v5466_v39 = vadd.s32 4294967294, %v1824_v15  ;;  %v1687_v50 = vsub.s32 4, %v6415_v21  ;;  %v1545_v16 = vadd.f32 0.008332121, %v1544_v43  ;;  %v1812_v9 = vadd.s32 %v6473_v53, %v6471_v34 }
 0x20f   :  { %v1927_v24 = vmul.u32 %v1925_v1, %v1922_v3  ;;  %v1928_v58 = vmul.u32 %v1924_v36, %v1923_v5  ;;  %v1700_v7 = vadd.f32 0.008332121, %v1699_v0  ;;  %v1949_v19 = vmul.u32 %v1947_v45, %v1922_v3 }
 0x210   :  { %vm5467_vm1 = vcmp.lt.s32.totalorder %v5466_v39, 0  ;;  %v1950_v2 = vmul.u32 %v1946_v25, %v1923_v5  ;;  %v1910_v20 = vsel %vm1908_vm14, %v1898_v30, 2102212464  ;;  %v1926_v15 = vmul.u32 %v1924_v36, %v1922_v3 }
 0x211   :  { %v1827_v38 = vsel %vm5467_vm1, 0, %v5466_v39  ;;  %v1930_v62 = vshll.u32 %v1927_v24, 16  ;;  %v1948_v39 = vmul.u32 %v1946_v25, %v1922_v3  ;;  %v1952_v43 = vshll.u32 %v1949_v19, 16 }
 0x212   :  { %v1828_v14 = vsub.s32 32, %v1827_v38  ;;  %v1832_v13 = vsub.s32 4294967266, %v1827_v38  ;;  %v1829_v26 = vshll.u32 %v6526_v32, %v1827_v38  ;;  %v1929_v4 = vmul.u32 %v1925_v1, %v1923_v5 }
 0x213   :  { %v1932_v27 = vshll.u32 %v1928_v58, 16  ;;  %vm1934_vm2 = vc.u32 %v1926_v15, %v1930_v62  ;;  %v1936_v34 = vadd.s32 %v1930_v62, %v1926_v15  ;;  %v1951_v35 = vmul.u32 %v1947_v45, %v1923_v5 }
 0x214   :  { %v1833_v10 = vadd.s32 127, %v1832_v13  ;;  %v1830_v41 = vshrl.u32 %v1812_v9, %v1828_v14  ;;  %v1935_v0 = vsel %vm1934_vm2, 1, %v5618_v61  ;;  %v1954_v11 = vshll.u32 %v1950_v2, 16 }
 0x215   :  { %v1937_v29 = vadd.s32 %v1935_v0, %v1929_v4  ;;  %vm1938_vm3 = vc.u32 %v1936_v34, %v1932_v27  ;;  %vm1956_vm5 = vc.u32 %v1948_v39, %v1952_v43  ;;  %v1958_v32 = vadd.s32 %v1952_v43, %v1948_v39 }
 0x216   :  { %v1834_v18 = vshll.u32 %v1833_v10, 23  ;;  %v1831_v30 = vor.u32 %v1830_v41, %v1829_v26  ;;  %v1939_v38 = vsel %vm1938_vm3, 1, %v5618_v61  ;;  %v1957_v36 = vsel %vm1956_vm5, 1, %v5618_v61 }
 0x217   :  { %v1537_v3 = vmul.f32 -0.001358992, %v6541_v37  ;;  %v1931_v25 = vshrl.u32 %v1927_v24, 16  ;;  %v1941_v1 = vadd.s32 %v1939_v38, %v1937_v29  ;;  %v1959_v14 = vadd.s32 %v1957_v36, %v1951_v35 }
 0x218   :  { %v1835_v53 = vor.u32 4788187, %v1834_v18  ;;  %vm1960_vm7 = vc.u32 %v1958_v32, %v1954_v11  ;;  %v1889_v45 = vshrl.u32 %v5612_v40, %v6497_v51  ;;  %v1933_v5 = vshrl.u32 %v1928_v58, 16 }
 0x219   :  { %v1961_v9 = vsel %vm1960_vm7, 1, %v5618_v61  ;;  %v1942_v10 = vadd.s32 %v1941_v1, %v1931_v25  ;;  %v1953_v15 = vshrl.u32 %v1949_v19, 16  ;;  %v1538_v62 = vadd.f32 0.041655596, %v1537_v3 }
 0x21a   :  { %v1836_v13 = vand.u32 2147483647, %v1835_v53  ;;  %v1963_v26 = vadd.s32 %v1961_v9, %v1959_v14  ;;  %v1546_v41 = vmul.f32 %v1545_v16, %v6541_v37  ;;  %v1838_v18 = vcvt.s32.f32 %v1831_v30 }
 0x21b   :  { %v1909_v24 = vsel %vm1905_vm13, %v1889_v45, %v6533_v59  ;;  %v1911_v39 = vsel %vm1907_vm12, %v6535_v17, %v1910_v20  ;;  %v1701_v51 = vmul.f32 %v1700_v7, %v6547_v63  ;;  %v1943_v58 = vadd.s32 %v1942_v10, %v1933_v5 }
 0x21c   :  { %v1955_v43 = vshrl.u32 %v1950_v2, 16  ;;  %v1964_v4 = vadd.s32 %v1963_v26, %v1953_v15  ;;  %v1839_v27 = vmul.f32 %v1838_v18, %v1836_v13  ;;  %v1962_v19 = vadd.s32 %v1958_v32, %v1954_v11  ;;  %v5565_v18 = vld [vmem:[%s7626_s6] sm:$0xff] }
 0x21d   :  { %v1533_v16 = vsel %vm1410_vm8, %v1532_v31, %v6344_v8  ;;  %v1912_v34 = vsel %vm1906_vm15, %v1909_v24, %v1911_v39  ;;  %v1539_v59 = vmul.f32 %v1538_v62, %v6541_v37  ;;  %v1547_v0 = vadd.f32 -0.16666654, %v1546_v41 }
 0x21e   :  { %v1965_v53 = vadd.s32 %v1964_v4, %v1955_v43  ;;  %vm1968_vm10 = vc.u32 %v1943_v58, %v1962_v19  ;;  %v1688_v17 = vsel %vm1565_vm4, %v1687_v50, %v6415_v21  ;;  %v1702_v7 = vadd.f32 -0.16666654, %v1701_v51 }
 0x21f   :  { %v1535_v20 = vsel %vm6491_vm9, 0, %v1533_v16  ;;  %v1840_v8 = vxor.u32 2147483648, %v1839_v27  ;;  %v1966_v44 = vmul.u32 %v6551_v22, %v1912_v34  ;;  %v1540_v35 = vadd.f32 -0.4999988, %v1539_v59 }
 0x220   :  { %v1969_v2 = vadd.s32 1, %v1965_v53  ;;  %v1548_v11 = vmul.f32 %v1547_v0, %v6541_v37  ;;  %v1690_v29 = vsel %vm6506_vm11, 0, %v1688_v17  ;;  %v1552_v30 = vadd.s32 3, %v1535_v20 }
 0x221   :  { %v1703_v38 = vmul.f32 %v1702_v7, %v6547_v63  ;;  %vm1720_vm8 = vcmp.lt.s32.totalorder %v6313_v28, 0  ;;  %v1707_v50 = vadd.s32 3, %v1690_v29  ;;  %v1541_v22 = vmul.f32 %v1540_v35, %v6541_v37  ;;  %v5566_v37 = vld [vmem:[%s7626_s6 + $0x8] sm:$0xff] }
 0x222   :  { %v1970_v31 = vsel %vm1968_vm10, %v1969_v2, %v1965_v53  ;;  %v1841_v21 = vsel %vm1720_vm8, %v1840_v8, %v1839_v27  ;;  %v1549_v36 = vadd.f32 1.0, %v1548_v11  ;;  %vm6625_vm4 = vcmp.le.f32.partialorder %v1718_v48, 0.7853982  ;;  %2693 = vmatpush.bf16.msra.mxu2 %v5566_v37 }
 0x223   :  { %v1971_v32 = vadd.s32 %v1970_v31, %v1966_v44  ;;  %v1704_v25 = vadd.f32 1.0, %v1703_v38  ;;  %v6634_v1 = vsel %vm6625_vm4, %v6313_v28, %v1841_v21  ;;  %v1553_v14 = vand.u32 3, %v1552_v30 }
 0x224   :  { %v1692_v48 = vmul.f32 -0.001358992, %v6547_v63  ;;  %v1542_v45 = vadd.f32 1.0, %v1541_v22  ;;  %v6641_v5 = vand.u32 3, %v1707_v50  ;;  %v1550_v9 = vmul.f32 %v1549_v36, %v6502_v33 }
 0x225   :  { %v1972_v54 = vadd.s32 536870912, %v1971_v32  ;;  %v6646_v10 = vmul.f32 %v6634_v1, %v6634_v1  ;;  %v1705_v62 = vmul.f32 %v1704_v25, %v6513_v60  ;;  %vm1551_vm9 = vweird.f32 %v6241_v47 }
 0x226   :  { %v1693_v26 = vadd.f32 0.041655596, %v1692_v48  ;;  %vm1554_vm11 = vcmp.lt.s32.totalorder %v1553_v14, 2  ;;  %v2178_v41 = vand.u32 3, %v1535_v20  ;;  %vm1555_vm14 = vcmp.eq.s32.totalorder %v1553_v14, 0  ;;  %2694 = vmatpush.bf16.msra.mxu2 %v5565_v18 }
 0x227   :  { %v6629_v6 = vshrl.u32 %v1972_v54, 30  ;;  %vm1558_vm12 = vcmp.eq.s32.totalorder %v1553_v14, 2  ;;  %v1559_v24 = vxor.u32 2147483648, %v1542_v45  ;;  %vm1710_vm15 = vcmp.eq.s32.totalorder %v6641_v5, 0 }
 0x228   :  { %v1694_v39 = vmul.f32 %v1693_v26, %v6547_v63  ;;  %v2332_v60 = vand.u32 3, %v1690_v29  ;;  %v1854_v51 = vmul.f32 -0.00019511016, %v6646_v10  ;;  %v1967_v43 = vadd.s32 %v1962_v19, %v1943_v58 }
 0x229   :  { %v1974_v13 = vshll.u32 %v6629_v6, 30  ;;  %v1556_v27 = vxor.u32 2147483648, %v1550_v9  ;;  %vm1713_vm1 = vcmp.eq.s32.totalorder %v6641_v5, 2  ;;  %vm2179_vm2 = vcmp.lt.s32.totalorder %v2178_v41, 2 }
 0x22a   :  { %v1695_v34 = vadd.f32 -0.4999988, %v1694_v39  ;;  %vm2180_vm3 = vcmp.eq.s32.totalorder %v2178_v41, 0  ;;  %v1560_v59 = vsel %vm1558_vm12, %v1559_v24, %v1550_v9  ;;  %vm1709_vm5 = vcmp.lt.s32.totalorder %v6641_v5, 2 }
 0x22b   :  { %v6648_v15 = vsub.s32 %v1971_v32, %v1974_v13  ;;  %v1557_v53 = vsel %vm1555_vm14, %v1542_v45, %v1556_v27  ;;  %v2182_v0 = vsel %vm2180_vm3, %v1542_v45, %v1556_v27  ;;  %vm2183_vm7 = vcmp.eq.s32.totalorder %v2178_v41, 2 }
 0x22c   :  { %v1561_v19 = vsel %vm1554_vm11, %v1557_v53, %v1560_v59  ;;  %v1696_v17 = vmul.f32 %v1695_v34, %v6547_v63  ;;  %vm1706_vm10 = vweird.f32 %v6278_v56  ;;  %v2185_v7 = vsel %vm2183_vm7, %v1559_v24, %v1550_v9 }
 0x22d   :  { %vm1976_vm13 = vcmp.lt.s32.totalorder %v6648_v15, 0  ;;  %v1977_v33 = vsub.s32 0, %v6648_v15  ;;  %v1855_v2 = vadd.f32 0.008332121, %v1854_v51  ;;  %v2186_v20 = vsel %vm2179_vm2, %v2182_v0, %v2185_v7 }
 0x22e   :  { %vm2334_vm14 = vcmp.eq.s32.totalorder %v2332_v60, 0  ;;  %v1697_v8 = vadd.f32 1.0, %v1696_v17  ;;  %v1711_v44 = vxor.u32 2147483648, %v1705_v62  ;;  %vm2337_vm12 = vcmp.eq.s32.totalorder %v2332_v60, 2 }
 0x22f   :  { %v1978_v4 = vsel %vm1976_vm13, %v1977_v33, %v6648_v15  ;;  %vm2333_vm13 = vcmp.lt.s32.totalorder %v2332_v60, 2  ;;  %v1562_v35 = vsel %vm1551_vm9, nan, %v1561_v19  ;;  %v6675_v11 = vstv %s6651_s18 }
 0x230   :  { %v1979_v16 = vclz %v1978_v4  ;;  %v1847_v63 = vmul.f32 -0.001358992, %v6646_v10  ;;  %v2187_v30 = vsel %vm1551_vm9, nan, %v2186_v20  ;;  %v6681_v38 = vstv %s6661_s21 }
 0x231   :  { %v1856_v21 = vmul.f32 %v1855_v2, %v6646_v10  ;;  %v1712_v54 = vsel %vm1710_vm15, %v1697_v8, %v1711_v44  ;;  %v1714_v50 = vxor.u32 2147483648, %v1697_v8  ;;  %v2336_v22 = vsel %vm2334_vm14, %v1697_v8, %v1711_v44 }
 0x232   :  { %v5469_v58 = vadd.s32 4294967294, %v1979_v16  ;;  %v2029_v13 = vmul.f32 %v6675_v11, %v1562_v35  ;;  %v2651_v48 = vmul.f32 %v6681_v38, %v2187_v30  ;;  %v1848_v45 = vadd.f32 0.041655596, %v1847_v63 }
 0x233   :  { %v1715_v47 = vsel %vm1713_vm1, %v1714_v50, %v1705_v62  ;;  %v2339_v37 = vsel %vm2337_vm12, %v1714_v50, %v1705_v62  ;;  %v1857_v24 = vadd.f32 -0.16666654, %v1856_v21  ;;  %v1997_v19 = vsub.s32 4, %v6629_v6 }
 0x234   :  { %vm5470_vm0 = vcmp.lt.s32.totalorder %v5469_v58, 0  ;;  %v1716_v41 = vsel %vm1709_vm5, %v1712_v54, %v1715_v47  ;;  %v2340_v33 = vsel %vm2333_vm13, %v2336_v22, %v2339_v37  ;;  %v2655_v4 = vadd.f32 %v2651_v48, %v2029_v13 }
 0x235   :  { %v1982_v31 = vsel %vm5470_vm0, 0, %v5469_v58  ;;  %v2341_v18 = vsel %vm1706_vm10, nan, %v2340_v33  ;;  %v1849_v60 = vmul.f32 %v1848_v45, %v6646_v10  ;;  %v1858_v34 = vmul.f32 %v1857_v24, %v6646_v10 }
 0x236   :  { %v1983_v29 = vsub.s32 32, %v1982_v31  ;;  %v1987_v32 = vsub.s32 4294967266, %v1982_v31  ;;  %v1984_v36 = vshll.u32 %v6648_v15, %v1982_v31  ;;  %v1717_v15 = vsel %vm1706_vm10, nan, %v1716_v41 }
 0x237   :  { %v2030_v62 = vmul.f32 %v6675_v11, %v1717_v15  ;;  %v2652_v51 = vmul.f32 %v6681_v38, %v2341_v18  ;;  %v1850_v58 = vadd.f32 -0.4999988, %v1849_v60  ;;  %vm1875_vm0 = vcmp.lt.s32.totalorder %v6453_v57, 0 }
 0x238   :  { %v1985_v25 = vshrl.u32 %v1967_v43, %v1983_v29  ;;  %v1988_v14 = vadd.s32 127, %v1987_v32  ;;  %v1842_v43 = vsub.s32 4, %v6495_v23  ;;  %v1859_v7 = vadd.f32 1.0, %v1858_v34 }
 0x239   :  { %v2656_v16 = vadd.f32 %v2652_v51, %v2030_v62  ;;  %vm1874_vm9 = vcmp.le.f32.partialorder %v1873_v12, 0.7853982  ;;  %v1998_v31 = vsel %vm1875_vm0, %v1997_v19, %v6629_v6  ;;  %vm1861_vm3 = vweird.f32 %v6313_v28 }
 0x23a   :  { %v1986_v9 = vor.u32 %v1985_v25, %v1984_v36  ;;  %v1989_v26 = vshll.u32 %v1988_v14, 23  ;;  %v1843_v56 = vsel %vm1720_vm8, %v1842_v43, %v6495_v23  ;;  %v1851_v23 = vmul.f32 %v1850_v58, %v6646_v10 }
 0x23b   :  { %v2659_v59 = vpack.c.bf16 %v2656_v16, %v2655_v4  ;;  %v1845_v17 = vsel %vm6625_vm4, 0, %v1843_v56  ;;  %v1860_v35 = vmul.f32 %v1859_v7, %v6634_v1  ;;  %v2000_v32 = vsel %vm1874_vm9, 0, %v1998_v31 }
 0x23c   :  { %v1990_v39 = vor.u32 4788187, %v1989_v26  ;;  %v1993_v5 = vcvt.s32.f32 %v1986_v9  ;;  %v1862_v44 = vadd.s32 3, %v1845_v17  ;;  %v1852_v30 = vadd.f32 1.0, %v1851_v23 }
 0x23d   :  { %5492 = vmatmul.msk.bf16.vlgmr.msra.gmra.mxu2 %vm1381_vm6, %v2659_v59  ;;  %v2486_v50 = vand.u32 3, %v1845_v17  ;;  %v1866_v22 = vxor.u32 2147483648, %v1860_v35  ;;  %v2017_v25 = vadd.s32 3, %v2000_v32  ;;  %v2640_v18 = vand.u32 3, %v2000_v32 }
 0x23e   :  { %v1991_v27 = vand.u32 2147483647, %v1990_v39  ;;  %v1863_v54 = vand.u32 3, %v1862_v44  ;;  %v1869_v13 = vxor.u32 2147483648, %v1852_v30  ;;  %vm2016_vm5 = vweird.f32 %v6453_v57 }
 0x23f   :  { %vm2488_vm11 = vcmp.eq.s32.totalorder %v2486_v50, 0  ;;  %v2018_v48 = vand.u32 3, %v2017_v25  ;;  %vm2487_vm1 = vcmp.lt.s32.totalorder %v2486_v50, 2  ;;  %vm2491_vm2 = vcmp.eq.s32.totalorder %v2486_v50, 2 }
 0x240   :  { %v1994_v53 = vmul.f32 %v1993_v5, %v1991_v27  ;;  %vm1864_vm8 = vcmp.lt.s32.totalorder %v1863_v54, 2  ;;  %vm1865_vm4 = vcmp.eq.s32.totalorder %v1863_v54, 0  ;;  %v2490_v37 = vsel %vm2488_vm11, %v1852_v30, %v1866_v22 }
 0x241   :  { %v1867_v1 = vsel %vm1865_vm4, %v1852_v30, %v1866_v22  ;;  %vm1868_vm15 = vcmp.eq.s32.totalorder %v1863_v54, 2  ;;  %v2493_v41 = vsel %vm2491_vm2, %v1869_v13, %v1860_v35  ;;  %vm2019_vm7 = vcmp.lt.s32.totalorder %v2018_v48, 2 }
 0x242   :  { %v1995_v0 = vxor.u32 2147483648, %v1994_v53  ;;  %v1870_v9 = vsel %vm1868_vm15, %v1869_v13, %v1860_v35  ;;  %v2494_v15 = vsel %vm2487_vm1, %v2490_v37, %v2493_v41  ;;  %vm2020_vm10 = vcmp.eq.s32.totalorder %v2018_v48, 0 }
 0x243   :  { %v1871_v33 = vsel %vm1864_vm8, %v1867_v1, %v1870_v9  ;;  %v2495_v43 = vsel %vm1861_vm3, nan, %v2494_v15  ;;  %vm2023_vm13 = vcmp.eq.s32.totalorder %v2018_v48, 2  ;;  %vm2641_vm14 = vcmp.lt.s32.totalorder %v2640_v18, 2 }
 0x244   :  { %v1996_v2 = vsel %vm1875_vm0, %v1995_v0, %v1994_v53  ;;  %v1872_v62 = vsel %vm1861_vm3, nan, %v1871_v33  ;;  %vm2642_vm12 = vcmp.eq.s32.totalorder %v2640_v18, 0  ;;  %vm2645_vm0 = vcmp.eq.s32.totalorder %v2640_v18, 2 }
 0x245   :  { %v1999_v20 = vsel %vm1874_vm9, %v6453_v57, %v1996_v2  ;;  %v2031_v34 = vmul.f32 %v6675_v11, %v1872_v62  ;;  %v2653_v28 = vmul.f32 %v6681_v38, %v2495_v43  ;;  %v6733_v2 = vld [vmem:[%s7627_s7] ss:$0 sm:$0xff]  ;;  %s7094_s7 = sld [smem:[#allocation3 + $0x100]] }
 0x246   :  { %v2001_v8 = vmul.f32 %v1999_v20, %v1999_v20 }
 0x247   :  { %v2657_v19 = vadd.f32 %v2653_v28, %v2031_v34 }
 0x248   :  { %v2009_v63 = vmul.f32 -0.00019511016, %v2001_v8  ;;  %v2002_v29 = vmul.f32 -0.001358992, %v2001_v8 }
 0x24a   :  { %v2010_v3 = vadd.f32 0.008332121, %v2009_v63  ;;  %v2003_v21 = vadd.f32 0.041655596, %v2002_v29 }
 0x24c   :  { %v2011_v12 = vmul.f32 %v2010_v3, %v2001_v8  ;;  %v2004_v36 = vmul.f32 %v2003_v21, %v2001_v8 }
 0x24e   :  { %v2012_v14 = vadd.f32 -0.16666654, %v2011_v12  ;;  %v2005_v10 = vadd.f32 -0.4999988, %v2004_v36 }
 0x250   :  { %v2013_v6 = vmul.f32 %v2012_v14, %v2001_v8  ;;  %v2006_v47 = vmul.f32 %v2005_v10, %v2001_v8 }
 0x252   :  { %v2014_v45 = vadd.f32 1.0, %v2013_v6  ;;  %v2007_v26 = vadd.f32 1.0, %v2006_v47 }
 0x254   :  { %v2015_v24 = vmul.f32 %v2014_v45, %v1999_v20  ;;  %v2024_v39 = vxor.u32 2147483648, %v2007_v26 }
 0x256   :  { %v2021_v51 = vxor.u32 2147483648, %v2015_v24  ;;  %v2025_v27 = vsel %vm2023_vm13, %v2024_v39, %v2015_v24  ;;  %v2647_v16 = vsel %vm2645_vm0, %v2024_v39, %v2015_v24 }
 0x258   :  { %v2022_v4 = vsel %vm2020_vm10, %v2007_v26, %v2021_v51  ;;  %v2644_v5 = vsel %vm2642_vm12, %v2007_v26, %v2021_v51 }
 0x259   :  { %v2026_v60 = vsel %vm2019_vm7, %v2022_v4, %v2025_v27  ;;  %v2648_v53 = vsel %vm2641_vm14, %v2644_v5, %v2647_v16 }
 0x25a   :  { %v2027_v59 = vsel %vm2016_vm5, nan, %v2026_v60  ;;  %v2649_v56 = vsel %vm2016_vm5, nan, %v2648_v53 }
 0x25b   :  { %v2032_v0 = vmul.f32 %v6675_v11, %v2027_v59  ;;  %v2654_v58 = vmul.f32 %v6681_v38, %v2649_v56 }
 0x25d   :  { %v2658_v17 = vadd.f32 %v2654_v58, %v2032_v0 }
 0x25f   :  { %v2660_v7 = vpack.c.bf16 %v2658_v17, %v2657_v19 }
 0x261   :  { %5493 = vmatmul.msk.bf16.gmra.mxu2 %vm1381_vm6, %v2660_v7 }
 0x2c0   :  { %v2696_v20 = vpop.f32.mrf.mxu2 }
 0x2c1   :  { %v6736_v8 = vadd.f32 %v6733_v2, %v2696_v20 }
 0x2c3   :  { %v2707_v57 = vand.u32 2147483647, %v6736_v8  ;;  %v2710_v11 = vand.u32 2139095040, %v6736_v8 }
 0x2c5   :  { %v2711_v23 = vshrl.u32 %v2710_v11, 23  ;;  %v2714_v38 = vand.u32 8388607, %v2707_v57 }
 0x2c7   :  { %v5495_v44 = vadd.s32 4294967169, %v2711_v23  ;;  %v2715_v31 = vor.u32 8388608, %v2714_v38 }
 0x2c8   :  { %v2698_v35 = vpop.f32.mrf.mxu2 }
 0x2c9   :  { %v2717_v63 = vadd.s32 1, %v5495_v44  ;;  %v6743_v29 = vadd.f32 %v6733_v2, %v2698_v35  ;;  %v6745_v32 = vshll.u32 %v2715_v31, 8 }
 0x2cb   :  { %vm2718_vm9 = vcmp.gt.s32.totalorder %v2717_v63, 0  ;;  %v2862_v30 = vand.u32 2147483647, %v6743_v29  ;;  %v2865_v21 = vand.u32 2139095040, %v6743_v29  ;;  %v2756_v12 = vand.u32 65535, %v6745_v32 }
 0x2cc   :  { %v2719_v3 = vsel %vm2718_vm9, %v2717_v63, 0  ;;  %v2757_v22 = vshrl.u32 %v6745_v32, 16 }
 0x2cd   :  { %v2721_v54 = vand.u32 31, %v2719_v3  ;;  %v2866_v36 = vshrl.u32 %v2865_v21, 23  ;;  %v2720_v25 = vshrl.u32 %v2719_v3, 5  ;;  %v6755_v10 = vand.u32 8388607, %v2862_v30 }
 0x2cf   :  { %v2722_v50 = vsub.s32 32, %v2721_v54  ;;  %v2724_v14 = vshll.u32 %v5612_v40, %v2721_v54  ;;  %v2727_v13 = vshll.u32 %v5613_v42, %v2721_v54  ;;  %v2730_v47 = vshll.u32 %v5614_v46, %v2721_v54 }
 0x2d0   :  { %v2733_v48 = vshll.u32 %v5615_v49, %v2721_v54  ;;  %v2736_v9 = vshll.u32 %v5616_v52, %v2721_v54  ;;  %v5498_v18 = vadd.s32 4294967169, %v2866_v36  ;;  %vm2739_vm8 = vcmp.lt.s32.totalorder %v2720_v25, 1 }
 0x2d1   :  { %v2725_v6 = vshrl.u32 %v5613_v42, %v2722_v50  ;;  %v2728_v1 = vshrl.u32 %v5614_v46, %v2722_v50  ;;  %v2731_v37 = vshrl.u32 %v5615_v49, %v2722_v50  ;;  %v2734_v45 = vshrl.u32 %v5616_v52, %v2722_v50 }
 0x2d2   :  { %v2737_v26 = vshrl.u32 %v5617_v55, %v2722_v50  ;;  %vm2742_vm4 = vcmp.lt.s32.totalorder %v2720_v25, 4  ;;  %v2723_v62 = vshrl.u32 %v5612_v40, %v2722_v50  ;;  %vm2741_vm11 = vcmp.lt.s32.totalorder %v2720_v25, 3 }
 0x2d3   :  { %v2726_v41 = vor.u32 %v2725_v6, %v2724_v14  ;;  %v2729_v33 = vor.u32 %v2728_v1, %v2727_v13  ;;  %v2732_v15 = vor.u32 %v2731_v37, %v2730_v47  ;;  %v2735_v24 = vor.u32 %v2734_v45, %v2733_v48 }
 0x2d4   :  { %v2738_v39 = vor.u32 %v2737_v26, %v2736_v9  ;;  %v2872_v16 = vadd.s32 1, %v5498_v18  ;;  %vm2740_vm15 = vcmp.lt.s32.totalorder %v2720_v25, 2  ;;  %v2870_v7 = vor.u32 8388608, %v6755_v10 }
 0x2d5   :  { %v2744_v51 = vsel %vm2742_vm4, %v2732_v15, 2102212464  ;;  %v2747_v43 = vsel %vm2739_vm8, %v2726_v41, %v2729_v33  ;;  %v2751_v4 = vsel %vm2739_vm8, %v2729_v33, %v2732_v15  ;;  %v2748_v27 = vsel %vm2742_vm4, %v2735_v24, 920167782 }
 0x2d6   :  { %v2752_v5 = vsel %vm2742_vm4, %v2738_v39, 1326507024  ;;  %v2743_v60 = vsel %vm2739_vm8, %v2723_v62, %v2726_v41  ;;  %v2749_v34 = vsel %vm2741_vm11, %v2732_v15, %v2748_v27  ;;  %v2745_v28 = vsel %vm2741_vm11, %v2729_v33, %v2744_v51 }
 0x2d7   :  { %v2753_v53 = vsel %vm2741_vm11, %v2735_v24, %v2752_v5  ;;  %v2750_v59 = vsel %vm2740_vm15, %v2747_v43, %v2749_v34  ;;  %vm2873_vm1 = vcmp.gt.s32.totalorder %v2872_v16, 0  ;;  %v6767_v20 = vsel %vm2740_vm15, %v2743_v60, %v2745_v28 }
 0x2d8   :  { %v2754_v56 = vsel %vm2740_vm15, %v2751_v4, %v2753_v53  ;;  %v2780_v19 = vand.u32 65535, %v2750_v59  ;;  %v2781_v17 = vshrl.u32 %v2750_v59, 16  ;;  %v2874_v38 = vsel %vm2873_vm1, %v2872_v16, 0 }
 0x2d9   :  { %v2758_v0 = vand.u32 65535, %v2754_v56  ;;  %v2759_v58 = vshrl.u32 %v2754_v56, 16  ;;  %v2876_v1 = vand.u32 31, %v2874_v38  ;;  %v6774_v41 = vshrl.u32 %v2874_v38, 5 }
 0x2da   :  { %v2783_v35 = vmul.u32 %v2781_v17, %v2756_v12  ;;  %v2784_v63 = vmul.u32 %v2780_v19, %v2757_v22  ;;  %v2782_v54 = vmul.u32 %v2780_v19, %v2756_v12  ;;  %v2785_v50 = vmul.u32 %v2781_v17, %v2757_v22 }
 0x2db   :  { %v2761_v11 = vmul.u32 %v2759_v58, %v2756_v12  ;;  %v2762_v23 = vmul.u32 %v2758_v0, %v2757_v22  ;;  %v2760_v44 = vmul.u32 %v2758_v0, %v2756_v12  ;;  %v2763_v31 = vmul.u32 %v2759_v58, %v2757_v22 }
 0x2dc   :  { %v2786_v14 = vshll.u32 %v2783_v35, 16  ;;  %v2787_v13 = vshrl.u32 %v2783_v35, 16  ;;  %v2788_v10 = vshll.u32 %v2784_v63, 16  ;;  %v2789_v37 = vshrl.u32 %v2784_v63, 16 }
 0x2dd   :  { %v2764_v3 = vshll.u32 %v2761_v11, 16  ;;  %v2765_v21 = vshrl.u32 %v2761_v11, 16  ;;  %v2766_v36 = vshll.u32 %v2762_v23, 16  ;;  %v2767_v25 = vshrl.u32 %v2762_v23, 16 }
 0x2de   :  { %vm2790_vm3 = vc.u32 %v2782_v54, %v2786_v14  ;;  %v2792_v48 = vadd.s32 %v2786_v14, %v2782_v54  ;;  %v6771_v26 = vsub.s32 32, %v2876_v1  ;;  %v2879_v24 = vshll.u32 %v5612_v40, %v2876_v1 }
 0x2df   :  { %vm2768_vm2 = vc.u32 %v2760_v44, %v2764_v3  ;;  %v2770_v6 = vadd.s32 %v2764_v3, %v2760_v44  ;;  %v2791_v9 = vsel %vm2790_vm3, 1, %v5618_v61  ;;  %v2882_v51 = vshll.u32 %v5613_v42, %v2876_v1 }
 0x2e0   :  { %v2769_v47 = vsel %vm2768_vm2, 1, %v5618_v61  ;;  %v2793_v22 = vadd.s32 %v2791_v9, %v2785_v50  ;;  %vm2794_vm7 = vc.u32 %v2792_v48, %v2788_v10  ;;  %v6777_v18 = vadd.s32 %v2792_v48, %v2788_v10 }
 0x2e1   :  { %v2771_v45 = vadd.s32 %v2769_v47, %v2763_v31  ;;  %vm2772_vm5 = vc.u32 %v2770_v6, %v2766_v36  ;;  %v2795_v15 = vsel %vm2794_vm7, 1, %v5618_v61  ;;  %v2880_v62 = vshrl.u32 %v5613_v42, %v6771_v26 }
 0x2e2   :  { %v2773_v12 = vsel %vm2772_vm5, 1, %v5618_v61  ;;  %v2797_v39 = vadd.s32 %v2795_v15, %v2793_v22  ;;  %v2883_v43 = vshrl.u32 %v5614_v46, %v6771_v26  ;;  %v2885_v27 = vshll.u32 %v5614_v46, %v2876_v1 }
 0x2e3   :  { %v2775_v33 = vadd.s32 %v2773_v12, %v2771_v45  ;;  %v2886_v5 = vshrl.u32 %v5615_v49, %v6771_v26  ;;  %v2888_v16 = vshll.u32 %v5615_v49, %v2876_v1  ;;  %v6789_v34 = vor.u32 %v2880_v62, %v2879_v24 }
 0x2e4   :  { %v2798_v60 = vadd.s32 %v2797_v39, %v2787_v13  ;;  %v6791_v53 = vor.u32 %v2883_v43, %v2882_v51  ;;  %v2889_v28 = vshrl.u32 %v5616_v52, %v6771_v26  ;;  %v2891_v0 = vshll.u32 %v5616_v52, %v2876_v1  ;;  %v2701_v22 = vpop.f32.mrf.mxu2 }
 0x2e5   :  { %v2776_v4 = vadd.s32 %v2775_v33, %v2765_v21  ;;  %v6797_v56 = vor.u32 %v2886_v5, %v2885_v27  ;;  %v2892_v58 = vshrl.u32 %v5617_v55, %v6771_v26  ;;  %vm2894_vm13 = vcmp.lt.s32.totalorder %v6774_v41, 1 }
 0x2e6   :  { %v2799_v19 = vadd.s32 %v2798_v60, %v2789_v37  ;;  %v2890_v17 = vor.u32 %v2889_v28, %v2888_v16  ;;  %v6805_v23 = vshll.u32 %v2870_v7, 8  ;;  %v2800_v38 = vmul.u32 %v6745_v32, %v6767_v20 }
 0x2e7   :  { %v6795_v59 = vadd.s32 %v2776_v4, %v2767_v25  ;;  %v2893_v11 = vor.u32 %v2892_v58, %v2891_v0  ;;  %vm2897_vm14 = vcmp.lt.s32.totalorder %v6774_v41, 4  ;;  %v2902_v31 = vsel %vm2894_vm13, %v6789_v34, %v6791_v53 }
 0x2e8   :  { %v2803_v44 = vadd.s32 1, %v2799_v19  ;;  %vm2896_vm12 = vcmp.lt.s32.totalorder %v6774_v41, 3  ;;  %v2903_v35 = vsel %vm2897_vm14, %v2890_v17, 920167782  ;;  %v2906_v7 = vsel %vm2894_vm13, %v6791_v53, %v6797_v56 }
 0x2e9   :  { %vm2802_vm10 = vc.u32 %v6795_v59, %v6777_v18  ;;  %v2907_v32 = vsel %vm2897_vm14, %v2893_v11, 1326507024  ;;  %vm2895_vm0 = vcmp.lt.s32.totalorder %v6774_v41, 2  ;;  %v2904_v63 = vsel %vm2896_vm12, %v6797_v56, %v2903_v35 }
 0x2ea   :  { %v2804_v20 = vsel %vm2802_vm10, %v2803_v44, %v2799_v19  ;;  %v2908_v3 = vsel %vm2896_vm12, %v2890_v17, %v2907_v32  ;;  %v2905_v54 = vsel %vm2895_vm0, %v2902_v31, %v2904_v63  ;;  %v2911_v36 = vand.u32 65535, %v6805_v23 }
 0x2eb   :  { %v2805_v21 = vadd.s32 %v2804_v20, %v2800_v38  ;;  %v2909_v50 = vsel %vm2895_vm0, %v2906_v7, %v2908_v3  ;;  %v2912_v25 = vshrl.u32 %v6805_v23, 16  ;;  %v2936_v6 = vshrl.u32 %v2905_v54, 16 }
 0x2ec   :  { %v2913_v14 = vand.u32 65535, %v2909_v50  ;;  %v2914_v13 = vshrl.u32 %v2909_v50, 16  ;;  %v2935_v1 = vand.u32 65535, %v2905_v54  ;;  %v6840_v5 = vadd.f32 %v6733_v2, %v2701_v22 }
 0x2ed   :  { %v2806_v10 = vadd.s32 536870912, %v2805_v21  ;;  %v2938_v45 = vmul.u32 %v2936_v6, %v2911_v36  ;;  %v2940_v58 = vmul.u32 %v2936_v6, %v2912_v25  ;;  %v2878_v31 = vshrl.u32 %v5612_v40, %v6771_v26 }
 0x2ee   :  { %v2916_v47 = vmul.u32 %v2914_v13, %v2911_v36  ;;  %v2917_v37 = vmul.u32 %v2913_v14, %v2912_v25  ;;  %v2915_v9 = vmul.u32 %v2913_v14, %v2911_v36  ;;  %v2918_v15 = vmul.u32 %v2914_v13, %v2912_v25 }
 0x2ef   :  { %v6835_v48 = vshrl.u32 %v2806_v10, 30  ;;  %v2937_v24 = vmul.u32 %v2935_v1, %v2911_v36  ;;  %v2941_v39 = vshll.u32 %v2938_v45, 16  ;;  %v2939_v43 = vmul.u32 %v2935_v1, %v2912_v25 }
 0x2f0   :  { %v2919_v12 = vshll.u32 %v2916_v47, 16  ;;  %v2921_v62 = vshll.u32 %v2917_v37, 16  ;;  %v2920_v16 = vshrl.u32 %v2916_v47, 16  ;;  %v3020_v7 = vand.u32 2139095040, %v6840_v5 }
 0x2f1   :  { %v2808_v33 = vshll.u32 %v6835_v48, 30  ;;  %vm2945_vm4 = vc.u32 %v2937_v24, %v2941_v39  ;;  %v2943_v17 = vshll.u32 %v2939_v43, 16  ;;  %v2947_v38 = vadd.s32 %v2941_v39, %v2937_v24 }
 0x2f2   :  { %vm2923_vm9 = vc.u32 %v2915_v9, %v2919_v12  ;;  %v2925_v51 = vadd.s32 %v2919_v12, %v2915_v9  ;;  %v2946_v11 = vsel %vm2945_vm4, 1, %v5618_v61  ;;  %v2899_v20 = vsel %vm2897_vm14, %v6797_v56, 2102212464 }
 0x2f3   :  { %v2809_v4 = vsub.s32 %v2805_v21, %v2808_v33  ;;  %v2924_v27 = vsel %vm2923_vm9, 1, %v5618_v61  ;;  %v2948_v35 = vadd.s32 %v2946_v11, %v2940_v58  ;;  %vm2949_vm15 = vc.u32 %v2947_v38, %v2943_v17 }
 0x2f4   :  { %v2926_v60 = vadd.s32 %v2924_v27, %v2918_v15  ;;  %vm2927_vm8 = vc.u32 %v2925_v51, %v2921_v62  ;;  %v2922_v3 = vshrl.u32 %v2917_v37, 16  ;;  %v2950_v21 = vsel %vm2949_vm15, 1, %v5618_v61 }
 0x2f5   :  { %vm2810_vm11 = vcmp.lt.s32.totalorder %v2809_v4, 0  ;;  %v2811_v28 = vsub.s32 0, %v2809_v4  ;;  %v2928_v0 = vsel %vm2927_vm8, 1, %v5618_v61  ;;  %v3021_v54 = vshrl.u32 %v3020_v7, 23 }
 0x2f6   :  { %v2930_v19 = vadd.s32 %v2928_v0, %v2926_v60  ;;  %v2898_v36 = vsel %vm2894_vm13, %v2878_v31, %v6789_v34  ;;  %v2942_v26 = vshrl.u32 %v2938_v45, 16  ;;  %v2952_v25 = vadd.s32 %v2950_v21, %v2948_v35 }
 0x2f7   :  { %v2812_v44 = vsel %vm2810_vm11, %v2811_v28, %v2809_v4  ;;  %v2900_v14 = vsel %vm2896_vm12, %v6791_v53, %v2899_v20  ;;  %v3017_v56 = vand.u32 2147483647, %v6840_v5  ;;  %v5501_v6 = vadd.s32 4294967169, %v3021_v54 }
 0x2f8   :  { %v2813_v32 = vclz %v2812_v44  ;;  %v2931_v63 = vadd.s32 %v2930_v19, %v2920_v16  ;;  %v2944_v10 = vshrl.u32 %v2939_v43, 16  ;;  %v2953_v1 = vadd.s32 %v2952_v25, %v2942_v26 }
 0x2f9   :  { %v2801_v47 = vadd.s32 %v6777_v18, %v6795_v59  ;;  %v6862_v9 = vadd.s32 %v2947_v38, %v2943_v17  ;;  %v3027_v34 = vadd.s32 1, %v5501_v6  ;;  %v2901_v53 = vsel %vm2895_vm0, %v2898_v36, %v2900_v14 }
 0x2fa   :  { %v5496_v50 = vadd.s32 4294967294, %v2813_v32  ;;  %v6857_v13 = vadd.s32 %v2931_v63, %v2922_v3  ;;  %v2954_v22 = vadd.s32 %v2953_v1, %v2944_v10  ;;  %v3024_v15 = vand.u32 8388607, %v3017_v56  ;;  %v2703_v3 = vpop.f32.mrf.mxu2 }
 0x2fb   :  { %vm3028_vm3 = vcmp.gt.s32.totalorder %v3027_v34, 0  ;;  %v2955_v62 = vmul.u32 %v6805_v23, %v2901_v53  ;;  %vm6888_vm5 = vcmp.le.f32.partialorder %v2707_v57, 0.7853982  ;;  %vm2709_vm7 = vcmp.lt.s32.totalorder %v6736_v8, 0 }
 0x2fc   :  { %vm5497_vm1 = vcmp.lt.s32.totalorder %v5496_v50, 0  ;;  %vm2957_vm2 = vc.u32 %v6857_v13, %v6862_v9  ;;  %v2958_v59 = vadd.s32 1, %v2954_v22  ;;  %v3029_v39 = vsel %vm3028_vm3, %v3027_v34, 0 }
 0x2fd   :  { %v2816_v37 = vsel %vm5497_vm1, 0, %v5496_v50  ;;  %v3031_v51 = vand.u32 31, %v3029_v39  ;;  %v3025_v28 = vor.u32 8388608, %v3024_v15  ;;  %v6880_v32 = vshrl.u32 %v3029_v39, 5 }
 0x2fe   :  { %v2817_v45 = vsub.s32 32, %v2816_v37  ;;  %v2821_v12 = vsub.s32 4294967266, %v2816_v37  ;;  %v2818_v33 = vshll.u32 %v2809_v4, %v2816_v37  ;;  %v2959_v41 = vsel %vm2957_vm2, %v2958_v59, %v2954_v22 }
 0x2ff   :  { %v2960_v16 = vadd.s32 %v2959_v41, %v2955_v62  ;;  %v3032_v60 = vsub.s32 32, %v3031_v51  ;;  %v3034_v0 = vshll.u32 %v5612_v40, %v3031_v51  ;;  %v3037_v58 = vshll.u32 %v5613_v42, %v3031_v51 }
 0x300   :  { %v2819_v24 = vshrl.u32 %v2801_v47, %v2817_v45  ;;  %v2822_v18 = vadd.s32 127, %v2821_v12  ;;  %v3043_v31 = vshll.u32 %v5615_v49, %v3031_v51  ;;  %v3040_v20 = vshll.u32 %v5614_v46, %v3031_v51 }
 0x301   :  { %v2961_v17 = vadd.s32 536870912, %v2960_v16  ;;  %v3035_v11 = vshrl.u32 %v5613_v42, %v3032_v60  ;;  %v3038_v38 = vshrl.u32 %v5614_v46, %v3032_v60  ;;  %v3041_v23 = vshrl.u32 %v5615_v49, %v3032_v60 }
 0x302   :  { %v2820_v43 = vor.u32 %v2819_v24, %v2818_v33  ;;  %v2823_v27 = vshll.u32 %v2822_v18, 23  ;;  %v3044_v35 = vshrl.u32 %v5616_v52, %v3032_v60  ;;  %v3047_v63 = vshrl.u32 %v5617_v55, %v3032_v60 }
 0x303   :  { %v6878_v7 = vshrl.u32 %v2961_v17, 30  ;;  %v3036_v54 = vor.u32 %v3035_v11, %v3034_v0  ;;  %v3039_v50 = vor.u32 %v3038_v38, %v3037_v58  ;;  %v3046_v25 = vshll.u32 %v5616_v52, %v3031_v51 }
 0x304   :  { %v2824_v4 = vor.u32 4788187, %v2823_v27  ;;  %v2827_v19 = vcvt.s32.f32 %v2820_v43  ;;  %v3045_v36 = vor.u32 %v3044_v35, %v3043_v31  ;;  %v3042_v6 = vor.u32 %v3041_v23, %v3040_v20 }
 0x305   :  { %v2963_v26 = vshll.u32 %v6878_v7, 30  ;;  %v6894_v10 = vadd.f32 %v6733_v2, %v2703_v3  ;;  %v3048_v47 = vor.u32 %v3047_v63, %v3046_v25  ;;  %vm3049_vm10 = vcmp.lt.s32.totalorder %v6880_v32, 1 }
 0x306   :  { %v2825_v44 = vand.u32 2147483647, %v2824_v4  ;;  %vm3052_vm13 = vcmp.lt.s32.totalorder %v6880_v32, 4  ;;  %v3057_v34 = vsel %vm3049_vm10, %v3036_v54, %v3039_v50  ;;  %v6902_v45 = vshll.u32 %v3025_v28, 8 }
 0x307   :  { %v2964_v1 = vsub.s32 %v2960_v16, %v2963_v26  ;;  %v3058_v57 = vsel %vm3052_vm13, %v3045_v36, 920167782  ;;  %v2831_v12 = vsub.s32 4, %v6835_v48  ;;  %vm3051_vm12 = vcmp.lt.s32.totalorder %v6880_v32, 3 }
 0x308   :  { %v2828_v21 = vmul.f32 %v2827_v19, %v2825_v44  ;;  %vm3050_vm0 = vcmp.lt.s32.totalorder %v6880_v32, 2  ;;  %v3059_v53 = vsel %vm3051_vm12, %v3042_v6, %v3058_v57  ;;  %v3061_v22 = vsel %vm3049_vm10, %v3039_v50, %v3042_v6 }
 0x309   :  { %vm2965_vm14 = vcmp.lt.s32.totalorder %v2964_v1, 0  ;;  %v2966_v2 = vsub.s32 0, %v2964_v1  ;;  %v3172_v33 = vand.u32 2147483647, %v6894_v10  ;;  %v3060_v24 = vsel %vm3050_vm0, %v3057_v34, %v3059_v53 }
 0x30a   :  { %v2829_v37 = vxor.u32 2147483648, %v2828_v21  ;;  %v3062_v18 = vsel %vm3052_vm13, %v3048_v47, 1326507024  ;;  %v3175_v59 = vand.u32 2139095040, %v6894_v10  ;;  %v3066_v43 = vand.u32 65535, %v6902_v45 }
 0x30b   :  { %v2967_v15 = vsel %vm2965_vm14, %v2966_v2, %v2964_v1  ;;  %v3063_v51 = vsel %vm3051_vm12, %v3045_v36, %v3062_v18  ;;  %v3054_v27 = vsel %vm3052_vm13, %v3042_v6, 2102212464  ;;  %v3067_v16 = vshrl.u32 %v6902_v45, 16 }
 0x30c   :  { %v2830_v39 = vsel %vm2709_vm7, %v2829_v37, %v2828_v21  ;;  %v2968_v62 = vclz %v2967_v15  ;;  %v3064_v41 = vsel %vm3050_vm0, %v3061_v22, %v3063_v51  ;;  %v3091_v4 = vshrl.u32 %v3060_v24, 16 }
 0x30d   :  { %v3068_v0 = vand.u32 65535, %v3064_v41  ;;  %v3069_v58 = vshrl.u32 %v3064_v41, 16  ;;  %v3090_v19 = vand.u32 65535, %v3060_v24  ;;  %v6930_v17 = vsel %vm6888_vm5, %v6736_v8, %v2830_v39 }
 0x30e   :  { %v5499_v28 = vadd.s32 4294967294, %v2968_v62  ;;  %v3033_v11 = vshrl.u32 %v5612_v40, %v3032_v60  ;;  %v6933_v38 = vmul.u32 %v3091_v4, %v3066_v43  ;;  %v3176_v44 = vshrl.u32 %v3175_v59, 23 }
 0x30f   :  { %v2956_v23 = vadd.s32 %v6862_v9, %v6857_v13  ;;  %v3071_v31 = vmul.u32 %v3069_v58, %v3066_v43  ;;  %v6939_v35 = vand.u32 8388607, %v3172_v33  ;;  %v3055_v3 = vsel %vm3051_vm12, %v3039_v50, %v3054_v27 }
 0x310   :  { %vm5500_vm9 = vcmp.lt.s32.totalorder %v5499_v28, 0  ;;  %v3053_v63 = vsel %vm3049_vm10, %v3033_v11, %v3036_v54  ;;  %v3072_v60 = vmul.u32 %v3068_v0, %v3067_v16  ;;  %v6947_v21 = vmul.f32 %v6930_v17, %v6930_v17 }
 0x311   :  { %v2971_v20 = vsel %vm5500_vm9, 0, %v5499_v28  ;;  %v3094_v9 = vmul.u32 %v3090_v19, %v3067_v16  ;;  %v3070_v26 = vmul.u32 %v3068_v0, %v3066_v43  ;;  %v3074_v25 = vshll.u32 %v3071_v31, 16 }
 0x312   :  { %v2972_v36 = vsub.s32 32, %v2971_v20  ;;  %v2976_v13 = vsub.s32 4294967266, %v2971_v20  ;;  %v3096_v6 = vshll.u32 %v6933_v38, 16  ;;  %v5504_v47 = vadd.s32 4294967169, %v3176_v44 }
 0x313   :  { %v2973_v37 = vshll.u32 %v2964_v1, %v2971_v20  ;;  %v3092_v54 = vmul.u32 %v3090_v19, %v3066_v43  ;;  %v3073_v2 = vmul.u32 %v3069_v58, %v3067_v16  ;;  %v3076_v53 = vshll.u32 %v3072_v60, 16 }
 0x314   :  { %v2974_v34 = vshrl.u32 %v2956_v23, %v2972_v36  ;;  %v2977_v57 = vadd.s32 127, %v2976_v13  ;;  %vm3078_vm8 = vc.u32 %v3070_v26, %v3074_v25  ;;  %v3080_v50 = vadd.s32 %v3074_v25, %v3070_v26 }
 0x315   :  { %v3079_v24 = vsel %vm3078_vm8, 1, %v5618_v61  ;;  %v3098_v18 = vshll.u32 %v3094_v9, 16  ;;  %vm2864_vm4 = vcmp.lt.s32.totalorder %v6743_v29, 0  ;;  %vm3100_vm15 = vc.u32 %v3092_v54, %v3096_v6 }
 0x316   :  { %v2975_v22 = vor.u32 %v2974_v34, %v2973_v37  ;;  %v2978_v15 = vshll.u32 %v2977_v57, 23  ;;  %v3081_v59 = vadd.s32 %v3079_v24, %v3073_v2  ;;  %vm3082_vm11 = vc.u32 %v3080_v50, %v3076_v53 }
 0x317   :  { %v3102_v39 = vadd.s32 %v3096_v6, %v3092_v54  ;;  %vm6954_vm1 = vcmp.le.f32.partialorder %v2862_v30, 0.7853982  ;;  %v3075_v51 = vshrl.u32 %v3071_v31, 16  ;;  %v3083_v43 = vsel %vm3082_vm11, 1, %v5618_v61 }
 0x318   :  { %v2979_v62 = vor.u32 4788187, %v2978_v15  ;;  %v3095_v27 = vmul.u32 %v3091_v4, %v3067_v16  ;;  %v2982_v41 = vcvt.s32.f32 %v2975_v22  ;;  %v3085_v28 = vadd.s32 %v3083_v43, %v3081_v59 }
 0x319   :  { %v3101_v0 = vsel %vm3100_vm15, 1, %v5618_v61  ;;  %vm3104_vm2 = vc.u32 %v3102_v39, %v3098_v18  ;;  %v3182_v44 = vadd.s32 1, %v5504_v47  ;;  %v2843_v30 = vmul.f32 -0.00019511016, %v6947_v21 }
 0x31a   :  { %v2980_v58 = vand.u32 2147483647, %v2979_v62  ;;  %v3103_v19 = vadd.s32 %v3101_v0, %v3095_v27  ;;  %v3105_v11 = vsel %vm3104_vm2, 1, %v5618_v61  ;;  %v3056_v23 = vsel %vm3050_vm0, %v3053_v63, %v3055_v3 }
 0x31b   :  { %v3077_v20 = vshrl.u32 %v3072_v60, 16  ;;  %v3086_v31 = vadd.s32 %v3085_v28, %v3075_v51  ;;  %v3097_v16 = vshrl.u32 %v6933_v38, 16  ;;  %vm3183_vm3 = vcmp.gt.s32.totalorder %v3182_v44, 0 }
 0x31c   :  { %v2983_v36 = vmul.f32 %v2982_v41, %v2980_v58  ;;  %v3107_v4 = vadd.s32 %v3105_v11, %v3103_v19  ;;  %v2832_v13 = vsel %vm2709_vm7, %v2831_v12, %v6835_v48  ;;  %v3099_v25 = vshrl.u32 %v3094_v9, 16 }
 0x31d   :  { %v6970_v26 = vadd.s32 %v3086_v31, %v3077_v20  ;;  %v3184_v6 = vsel %vm3183_vm3, %v3182_v44, 0  ;;  %v6972_v32 = vadd.s32 %v3102_v39, %v3098_v18  ;;  %v2844_v60 = vadd.f32 0.008332121, %v2843_v30 }
 0x31e   :  { %v2984_v47 = vxor.u32 2147483648, %v2983_v36  ;;  %v3108_v63 = vadd.s32 %v3107_v4, %v3097_v16  ;;  %v3186_v3 = vand.u32 31, %v3184_v6  ;;  %v3110_v38 = vmul.u32 %v6902_v45, %v3056_v23 }
 0x31f   :  { %v3180_v37 = vor.u32 8388608, %v6939_v35  ;;  %v6976_v34 = vshrl.u32 %v3184_v6, 5  ;;  %vm3112_vm7 = vc.u32 %v6970_v26, %v6972_v32  ;;  %v2845_v58 = vmul.f32 %v2844_v60, %v6947_v21 }
 0x320   :  { %v2985_v57 = vsel %vm2864_vm4, %v2984_v47, %v2983_v36  ;;  %v3109_v48 = vadd.s32 %v3108_v63, %v3099_v25  ;;  %v3187_v12 = vsub.s32 32, %v3186_v3  ;;  %v3189_v54 = vshll.u32 %v5612_v40, %v3186_v3 }
 0x321   :  { %v6985_v9 = vsel %vm6954_vm1, %v6743_v29, %v2985_v57  ;;  %v3192_v45 = vshll.u32 %v5613_v42, %v3186_v3  ;;  %v3195_v35 = vshll.u32 %v5614_v46, %v3186_v3  ;;  %v3198_v22 = vshll.u32 %v5615_v49, %v3186_v3 }
 0x322   :  { %v6992_v2 = vmul.f32 %v6985_v9, %v6985_v9  ;;  %v3113_v53 = vadd.s32 1, %v3109_v48  ;;  %v3190_v50 = vshrl.u32 %v5613_v42, %v3187_v12  ;;  %v3193_v15 = vshrl.u32 %v5614_v46, %v3187_v12 }
 0x323   :  { %v3196_v24 = vshrl.u32 %v5615_v49, %v3187_v12  ;;  %v3199_v18 = vshrl.u32 %v5616_v52, %v3187_v12  ;;  %v3201_v59 = vshll.u32 %v5616_v52, %v3186_v3  ;;  %v3202_v43 = vshrl.u32 %v5617_v55, %v3187_v12 }
 0x324   :  { %v2998_v39 = vmul.f32 -0.00019511016, %v6992_v2  ;;  %v3114_v62 = vsel %vm3112_vm7, %v3113_v53, %v3109_v48  ;;  %v3191_v51 = vor.u32 %v3190_v50, %v3189_v54  ;;  %v7002_v41 = vor.u32 %v3193_v15, %v3192_v45 }
 0x325   :  { %v3115_v27 = vadd.s32 %v3114_v62, %v3110_v38  ;;  %v3197_v28 = vor.u32 %v3196_v24, %v3195_v35  ;;  %v3200_v0 = vor.u32 %v3199_v18, %v3198_v22  ;;  %v2986_v19 = vsub.s32 4, %v6878_v7 }
 0x326   :  { %v2999_v11 = vadd.f32 0.008332121, %v2998_v39  ;;  %v3203_v44 = vor.u32 %v3202_v43, %v3201_v59  ;;  %vm3204_vm10 = vcmp.lt.s32.totalorder %v6976_v34, 1  ;;  %vm3207_vm13 = vcmp.lt.s32.totalorder %v6976_v34, 4 }
 0x327   :  { %v3116_v30 = vadd.s32 536870912, %v3115_v27  ;;  %v7008_v23 = vshll.u32 %v3180_v37, 8  ;;  %vm3206_vm14 = vcmp.lt.s32.totalorder %v6976_v34, 3  ;;  %v3212_v31 = vsel %vm3204_vm10, %v3191_v51, %v7002_v41 }
 0x328   :  { %v3000_v20 = vmul.f32 %v2999_v11, %v6992_v2  ;;  %v3213_v36 = vsel %vm3207_vm13, %v3200_v0, 920167782  ;;  %vm3205_vm12 = vcmp.lt.s32.totalorder %v6976_v34, 2  ;;  %v3216_v25 = vsel %vm3204_vm10, %v7002_v41, %v3197_v28 }
 0x329   :  { %v7017_v16 = vshrl.u32 %v3116_v30, 30  ;;  %v3214_v4 = vsel %vm3206_vm14, %v3197_v28, %v3213_v36  ;;  %v7027_v6 = vsel %vm6888_vm5, 0, %v2832_v13  ;;  %v2846_v47 = vadd.f32 -0.16666654, %v2845_v58 }
 0x32a   :  { %v3215_v63 = vsel %vm3205_vm12, %v3212_v31, %v3214_v4  ;;  %v3217_v3 = vsel %vm3207_vm13, %v3203_v44, 1326507024  ;;  %v2987_v60 = vsel %vm2864_vm4, %v2986_v19, %v6878_v7  ;;  %v3221_v14 = vand.u32 65535, %v7008_v23 }
 0x32b   :  { %v3118_v38 = vshll.u32 %v7017_v16, 30  ;;  %v3218_v37 = vsel %vm3206_vm14, %v3200_v0, %v3217_v3  ;;  %v3001_v13 = vadd.f32 -0.16666654, %v3000_v20  ;;  %v3188_v57 = vshrl.u32 %v5612_v40, %v3187_v12 }
 0x32c   :  { %v3219_v48 = vsel %vm3205_vm12, %v3216_v25, %v3218_v37  ;;  %v3246_v54 = vshrl.u32 %v3215_v63, 16  ;;  %v3245_v50 = vand.u32 65535, %v3215_v63  ;;  %v2847_v7 = vmul.f32 %v2846_v47, %v6947_v21 }
 0x32d   :  { %v3119_v45 = vsub.s32 %v3115_v27, %v3118_v38  ;;  %v3223_v35 = vand.u32 65535, %v3219_v48  ;;  %v3224_v53 = vshrl.u32 %v3219_v48, 16  ;;  %v7046_v22 = vsel %vm6954_vm1, 0, %v2987_v60 }
 0x32e   :  { %v3222_v15 = vshrl.u32 %v7008_v23, 16  ;;  %v3248_v24 = vmul.u32 %v3246_v54, %v3221_v14  ;;  %v3111_v12 = vadd.s32 %v6972_v32, %v6970_v26  ;;  %v3208_v59 = vsel %vm3204_vm10, %v3188_v57, %v3191_v51 }
 0x32f   :  { %vm3120_vm5 = vcmp.lt.s32.totalorder %v3119_v45, 0  ;;  %v3121_v18 = vsub.s32 0, %v3119_v45  ;;  %v3002_v39 = vmul.f32 %v3001_v13, %v6992_v2  ;;  %v3209_v62 = vsel %vm3207_vm13, %v3197_v28, 2102212464 }
 0x330   :  { %v3226_v43 = vmul.u32 %v3224_v53, %v3221_v14  ;;  %v3227_v1 = vmul.u32 %v3223_v35, %v3222_v15  ;;  %v3247_v0 = vmul.u32 %v3245_v50, %v3221_v14  ;;  %v3249_v58 = vmul.u32 %v3245_v50, %v3222_v15 }
 0x331   :  { %v3122_v27 = vsel %vm3120_vm5, %v3121_v18, %v3119_v45  ;;  %v3251_v19 = vshll.u32 %v3248_v24, 16  ;;  %v3225_v44 = vmul.u32 %v3223_v35, %v3221_v14  ;;  %v3228_v30 = vmul.u32 %v3224_v53, %v3222_v15 }
 0x332   :  { %v3123_v11 = vclz %v3122_v27  ;;  %v3229_v26 = vshll.u32 %v3226_v43, 16  ;;  %v3230_v32 = vshrl.u32 %v3226_v43, 16  ;;  %v3231_v20 = vshll.u32 %v3227_v1, 16 }
 0x333   :  { %v3250_v31 = vmul.u32 %v3246_v54, %v3222_v15  ;;  %v3253_v36 = vshll.u32 %v3249_v58, 16  ;;  %vm3255_vm9 = vc.u32 %v3247_v0, %v3251_v19  ;;  %v3257_v47 = vadd.s32 %v3251_v19, %v3247_v0 }
 0x334   :  { %v5502_v51 = vadd.s32 4294967294, %v3123_v11  ;;  %vm3233_vm0 = vc.u32 %v3225_v44, %v3229_v26  ;;  %v3235_v4 = vadd.s32 %v3229_v26, %v3225_v44  ;;  %v3256_v25 = vsel %vm3255_vm9, 1, %v5618_v61 }
 0x335   :  { %v3234_v28 = vsel %vm3233_vm0, 1, %v5618_v61  ;;  %v2836_v63 = vmul.f32 -0.001358992, %v6947_v21  ;;  %v3258_v60 = vadd.s32 %v3256_v25, %v3250_v31  ;;  %v3232_v37 = vshrl.u32 %v3227_v1, 16 }
 0x336   :  { %vm5503_vm8 = vcmp.lt.s32.totalorder %v5502_v51, 0  ;;  %v3236_v3 = vadd.s32 %v3234_v28, %v3228_v30  ;;  %vm3237_vm4 = vc.u32 %v3235_v4, %v3231_v20  ;;  %vm3259_vm11 = vc.u32 %v3257_v47, %v3253_v36 }
 0x337   :  { %v3126_v38 = vsel %vm5503_vm8, 0, %v5502_v51  ;;  %v3238_v14 = vsel %vm3237_vm4, 1, %v5618_v61  ;;  %v3252_v54 = vshrl.u32 %v3248_v24, 16  ;;  %v3260_v53 = vsel %vm3259_vm11, 1, %v5618_v61 }
 0x338   :  { %v3127_v13 = vsub.s32 32, %v3126_v38  ;;  %v3131_v57 = vsub.s32 4294967266, %v3126_v38  ;;  %v3240_v48 = vadd.s32 %v3238_v14, %v3236_v3  ;;  %v3128_v35 = vshll.u32 %v3119_v45, %v3126_v38 }
 0x339   :  { %v2837_v50 = vadd.f32 0.041655596, %v2836_v63  ;;  %v2991_v15 = vmul.f32 -0.001358992, %v6992_v2  ;;  %v3262_v0 = vadd.s32 %v3260_v53, %v3258_v60  ;;  %v3210_v1 = vsel %vm3206_vm14, %v7002_v41, %v3209_v62 }
 0x33a   :  { %v3129_v18 = vshrl.u32 %v3111_v12, %v3127_v13  ;;  %v3132_v43 = vadd.s32 127, %v3131_v57  ;;  %v3241_v27 = vadd.s32 %v3240_v48, %v3230_v32  ;;  %v3254_v19 = vshrl.u32 %v3249_v58, 16 }
 0x33b   :  { %v2838_v11 = vmul.f32 %v2837_v50, %v6947_v21  ;;  %v2992_v44 = vadd.f32 0.041655596, %v2991_v15  ;;  %v3263_v26 = vadd.s32 %v3262_v0, %v3252_v54  ;;  %v2848_v20 = vadd.f32 1.0, %v2847_v7 }
 0x33c   :  { %v3130_v30 = vor.u32 %v3129_v18, %v3128_v35  ;;  %v3133_v24 = vshll.u32 %v3132_v43, 23  ;;  %v7066_v45 = vadd.s32 %v3241_v27, %v3232_v37  ;;  %v7068_v31 = vadd.s32 %v3257_v47, %v3253_v36 }
 0x33d   :  { %v2839_v12 = vadd.f32 -0.4999988, %v2838_v11  ;;  %v2993_v32 = vmul.f32 %v2992_v44, %v6992_v2  ;;  %v3003_v51 = vadd.f32 1.0, %v3002_v39  ;;  %v3211_v41 = vsel %vm3205_vm12, %v3208_v59, %v3210_v1 }
 0x33e   :  { %v3134_v4 = vor.u32 4788187, %v3133_v24  ;;  %v3264_v62 = vadd.s32 %v3263_v26, %v3254_v19  ;;  %v2851_v58 = vadd.s32 3, %v7027_v6  ;;  %vm3267_vm15 = vc.u32 %v7066_v45, %v7068_v31 }
 0x33f   :  { %v2840_v28 = vmul.f32 %v2839_v12, %v6947_v21  ;;  %v2994_v25 = vadd.f32 -0.4999988, %v2993_v32  ;;  %v3006_v7 = vadd.s32 3, %v7046_v22  ;;  %v3137_v47 = vcvt.s32.f32 %v3130_v30  ;;  %v5567_v30 = vld [vmem:[%s7628_s8] sm:$0xff] }
 0x340   :  { %v3135_v36 = vand.u32 2147483647, %v3134_v4  ;;  %v3268_v63 = vadd.s32 1, %v3264_v62  ;;  %v2849_v39 = vmul.f32 %v2848_v20, %v6930_v17  ;;  %v3265_v3 = vmul.u32 %v7008_v23, %v3211_v41 }
 0x341   :  { %v2995_v34 = vmul.f32 %v2994_v25, %v6992_v2  ;;  %v7082_v59 = vmul.f32 %v3003_v51, %v6985_v9  ;;  %v2841_v14 = vadd.f32 1.0, %v2840_v28  ;;  %v2852_v21 = vand.u32 3, %v2851_v58 }
 0x342   :  { %v3138_v60 = vmul.f32 %v3137_v47, %v3135_v36  ;;  %v3269_v38 = vsel %vm3267_vm15, %v3268_v63, %v3264_v62  ;;  %v3007_v48 = vand.u32 3, %v3006_v7  ;;  %vm3019_vm1 = vcmp.lt.s32.totalorder %v6840_v5, 0 }
 0x343   :  { %v3270_v37 = vadd.s32 %v3269_v38, %v3265_v3  ;;  %v2996_v57 = vadd.f32 1.0, %v2995_v34  ;;  %v2855_v35 = vxor.u32 2147483648, %v2849_v39  ;;  %v3477_v17 = vand.u32 3, %v7027_v6 }
 0x344   :  { %v3139_v13 = vxor.u32 2147483648, %v3138_v60  ;;  %vm7088_vm2 = vcmp.le.f32.partialorder %v3017_v56, 0.7853982  ;;  %v3010_v23 = vxor.u32 2147483648, %v7082_v59  ;;  %vm2853_vm3 = vcmp.lt.s32.totalorder %v2852_v21, 2  ;;  %v5568_v56 = vld [vmem:[%s7628_s8 + $0x8] sm:$0xff] }
 0x345   :  { %v3271_v54 = vadd.s32 536870912, %v3270_v37  ;;  %vm2854_vm7 = vcmp.eq.s32.totalorder %v2852_v21, 0  ;;  %v2858_v50 = vxor.u32 2147483648, %v2841_v14  ;;  %vm2857_vm10 = vcmp.eq.s32.totalorder %v2852_v21, 2  ;;  %3992 = vmatpush.bf16.msra.mxu3 %v5568_v56 }
 0x346   :  { %v3140_v9 = vsel %vm3019_vm1, %v3139_v13, %v3138_v60  ;;  %vm3008_vm13 = vcmp.lt.s32.totalorder %v3007_v48, 2  ;;  %v3013_v15 = vxor.u32 2147483648, %v2996_v57  ;;  %v2856_v43 = vsel %vm2854_vm7, %v2841_v14, %v2855_v35 }
 0x347   :  { %v7097_v53 = vshrl.u32 %v3271_v54, 30  ;;  %v7102_v6 = vsel %vm7088_vm2, %v6840_v5, %v3140_v9  ;;  %vm3009_vm14 = vcmp.eq.s32.totalorder %v3007_v48, 0  ;;  %vm3479_vm12 = vcmp.eq.s32.totalorder %v3477_v17, 0 }
 0x348   :  { %v3011_v27 = vsel %vm3009_vm14, %v2996_v57, %v3010_v23  ;;  %vm3012_vm5 = vcmp.eq.s32.totalorder %v3007_v48, 2  ;;  %v3481_v0 = vsel %vm3479_vm12, %v2841_v14, %v2855_v35  ;;  %v3631_v1 = vand.u32 3, %v7046_v22 }
 0x349   :  { %v3273_v18 = vshll.u32 %v7097_v53, 30  ;;  %v7113_v19 = vmul.f32 %v7102_v6, %v7102_v6  ;;  %v2859_v44 = vsel %vm2857_vm10, %v2858_v50, %v2849_v39  ;;  %vm3482_vm0 = vcmp.eq.s32.totalorder %v3477_v17, 2  ;;  %3993 = vmatpush.bf16.msra.mxu3 %v5567_v30 }
 0x34a   :  { %v2860_v24 = vsel %vm2853_vm3, %v2856_v43, %v2859_v44  ;;  %v3014_v26 = vsel %vm3012_vm5, %v3013_v15, %v7082_v59  ;;  %vm3478_vm9 = vcmp.lt.s32.totalorder %v3477_v17, 2  ;;  %v3484_v20 = vsel %vm3482_vm0, %v2858_v50, %v2849_v39 }
 0x34b   :  { %v3274_v11 = vsub.s32 %v3270_v37, %v3273_v18  ;;  %v3015_v12 = vsel %vm3008_vm13, %v3011_v27, %v3014_v26  ;;  %v3485_v32 = vsel %vm3478_vm9, %v3481_v0, %v3484_v20  ;;  %vm2850_vm4 = vweird.f32 %v6736_v8 }
 0x34c   :  { %vm3005_vm11 = vweird.f32 %v6743_v29  ;;  %v7124_v51 = vstv %s7094_s7  ;;  %vm3633_vm15 = vcmp.eq.s32.totalorder %v3631_v1, 0  ;;  %v3153_v4 = vmul.f32 -0.00019511016, %v7113_v19 }
 0x34d   :  { %vm3275_vm8 = vcmp.lt.s32.totalorder %v3274_v11, 0  ;;  %v3276_v22 = vsub.s32 0, %v3274_v11  ;;  %v2861_v62 = vsel %vm2850_vm4, nan, %v2860_v24  ;;  %vm3636_vm3 = vcmp.eq.s32.totalorder %v3631_v1, 2 }
 0x34e   :  { %v3016_v28 = vsel %vm3005_vm11, nan, %v3015_v12  ;;  %v3486_v25 = vsel %vm2850_vm4, nan, %v3485_v32  ;;  %v7130_v7 = vstv %s7107_s1  ;;  %vm3632_vm7 = vcmp.lt.s32.totalorder %v3631_v1, 2 }
 0x34f   :  { %v3277_v41 = vsel %vm3275_vm8, %v3276_v22, %v3274_v11  ;;  %v3635_v36 = vsel %vm3633_vm15, %v2996_v57, %v3010_v23  ;;  %v3638_v8 = vsel %vm3636_vm3, %v3013_v15, %v7082_v59  ;;  %v3328_v39 = vmul.f32 %v7124_v51, %v2861_v62 }
 0x350   :  { %v3278_v58 = vclz %v3277_v41  ;;  %v3639_v63 = vsel %vm3632_vm7, %v3635_v36, %v3638_v8  ;;  %v3329_v3 = vmul.f32 %v7124_v51, %v3016_v28  ;;  %v3950_v60 = vmul.f32 %v7130_v7, %v3486_v25 }
 0x351   :  { %v3640_v34 = vsel %vm3005_vm11, nan, %v3639_v63  ;;  %v3154_v38 = vadd.f32 0.008332121, %v3153_v4  ;;  %v3266_v21 = vadd.s32 %v7068_v31, %v7066_v45  ;;  %v3146_v57 = vmul.f32 -0.001358992, %v7113_v19 }
 0x352   :  { %v5505_v47 = vadd.s32 4294967294, %v3278_v58  ;;  %v3951_v37 = vmul.f32 %v7130_v7, %v3640_v34  ;;  %v3954_v48 = vadd.f32 %v3950_v60, %v3328_v39  ;;  %v3141_v45 = vsub.s32 4, %v7017_v16 }
 0x353   :  { %v3155_v35 = vmul.f32 %v3154_v38, %v7113_v19  ;;  %v3147_v15 = vadd.f32 0.041655596, %v3146_v57  ;;  %v3296_v30 = vsub.s32 4, %v7097_v53  ;;  %vm3174_vm13 = vcmp.lt.s32.totalorder %v6894_v10, 0 }
 0x354   :  { %vm5506_vm10 = vcmp.lt.s32.totalorder %v5505_v47, 0  ;;  %v3955_v54 = vadd.f32 %v3951_v37, %v3329_v3  ;;  %vm3173_vm14 = vcmp.le.f32.partialorder %v3172_v33, 0.7853982  ;;  %vm3160_vm8 = vweird.f32 %v6840_v5 }
 0x355   :  { %v3281_v14 = vsel %vm5506_vm10, 0, %v5505_v47  ;;  %v3156_v18 = vadd.f32 -0.16666654, %v3155_v35  ;;  %v3148_v0 = vmul.f32 %v3147_v15, %v7113_v19  ;;  %v3297_v32 = vsel %vm3174_vm13, %v3296_v30, %v7097_v53 }
 0x356   :  { %v3282_v59 = vsub.s32 32, %v3281_v14  ;;  %v3286_v13 = vsub.s32 4294967266, %v3281_v14  ;;  %v3283_v29 = vshll.u32 %v3274_v11, %v3281_v14  ;;  %v3958_v23 = vpack.c.bf16 %v3955_v54, %v3954_v48 }
 0x357   :  { %v3157_v1 = vmul.f32 %v3156_v18, %v7113_v19  ;;  %v3142_v11 = vsel %vm3019_vm1, %v3141_v45, %v7017_v16  ;;  %v3149_v26 = vadd.f32 -0.4999988, %v3148_v0  ;;  %v3299_v28 = vsel %vm3173_vm14, 0, %v3297_v32 }
 0x358   :  { %v3284_v17 = vshrl.u32 %v3266_v21, %v3282_v59  ;;  %v3287_v9 = vadd.s32 127, %v3286_v13  ;;  %5528 = vmatmul.msk.bf16.vlgmr.msra.gmra.mxu3 %vm1381_vm6, %v3958_v23  ;;  %v3144_v20 = vsel %vm7088_vm2, 0, %v3142_v11  ;;  %v3316_v63 = vadd.s32 3, %v3299_v28 }
 0x359   :  { %v3158_v22 = vadd.f32 1.0, %v3157_v1  ;;  %v3150_v16 = vmul.f32 %v3149_v26, %v7113_v19  ;;  %v3161_v62 = vadd.s32 3, %v3144_v20  ;;  %v3785_v33 = vand.u32 3, %v3144_v20 }
 0x35a   :  { %v3285_v50 = vor.u32 %v3284_v17, %v3283_v29  ;;  %v3288_v56 = vshll.u32 %v3287_v9, 23  ;;  %v3317_v19 = vand.u32 3, %v3316_v63  ;;  %v3939_v17 = vand.u32 3, %v3299_v28 }
 0x35b   :  { %v3159_v58 = vmul.f32 %v3158_v22, %v7102_v6  ;;  %v3151_v8 = vadd.f32 1.0, %v3150_v16  ;;  %v3162_v39 = vand.u32 3, %v3161_v62  ;;  %vm3787_vm2 = vcmp.eq.s32.totalorder %v3785_v33, 0 }
 0x35c   :  { %v3289_v43 = vor.u32 4788187, %v3288_v56  ;;  %v3292_v27 = vcvt.s32.f32 %v3285_v50  ;;  %vm3786_vm0 = vcmp.lt.s32.totalorder %v3785_v33, 2  ;;  %vm3790_vm9 = vcmp.eq.s32.totalorder %v3785_v33, 2 }
 0x35d   :  { %v3165_v34 = vxor.u32 2147483648, %v3159_v58  ;;  %v3168_v38 = vxor.u32 2147483648, %v3151_v8  ;;  %vm3164_vm1 = vcmp.eq.s32.totalorder %v3162_v39, 0  ;;  %vm3163_vm12 = vcmp.lt.s32.totalorder %v3162_v39, 2 }
 0x35e   :  { %v3290_v31 = vand.u32 2147483647, %v3289_v43  ;;  %vm3167_vm5 = vcmp.eq.s32.totalorder %v3162_v39, 2  ;;  %vm3315_vm4 = vweird.f32 %v6894_v10  ;;  %vm3318_vm11 = vcmp.lt.s32.totalorder %v3317_v19, 2 }
 0x35f   :  { %v3166_v6 = vsel %vm3164_vm1, %v3151_v8, %v3165_v34  ;;  %v3789_v59 = vsel %vm3787_vm2, %v3151_v8, %v3165_v34  ;;  %v3169_v57 = vsel %vm3167_vm5, %v3168_v38, %v3159_v58  ;;  %v3792_v54 = vsel %vm3790_vm9, %v3168_v38, %v3159_v58 }
 0x360   :  { %v3293_v44 = vmul.f32 %v3292_v27, %v3290_v31  ;;  %v3170_v35 = vsel %vm3163_vm12, %v3166_v6, %v3169_v57  ;;  %v3793_v29 = vsel %vm3786_vm0, %v3789_v59, %v3792_v54  ;;  %vm3319_vm15 = vcmp.eq.s32.totalorder %v3317_v19, 0 }
 0x361   :  { %v3171_v50 = vsel %vm3160_vm8, nan, %v3170_v35  ;;  %v3794_v15 = vsel %vm3160_vm8, nan, %v3793_v29  ;;  %vm3322_vm3 = vcmp.eq.s32.totalorder %v3317_v19, 2  ;;  %vm3940_vm7 = vcmp.lt.s32.totalorder %v3939_v17, 2 }
 0x362   :  { %v3294_v24 = vxor.u32 2147483648, %v3293_v44  ;;  %vm3941_vm10 = vcmp.eq.s32.totalorder %v3939_v17, 0  ;;  %v3330_v0 = vmul.f32 %v7124_v51, %v3171_v50  ;;  %v3952_v5 = vmul.f32 %v7130_v7, %v3794_v15 }
 0x364   :  { %v3295_v12 = vsel %vm3174_vm13, %v3294_v24, %v3293_v44  ;;  %vm3944_vm13 = vcmp.eq.s32.totalorder %v3939_v17, 2  ;;  %v3956_v26 = vadd.f32 %v3952_v5, %v3330_v0 }
 0x365   :  { %v3298_v4 = vsel %vm3173_vm14, %v6894_v10, %v3295_v12  ;;  %v7174_v12 = vld [vmem:[%s7629_s9] ss:$0 sm:$0xff]  ;;  %s7445_s9 = sld [smem:[#allocation3 + $0x180]] }
 0x366   :  { %v3300_v41 = vmul.f32 %v3298_v4, %v3298_v4 }
 0x368   :  { %v3308_v25 = vmul.f32 -0.00019511016, %v3300_v41  ;;  %v3301_v36 = vmul.f32 -0.001358992, %v3300_v41 }
 0x36a   :  { %v3309_v2 = vadd.f32 0.008332121, %v3308_v25  ;;  %v3302_v47 = vadd.f32 0.041655596, %v3301_v36 }
 0x36c   :  { %v3310_v3 = vmul.f32 %v3309_v2, %v3300_v41  ;;  %v3303_v53 = vmul.f32 %v3302_v47, %v3300_v41 }
 0x36e   :  { %v3311_v60 = vadd.f32 -0.16666654, %v3310_v3  ;;  %v3304_v37 = vadd.f32 -0.4999988, %v3303_v53 }
 0x370   :  { %v3312_v14 = vmul.f32 %v3311_v60, %v3300_v41  ;;  %v3305_v21 = vmul.f32 %v3304_v37, %v3300_v41 }
 0x372   :  { %v3313_v13 = vadd.f32 1.0, %v3312_v14  ;;  %v3306_v48 = vadd.f32 1.0, %v3305_v21 }
 0x374   :  { %v3314_v9 = vmul.f32 %v3313_v13, %v3298_v4  ;;  %v3323_v23 = vxor.u32 2147483648, %v3306_v48 }
 0x376   :  { %v3320_v56 = vxor.u32 2147483648, %v3314_v9  ;;  %v3324_v43 = vsel %vm3322_vm3, %v3323_v23, %v3314_v9  ;;  %v3946_v31 = vsel %vm3944_vm13, %v3323_v23, %v3314_v9 }
 0x378   :  { %v3321_v18 = vsel %vm3319_vm15, %v3306_v48, %v3320_v56  ;;  %v3943_v45 = vsel %vm3941_vm10, %v3306_v48, %v3320_v56 }
 0x379   :  { %v3325_v27 = vsel %vm3318_vm11, %v3321_v18, %v3324_v43  ;;  %v3947_v1 = vsel %vm3940_vm7, %v3943_v45, %v3946_v31 }
 0x37a   :  { %v3326_v44 = vsel %vm3315_vm4, nan, %v3325_v27  ;;  %v3948_v11 = vsel %vm3315_vm4, nan, %v3947_v1 }
 0x37b   :  { %v3331_v30 = vmul.f32 %v7124_v51, %v3326_v44  ;;  %v3953_v24 = vmul.f32 %v7130_v7, %v3948_v11 }
 0x37d   :  { %v3957_v20 = vadd.f32 %v3953_v24, %v3331_v30 }
 0x37f   :  { %v3959_v22 = vpack.c.bf16 %v3957_v20, %v3956_v26 }
 0x381   :  { %5529 = vmatmul.msk.bf16.gmra.mxu3 %vm1381_vm6, %v3959_v22 }
 0x3db   :  { %v3995_v32 = vpop.f32.mrf.mxu3 }
 0x3dc   :  { %v7177_v4 = vadd.f32 %v7174_v12, %v3995_v32 }
 0x3de   :  { %v4009_v10 = vand.u32 2139095040, %v7177_v4  ;;  %v4006_v7 = vand.u32 2147483647, %v7177_v4 }
 0x3e0   :  { %v4010_v41 = vshrl.u32 %v4009_v10, 23  ;;  %v4013_v62 = vand.u32 8388607, %v4006_v7 }
 0x3e2   :  { %v5531_v51 = vadd.s32 4294967169, %v4010_v41  ;;  %v4014_v36 = vor.u32 8388608, %v4013_v62 }
 0x3e4   :  { %v4016_v16 = vadd.s32 1, %v5531_v51  ;;  %v7196_v59 = vshll.u32 %v4014_v36, 8 }
 0x3e6   :  { %vm4017_vm14 = vcmp.gt.s32.totalorder %v4016_v16, 0  ;;  %v4055_v23 = vand.u32 65535, %v7196_v59  ;;  %v4056_v50 = vshrl.u32 %v7196_v59, 16 }
 0x3e7   :  { %v4018_v58 = vsel %vm4017_vm14, %v4016_v16, 0 }
 0x3e8   :  { %v4020_v28 = vand.u32 31, %v4018_v58  ;;  %v7183_v2 = vshrl.u32 %v4018_v58, 5 }
 0x3ea   :  { %v4021_v25 = vsub.s32 32, %v4020_v28  ;;  %v4023_v8 = vshll.u32 %v5612_v40, %v4020_v28  ;;  %v4026_v47 = vshll.u32 %v5613_v42, %v4020_v28  ;;  %v4029_v33 = vshll.u32 %v5614_v46, %v4020_v28 }
 0x3eb   :  { %v4032_v34 = vshll.u32 %v5615_v49, %v4020_v28  ;;  %v4035_v60 = vshll.u32 %v5616_v52, %v4020_v28  ;;  %vm4038_vm6 = vcmp.lt.s32.totalorder %v7183_v2, 1  ;;  %vm4041_vm1 = vcmp.lt.s32.totalorder %v7183_v2, 4 }
 0x3ec   :  { %v4024_v63 = vshrl.u32 %v5613_v42, %v4021_v25  ;;  %v4027_v39 = vshrl.u32 %v5614_v46, %v4021_v25  ;;  %v4030_v3 = vshrl.u32 %v5615_v49, %v4021_v25  ;;  %v4033_v53 = vshrl.u32 %v5616_v52, %v4021_v25 }
 0x3ed   :  { %v4036_v38 = vshrl.u32 %v5617_v55, %v4021_v25  ;;  %vm4040_vm2 = vcmp.lt.s32.totalorder %v7183_v2, 3  ;;  %vm4039_vm12 = vcmp.lt.s32.totalorder %v7183_v2, 2  ;;  %v4022_v28 = vshrl.u32 %v5612_v40, %v4021_v25 }
 0x3ee   :  { %v4025_v37 = vor.u32 %v4024_v63, %v4023_v8  ;;  %v4028_v19 = vor.u32 %v4027_v39, %v4026_v47  ;;  %v4031_v14 = vor.u32 %v4030_v3, %v4029_v33  ;;  %v4034_v6 = vor.u32 %v4033_v53, %v4032_v34 }
 0x3ef   :  { %v4037_v21 = vor.u32 %v4036_v38, %v4035_v60 }
 0x3f0   :  { %v4046_v13 = vsel %vm4038_vm6, %v4025_v37, %v4028_v19  ;;  %v4050_v57 = vsel %vm4038_vm6, %v4028_v19, %v4031_v14  ;;  %v4047_v48 = vsel %vm4041_vm1, %v4034_v6, 920167782  ;;  %v4043_v16 = vsel %vm4041_vm1, %v4031_v14, 2102212464 }
 0x3f1   :  { %v4051_v54 = vsel %vm4041_vm1, %v4037_v21, 1326507024  ;;  %v4048_v35 = vsel %vm4040_vm2, %v4031_v14, %v4047_v48  ;;  %v4042_v33 = vsel %vm4038_vm6, %v4022_v28, %v4025_v37  ;;  %v4044_v3 = vsel %vm4040_vm2, %v4028_v19, %v4043_v16 }
 0x3f2   :  { %v4052_v29 = vsel %vm4040_vm2, %v4034_v6, %v4051_v54  ;;  %v4049_v17 = vsel %vm4039_vm12, %v4046_v13, %v4048_v35  ;;  %v4045_v25 = vsel %vm4039_vm12, %v4042_v33, %v4044_v3  ;;  %v3997_v54 = vpop.f32.mrf.mxu3 }
 0x3f3   :  { %v4053_v9 = vsel %vm4039_vm12, %v4050_v57, %v4052_v29  ;;  %v4079_v18 = vand.u32 65535, %v4049_v17  ;;  %v4080_v43 = vshrl.u32 %v4049_v17, 16  ;;  %v4099_v57 = vmul.u32 %v7196_v59, %v4045_v25 }
 0x3f4   :  { %v4057_v56 = vand.u32 65535, %v4053_v9  ;;  %v4058_v15 = vshrl.u32 %v4053_v9, 16  ;;  %v7234_v35 = vadd.f32 %v7174_v12, %v3997_v54 }
 0x3f5   :  { %v4082_v27 = vmul.u32 %v4080_v43, %v4055_v23  ;;  %v4083_v0 = vmul.u32 %v4079_v18, %v4056_v50  ;;  %v4081_v11 = vmul.u32 %v4079_v18, %v4055_v23  ;;  %v4084_v20 = vmul.u32 %v4080_v43, %v4056_v50 }
 0x3f6   :  { %v4060_v45 = vmul.u32 %v4058_v15, %v4055_v23  ;;  %v4061_v31 = vmul.u32 %v4057_v56, %v4056_v50  ;;  %v4059_v1 = vmul.u32 %v4057_v56, %v4055_v23  ;;  %v4062_v44 = vmul.u32 %v4058_v15, %v4056_v50 }
 0x3f7   :  { %v4085_v30 = vshll.u32 %v4082_v27, 16  ;;  %v4087_v32 = vshll.u32 %v4083_v0, 16  ;;  %v4086_v63 = vshrl.u32 %v4082_v27, 16  ;;  %v4088_v60 = vshrl.u32 %v4083_v0, 16 }
 0x3f8   :  { %v4063_v5 = vshll.u32 %v4060_v45, 16  ;;  %v4065_v24 = vshll.u32 %v4061_v31, 16  ;;  %v4064_v36 = vshrl.u32 %v4060_v45, 16  ;;  %v4066_v34 = vshrl.u32 %v4061_v31, 16 }
 0x3f9   :  { %vm4089_vm0 = vc.u32 %v4081_v11, %v4085_v30  ;;  %v4091_v10 = vadd.s32 %v4085_v30, %v4081_v11  ;;  %v4161_v29 = vand.u32 2147483647, %v7234_v35  ;;  %v4164_v17 = vand.u32 2139095040, %v7234_v35 }
 0x3fa   :  { %vm4067_vm5 = vc.u32 %v4059_v1, %v4063_v5  ;;  %v4069_v26 = vadd.s32 %v4063_v5, %v4059_v1  ;;  %v4090_v51 = vsel %vm4089_vm0, 1, %v5618_v61  ;;  %vm4008_vm0 = vcmp.lt.s32.totalorder %v7177_v4, 0 }
 0x3fb   :  { %v4068_v22 = vsel %vm4067_vm5, 1, %v5618_v61  ;;  %v4092_v58 = vadd.s32 %v4090_v51, %v4084_v20  ;;  %vm4093_vm8 = vc.u32 %v4091_v10, %v4087_v32  ;;  %v4095_v6 = vadd.s32 %v4091_v10, %v4087_v32 }
 0x3fc   :  { %v4070_v41 = vadd.s32 %v4068_v22, %v4062_v44  ;;  %vm4071_vm9 = vc.u32 %v4069_v26, %v4065_v24  ;;  %v4094_v47 = vsel %vm4093_vm8, 1, %v5618_v61  ;;  %v4165_v2 = vshrl.u32 %v4164_v17, 23 }
 0x3fd   :  { %v4072_v62 = vsel %vm4071_vm9, 1, %v5618_v61  ;;  %v4096_v39 = vadd.s32 %v4094_v47, %v4092_v58  ;;  %v4168_v23 = vand.u32 8388607, %v4161_v29  ;;  %vm7304_vm9 = vcmp.le.f32.partialorder %v4006_v7, 0.7853982 }
 0x3fe   :  { %v4074_v8 = vadd.s32 %v4072_v62, %v4070_v41  ;;  %v5534_v59 = vadd.s32 4294967169, %v4165_v2 }
 0x3ff   :  { %v4097_v38 = vadd.s32 %v4096_v39, %v4086_v63  ;;  %v4169_v56 = vor.u32 8388608, %v4168_v23 }
 0x400   :  { %v4075_v53 = vadd.s32 %v4074_v8, %v4064_v36  ;;  %v4171_v18 = vadd.s32 1, %v5534_v59 }
 0x401   :  { %v4098_v21 = vadd.s32 %v4097_v38, %v4088_v60  ;;  %v7243_v45 = vshll.u32 %v4169_v56, 8 }
 0x402   :  { %v4076_v14 = vadd.s32 %v4075_v53, %v4066_v34  ;;  %vm4172_vm15 = vcmp.gt.s32.totalorder %v4171_v18, 0 }
 0x403   :  { %v4102_v13 = vadd.s32 1, %v4098_v21  ;;  %v4173_v31 = vsel %vm4172_vm15, %v4171_v18, 0  ;;  %v7248_v24 = vand.u32 65535, %v7243_v45 }
 0x404   :  { %vm4101_vm4 = vc.u32 %v4076_v14, %v4095_v6  ;;  %v4000_v27 = vpop.f32.mrf.mxu3  ;;  %v4175_v1 = vand.u32 31, %v4173_v31  ;;  %v4100_v5 = vadd.s32 %v4095_v6, %v4076_v14  ;;  %v7245_v11 = vshrl.u32 %v4173_v31, 5 }
 0x405   :  { %v4103_v48 = vsel %vm4101_vm4, %v4102_v13, %v4098_v21  ;;  %v7251_v26 = vadd.f32 %v7174_v12, %v4000_v27 }
 0x406   :  { %v4104_v37 = vadd.s32 %v4103_v48, %v4099_v57  ;;  %v4176_v30 = vsub.s32 32, %v4175_v1  ;;  %v4178_v22 = vshll.u32 %v5612_v40, %v4175_v1  ;;  %v4181_v32 = vshll.u32 %v5613_v42, %v4175_v1 }
 0x407   :  { %v4184_v10 = vshll.u32 %v5614_v46, %v4175_v1  ;;  %v4187_v62 = vshll.u32 %v5615_v49, %v4175_v1  ;;  %v4190_v28 = vshll.u32 %v5616_v52, %v4175_v1  ;;  %v4316_v53 = vand.u32 2147483647, %v7251_v26 }
 0x408   :  { %v4105_v19 = vadd.s32 536870912, %v4104_v37  ;;  %v4179_v41 = vshrl.u32 %v5613_v42, %v4176_v30  ;;  %v4182_v51 = vshrl.u32 %v5614_v46, %v4176_v30  ;;  %v4185_v16 = vshrl.u32 %v5615_v49, %v4176_v30 }
 0x409   :  { %v4188_v58 = vshrl.u32 %v5616_v52, %v4176_v30  ;;  %v4191_v36 = vshrl.u32 %v5617_v55, %v4176_v30  ;;  %v4177_v60 = vshrl.u32 %v5612_v40, %v4176_v30  ;;  %vm4193_vm7 = vcmp.lt.s32.totalorder %v7245_v11, 1 }
 0x40a   :  { %v7238_v9 = vshrl.u32 %v4105_v19, 30  ;;  %v4180_v47 = vor.u32 %v4179_v41, %v4178_v22  ;;  %v4183_v63 = vor.u32 %v4182_v51, %v4181_v32  ;;  %v4186_v39 = vor.u32 %v4185_v16, %v4184_v10 }
 0x40b   :  { %v4189_v34 = vor.u32 %v4188_v58, %v4187_v62  ;;  %v4192_v38 = vor.u32 %v4191_v36, %v4190_v28  ;;  %v4319_v14 = vand.u32 2139095040, %v7251_v26  ;;  %vm4196_vm10 = vcmp.lt.s32.totalorder %v7245_v11, 4 }
 0x40c   :  { %v4107_v50 = vshll.u32 %v7238_v9, 30  ;;  %v4201_v21 = vsel %vm4193_vm7, %v4180_v47, %v4183_v63  ;;  %vm4195_vm13 = vcmp.lt.s32.totalorder %v7245_v11, 3  ;;  %v4205_v57 = vsel %vm4193_vm7, %v4183_v63, %v4186_v39 }
 0x40d   :  { %v4202_v13 = vsel %vm4196_vm10, %v4189_v34, 920167782  ;;  %v4206_v48 = vsel %vm4196_vm10, %v4192_v38, 1326507024  ;;  %vm4194_vm14 = vcmp.lt.s32.totalorder %v7245_v11, 2 }
 0x40e   :  { %v4108_v15 = vsub.s32 %v4104_v37, %v4107_v50  ;;  %v4203_v19 = vsel %vm4195_vm13, %v4186_v39, %v4202_v13  ;;  %v4198_v17 = vsel %vm4196_vm10, %v4186_v39, 2102212464  ;;  %v4207_v23 = vsel %vm4195_vm13, %v4189_v34, %v4206_v48 }
 0x40f   :  { %v4204_v2 = vsel %vm4194_vm14, %v4201_v21, %v4203_v19  ;;  %v4320_v50 = vshrl.u32 %v4319_v14, 23  ;;  %v4208_v18 = vsel %vm4194_vm14, %v4205_v57, %v4207_v23  ;;  %v4323_v51 = vand.u32 8388607, %v4316_v53 }
 0x410   :  { %vm4109_vm11 = vcmp.lt.s32.totalorder %v4108_v15, 0  ;;  %v4110_v43 = vsub.s32 0, %v4108_v15  ;;  %v4212_v31 = vand.u32 65535, %v4208_v18  ;;  %v4213_v27 = vshrl.u32 %v4208_v18, 16 }
 0x411   :  { %v5537_v22 = vadd.s32 4294967169, %v4320_v50 }
 0x412   :  { %v4111_v0 = vsel %vm4109_vm11, %v4110_v43, %v4108_v15  ;;  %v4211_v43 = vshrl.u32 %v7243_v45, 16  ;;  %v4215_v30 = vmul.u32 %v4213_v27, %v7248_v24  ;;  %v4214_v62 = vmul.u32 %v4212_v31, %v7248_v24 }
 0x413   :  { %v4112_v44 = vclz %v4111_v0  ;;  %v4235_v0 = vshrl.u32 %v4204_v2, 16 }
 0x414   :  { %v4218_v58 = vshll.u32 %v4215_v30, 16 }
 0x415   :  { %v5532_v20 = vadd.s32 4294967294, %v4112_v44  ;;  %v4199_v44 = vsel %vm4195_vm13, %v4183_v63, %v4198_v17  ;;  %v4237_v10 = vmul.u32 %v4235_v0, %v7248_v24 }
 0x416   :  { %vm4222_vm6 = vc.u32 %v4214_v62, %v4218_v58 }
 0x417   :  { %vm5533_vm3 = vcmp.lt.s32.totalorder %v5532_v20, 0  ;;  %v4240_v63 = vshll.u32 %v4237_v10, 16  ;;  %v4223_v34 = vsel %vm4222_vm6, 1, %v5618_v61 }
 0x418   :  { %v4115_v8 = vsel %vm5533_vm3, 0, %v5532_v20  ;;  %v4216_v20 = vmul.u32 %v4212_v31, %v4211_v43 }
 0x419   :  { %v4116_v33 = vsub.s32 32, %v4115_v8  ;;  %v4120_v3 = vsub.s32 4294967266, %v4115_v8  ;;  %v4117_v54 = vshll.u32 %v4108_v15, %v4115_v8  ;;  %v4234_v15 = vand.u32 65535, %v4204_v2 }
 0x41a   :  { %v4217_v8 = vmul.u32 %v4213_v27, %v4211_v43  ;;  %v4220_v39 = vshll.u32 %v4216_v20, 16  ;;  %v4221_v2 = vshrl.u32 %v4216_v20, 16 }
 0x41b   :  { %v4118_v6 = vshrl.u32 %v4100_v5, %v4116_v33  ;;  %v4121_v25 = vadd.s32 127, %v4120_v3  ;;  %v4197_v5 = vsel %vm4193_vm7, %v4177_v60, %v4180_v47  ;;  %v4238_v41 = vmul.u32 %v4234_v15, %v4211_v43 }
 0x41c   :  { %v7293_v16 = vsel %vm4194_vm14, %v4197_v5, %v4199_v44  ;;  %v4236_v28 = vmul.u32 %v4234_v15, %v7248_v24  ;;  %v4239_v47 = vmul.u32 %v4235_v0, %v4211_v43  ;;  %v4224_v33 = vadd.s32 %v4218_v58, %v4214_v62 }
 0x41d   :  { %v4122_v37 = vshll.u32 %v4121_v25, 23  ;;  %v4119_v59 = vor.u32 %v4118_v6, %v4117_v54  ;;  %v4326_v3 = vadd.s32 1, %v5537_v22  ;;  %v4242_v60 = vshll.u32 %v4238_v41, 16 }
 0x41e   :  { %vm4244_vm1 = vc.u32 %v4236_v28, %v4240_v63  ;;  %v4246_v11 = vadd.s32 %v4240_v63, %v4236_v28  ;;  %v4225_v38 = vadd.s32 %v4223_v34, %v4217_v8  ;;  %vm4226_vm2 = vc.u32 %v4224_v33, %v4220_v39  ;;  %v4002_v33 = vpop.f32.mrf.mxu3 }
 0x41f   :  { %v4123_v56 = vor.u32 4788187, %v4122_v37  ;;  %v4126_v32 = vcvt.s32.f32 %v4119_v59  ;;  %v4245_v14 = vsel %vm4244_vm1, 1, %v5618_v61  ;;  %v4324_v6 = vor.u32 8388608, %v4323_v51 }
 0x420   :  { %v4219_v25 = vshrl.u32 %v4215_v30, 16  ;;  %v4227_v24 = vsel %vm4226_vm2, 1, %v5618_v61  ;;  %v4247_v21 = vadd.s32 %v4245_v14, %v4239_v47  ;;  %vm4248_vm12 = vc.u32 %v4246_v11, %v4242_v60 }
 0x421   :  { %v4124_v1 = vand.u32 2147483647, %v4123_v56  ;;  %v4229_v57 = vadd.s32 %v4227_v24, %v4225_v38  ;;  %v4249_v48 = vsel %vm4248_vm12, 1, %v5618_v61  ;;  %vm4327_vm5 = vcmp.gt.s32.totalorder %v4326_v3, 0 }
 0x422   :  { %v4241_v54 = vshrl.u32 %v4237_v10, 16  ;;  %v4251_v37 = vadd.s32 %v4249_v48, %v4247_v21  ;;  %v4328_v19 = vsel %vm4327_vm5, %v4326_v3, 0  ;;  %v4243_v59 = vshrl.u32 %v4238_v41, 16 }
 0x423   :  { %v4127_v36 = vmul.f32 %v4126_v32, %v4124_v1  ;;  %v4230_v23 = vadd.s32 %v4229_v57, %v4219_v25  ;;  %v4330_v50 = vand.u32 31, %v4328_v19  ;;  %v4254_v18 = vmul.u32 %v7243_v45, %v7293_v16 }
 0x424   :  { %v4252_v56 = vadd.s32 %v4251_v37, %v4241_v54  ;;  %v7310_v15 = vshll.u32 %v4324_v6, 8  ;;  %v4250_v27 = vadd.s32 %v4246_v11, %v4242_v60  ;;  %v7314_v1 = vshrl.u32 %v4328_v19, 5 }
 0x425   :  { %v4128_v13 = vxor.u32 2147483648, %v4127_v36  ;;  %v4231_v31 = vadd.s32 %v4230_v23, %v4221_v2  ;;  %v4331_v0 = vsub.s32 32, %v4330_v50  ;;  %v4333_v5 = vshll.u32 %v5612_v40, %v4330_v50 }
 0x426   :  { %v4253_v7 = vadd.s32 %v4252_v56, %v4243_v59  ;;  %v4336_v44 = vshll.u32 %v5613_v42, %v4330_v50  ;;  %v4339_v45 = vshll.u32 %v5614_v46, %v4330_v50  ;;  %v4342_v20 = vshll.u32 %v5615_v49, %v4330_v50 }
 0x427   :  { %v4129_v43 = vsel %vm4008_vm0, %v4128_v13, %v4127_v36  ;;  %vm4256_vm8 = vc.u32 %v4231_v31, %v4250_v27  ;;  %v4334_v30 = vshrl.u32 %v5613_v42, %v4331_v0  ;;  %v4337_v32 = vshrl.u32 %v5614_v46, %v4331_v0 }
 0x428   :  { %v4257_v22 = vadd.s32 1, %v4253_v7  ;;  %v4340_v10 = vshrl.u32 %v5615_v49, %v4331_v0  ;;  %v4343_v41 = vshrl.u32 %v5616_v52, %v4331_v0  ;;  %v7327_v51 = vsel %vm7304_vm9, %v7177_v4, %v4129_v43 }
 0x429   :  { %v4335_v16 = vor.u32 %v4334_v30, %v4333_v5  ;;  %v4345_v62 = vshll.u32 %v5616_v52, %v4330_v50  ;;  %v4346_v58 = vshrl.u32 %v5617_v55, %v4331_v0  ;;  %v4338_v36 = vor.u32 %v4337_v32, %v4336_v44 }
 0x42a   :  { %v4258_v28 = vsel %vm4256_vm8, %v4257_v22, %v4253_v7  ;;  %v4341_v8 = vor.u32 %v4340_v10, %v4339_v45  ;;  %v4344_v47 = vor.u32 %v4343_v41, %v4342_v20  ;;  %vm4348_vm4 = vcmp.lt.s32.totalorder %v7314_v1, 1 }
 0x42b   :  { %v4259_v63 = vadd.s32 %v4258_v28, %v4254_v18  ;;  %v4347_v39 = vor.u32 %v4346_v58, %v4345_v62  ;;  %vm4351_vm11 = vcmp.lt.s32.totalorder %v7314_v1, 4  ;;  %v7335_v3 = vmul.f32 %v7327_v51, %v7327_v51 }
 0x42c   :  { %vm4350_vm15 = vcmp.lt.s32.totalorder %v7314_v1, 3  ;;  %v4356_v34 = vsel %vm4348_vm4, %v4335_v16, %v4338_v36  ;;  %v4357_v60 = vsel %vm4351_vm11, %v4344_v47, 920167782  ;;  %vm4349_vm3 = vcmp.lt.s32.totalorder %v7314_v1, 2 }
 0x42d   :  { %v4260_v11 = vadd.s32 536870912, %v4259_v63  ;;  %v4358_v38 = vsel %vm4350_vm15, %v4341_v8, %v4357_v60  ;;  %v4360_v14 = vsel %vm4348_vm4, %v4338_v36, %v4341_v8  ;;  %v4353_v6 = vsel %vm4351_vm11, %v4341_v8, 2102212464 }
 0x42e   :  { %v4359_v25 = vsel %vm4349_vm3, %v4356_v34, %v4358_v38  ;;  %v4361_v24 = vsel %vm4351_vm11, %v4347_v39, 1326507024  ;;  %v7348_v21 = vadd.f32 %v7174_v12, %v4002_v33  ;;  %v4332_v37 = vshrl.u32 %v5612_v40, %v4331_v0 }
 0x42f   :  { %v7350_v13 = vshrl.u32 %v4260_v11, 30  ;;  %v4362_v57 = vsel %vm4350_vm15, %v4344_v47, %v4361_v24  ;;  %v4389_v48 = vand.u32 65535, %v4359_v25  ;;  %v4390_v54 = vshrl.u32 %v4359_v25, 16 }
 0x430   :  { %v4363_v19 = vsel %vm4349_vm3, %v4360_v14, %v4362_v57  ;;  %v4365_v2 = vand.u32 65535, %v7310_v15  ;;  %v4366_v23 = vshrl.u32 %v7310_v15, 16  ;;  %v4255_v50 = vadd.s32 %v4250_v27, %v4231_v31 }
 0x431   :  { %v4262_v12 = vshll.u32 %v7350_v13, 30  ;;  %v4367_v59 = vand.u32 65535, %v4363_v19  ;;  %v4368_v56 = vshrl.u32 %v4363_v19, 16  ;;  %v4352_v18 = vsel %vm4348_vm4, %v4332_v37, %v4335_v16 }
 0x432   :  { %v4354_v43 = vsel %vm4350_vm15, %v4338_v36, %v4353_v6  ;;  %v4392_v7 = vmul.u32 %v4390_v54, %v4365_v2  ;;  %v4393_v0 = vmul.u32 %v4389_v48, %v4366_v23  ;;  %v4471_v45 = vand.u32 2147483647, %v7348_v21 }
 0x433   :  { %v4263_v5 = vsub.s32 %v4259_v63, %v4262_v12  ;;  %v4370_v44 = vmul.u32 %v4368_v56, %v4365_v2  ;;  %v4371_v30 = vmul.u32 %v4367_v59, %v4366_v23  ;;  %v4391_v20 = vmul.u32 %v4389_v48, %v4365_v2 }
 0x434   :  { %v4394_v22 = vmul.u32 %v4390_v54, %v4366_v23  ;;  %v4395_v31 = vshll.u32 %v4392_v7, 16  ;;  %v4474_v27 = vand.u32 2139095040, %v7348_v21  ;;  %v4369_v10 = vmul.u32 %v4367_v59, %v4365_v2 }
 0x435   :  { %vm4264_vm7 = vcmp.lt.s32.totalorder %v4263_v5, 0  ;;  %v4265_v32 = vsub.s32 0, %v4263_v5  ;;  %v4373_v41 = vshll.u32 %v4370_v44, 16  ;;  %v4372_v16 = vmul.u32 %v4368_v56, %v4366_v23 }
 0x436   :  { %v4375_v62 = vshll.u32 %v4371_v30, 16  ;;  %v4397_v58 = vshll.u32 %v4393_v0, 16  ;;  %vm4399_vm10 = vc.u32 %v4391_v20, %v4395_v31  ;;  %v4401_v39 = vadd.s32 %v4395_v31, %v4391_v20 }
 0x437   :  { %v4266_v28 = vsel %vm4264_vm7, %v4265_v32, %v4263_v5  ;;  %vm4377_vm13 = vc.u32 %v4369_v10, %v4373_v41  ;;  %v4379_v36 = vadd.s32 %v4373_v41, %v4369_v10  ;;  %v4400_v8 = vsel %vm4399_vm10, 1, %v5618_v61 }
 0x438   :  { %v4267_v47 = vclz %v4266_v28  ;;  %v4378_v63 = vsel %vm4377_vm13, 1, %v5618_v61  ;;  %v4402_v33 = vadd.s32 %v4400_v8, %v4394_v22  ;;  %v4355_v34 = vsel %vm4349_vm3, %v4352_v18, %v4354_v43 }
 0x439   :  { %v4380_v60 = vadd.s32 %v4378_v63, %v4372_v16  ;;  %vm4381_vm14 = vc.u32 %v4379_v36, %v4375_v62  ;;  %v4475_v11 = vshrl.u32 %v4474_v27, 23  ;;  %vm4403_vm6 = vc.u32 %v4401_v39, %v4397_v58 }
 0x43a   :  { %v5535_v38 = vadd.s32 4294967294, %v4267_v47  ;;  %v4382_v14 = vsel %vm4381_vm14, 1, %v5618_v61  ;;  %v4478_v6 = vand.u32 8388607, %v4471_v45  ;;  %v4374_v25 = vshrl.u32 %v4370_v44, 16 }
 0x43b   :  { %v4384_v24 = vadd.s32 %v4382_v14, %v4380_v60  ;;  %v4404_v57 = vsel %vm4403_vm6, 1, %v5618_v61  ;;  %v5540_v48 = vadd.s32 4294967169, %v4475_v11  ;;  %v4376_v54 = vshrl.u32 %v4371_v30, 16 }
 0x43c   :  { %vm5536_vm1 = vcmp.lt.s32.totalorder %v5535_v38, 0  ;;  %v4396_v37 = vshrl.u32 %v4392_v7, 16  ;;  %v4406_v1 = vadd.s32 %v4404_v57, %v4402_v33  ;;  %v4398_v23 = vshrl.u32 %v4393_v0, 16 }
 0x43d   :  { %v4270_v19 = vsel %vm5536_vm1, 0, %v5535_v38  ;;  %v4385_v2 = vadd.s32 %v4384_v24, %v4374_v25  ;;  %v4481_v12 = vadd.s32 1, %v5540_v48  ;;  %v4479_v43 = vor.u32 8388608, %v4478_v6 }
 0x43e   :  { %v4271_v59 = vsub.s32 32, %v4270_v19  ;;  %v4275_v56 = vsub.s32 4294967266, %v4270_v19  ;;  %v4407_v18 = vadd.s32 %v4406_v1, %v4396_v37  ;;  %v4272_v20 = vshll.u32 %v4263_v5, %v4270_v19 }
 0x43f   :  { %v7374_v22 = vadd.s32 %v4385_v2, %v4376_v54  ;;  %v7376_v44 = vadd.s32 %v4401_v39, %v4397_v58  ;;  %vm4482_vm2 = vcmp.gt.s32.totalorder %v4481_v12, 0  ;;  %v4409_v7 = vmul.u32 %v7310_v15, %v4355_v34 }
 0x440   :  { %v4273_v31 = vshrl.u32 %v4255_v50, %v4271_v59  ;;  %v4276_v27 = vadd.s32 127, %v4275_v56  ;;  %v4408_v32 = vadd.s32 %v4407_v18, %v4398_v23  ;;  %v4483_v30 = vsel %vm4482_vm2, %v4481_v12, 0 }
 0x441   :  { %vm4411_vm12 = vc.u32 %v7374_v22, %v7376_v44  ;;  %v4485_v0 = vand.u32 31, %v4483_v30  ;;  %v4130_v10 = vsub.s32 4, %v7238_v9  ;;  %v7382_v62 = vshll.u32 %v4479_v43, 8 }
 0x442   :  { %v4274_v41 = vor.u32 %v4273_v31, %v4272_v20  ;;  %v4277_v16 = vshll.u32 %v4276_v27, 23  ;;  %v4412_v5 = vadd.s32 1, %v4408_v32  ;;  %v4484_v58 = vshrl.u32 %v4483_v30, 5 }
 0x443   :  { %v4486_v28 = vsub.s32 32, %v4485_v0  ;;  %v4488_v50 = vshll.u32 %v5612_v40, %v4485_v0  ;;  %v4491_v36 = vshll.u32 %v5613_v42, %v4485_v0  ;;  %vm4163_vm5 = vcmp.lt.s32.totalorder %v7234_v35, 0 }
 0x444   :  { %v4278_v15 = vor.u32 4788187, %v4277_v16  ;;  %v4281_v8 = vcvt.s32.f32 %v4274_v41  ;;  %v4413_v47 = vsel %vm4411_vm12, %v4412_v5, %v4408_v32  ;;  %v4494_v63 = vshll.u32 %v5614_v46, %v4485_v0 }
 0x445   :  { %v4414_v39 = vadd.s32 %v4413_v47, %v4409_v7  ;;  %v4489_v33 = vshrl.u32 %v5613_v42, %v4486_v28  ;;  %v4492_v34 = vshrl.u32 %v5614_v46, %v4486_v28  ;;  %v4497_v60 = vshll.u32 %v5615_v49, %v4485_v0 }
 0x446   :  { %v4279_v11 = vand.u32 2147483647, %v4278_v15  ;;  %v4495_v38 = vshrl.u32 %v5615_v49, %v4486_v28  ;;  %v4498_v14 = vshrl.u32 %v5616_v52, %v4486_v28  ;;  %v4500_v6 = vshll.u32 %v5616_v52, %v4485_v0 }
 0x447   :  { %v4415_v25 = vadd.s32 536870912, %v4414_v39  ;;  %v4490_v24 = vor.u32 %v4489_v33, %v4488_v50  ;;  %v4493_v57 = vor.u32 %v4492_v34, %v4491_v36  ;;  %v4501_v48 = vshrl.u32 %v5617_v55, %v4486_v28 }
 0x448   :  { %vm7397_vm8 = vcmp.le.f32.partialorder %v4161_v29, 0.7853982  ;;  %v4282_v46 = vmul.f32 %v4281_v8, %v4279_v11  ;;  %v4496_v54 = vor.u32 %v4495_v38, %v4494_v63  ;;  %v4499_v37 = vor.u32 %v4498_v14, %v4497_v60 }
 0x449   :  { %v4520_v49 = vand.u32 65535, %v7382_v62  ;;  %v7402_v1 = vshrl.u32 %v4415_v25, 30  ;;  %v4502_v19 = vor.u32 %v4501_v48, %v4500_v6  ;;  %vm4503_vm4 = vcmp.lt.s32.totalorder %v4484_v58, 1 }
 0x44a   :  { %v4521_v52 = vshrl.u32 %v7382_v62, 16  ;;  %v4283_v2 = vxor.u32 2147483648, %v4282_v46  ;;  %v4487_v55 = vshrl.u32 %v5612_v40, %v4486_v28  ;;  %vm4506_vm11 = vcmp.lt.s32.totalorder %v4484_v58, 4 }
 0x44b   :  { %v4511_v29 = vsel %vm4503_vm4, %v4490_v24, %v4493_v57  ;;  %v4417_v23 = vshll.u32 %v7402_v1, 30  ;;  %vm4505_vm15 = vcmp.lt.s32.totalorder %v4484_v58, 3  ;;  %v4508_v12 = vsel %vm4506_vm11, %v4496_v54, 2102212464 }
 0x44c   :  { %v4512_v59 = vsel %vm4506_vm11, %v4499_v37, 920167782  ;;  %vm4504_vm3 = vcmp.lt.s32.totalorder %v4484_v58, 2  ;;  %v4515_v18 = vsel %vm4503_vm4, %v4493_v57, %v4496_v54  ;;  %v4516_v43 = vsel %vm4506_vm11, %v4502_v19, 1326507024 }
 0x44d   :  { %v4513_v56 = vsel %vm4505_vm15, %v4496_v54, %v4512_v59  ;;  %v4284_v20 = vsel %vm4163_vm5, %v4283_v2, %v4282_v46  ;;  %v4418_v31 = vsub.s32 %v4414_v39, %v4417_v23  ;;  %v4507_v27 = vsel %vm4503_vm4, %v4487_v55, %v4490_v24 }
 0x44e   :  { %v4514_v40 = vsel %vm4504_vm3, %v4511_v29, %v4513_v56  ;;  %v4509_v32 = vsel %vm4505_vm15, %v4493_v57, %v4508_v12  ;;  %v4517_v30 = vsel %vm4505_vm15, %v4499_v37, %v4516_v43  ;;  %v4410_v41 = vadd.s32 %v7376_v44, %v7374_v22 }
 0x44f   :  { %v4544_v7 = vand.u32 65535, %v4514_v40  ;;  %v4545_v0 = vshrl.u32 %v4514_v40, 16  ;;  %vm4419_vm7 = vcmp.lt.s32.totalorder %v4418_v31, 0  ;;  %v4420_v16 = vsub.s32 0, %v4418_v31 }
 0x450   :  { %v4518_v5 = vsel %vm4504_vm3, %v4515_v18, %v4517_v30  ;;  %v4131_v15 = vsel %vm4008_vm0, %v4130_v10, %v7238_v9  ;;  %v7424_v8 = vsel %vm7397_vm8, %v7234_v35, %v4284_v20  ;;  %v7427_v22 = vsel %vm4504_vm3, %v4507_v27, %v4509_v32 }
 0x451   :  { %v4522_v28 = vand.u32 65535, %v4518_v5  ;;  %v4523_v50 = vshrl.u32 %v4518_v5, 16  ;;  %v4547_v36 = vmul.u32 %v4545_v0, %v4520_v49  ;;  %v4421_v47 = vsel %vm4419_vm7, %v4420_v16, %v4418_v31 }
 0x452   :  { %v4548_v44 = vmul.u32 %v4544_v7, %v4521_v52  ;;  %v4422_v63 = vclz %v4421_v47  ;;  %v4546_v34 = vmul.u32 %v4544_v7, %v4520_v49  ;;  %v4549_v11 = vmul.u32 %v4545_v0, %v4521_v52 }
 0x453   :  { %v4525_v39 = vmul.u32 %v4523_v50, %v4520_v49  ;;  %v4526_v33 = vmul.u32 %v4522_v28, %v4521_v52  ;;  %v4524_v60 = vmul.u32 %v4522_v28, %v4520_v49  ;;  %v4550_v38 = vshll.u32 %v4547_v36, 16 }
 0x454   :  { %v4133_v9 = vsel %vm7304_vm9, 0, %v4131_v15  ;;  %v5538_v10 = vadd.s32 4294967294, %v4422_v63  ;;  %v4527_v14 = vmul.u32 %v4523_v50, %v4521_v52  ;;  %v4551_v25 = vshrl.u32 %v4547_v36, 16 }
 0x455   :  { %v4528_v6 = vshll.u32 %v4525_v39, 16  ;;  %v4530_v24 = vshll.u32 %v4526_v33, 16  ;;  %v4552_v57 = vshll.u32 %v4548_v44, 16  ;;  %vm4554_vm0 = vc.u32 %v4546_v34, %v4550_v38 }
 0x456   :  { %v4556_v58 = vadd.s32 %v4550_v38, %v4546_v34  ;;  %vm5539_vm10 = vcmp.lt.s32.totalorder %v5538_v10, 0  ;;  %v4555_v46 = vsel %vm4554_vm0, 1, %v5618_v61  ;;  %v4529_v2 = vshrl.u32 %v4525_v39, 16 }
 0x457   :  { %vm4532_vm13 = vc.u32 %v4524_v60, %v4528_v6  ;;  %v4534_v48 = vadd.s32 %v4528_v6, %v4524_v60  ;;  %v4425_v54 = vsel %vm5539_vm10, 0, %v5538_v10  ;;  %v4557_v49 = vadd.s32 %v4555_v46, %v4549_v11 }
 0x458   :  { %v4533_v37 = vsel %vm4532_vm13, 1, %v5618_v61  ;;  %vm4558_vm14 = vc.u32 %v4556_v58, %v4552_v57  ;;  %v4426_v17 = vsub.s32 32, %v4425_v54  ;;  %v4430_v19 = vsub.s32 4294967266, %v4425_v54 }
 0x459   :  { %v4535_v52 = vadd.s32 %v4533_v37, %v4527_v14  ;;  %v4427_v55 = vshll.u32 %v4418_v31, %v4425_v54  ;;  %vm4536_vm9 = vc.u32 %v4534_v48, %v4530_v24  ;;  %v4559_v29 = vsel %vm4558_vm14, 1, %v5618_v61 }
 0x45a   :  { %v4135_v23 = vmul.f32 -0.001358992, %v7335_v3  ;;  %v4428_v12 = vshrl.u32 %v4410_v41, %v4426_v17  ;;  %v4431_v59 = vadd.s32 127, %v4430_v19  ;;  %v4537_v56 = vsel %vm4536_vm9, 1, %v5618_v61 }
 0x45b   :  { %v4561_v18 = vadd.s32 %v4559_v29, %v4557_v49  ;;  %v4539_v43 = vadd.s32 %v4537_v56, %v4535_v52  ;;  %v4142_v27 = vmul.f32 -0.00019511016, %v7335_v3  ;;  %v4150_v40 = vadd.s32 3, %v4133_v9 }
 0x45c   :  { %v4136_v20 = vadd.f32 0.041655596, %v4135_v23  ;;  %v4429_v32 = vor.u32 %v4428_v12, %v4427_v55  ;;  %v4432_v30 = vshll.u32 %v4431_v59, 23  ;;  %v4553_v7 = vshrl.u32 %v4548_v44, 16 }
 0x45d   :  { %v4562_v0 = vadd.s32 %v4561_v18, %v4551_v25  ;;  %vm4318_vm6 = vcmp.lt.s32.totalorder %v7251_v26, 0  ;;  %v4531_v31 = vshrl.u32 %v4526_v33, 16  ;;  %v4540_v16 = vadd.s32 %v4539_v43, %v4529_v2 }
 0x45e   :  { %v4137_v5 = vmul.f32 %v4136_v20, %v7335_v3  ;;  %v4143_v41 = vadd.f32 0.008332121, %v4142_v27  ;;  %vm7441_vm1 = vcmp.le.f32.partialorder %v4316_v53, 0.7853982  ;;  %v4433_v28 = vor.u32 4788187, %v4432_v30 }
 0x45f   :  { %v4560_v50 = vadd.s32 %v4556_v58, %v4552_v57  ;;  %v4563_v36 = vadd.s32 %v4562_v0, %v4553_v7  ;;  %v4151_v15 = vand.u32 3, %v4150_v40  ;;  %v4541_v47 = vadd.s32 %v4540_v16, %v4531_v31 }
 0x460   :  { %v4138_v44 = vadd.f32 -0.4999988, %v4137_v5  ;;  %v4144_v63 = vmul.f32 %v4143_v41, %v7335_v3  ;;  %v4776_v39 = vand.u32 3, %v4133_v9  ;;  %v7450_v33 = vmul.f32 %v7424_v8, %v7424_v8 }
 0x461   :  { %v4434_v34 = vand.u32 2147483647, %v4433_v28  ;;  %v4436_v53 = vcvt.s32.f32 %v4429_v32  ;;  %v4567_v60 = vadd.s32 1, %v4563_v36  ;;  %v4564_v11 = vmul.u32 %v7382_v62, %v7427_v22 }
 0x462   :  { %vm4566_vm2 = vc.u32 %v4541_v47, %v4560_v50  ;;  %v4139_v38 = vmul.f32 %v4138_v44, %v7335_v3  ;;  %v4145_v10 = vadd.f32 -0.16666654, %v4144_v63  ;;  %v7457_v6 = vadd.s32 %v4560_v50, %v4541_v47 }
 0x463   :  { %v4437_v14 = vmul.f32 %v4436_v53, %v4434_v34  ;;  %v4568_v9 = vsel %vm4566_vm2, %v4567_v60, %v4563_v36  ;;  %vm4153_vm12 = vcmp.eq.s32.totalorder %v4151_v15, 0  ;;  %vm4156_vm4 = vcmp.eq.s32.totalorder %v4151_v15, 2 }
 0x464   :  { %v4569_v25 = vadd.s32 %v4568_v9, %v4564_v11  ;;  %v4140_v24 = vadd.f32 1.0, %v4139_v38  ;;  %v4146_v57 = vmul.f32 %v4145_v10, %v7335_v3  ;;  %vm4152_vm11 = vcmp.lt.s32.totalorder %v4151_v15, 2 }
 0x465   :  { %vm4777_vm15 = vcmp.lt.s32.totalorder %v4776_v39, 2  ;;  %v4285_v58 = vsub.s32 4, %v7350_v13  ;;  %v4438_v48 = vxor.u32 2147483648, %v4437_v14  ;;  %vm4149_vm3 = vweird.f32 %v7177_v4 }
 0x466   :  { %vm4778_vm7 = vcmp.eq.s32.totalorder %v4776_v39, 0  ;;  %v4290_v62 = vmul.f32 -0.001358992, %v7450_v33  ;;  %v4297_v22 = vmul.f32 -0.00019511016, %v7450_v33  ;;  %v4570_v46 = vadd.s32 536870912, %v4569_v25 }
 0x467   :  { %v4147_v54 = vadd.f32 1.0, %v4146_v57  ;;  %vm4781_vm0 = vcmp.eq.s32.totalorder %v4776_v39, 2  ;;  %v4286_v3 = vsel %vm4163_vm5, %v4285_v58, %v7350_v13  ;;  %v4439_v37 = vsel %vm4318_vm6, %v4438_v48, %v4437_v14 }
 0x468   :  { %v4157_v49 = vxor.u32 2147483648, %v4140_v24  ;;  %v4288_v17 = vsel %vm7397_vm8, 0, %v4286_v3  ;;  %v4440_v19 = vsub.s32 4, %v7402_v1  ;;  %v7475_v2 = vsel %vm7441_vm1, %v7251_v26, %v4439_v37 }
 0x469   :  { %v7477_v52 = vshrl.u32 %v4570_v46, 30  ;;  %v4148_v55 = vmul.f32 %v4147_v54, %v7327_v51  ;;  %v4291_v29 = vadd.f32 0.041655596, %v4290_v62  ;;  %v7481_v13 = vstv %s7445_s9 }
 0x46a   :  { %v7484_v23 = vstv %s7452_s2  ;;  %v4298_v12 = vadd.f32 0.008332121, %v4297_v22  ;;  %v4305_v59 = vadd.s32 3, %v4288_v17  ;;  %v7488_v42 = vmul.f32 %v7475_v2, %v7475_v2 }
 0x46b   :  { %v4572_v56 = vshll.u32 %v7477_v52, 30  ;;  %v4154_v18 = vxor.u32 2147483648, %v4148_v55  ;;  %v7491_v43 = vand.u32 3, %v4288_v17  ;;  %v4158_v20 = vsel %vm4156_vm4, %v4157_v49, %v4148_v55 }
 0x46c   :  { %v4783_v51 = vsel %vm4781_vm0, %v4157_v49, %v4148_v55  ;;  %v4292_v27 = vmul.f32 %v4291_v29, %v7450_v33  ;;  %v4299_v40 = vmul.f32 %v4298_v12, %v7450_v33  ;;  %v4306_v0 = vand.u32 3, %v4305_v59 }
 0x46d   :  { %v7497_v32 = vsub.s32 %v4569_v25, %v4572_v56  ;;  %v4155_v30 = vsel %vm4153_vm12, %v4140_v24, %v4154_v18  ;;  %v4780_v7 = vsel %vm4778_vm7, %v4140_v24, %v4154_v18  ;;  %vm4304_vm8 = vweird.f32 %v7234_v35 }
 0x46e   :  { %v4159_v31 = vsel %vm4152_vm11, %v4155_v30, %v4158_v20  ;;  %v4784_v16 = vsel %vm4777_vm15, %v4780_v7, %v4783_v51  ;;  %v4293_v5 = vadd.f32 -0.4999988, %v4292_v27  ;;  %v4300_v41 = vadd.f32 -0.16666654, %v4299_v40 }
 0x46f   :  { %vm4574_vm5 = vcmp.lt.s32.totalorder %v7497_v32, 0  ;;  %v4575_v28 = vsub.s32 0, %v7497_v32  ;;  %v4160_v50 = vsel %vm4149_vm3, nan, %v4159_v31  ;;  %v4785_v36 = vsel %vm4149_vm3, nan, %v4784_v16 }
 0x470   :  { %v4627_v47 = vmul.f32 %v7481_v13, %v4160_v50  ;;  %v5249_v44 = vmul.f32 %v7484_v23, %v4785_v36  ;;  %v4294_v15 = vmul.f32 %v4293_v5, %v7450_v33  ;;  %v4301_v63 = vmul.f32 %v4300_v41, %v7450_v33 }
 0x471   :  { %v4576_v39 = vsel %vm4574_vm5, %v4575_v28, %v7497_v32  ;;  %vm4307_vm10 = vcmp.lt.s32.totalorder %v4306_v0, 2  ;;  %vm4308_vm13 = vcmp.eq.s32.totalorder %v4306_v0, 0  ;;  %vm4931_vm14 = vcmp.lt.s32.totalorder %v7491_v43, 2 }
 0x472   :  { %vm4932_vm9 = vcmp.eq.s32.totalorder %v7491_v43, 0  ;;  %v4577_v4 = vclz %v4576_v39  ;;  %v7517_v34 = vadd.f32 %v5249_v44, %v4627_v47  ;;  %v4295_v53 = vadd.f32 1.0, %v4294_v15 }
 0x473   :  { %v4302_v60 = vadd.f32 1.0, %v4301_v63  ;;  %vm4311_vm2 = vcmp.eq.s32.totalorder %v4306_v0, 2  ;;  %v4441_v33 = vsel %vm4318_vm6, %v4440_v19, %v7402_v1  ;;  %v4445_v11 = vmul.f32 -0.001358992, %v7488_v42 }
 0x474   :  { %v4452_v38 = vmul.f32 -0.00019511016, %v7488_v42  ;;  %v5541_v10 = vadd.s32 4294967294, %v4577_v4  ;;  %vm7660_vm12 = vcmask 130048   ;;  %v4312_v25 = vxor.u32 2147483648, %v4295_v53 }
 0x475   :  { %v5259_v14 = vsel %vm7660_vm12, %v7517_v34, 0.0  ;;  %v4303_v9 = vmul.f32 %v4302_v60, %v7424_v8  ;;  %vm4935_vm4 = vcmp.eq.s32.totalorder %v7491_v43, 2  ;;  %v4443_v24 = vsel %vm7441_vm1, 0, %v4441_v33  ;;  %vm7661_vm1 = vmmov %vm7660_vm12 }
 0x476   :  { %5260 = vadd.xlane.f32.xlu0 %v5259_v14  ;;  %v4446_v57 = vadd.f32 0.041655596, %v4445_v11  ;;  %v4453_v58 = vadd.f32 0.008332121, %v4452_v38  ;;  %vm5542_vm6 = vcmp.lt.s32.totalorder %v5541_v10, 0  ;;  %v4460_v3 = vadd.s32 3, %v4443_v24 }
 0x477   :  { %v4309_v1 = vxor.u32 2147483648, %v4303_v9  ;;  %v4313_v48 = vsel %vm4311_vm2, %v4312_v25, %v4303_v9  ;;  %v4937_v62 = vsel %vm4935_vm4, %v4312_v25, %v4303_v9  ;;  %v4580_v22 = vsel %vm5542_vm6, 0, %v5541_v10 }
 0x478   :  { %v4447_v46 = vmul.f32 %v4446_v57, %v7488_v42  ;;  %v4454_v54 = vmul.f32 %v4453_v58, %v7488_v42  ;;  %v4581_v8 = vsub.s32 32, %v4580_v22  ;;  %v4582_v37 = vshll.u32 %v7497_v32, %v4580_v22 }
 0x479   :  { %v4585_v49 = vsub.s32 4294967266, %v4580_v22  ;;  %v4310_v17 = vsel %vm4308_vm13, %v4295_v53, %v4309_v1  ;;  %v4934_v19 = vsel %vm4932_vm9, %v4295_v53, %v4309_v1  ;;  %v4461_v31 = vand.u32 3, %v4460_v3 }
 0x47a   :  { %v4314_v61 = vsel %vm4307_vm10, %v4310_v17, %v4313_v48  ;;  %v4448_v55 = vadd.f32 -0.4999988, %v4447_v46  ;;  %v4455_v29 = vadd.f32 -0.16666654, %v4454_v54  ;;  %v4583_v12 = vshrl.u32 %v7457_v6, %v4581_v8 }
 0x47b   :  { %v4586_v59 = vadd.s32 127, %v4585_v49  ;;  %v4315_v56 = vsel %vm4304_vm8, nan, %v4314_v61  ;;  %v4938_v18 = vsel %vm4931_vm14, %v4934_v19, %v4937_v62  ;;  %v5084_v43 = vand.u32 3, %v4443_v24  ;;  %vm7662_vm14 = vmmov %vm7661_vm1 }
 0x47c   :  { %v4628_v20 = vmul.f32 %v7481_v13, %v4315_v56  ;;  %v4939_v51 = vsel %vm4304_vm8, nan, %v4938_v18  ;;  %v4449_v27 = vmul.f32 %v4448_v55, %v7488_v42  ;;  %v4456_v40 = vmul.f32 %v4455_v29, %v7488_v42 }
 0x47d   :  { %v4584_v32 = vor.u32 %v4583_v12, %v4582_v37  ;;  %v4587_v30 = vshll.u32 %v4586_v59, 23  ;;  %v5250_v6 = vmul.f32 %v7484_v23, %v4939_v51  ;;  %vm4462_vm11 = vcmp.lt.s32.totalorder %v4461_v31, 2 }
 0x47e   :  { %v4450_v7 = vadd.f32 1.0, %v4449_v27  ;;  %v4457_v0 = vadd.f32 1.0, %v4456_v40  ;;  %vm4463_vm15 = vcmp.eq.s32.totalorder %v4461_v31, 0  ;;  %vm4466_vm3 = vcmp.eq.s32.totalorder %v4461_v31, 2 }
 0x47f   :  { %v4588_v16 = vor.u32 4788187, %v4587_v30  ;;  %v7548_v5 = vadd.f32 %v5250_v6, %v4628_v20  ;;  %v4591_v50 = vcvt.s32.f32 %v4584_v32  ;;  %vm5085_vm7 = vcmp.lt.s32.totalorder %v5084_v43, 2 }
 0x480   :  { %v4458_v41 = vmul.f32 %v4457_v0, %v7475_v2  ;;  %v4467_v28 = vxor.u32 2147483648, %v4450_v7  ;;  %vm5086_vm0 = vcmp.eq.s32.totalorder %v5084_v43, 0  ;;  %vm5089_vm5 = vcmp.eq.s32.totalorder %v5084_v43, 2 }
 0x481   :  { %v4589_v35 = vand.u32 2147483647, %v4588_v16  ;;  %v5262_v36 = vsel %vm7661_vm1, %v7548_v5, 0.0  ;;  %vm4459_vm8 = vweird.f32 %v7251_v26  ;;  %vm4473_vm10 = vcmp.lt.s32.totalorder %v7348_v21, 0 }
 0x482   :  { %5263 = vadd.xlane.f32.xlu0 %v5262_v36  ;;  %v4464_v42 = vxor.u32 2147483648, %v4458_v41  ;;  %v4468_v15 = vsel %vm4466_vm3, %v4467_v28, %v4458_v41  ;;  %v5091_v39 = vsel %vm5089_vm5, %v4467_v28, %v4458_v41  ;;  %vm4472_vm13 = vcmp.le.f32.partialorder %v4471_v45, 0.7853982 }
 0x483   :  { %v4592_v47 = vmul.f32 %v4591_v50, %v4589_v35  ;;  %v4595_v9 = vsub.s32 4, %v7477_v52  ;;  %v5619_v31 = vmov 16.0  }
 0x484   :  { %v4465_v44 = vsel %vm4463_vm15, %v4450_v7, %v4464_v42  ;;  %v5088_v63 = vsel %vm5086_vm0, %v4450_v7, %v4464_v42  ;;  %vm7663_vm15 = vmmov %vm7662_vm14  ;;  %5587 = vrcp.f32 %v5619_v31 }
 0x485   :  { %v4593_v2 = vxor.u32 2147483648, %v4592_v47  ;;  %v4469_v4 = vsel %vm4462_vm11, %v4465_v44, %v4468_v15  ;;  %v5092_v53 = vsel %vm5085_vm7, %v5088_v63, %v5091_v39  ;;  %v4596_v45 = vsel %vm4473_vm10, %v4595_v9, %v7477_v52  ;;  %vm7664_vm7 = vmmov %vm7662_vm14 }
 0x486   :  { %v4470_v60 = vsel %vm4459_vm8, nan, %v4469_v4  ;;  %v5093_v33 = vsel %vm4459_vm8, nan, %v5092_v53  ;;  %v4598_v62 = vsel %vm4472_vm13, 0, %v4596_v45  ;;  %vm4614_vm11 = vweird.f32 %v7348_v21  ;;  %vm7665_vm0 = vmmov %vm7664_vm7  ;;  %v5569_v45 = vld [vmem:[%s7632_s12] sm:$0xff] }
 0x487   :  { %v4594_v11 = vsel %vm4473_vm10, %v4593_v2, %v4592_v47  ;;  %v4629_v38 = vmul.f32 %v7481_v13, %v4470_v60  ;;  %v5251_v10 = vmul.f32 %v7484_v23, %v5093_v33  ;;  %v4615_v8 = vadd.s32 3, %v4598_v62  ;;  %vm7666_vm5 = vmmov %vm7665_vm0  ;;  %5395 = vmatpush.bf16.msrb.mxu0 %v5569_v45 }
 0x488   :  { %v4597_v14 = vsel %vm4472_vm13, %v7348_v21, %v4594_v11  ;;  %v5238_v19 = vand.u32 3, %v4598_v62  ;;  %vm7667_vm8 = vmmov %vm7665_vm0 }
 0x489   :  { %v4599_v25 = vmul.f32 %v4597_v14, %v4597_v14  ;;  %v7561_v26 = vadd.f32 %v5251_v10, %v4629_v38  ;;  %v4616_v55 = vand.u32 3, %v4615_v8 }
 0x48a   :  { %vm5239_vm9 = vcmp.lt.s32.totalorder %v5238_v19, 2  ;;  %vm5240_vm2 = vcmp.eq.s32.totalorder %v5238_v19, 0  ;;  %vm5243_vm1 = vcmp.eq.s32.totalorder %v5238_v19, 2  ;;  %v5588_v16 = vpop.eup %5587 }
 0x48b   :  { %v5265_v24 = vsel %vm7662_vm14, %v7561_v26, 0.0  ;;  %v4600_v57 = vmul.f32 -0.001358992, %v4599_v25  ;;  %v4607_v58 = vmul.f32 -0.00019511016, %v4599_v25  ;;  %vm4617_vm12 = vcmp.lt.s32.totalorder %v4616_v55, 2 }
 0x48c   :  { %5266 = vadd.xlane.f32.xlu1 %v5265_v24  ;;  %vm4618_vm4 = vcmp.eq.s32.totalorder %v4616_v55, 0  ;;  %vm4621_vm6 = vcmp.eq.s32.totalorder %v4616_v55, 2  ;;  %v5272_v43 = vmul.f32 16.0, %v5588_v16  ;;  %vm5276_vm3 = vweird.f32 %v5588_v16 }
 0x48d   :  { %v4601_v1 = vadd.f32 0.041655596, %v4600_v57  ;;  %v4608_v48 = vadd.f32 0.008332121, %v4607_v58 }
 0x48e   :  { %v5273_v41 = vsub.f32 1.0, %v5272_v43 }
 0x48f   :  { %v4602_v22 = vmul.f32 %v4601_v1, %v4599_v25  ;;  %v4609_v46 = vmul.f32 %v4608_v48, %v4599_v25 }
 0x490   :  { %v5274_v28 = vmul.f32 %v5588_v16, %v5273_v41 }
 0x491   :  { %v4603_v54 = vadd.f32 -0.4999988, %v4602_v22  ;;  %v4610_v3 = vadd.f32 -0.16666654, %v4609_v46 }
 0x492   :  { %v5275_v35 = vadd.f32 %v5588_v16, %v5274_v28 }
 0x493   :  { %v4604_v37 = vmul.f32 %v4603_v54, %v4599_v25  ;;  %v4611_v49 = vmul.f32 %v4610_v3, %v4599_v25 }
 0x494   :  { %v7570_v21 = vsel %vm5276_vm3, %v5588_v16, %v5275_v35 }
 0x495   :  { %v4605_v17 = vadd.f32 1.0, %v4604_v37  ;;  %v4612_v61 = vadd.f32 1.0, %v4611_v49 }
 0x497   :  { %v4613_v29 = vmul.f32 %v4612_v61, %v4597_v14  ;;  %v4622_v12 = vxor.u32 2147483648, %v4605_v17 }
 0x499   :  { %v4619_v59 = vxor.u32 2147483648, %v4613_v29  ;;  %v4623_v56 = vsel %vm4621_vm6, %v4622_v12, %v4613_v29  ;;  %v5245_v20 = vsel %vm5243_vm1, %v4622_v12, %v4613_v29 }
 0x49b   :  { %v4620_v52 = vsel %vm4618_vm4, %v4605_v17, %v4619_v59  ;;  %v5242_v18 = vsel %vm5240_vm2, %v4605_v17, %v4619_v59  ;;  %vm7668_vm4 = vmmov %vm7665_vm0 }
 0x49c   :  { %v4624_v51 = vsel %vm4617_vm12, %v4620_v52, %v4623_v56  ;;  %v5246_v27 = vsel %vm5239_vm9, %v5242_v18, %v5245_v20  ;;  %v5584_v56 = vld [vmem:[%s7630_s10] ss:$0 sm:$0xff] }
 0x49d   :  { %v4625_v40 = vsel %vm4614_vm11, nan, %v4624_v51  ;;  %v5247_v32 = vsel %vm4614_vm11, nan, %v5246_v27  ;;  %v5585_v18 = vld [vmem:[%s7631_s11] ss:$0 sm:$0xff] }
 0x49e   :  { %v4630_v30 = vmul.f32 %v7481_v13, %v4625_v40  ;;  %v5252_v6 = vmul.f32 %v7484_v23, %v5247_v32 }
 0x4a0   :  { %v5256_v7 = vadd.f32 %v5252_v6, %v4630_v30 }
 0x4a2   :  { %v5268_v0 = vsel %vm7663_vm15, %v5256_v7, 0.0 }
 0x4a3   :  { %5269 = vadd.xlane.f32.xlu1 %v5268_v0 }
 0x4e9   :  { %v5261_v50 = vpop.xlane.xlu0 %5260 }
 0x4ea   :  { %v5278_v36 = vmul.f32 %v7570_v21, %v5261_v50 }
 0x4ec   :  { %v5282_v13 = vsub.f32 %v7517_v34, %v5278_v36 }
 0x4ee   :  { %v5286_v23 = vmul.f32 %v5282_v13, %v5282_v13 }
 0x4f0   :  { %v5290_v42 = vsel %vm7664_vm7, %v5286_v23, 0.0 }
 0x4f1   :  { %5291 = vadd.xlane.f32.xlu2 %v5290_v42 }
 0x4f5   :  { %v5264_v47 = vpop.xlane.xlu0 %5263 }
 0x4f6   :  { %v5279_v44 = vmul.f32 %v7570_v21, %v5264_v47 }
 0x4f8   :  { %v5283_v15 = vsub.f32 %v7548_v5, %v5279_v44 }
 0x4fa   :  { %v5287_v63 = vmul.f32 %v5283_v15, %v5283_v15 }
 0x4fc   :  { %v5293_v39 = vsel %vm7665_vm0, %v5287_v63, 0.0 }
 0x4fd   :  { %5294 = vadd.xlane.f32.xlu2 %v5293_v39 }
 0x4ff   :  { %v5267_v2 = vpop.xlane.xlu1 %5266 }
 0x500   :  { %v5280_v4 = vmul.f32 %v7570_v21, %v5267_v2 }
 0x502   :  { %v7580_v53 = vsub.f32 %v7561_v26, %v5280_v4 }
 0x504   :  { %v5288_v34 = vmul.f32 %v7580_v53, %v7580_v53 }
 0x506   :  { %v5296_v60 = vsel %vm7666_vm5, %v5288_v34, 0.0  ;;  %vm5407_vm5 = vcmask 7168  }
 0x507   :  { %5297 = vadd.xlane.f32.xlu0 %v5296_v60  ;;  %v5586_v60 = vld [vmem:[#allocation2] ss:$0 sm:$0xff] }
 0x516   :  { %v5270_v33 = vpop.xlane.xlu1 %5269 }
 0x517   :  { %v5281_v11 = vmul.f32 %v7570_v21, %v5270_v33 }
 0x519   :  { %v7586_v5 = vsub.f32 %v5256_v7, %v5281_v11 }
 0x51b   :  { %v5289_v38 = vmul.f32 %v7586_v5, %v7586_v5 }
 0x51d   :  { %v5299_v10 = vsel %vm7667_vm8, %v5289_v38, 0.0 }
 0x51e   :  { %5300 = vadd.xlane.f32.xlu1 %v5299_v10 }
 0x564   :  { %v5292_v14 = vpop.xlane.xlu2 %5291 }
 0x565   :  { %v5302_v9 = vmul.f32 %v5292_v14, %v7570_v21 }
 0x567   :  { %v5306_v25 = vadd.f32 1e-05, %v5302_v9 }
 0x569   :  { %5589 = vrsqrt.f32 %v5306_v25  ;;  %vm5316_vm13 = vweird.f32 %v5306_v25 }
 0x56f   :  { %v5590_v26 = vpop.eup %5589 }
 0x570   :  { %v5311_v24 = vmul.f32 %v5590_v26, %v5306_v25  ;;  %v5295_v57 = vpop.xlane.xlu2 %5294  ;;  %vm5317_vm10 = vweird.f32 %v5590_v26 }
 0x571   :  { %v5303_v58 = vmul.f32 %v5295_v57, %v7570_v21  ;;  %vm5318_vm14 = vmor %vm5316_vm13, %vm5317_vm10 }
 0x572   :  { %v5312_v1 = vmul.f32 %v5590_v26, %v5311_v24 }
 0x573   :  { %v5307_v48 = vadd.f32 1e-05, %v5303_v58 }
 0x574   :  { %v5313_v62 = vmul.f32 0.5, %v5312_v1 }
 0x575   :  { %5591 = vrsqrt.f32 %v5307_v48  ;;  %vm5326_vm2 = vweird.f32 %v5307_v48 }
 0x576   :  { %v5314_v54 = vsub.f32 1.5, %v5313_v62 }
 0x578   :  { %v5315_v49 = vmul.f32 %v5590_v26, %v5314_v54 }
 0x57a   :  { %v5298_v22 = vpop.xlane.xlu0 %5297  ;;  %v5319_v55 = vsel %vm5318_vm14, %v5590_v26, %v5315_v49 }
 0x57b   :  { %v5592_v46 = vpop.eup %5591  ;;  %v5304_v8 = vmul.f32 %v5298_v22, %v7570_v21  ;;  %v5350_v12 = vmul.f32 %v5319_v55, %v5282_v13 }
 0x57c   :  { %v5321_v3 = vmul.f32 %v5592_v46, %v5307_v48  ;;  %vm5327_vm9 = vweird.f32 %v5592_v46 }
 0x57d   :  { %v5308_v61 = vadd.f32 1e-05, %v5304_v8  ;;  %vm5328_vm12 = vmor %vm5326_vm2, %vm5327_vm9  ;;  %v5357_v51 = vmul.f32 %v5584_v56, %v5350_v12 }
 0x57e   :  { %v5322_v37 = vmul.f32 %v5592_v46, %v5321_v3 }
 0x57f   :  { %5593 = vrsqrt.f32 %v5308_v61  ;;  %v5364_v40 = vadd.f32 %v5585_v18, %v5357_v51  ;;  %vm5336_vm1 = vweird.f32 %v5308_v61 }
 0x580   :  { %v5323_v17 = vmul.f32 0.5, %v5322_v37 }
 0x582   :  { %v5324_v19 = vsub.f32 1.5, %v5323_v17 }
 0x584   :  { %v5325_v29 = vmul.f32 %v5592_v46, %v5324_v19 }
 0x585   :  { %v5594_v20 = vpop.eup %5593 }
 0x586   :  { %v5329_v59 = vsel %vm5328_vm12, %v5592_v46, %v5325_v29  ;;  %v5331_v30 = vmul.f32 %v5594_v20, %v5308_v61  ;;  %vm5337_vm6 = vweird.f32 %v5594_v20 }
 0x587   :  { %v5351_v52 = vmul.f32 %v5329_v59, %v5283_v15  ;;  %vm5338_vm11 = vmor %vm5336_vm1, %vm5337_vm6 }
 0x588   :  { %v5332_v7 = vmul.f32 %v5594_v20, %v5331_v30 }
 0x589   :  { %v5358_v27 = vmul.f32 %v5584_v56, %v5351_v52 }
 0x58a   :  { %v5333_v43 = vmul.f32 0.5, %v5332_v7 }
 0x58b   :  { %v5365_v32 = vadd.f32 %v5585_v18, %v5358_v27 }
 0x58c   :  { %v5334_v41 = vsub.f32 1.5, %v5333_v43 }
 0x58d   :  { %v5368_v6 = vpack.c.bf16 %v5365_v32, %v5364_v40 }
 0x58e   :  { %v5335_v35 = vmul.f32 %v5594_v20, %v5334_v41 }
 0x58f   :  { %5560 = vmatmul.msk.bf16.vlgmr.msrb.gmra.mxu0 %vm7668_vm4, %v5368_v6 }
 0x590   :  { %v5339_v13 = vsel %vm5338_vm11, %v5594_v20, %v5335_v35 }
 0x591   :  { %v5301_v0 = vpop.xlane.xlu1 %5300  ;;  %v5352_v47 = vmul.f32 %v5339_v13, %v7580_v53 }
 0x592   :  { %v5305_v31 = vmul.f32 %v5301_v0, %v7570_v21 }
 0x593   :  { %v5359_v63 = vmul.f32 %v5584_v56, %v5352_v47 }
 0x594   :  { %v5309_v16 = vadd.f32 1e-05, %v5305_v31 }
 0x595   :  { %v5366_v2 = vadd.f32 %v5585_v18, %v5359_v63 }
 0x596   :  { %5595 = vrsqrt.f32 %v5309_v16  ;;  %vm5346_vm3 = vweird.f32 %v5309_v16 }
 0x59c   :  { %v5596_v28 = vpop.eup %5595 }
 0x59d   :  { %v5341_v50 = vmul.f32 %v5596_v28, %v5309_v16  ;;  %vm5347_vm15 = vweird.f32 %v5596_v28 }
 0x59e   :  { %vm5348_vm7 = vmor %vm5346_vm3, %vm5347_vm15 }
 0x59f   :  { %v5342_v36 = vmul.f32 %v5596_v28, %v5341_v50 }
 0x5a1   :  { %v5343_v23 = vmul.f32 0.5, %v5342_v36 }
 0x5a3   :  { %v5344_v42 = vsub.f32 1.5, %v5343_v23 }
 0x5a5   :  { %v5345_v44 = vmul.f32 %v5596_v28, %v5344_v42 }
 0x5a7   :  { %v5349_v21 = vsel %vm5348_vm7, %v5596_v28, %v5345_v44 }
 0x5a8   :  { %v5353_v15 = vmul.f32 %v5349_v21, %v7586_v5 }
 0x5aa   :  { %v5360_v39 = vmul.f32 %v5584_v56, %v5353_v15 }
 0x5ac   :  { %v5367_v4 = vadd.f32 %v5585_v18, %v5360_v39 }
 0x5ae   :  { %v5369_v34 = vpack.c.bf16 %v5367_v4, %v5366_v2 }
 0x5b0   :  { %5561 = vmatmul.msk.bf16.gmra.mxu0 %vm7665_vm0, %v5369_v34 }
 0x60c   :  { %v5397_v33 = vpop.f32.mrf.mxu0 }
 0x60d   :  { %v5398_v11 = vadd.f32 %v5586_v60, %v5397_v33 }
 0x60f   :  { %5408 = vst.msk [vmem:[%s7634_s14] sm:$0xff] %vm5407_vm5, %v5398_v11 }
 0x614   :  { %v5399_v53 = vpop.f32.mrf.mxu0 }
 0x615   :  { %v5400_v38 = vadd.f32 %v5586_v60, %v5399_v53 }
 0x617   :  { %5409 = vst.msk [vmem:[%s7634_s14 + $0x8] sm:$0xff] %vm5407_vm5, %v5400_v38 }
 0x62d   :  { %v5402_v5 = vpop.f32.mrf.mxu0 }
 0x62e   :  { %v5403_v10 = vadd.f32 %v5586_v60, %v5402_v5 }
 0x630   :  { %5410 = vst.msk [vmem:[%s7634_s14 + $0x10] sm:$0xff] %vm5407_vm5, %v5403_v10 }
 0x635   :  { %v5404_v14 = vpop.f32.mrf.mxu0 }
 0x636   :  { %v5405_v9 = vadd.f32 %v5586_v60, %v5404_v14 }
 0x638   :  { %5411 = vst.msk [vmem:[%s7634_s14 + $0x18] sm:$0xff] %vm5407_vm5, %v5405_v9 }
 0x639   :  { %5416 = vsyncpa [#allocation4], 1 }

</bundles_post_ra>
